<compile_context>
chip_gen: v7x
topology: tpu7x:2x2x1
jax: 0.10.0
libtpu: 0.0.40
codegen_flags: <defaults>
</compile_context>

<pallas_src>
import functools

import jax
import jax.numpy as jnp
from jax import lax
from jax.experimental import pallas as pl
from jax.experimental.pallas import tpu as pltpu

LEAK = 0.2
N_CONV = 10  # number of 3x3 conv layers in the block


def _leaky(v):
    return jnp.where(v >= 0, v, LEAK * v)


# ----------------------------------------------------------------------------
# Fused Pallas kernel: 10x(conv3x3 + leaky) + fused polyphase deconv + leaky
# ----------------------------------------------------------------------------
def _block_kernel(x_ref, wc_ref, wd_ref, o_ref, buf_ref, *, H, W, Wp, C):
    """Fused Block forward for one batch element.

    x_ref  : (1, (Hp+1)*Wp, C) bf16 zero-padded input, rows flattened (+slack row)
    wc_ref : (N_CONV, 3C, 3C)  bf16 conv weights, [dy*C+ci, dx*C+co]
    wd_ref : (3C, 12C)         bf16 fused polyphase deconv weight
    o_ref  : (1, H*Wp, 4C)     bf16 output, 4 phases lane-concatenated
    buf_ref: (2, Hp*Wp+8, C)   bf16 ping-pong padded activation (+slack rows)
    """
    Hp = H + 2
    L = H * Wp          # flattened output rows per layer (multiple of 8)
    Lp = L + 8          # slab length: covers the +2 shifted reads, stays aligned
    R = Hp * Wp + 8     # scratch rows per slot

    # Zero only the rows the per-layer interior store never touches: the top
    # border ([0, Wp+1)) and the bottom border + slack ([L+Wp, R)).  Interior
    # garbage columns are forced to 0 by the valid mask every layer, so they
    # double as the left/right zero border.  Done every grid step (cheap, and
    # megacore-safe: each core has its own scratch).
    zrows = jnp.zeros((Wp + 8, C), dtype=buf_ref.dtype)
    for s in (0, 1):
        buf_ref[s, pl.ds(0, Wp + 8), :] = zrows
        buf_ref[s, pl.ds(L + Wp, Wp + 8), :] = zrows

    # Validity mask over the L flattened output rows (col < W).
    col = lax.broadcasted_iota(jnp.int32, (L, 1), 0) % Wp
    valid = col < W

    def row_slabs(load):
        # 3 sublane-aligned row-slab loads (offsets 0, Wp, 2*Wp), lane-concat
        # into a (Lp, 3C) bf16 matrix.
        return jnp.concatenate([load(dy * Wp, Lp) for dy in range(3)], axis=-1)

    def conv_step(x3, w):
        # z[j, dx*C+co] = sum_{dy,ci} x[j + dy*Wp, ci] * W[co,ci,dy,dx]
        z = jnp.dot(x3, w, preferred_element_type=jnp.float32)      # (Lp, 3C)
        # y[i] = z[i, 0:C] + z[i+1, C:2C] + z[i+2, 2C:3C]
        return z[0:L, 0:C] + z[1:L + 1, C:2 * C] + z[2:L + 2, 2 * C:3 * C]

    def store_act(dst, y):
        # Interior store at padded location (r+1, c+1); garbage columns -> 0.
        buf_ref[dst, pl.ds(Wp + 1, L), :] = (
            jnp.where(valid, _leaky(y), 0.0).astype(buf_ref.dtype))

    # ---- layer 0: read the padded input directly (no copy into scratch) ----
    x3 = row_slabs(lambda off, n: x_ref[0, pl.ds(off, n), :])
    store_act(0, conv_step(x3, wc_ref[0]))

    # ---- layers 1..9: ping-pong inside the VMEM scratch ----
    src = 0
    for layer in range(1, N_CONV):
        dst = 1 - src
        x3 = row_slabs(lambda off, n, s=src: buf_ref[s, pl.ds(off, n), :])
        store_act(dst, conv_step(x3, wc_ref[layer]))
        src = dst

    # ---- fused polyphase ConvTranspose2d(4, s=2, p=1): one matmul ----
    # zd[j, ss*4C + p*C + co] = sum_{rr,ci} x[j + rr*Wp, ci] * V[p,rr,ss][ci,co]
    # y[i, p*C+co] = zd[i,0:4C] + zd[i+1,4C:8C] + zd[i+2,8C:12C]
    x3 = row_slabs(lambda off, n, s=src: buf_ref[s, pl.ds(off, n), :])
    zd = jnp.dot(x3, wd_ref[...], preferred_element_type=jnp.float32)  # (Lp, 12C)
    yd = (zd[0:L, 0:4 * C]
          + zd[1:L + 1, 4 * C:8 * C]
          + zd[2:L + 2, 8 * C:12 * C])                                 # (L, 4C)
    # Lane-dense 256-wide store; garbage columns are sliced off by the wrapper.
    o_ref[0] = _leaky(yd).astype(o_ref.dtype)


# ----------------------------------------------------------------------------
# One-time weight packing (outside the kernel, pure XLA)
# ----------------------------------------------------------------------------
def _pack_conv_weights(conv_ws):
    # torch Conv2d weight (Cout, Cin, 3, 3) -> (3*Cin, 3*Cout):
    #   packed[dy*Cin + ci, dx*Cout + co] = w[co, ci, dy, dx]
    packed = [jnp.transpose(w, (2, 1, 3, 0)).reshape(3 * w.shape[1], 3 * w.shape[0])
              for w in conv_ws]
    return jnp.stack(packed).astype(jnp.bfloat16)                 # (10, 3C, 3C)


def _pack_deconv_weights(wT):
    # torch ConvTranspose2d weight (Cin, Cout, 4, 4) -> zero-structured fused
    # polyphase weight (3*Cin, 3*4*Cout):
    #   V[rr*Cin+ci, ss*4*Cout + p*Cout + co] = wT[ci, co, 3-py-2dy, 3-px-2dx]
    #   with p=(py,px), dy=rr-py, dx=ss-px (zero if dy/dx not in {0,1}).
    C = wT.shape[0]
    phases = ((0, 0), (0, 1), (1, 0), (1, 1))
    zeros = jnp.zeros((C, C), wT.dtype)
    row_blocks = []
    for rr in range(3):
        cols = []
        for ss in range(3):
            for (py, px) in phases:
                dy, dx = rr - py, ss - px
                if dy in (0, 1) and dx in (0, 1):
                    cols.append(wT[:, :, 3 - py - 2 * dy, 3 - px - 2 * dx])
                else:
                    cols.append(zeros)
        row_blocks.append(jnp.concatenate(cols, axis=1))          # (C, 12C)
    return jnp.concatenate(row_blocks, axis=0).astype(jnp.bfloat16)  # (3C, 12C)


# ----------------------------------------------------------------------------
# Public wrapper (NCHW in / NCHW out, matching the PyTorch module)
# ----------------------------------------------------------------------------
def block_forward(x_nchw, conv_ws, wT):
    """Forward pass of `Block`.  x_nchw: (N, 64, H, W) -> (N, 64, 2H, 2W)."""
    n, c, h, w = x_nchw.shape
    wp = -(-(w + 2) // 8) * 8          # padded row stride, multiple of 8
    hp = h + 2
    hpp = hp + 1                        # one extra zero slack row for slab reads
    L = h * wp

    # One-time layout glue (NCHW -> padded flat bf16 NHWC) and weight packing.
    x = jnp.transpose(x_nchw, (0, 2, 3, 1)).astype(jnp.bfloat16)
    x_pad = jnp.pad(x, ((0, 0), (1, hpp - h - 1), (1, wp - w - 1), (0, 0)))
    x_pad = x_pad.reshape(n, hpp * wp, c)
    wc = _pack_conv_weights(conv_ws)        # (10, 3C, 3C) bf16
    wd = _pack_deconv_weights(wT)           # (3C, 12C)    bf16

    kernel = functools.partial(_block_kernel, H=h, W=w, Wp=wp, C=c)
    out = pl.pallas_call(
        kernel,
        out_shape=jax.ShapeDtypeStruct((n, L, 4 * c), jnp.bfloat16),
        grid=(n,),
        in_specs=[
            pl.BlockSpec((1, hpp * wp, c), lambda b: (b, 0, 0)),
            # Weights are grid-invariant (constant index_map).
            pl.BlockSpec((N_CONV, 3 * c, 3 * c), lambda b: (0, 0, 0)),
            pl.BlockSpec((3 * c, 12 * c), lambda b: (0, 0)),
        ],
        out_specs=pl.BlockSpec((1, L, 4 * c), lambda b: (b, 0, 0)),
        scratch_shapes=[pltpu.VMEM((2, hp * wp + 8, c), jnp.bfloat16)],
        compiler_params=pltpu.CompilerParams(
            dimension_semantics=("parallel",),
            # Generous on 128 MiB parts, still safe on v7x's 64 MiB.
            vmem_limit_bytes=48 * 1024 * 1024),
    )(x_pad, wc, wd)
    # TODO(synk): for large H, W add row-band tiling with an 11-row halo
    # (mandatory under v7x's 64 MiB VMEM) which also exposes >=2 parallel grid
    # steps per chip when n == 1; and single-buffer the weight inputs once
    # pl.Buffered(1) is available on the target JAX version.

    # (N, L, 4C) -> (N, H, Wp, py, px, C) -> drop garbage cols -> interleave.
    out = out.reshape(n, h, wp, 2, 2, c)[:, :, :w]
    out = jnp.transpose(out, (0, 1, 3, 2, 4, 5)).reshape(n, 2 * h, 2 * w, c)
    return jnp.transpose(out, (0, 3, 1, 2)).astype(jnp.float32)  # NHWC -> NCHW


# ----------------------------------------------------------------------------
# Reference (pure lax) for validation
# ----------------------------------------------------------------------------
def block_reference(x_nchw, conv_ws, wT):
    y = x_nchw
    for wconv in conv_ws:
        y = lax.conv_general_dilated(
            y, wconv, (1, 1), ((1, 1), (1, 1)),
            dimension_numbers=("NCHW", "OIHW", "NCHW"))
        y = jnp.where(y >= 0, y, LEAK * y)
    w_eq = jnp.transpose(jnp.flip(wT, (2, 3)), (1, 0, 2, 3))  # -> OIHW
    y = lax.conv_general_dilated(
        y, w_eq, (1, 1), ((2, 2), (2, 2)), lhs_dilation=(2, 2),
        dimension_numbers=("NCHW", "OIHW", "NCHW"))
    y = jnp.where(y >= 0, y, LEAK * y)
    return y


# ----------------------------------------------------------------------------
if __name__ == "__main__":
    N, C, H, W = 2, 64, 8, 8  # C is fixed to 64 by the module definition

    key = jax.random.PRNGKey(0)
    keys = jax.random.split(key, 12)
    x = jax.random.normal(keys[0], (N, C, H, W), jnp.float32)
    # Deterministic synthetic weights (PyTorch layouts), scaled for stability.
    conv_ws = [jax.random.normal(keys[1 + i], (64, 64, 3, 3), jnp.float32) * 0.05
               for i in range(10)]
    wT = jax.random.normal(keys[11], (64, 64, 4, 4), jnp.float32) * 0.05

    fwd = jax.jit(block_forward)
    out = jax.block_until_ready(fwd(x, conv_ws, wT))
    assert out.shape == (N, 64, 2 * H, 2 * W), out.shape
    assert out.dtype == jnp.float32

    ref = jax.block_until_ready(block_reference(x, conv_ws, wT))
    max_err = float(jnp.max(jnp.abs(out - ref)))
    scale = float(jnp.max(jnp.abs(ref))) + 1e-6
    # bf16 matmul inputs / activations (f32 accumulation) across 11 stacked
    # layers compound to ~1-2% relative error; allow 5% of the max magnitude.
    if not (max_err / scale < 5e-2):
        raise SystemExit(f"mismatch: max_err={max_err} scale={scale}")

    print("KERNEL_OK")
</pallas_src>

<mosaic_0001>
module attributes {stable_mosaic.version = 11 : i64} {
  func.func @_block_kernel(%arg0: i32, %arg1: memref<1x176x64xbf16, #tpu.memory_space<vmem>>, %arg2: memref<10x192x192xbf16, #tpu.memory_space<vmem>>, %arg3: memref<192x768xbf16, #tpu.memory_space<vmem>>, %arg4: memref<1x128x256xbf16, #tpu.memory_space<vmem>>, %arg5: memref<2x168x64xbf16, #tpu.memory_space<vmem>>) attributes {dimension_semantics = [#tpu.dimension_semantics<parallel>], iteration_bounds = array<i64: 2>, scalar_prefetch = 0 : i64, scratch_operands = 1 : i64, tpu.core_type = #tpu.core_type<tc>, window_params = [{transform_indices = @transform_0, window_bounds = array<i64: 1, 176, 64>}, {pipeline_mode = #tpu.pipeline_mode<synchronous>, transform_indices = @transform_1, window_bounds = array<i64: 10, 192, 192>}, {pipeline_mode = #tpu.pipeline_mode<synchronous>, transform_indices = @transform_2, window_bounds = array<i64: 192, 768>}, {transform_indices = @transform_3, window_bounds = array<i64: 1, 128, 256>}]} {
    %cst = arith.constant 0.000000e+00 : bf16
    %0 = vector.broadcast %cst : bf16 to vector<24x64xbf16>
    %c0 = arith.constant 0 : index
    %c0_0 = arith.constant 0 : index
    %c0_1 = arith.constant 0 : index
    %1 = vector.load %arg5[%c0, %c0_0, %c0_1] : memref<2x168x64xbf16, #tpu.memory_space<vmem>>, vector<1x24x64xbf16>
    %2 = vector.shape_cast %1 : vector<1x24x64xbf16> to vector<24x64xbf16>
    %3 = vector.shape_cast %0 : vector<24x64xbf16> to vector<1x24x64xbf16>
    tpu.vector_store %arg5[%c0, %c0_0, %c0_1], %3 {strides = array<i32>} : memref<2x168x64xbf16, #tpu.memory_space<vmem>>, vector<1x24x64xbf16>,
    %c0_2 = arith.constant 0 : index
    %c144 = arith.constant 144 : index
    %c0_3 = arith.constant 0 : index
    %4 = vector.load %arg5[%c0_2, %c144, %c0_3] : memref<2x168x64xbf16, #tpu.memory_space<vmem>>, vector<1x24x64xbf16>
    %5 = vector.shape_cast %4 : vector<1x24x64xbf16> to vector<24x64xbf16>
    %6 = vector.shape_cast %0 : vector<24x64xbf16> to vector<1x24x64xbf16>
    tpu.vector_store %arg5[%c0_2, %c144, %c0_3], %6 {strides = array<i32>} : memref<2x168x64xbf16, #tpu.memory_space<vmem>>, vector<1x24x64xbf16>,
    %c1 = arith.constant 1 : index
    %c0_4 = arith.constant 0 : index
    %c0_5 = arith.constant 0 : index
    %7 = vector.load %arg5[%c1, %c0_4, %c0_5] : memref<2x168x64xbf16, #tpu.memory_space<vmem>>, vector<1x24x64xbf16>
    %8 = vector.shape_cast %7 : vector<1x24x64xbf16> to vector<24x64xbf16>
    %9 = vector.shape_cast %0 : vector<24x64xbf16> to vector<1x24x64xbf16>
    tpu.vector_store %arg5[%c1, %c0_4, %c0_5], %9 {strides = array<i32>} : memref<2x168x64xbf16, #tpu.memory_space<vmem>>, vector<1x24x64xbf16>,
    %c1_6 = arith.constant 1 : index
    %c144_7 = arith.constant 144 : index
    %c0_8 = arith.constant 0 : index
    %10 = vector.load %arg5[%c1_6, %c144_7, %c0_8] : memref<2x168x64xbf16, #tpu.memory_space<vmem>>, vector<1x24x64xbf16>
    %11 = vector.shape_cast %10 : vector<1x24x64xbf16> to vector<24x64xbf16>
    %12 = vector.shape_cast %0 : vector<24x64xbf16> to vector<1x24x64xbf16>
    tpu.vector_store %arg5[%c1_6, %c144_7, %c0_8], %12 {strides = array<i32>} : memref<2x168x64xbf16, #tpu.memory_space<vmem>>, vector<1x24x64xbf16>,
    %13 = tpu.iota {dimensions = array<i32: 0>} : vector<128x1xi32>
    %c16_i32 = arith.constant 16 : i32
    %c0_i32 = arith.constant 0 : i32
    %14 = arith.cmpi eq, %c16_i32, %c0_i32 : i32
    %c1_i32 = arith.constant 1 : i32
    %15 = arith.select %14, %c1_i32, %c16_i32 : i32
    %16 = vector.broadcast %15 : i32 to vector<128x1xi32>
    %17 = arith.remsi %13, %16 : vector<128x1xi32>
    %c0_i32_9 = arith.constant 0 : i32
    %18 = vector.broadcast %c0_i32_9 : i32 to vector<128x1xi32>
    %19 = arith.cmpi ne, %17, %18 : vector<128x1xi32>
    %c0_i32_10 = arith.constant 0 : i32
    %20 = vector.broadcast %c0_i32_10 : i32 to vector<128x1xi32>
    %21 = arith.cmpi slt, %17, %20 : vector<128x1xi32>
    %c0_i32_11 = arith.constant 0 : i32
    %22 = arith.cmpi slt, %15, %c0_i32_11 : i32
    %23 = vector.broadcast %22 : i1 to vector<128x1xi1>
    %24 = vector.broadcast %23 : vector<128x1xi1> to vector<128x1xi1>
    %25 = arith.xori %21, %24 : vector<128x1xi1>
    %26 = arith.andi %25, %19 : vector<128x1xi1>
    %27 = vector.broadcast %15 : i32 to vector<128x1xi32>
    %28 = arith.addi %17, %27 : vector<128x1xi32>
    %29 = arith.select %26, %28, %17 : vector<128x1xi1>, vector<128x1xi32>
    %c8_i32 = arith.constant 8 : i32
    %30 = vector.broadcast %c8_i32 : i32 to vector<128x1xi32>
    %31 = arith.cmpi slt, %29, %30 : vector<128x1xi32>
    %c0_12 = arith.constant 0 : index
    %c0_13 = arith.constant 0 : index
    %c0_14 = arith.constant 0 : index
    %32 = vector.load %arg1[%c0_12, %c0_13, %c0_14] : memref<1x176x64xbf16, #tpu.memory_space<vmem>>, vector<1x136x64xbf16>
    %33 = vector.shape_cast %32 : vector<1x136x64xbf16> to vector<136x64xbf16>
    %c0_15 = arith.constant 0 : index
    %c16 = arith.constant 16 : index
    %c0_16 = arith.constant 0 : index
    %34 = vector.load %arg1[%c0_15, %c16, %c0_16] : memref<1x176x64xbf16, #tpu.memory_space<vmem>>, vector<1x136x64xbf16>
    %35 = vector.shape_cast %34 : vector<1x136x64xbf16> to vector<136x64xbf16>
    %c0_17 = arith.constant 0 : index
    %c32 = arith.constant 32 : index
    %c0_18 = arith.constant 0 : index
    %36 = vector.load %arg1[%c0_17, %c32, %c0_18] : memref<1x176x64xbf16, #tpu.memory_space<vmem>>, vector<1x136x64xbf16>
    %37 = vector.shape_cast %36 : vector<1x136x64xbf16> to vector<136x64xbf16>
    %38 = tpu.concatenate %33, %35, %37 in 1 : vector<136x64xbf16>, vector<136x64xbf16>, vector<136x64xbf16> -> vector<136x192xbf16>
    %c0_19 = arith.constant 0 : index
    %c0_20 = arith.constant 0 : index
    %c0_21 = arith.constant 0 : index
    %39 = vector.load %arg2[%c0_19, %c0_20, %c0_21] : memref<10x192x192xbf16, #tpu.memory_space<vmem>>, vector<1x192x192xbf16>
    %40 = vector.shape_cast %39 : vector<1x192x192xbf16> to vector<192x192xbf16>
    %cst_22 = arith.constant dense<0.000000e+00> : vector<136x192xf32>
    %41 = tpu.matmul %38, %40, %cst_22 {dimension_numbers = #tpu.dot_dimension_numbers<[1], [0], [0], [1], [0, 0, 1, 1], [], []>} : vector<136x192xbf16>, vector<192x192xbf16>, vector<136x192xf32> -> vector<136x192xf32>
    %42 = vector.extract_strided_slice %41 {offsets = [0, 0], sizes = [128, 64], strides = [1, 1]} : vector<136x192xf32> to vector<128x64xf32>
    %43 = vector.extract_strided_slice %41 {offsets = [1, 64], sizes = [128, 64], strides = [1, 1]} : vector<136x192xf32> to vector<128x64xf32>
    %44 = arith.addf %42, %43 : vector<128x64xf32>
    %45 = vector.extract_strided_slice %41 {offsets = [2, 128], sizes = [128, 64], strides = [1, 1]} : vector<136x192xf32> to vector<128x64xf32>
    %46 = arith.addf %44, %45 : vector<128x64xf32>
    %cst_23 = arith.constant 0.000000e+00 : f32
    %47 = vector.broadcast %cst_23 : f32 to vector<128x64xf32>
    %48 = arith.cmpf oge, %46, %47 : vector<128x64xf32>
    %cst_24 = arith.constant 2.000000e-01 : f32
    %49 = vector.broadcast %cst_24 : f32 to vector<128x64xf32>
    %50 = arith.mulf %49, %46 : vector<128x64xf32>
    %51 = arith.select %48, %46, %50 : vector<128x64xi1>, vector<128x64xf32>
    %cst_25 = arith.constant 0.000000e+00 : f32
    %52 = vector.shape_cast %31 : vector<128x1xi1> to vector<128x1xi1>
    %53 = vector.broadcast %52 : vector<128x1xi1> to vector<128x64xi1>
    %54 = vector.broadcast %cst_25 : f32 to vector<128x64xf32>
    %55 = arith.select %53, %51, %54 : vector<128x64xi1>, vector<128x64xf32>
    %56 = arith.truncf %55 : vector<128x64xf32> to vector<128x64xbf16>
    %c0_26 = arith.constant 0 : index
    %c17 = arith.constant 17 : index
    %c0_27 = arith.constant 0 : index
    %57 = vector.load %arg5[%c0_26, %c17, %c0_27] : memref<2x168x64xbf16, #tpu.memory_space<vmem>>, vector<1x128x64xbf16>
    %58 = vector.shape_cast %57 : vector<1x128x64xbf16> to vector<128x64xbf16>
    %59 = vector.shape_cast %56 : vector<128x64xbf16> to vector<1x128x64xbf16>
    tpu.vector_store %arg5[%c0_26, %c17, %c0_27], %59 {strides = array<i32>} : memref<2x168x64xbf16, #tpu.memory_space<vmem>>, vector<1x128x64xbf16>,
    %c0_28 = arith.constant 0 : index
    %c0_29 = arith.constant 0 : index
    %c0_30 = arith.constant 0 : index
    %60 = vector.load %arg5[%c0_28, %c0_29, %c0_30] : memref<2x168x64xbf16, #tpu.memory_space<vmem>>, vector<1x136x64xbf16>
    %61 = vector.shape_cast %60 : vector<1x136x64xbf16> to vector<136x64xbf16>
    %c0_31 = arith.constant 0 : index
    %c16_32 = arith.constant 16 : index
    %c0_33 = arith.constant 0 : index
    %62 = vector.load %arg5[%c0_31, %c16_32, %c0_33] : memref<2x168x64xbf16, #tpu.memory_space<vmem>>, vector<1x136x64xbf16>
    %63 = vector.shape_cast %62 : vector<1x136x64xbf16> to vector<136x64xbf16>
    %c0_34 = arith.constant 0 : index
    %c32_35 = arith.constant 32 : index
    %c0_36 = arith.constant 0 : index
    %64 = vector.load %arg5[%c0_34, %c32_35, %c0_36] : memref<2x168x64xbf16, #tpu.memory_space<vmem>>, vector<1x136x64xbf16>
    %65 = vector.shape_cast %64 : vector<1x136x64xbf16> to vector<136x64xbf16>
    %66 = tpu.concatenate %61, %63, %65 in 1 : vector<136x64xbf16>, vector<136x64xbf16>, vector<136x64xbf16> -> vector<136x192xbf16>
    %c1_37 = arith.constant 1 : index
    %c0_38 = arith.constant 0 : index
    %c0_39 = arith.constant 0 : index
    %67 = vector.load %arg2[%c1_37, %c0_38, %c0_39] : memref<10x192x192xbf16, #tpu.memory_space<vmem>>, vector<1x192x192xbf16>
    %68 = vector.shape_cast %67 : vector<1x192x192xbf16> to vector<192x192xbf16>
    %cst_40 = arith.constant dense<0.000000e+00> : vector<136x192xf32>
    %69 = tpu.matmul %66, %68, %cst_40 {dimension_numbers = #tpu.dot_dimension_numbers<[1], [0], [0], [1], [0, 0, 1, 1], [], []>} : vector<136x192xbf16>, vector<192x192xbf16>, vector<136x192xf32> -> vector<136x192xf32>
    %70 = vector.extract_strided_slice %69 {offsets = [0, 0], sizes = [128, 64], strides = [1, 1]} : vector<136x192xf32> to vector<128x64xf32>
    %71 = vector.extract_strided_slice %69 {offsets = [1, 64], sizes = [128, 64], strides = [1, 1]} : vector<136x192xf32> to vector<128x64xf32>
    %72 = arith.addf %70, %71 : vector<128x64xf32>
    %73 = vector.extract_strided_slice %69 {offsets = [2, 128], sizes = [128, 64], strides = [1, 1]} : vector<136x192xf32> to vector<128x64xf32>
    %74 = arith.addf %72, %73 : vector<128x64xf32>
    %cst_41 = arith.constant 0.000000e+00 : f32
    %75 = vector.broadcast %cst_41 : f32 to vector<128x64xf32>
    %76 = arith.cmpf oge, %74, %75 : vector<128x64xf32>
    %cst_42 = arith.constant 2.000000e-01 : f32
    %77 = vector.broadcast %cst_42 : f32 to vector<128x64xf32>
    %78 = arith.mulf %77, %74 : vector<128x64xf32>
    %79 = arith.select %76, %74, %78 : vector<128x64xi1>, vector<128x64xf32>
    %cst_43 = arith.constant 0.000000e+00 : f32
    %80 = vector.shape_cast %31 : vector<128x1xi1> to vector<128x1xi1>
    %81 = vector.broadcast %80 : vector<128x1xi1> to vector<128x64xi1>
    %82 = vector.broadcast %cst_43 : f32 to vector<128x64xf32>
    %83 = arith.select %81, %79, %82 : vector<128x64xi1>, vector<128x64xf32>
    %84 = arith.truncf %83 : vector<128x64xf32> to vector<128x64xbf16>
    %c1_44 = arith.constant 1 : index
    %c17_45 = arith.constant 17 : index
    %c0_46 = arith.constant 0 : index
    %85 = vector.load %arg5[%c1_44, %c17_45, %c0_46] : memref<2x168x64xbf16, #tpu.memory_space<vmem>>, vector<1x128x64xbf16>
    %86 = vector.shape_cast %85 : vector<1x128x64xbf16> to vector<128x64xbf16>
    %87 = vector.shape_cast %84 : vector<128x64xbf16> to vector<1x128x64xbf16>
    tpu.vector_store %arg5[%c1_44, %c17_45, %c0_46], %87 {strides = array<i32>} : memref<2x168x64xbf16, #tpu.memory_space<vmem>>, vector<1x128x64xbf16>,
    %c1_47 = arith.constant 1 : index
    %c0_48 = arith.constant 0 : index
    %c0_49 = arith.constant 0 : index
    %88 = vector.load %arg5[%c1_47, %c0_48, %c0_49] : memref<2x168x64xbf16, #tpu.memory_space<vmem>>, vector<1x136x64xbf16>
    %89 = vector.shape_cast %88 : vector<1x136x64xbf16> to vector<136x64xbf16>
    %c1_50 = arith.constant 1 : index
    %c16_51 = arith.constant 16 : index
    %c0_52 = arith.constant 0 : index
    %90 = vector.load %arg5[%c1_50, %c16_51, %c0_52] : memref<2x168x64xbf16, #tpu.memory_space<vmem>>, vector<1x136x64xbf16>
    %91 = vector.shape_cast %90 : vector<1x136x64xbf16> to vector<136x64xbf16>
    %c1_53 = arith.constant 1 : index
    %c32_54 = arith.constant 32 : index
    %c0_55 = arith.constant 0 : index
    %92 = vector.load %arg5[%c1_53, %c32_54, %c0_55] : memref<2x168x64xbf16, #tpu.memory_space<vmem>>, vector<1x136x64xbf16>
    %93 = vector.shape_cast %92 : vector<1x136x64xbf16> to vector<136x64xbf16>
    %94 = tpu.concatenate %89, %91, %93 in 1 : vector<136x64xbf16>, vector<136x64xbf16>, vector<136x64xbf16> -> vector<136x192xbf16>
    %c2 = arith.constant 2 : index
    %c0_56 = arith.constant 0 : index
    %c0_57 = arith.constant 0 : index
    %95 = vector.load %arg2[%c2, %c0_56, %c0_57] : memref<10x192x192xbf16, #tpu.memory_space<vmem>>, vector<1x192x192xbf16>
    %96 = vector.shape_cast %95 : vector<1x192x192xbf16> to vector<192x192xbf16>
    %cst_58 = arith.constant dense<0.000000e+00> : vector<136x192xf32>
    %97 = tpu.matmul %94, %96, %cst_58 {dimension_numbers = #tpu.dot_dimension_numbers<[1], [0], [0], [1], [0, 0, 1, 1], [], []>} : vector<136x192xbf16>, vector<192x192xbf16>, vector<136x192xf32> -> vector<136x192xf32>
    %98 = vector.extract_strided_slice %97 {offsets = [0, 0], sizes = [128, 64], strides = [1, 1]} : vector<136x192xf32> to vector<128x64xf32>
    %99 = vector.extract_strided_slice %97 {offsets = [1, 64], sizes = [128, 64], strides = [1, 1]} : vector<136x192xf32> to vector<128x64xf32>
    %100 = arith.addf %98, %99 : vector<128x64xf32>
    %101 = vector.extract_strided_slice %97 {offsets = [2, 128], sizes = [128, 64], strides = [1, 1]} : vector<136x192xf32> to vector<128x64xf32>
    %102 = arith.addf %100, %101 : vector<128x64xf32>
    %cst_59 = arith.constant 0.000000e+00 : f32
    %103 = vector.broadcast %cst_59 : f32 to vector<128x64xf32>
    %104 = arith.cmpf oge, %102, %103 : vector<128x64xf32>
    %cst_60 = arith.constant 2.000000e-01 : f32
    %105 = vector.broadcast %cst_60 : f32 to vector<128x64xf32>
    %106 = arith.mulf %105, %102 : vector<128x64xf32>
    %107 = arith.select %104, %102, %106 : vector<128x64xi1>, vector<128x64xf32>
    %cst_61 = arith.constant 0.000000e+00 : f32
    %108 = vector.shape_cast %31 : vector<128x1xi1> to vector<128x1xi1>
    %109 = vector.broadcast %108 : vector<128x1xi1> to vector<128x64xi1>
    %110 = vector.broadcast %cst_61 : f32 to vector<128x64xf32>
    %111 = arith.select %109, %107, %110 : vector<128x64xi1>, vector<128x64xf32>
    %112 = arith.truncf %111 : vector<128x64xf32> to vector<128x64xbf16>
    %c0_62 = arith.constant 0 : index
    %c17_63 = arith.constant 17 : index
    %c0_64 = arith.constant 0 : index
    %113 = vector.load %arg5[%c0_62, %c17_63, %c0_64] : memref<2x168x64xbf16, #tpu.memory_space<vmem>>, vector<1x128x64xbf16>
    %114 = vector.shape_cast %113 : vector<1x128x64xbf16> to vector<128x64xbf16>
    %115 = vector.shape_cast %112 : vector<128x64xbf16> to vector<1x128x64xbf16>
    tpu.vector_store %arg5[%c0_62, %c17_63, %c0_64], %115 {strides = array<i32>} : memref<2x168x64xbf16, #tpu.memory_space<vmem>>, vector<1x128x64xbf16>,
    %c0_65 = arith.constant 0 : index
    %c0_66 = arith.constant 0 : index
    %c0_67 = arith.constant 0 : index
    %116 = vector.load %arg5[%c0_65, %c0_66, %c0_67] : memref<2x168x64xbf16, #tpu.memory_space<vmem>>, vector<1x136x64xbf16>
    %117 = vector.shape_cast %116 : vector<1x136x64xbf16> to vector<136x64xbf16>
    %c0_68 = arith.constant 0 : index
    %c16_69 = arith.constant 16 : index
    %c0_70 = arith.constant 0 : index
    %118 = vector.load %arg5[%c0_68, %c16_69, %c0_70] : memref<2x168x64xbf16, #tpu.memory_space<vmem>>, vector<1x136x64xbf16>
    %119 = vector.shape_cast %118 : vector<1x136x64xbf16> to vector<136x64xbf16>
    %c0_71 = arith.constant 0 : index
    %c32_72 = arith.constant 32 : index
    %c0_73 = arith.constant 0 : index
    %120 = vector.load %arg5[%c0_71, %c32_72, %c0_73] : memref<2x168x64xbf16, #tpu.memory_space<vmem>>, vector<1x136x64xbf16>
    %121 = vector.shape_cast %120 : vector<1x136x64xbf16> to vector<136x64xbf16>
    %122 = tpu.concatenate %117, %119, %121 in 1 : vector<136x64xbf16>, vector<136x64xbf16>, vector<136x64xbf16> -> vector<136x192xbf16>
    %c3 = arith.constant 3 : index
    %c0_74 = arith.constant 0 : index
    %c0_75 = arith.constant 0 : index
    %123 = vector.load %arg2[%c3, %c0_74, %c0_75] : memref<10x192x192xbf16, #tpu.memory_space<vmem>>, vector<1x192x192xbf16>
    %124 = vector.shape_cast %123 : vector<1x192x192xbf16> to vector<192x192xbf16>
    %cst_76 = arith.constant dense<0.000000e+00> : vector<136x192xf32>
    %125 = tpu.matmul %122, %124, %cst_76 {dimension_numbers = #tpu.dot_dimension_numbers<[1], [0], [0], [1], [0, 0, 1, 1], [], []>} : vector<136x192xbf16>, vector<192x192xbf16>, vector<136x192xf32> -> vector<136x192xf32>
    %126 = vector.extract_strided_slice %125 {offsets = [0, 0], sizes = [128, 64], strides = [1, 1]} : vector<136x192xf32> to vector<128x64xf32>
    %127 = vector.extract_strided_slice %125 {offsets = [1, 64], sizes = [128, 64], strides = [1, 1]} : vector<136x192xf32> to vector<128x64xf32>
    %128 = arith.addf %126, %127 : vector<128x64xf32>
    %129 = vector.extract_strided_slice %125 {offsets = [2, 128], sizes = [128, 64], strides = [1, 1]} : vector<136x192xf32> to vector<128x64xf32>
    %130 = arith.addf %128, %129 : vector<128x64xf32>
    %cst_77 = arith.constant 0.000000e+00 : f32
    %131 = vector.broadcast %cst_77 : f32 to vector<128x64xf32>
    %132 = arith.cmpf oge, %130, %131 : vector<128x64xf32>
    %cst_78 = arith.constant 2.000000e-01 : f32
    %133 = vector.broadcast %cst_78 : f32 to vector<128x64xf32>
    %134 = arith.mulf %133, %130 : vector<128x64xf32>
    %135 = arith.select %132, %130, %134 : vector<128x64xi1>, vector<128x64xf32>
    %cst_79 = arith.constant 0.000000e+00 : f32
    %136 = vector.shape_cast %31 : vector<128x1xi1> to vector<128x1xi1>
    %137 = vector.broadcast %136 : vector<128x1xi1> to vector<128x64xi1>
    %138 = vector.broadcast %cst_79 : f32 to vector<128x64xf32>
    %139 = arith.select %137, %135, %138 : vector<128x64xi1>, vector<128x64xf32>
    %140 = arith.truncf %139 : vector<128x64xf32> to vector<128x64xbf16>
    %c1_80 = arith.constant 1 : index
    %c17_81 = arith.constant 17 : index
    %c0_82 = arith.constant 0 : index
    %141 = vector.load %arg5[%c1_80, %c17_81, %c0_82] : memref<2x168x64xbf16, #tpu.memory_space<vmem>>, vector<1x128x64xbf16>
    %142 = vector.shape_cast %141 : vector<1x128x64xbf16> to vector<128x64xbf16>
    %143 = vector.shape_cast %140 : vector<128x64xbf16> to vector<1x128x64xbf16>
    tpu.vector_store %arg5[%c1_80, %c17_81, %c0_82], %143 {strides = array<i32>} : memref<2x168x64xbf16, #tpu.memory_space<vmem>>, vector<1x128x64xbf16>,
    %c1_83 = arith.constant 1 : index
    %c0_84 = arith.constant 0 : index
    %c0_85 = arith.constant 0 : index
    %144 = vector.load %arg5[%c1_83, %c0_84, %c0_85] : memref<2x168x64xbf16, #tpu.memory_space<vmem>>, vector<1x136x64xbf16>
    %145 = vector.shape_cast %144 : vector<1x136x64xbf16> to vector<136x64xbf16>
    %c1_86 = arith.constant 1 : index
    %c16_87 = arith.constant 16 : index
    %c0_88 = arith.constant 0 : index
    %146 = vector.load %arg5[%c1_86, %c16_87, %c0_88] : memref<2x168x64xbf16, #tpu.memory_space<vmem>>, vector<1x136x64xbf16>
    %147 = vector.shape_cast %146 : vector<1x136x64xbf16> to vector<136x64xbf16>
    %c1_89 = arith.constant 1 : index
    %c32_90 = arith.constant 32 : index
    %c0_91 = arith.constant 0 : index
    %148 = vector.load %arg5[%c1_89, %c32_90, %c0_91] : memref<2x168x64xbf16, #tpu.memory_space<vmem>>, vector<1x136x64xbf16>
    %149 = vector.shape_cast %148 : vector<1x136x64xbf16> to vector<136x64xbf16>
    %150 = tpu.concatenate %145, %147, %149 in 1 : vector<136x64xbf16>, vector<136x64xbf16>, vector<136x64xbf16> -> vector<136x192xbf16>
    %c4 = arith.constant 4 : index
    %c0_92 = arith.constant 0 : index
    %c0_93 = arith.constant 0 : index
    %151 = vector.load %arg2[%c4, %c0_92, %c0_93] : memref<10x192x192xbf16, #tpu.memory_space<vmem>>, vector<1x192x192xbf16>
    %152 = vector.shape_cast %151 : vector<1x192x192xbf16> to vector<192x192xbf16>
    %cst_94 = arith.constant dense<0.000000e+00> : vector<136x192xf32>
    %153 = tpu.matmul %150, %152, %cst_94 {dimension_numbers = #tpu.dot_dimension_numbers<[1], [0], [0], [1], [0, 0, 1, 1], [], []>} : vector<136x192xbf16>, vector<192x192xbf16>, vector<136x192xf32> -> vector<136x192xf32>
    %154 = vector.extract_strided_slice %153 {offsets = [0, 0], sizes = [128, 64], strides = [1, 1]} : vector<136x192xf32> to vector<128x64xf32>
    %155 = vector.extract_strided_slice %153 {offsets = [1, 64], sizes = [128, 64], strides = [1, 1]} : vector<136x192xf32> to vector<128x64xf32>
    %156 = arith.addf %154, %155 : vector<128x64xf32>
    %157 = vector.extract_strided_slice %153 {offsets = [2, 128], sizes = [128, 64], strides = [1, 1]} : vector<136x192xf32> to vector<128x64xf32>
    %158 = arith.addf %156, %157 : vector<128x64xf32>
    %cst_95 = arith.constant 0.000000e+00 : f32
    %159 = vector.broadcast %cst_95 : f32 to vector<128x64xf32>
    %160 = arith.cmpf oge, %158, %159 : vector<128x64xf32>
    %cst_96 = arith.constant 2.000000e-01 : f32
    %161 = vector.broadcast %cst_96 : f32 to vector<128x64xf32>
    %162 = arith.mulf %161, %158 : vector<128x64xf32>
    %163 = arith.select %160, %158, %162 : vector<128x64xi1>, vector<128x64xf32>
    %cst_97 = arith.constant 0.000000e+00 : f32
    %164 = vector.shape_cast %31 : vector<128x1xi1> to vector<128x1xi1>
    %165 = vector.broadcast %164 : vector<128x1xi1> to vector<128x64xi1>
    %166 = vector.broadcast %cst_97 : f32 to vector<128x64xf32>
    %167 = arith.select %165, %163, %166 : vector<128x64xi1>, vector<128x64xf32>
    %168 = arith.truncf %167 : vector<128x64xf32> to vector<128x64xbf16>
    %c0_98 = arith.constant 0 : index
    %c17_99 = arith.constant 17 : index
    %c0_100 = arith.constant 0 : index
    %169 = vector.load %arg5[%c0_98, %c17_99, %c0_100] : memref<2x168x64xbf16, #tpu.memory_space<vmem>>, vector<1x128x64xbf16>
    %170 = vector.shape_cast %169 : vector<1x128x64xbf16> to vector<128x64xbf16>
    %171 = vector.shape_cast %168 : vector<128x64xbf16> to vector<1x128x64xbf16>
    tpu.vector_store %arg5[%c0_98, %c17_99, %c0_100], %171 {strides = array<i32>} : memref<2x168x64xbf16, #tpu.memory_space<vmem>>, vector<1x128x64xbf16>,
    %c0_101 = arith.constant 0 : index
    %c0_102 = arith.constant 0 : index
    %c0_103 = arith.constant 0 : index
    %172 = vector.load %arg5[%c0_101, %c0_102, %c0_103] : memref<2x168x64xbf16, #tpu.memory_space<vmem>>, vector<1x136x64xbf16>
    %173 = vector.shape_cast %172 : vector<1x136x64xbf16> to vector<136x64xbf16>
    %c0_104 = arith.constant 0 : index
    %c16_105 = arith.constant 16 : index
    %c0_106 = arith.constant 0 : index
    %174 = vector.load %arg5[%c0_104, %c16_105, %c0_106] : memref<2x168x64xbf16, #tpu.memory_space<vmem>>, vector<1x136x64xbf16>
    %175 = vector.shape_cast %174 : vector<1x136x64xbf16> to vector<136x64xbf16>
    %c0_107 = arith.constant 0 : index
    %c32_108 = arith.constant 32 : index
    %c0_109 = arith.constant 0 : index
    %176 = vector.load %arg5[%c0_107, %c32_108, %c0_109] : memref<2x168x64xbf16, #tpu.memory_space<vmem>>, vector<1x136x64xbf16>
    %177 = vector.shape_cast %176 : vector<1x136x64xbf16> to vector<136x64xbf16>
    %178 = tpu.concatenate %173, %175, %177 in 1 : vector<136x64xbf16>, vector<136x64xbf16>, vector<136x64xbf16> -> vector<136x192xbf16>
    %c5 = arith.constant 5 : index
    %c0_110 = arith.constant 0 : index
    %c0_111 = arith.constant 0 : index
    %179 = vector.load %arg2[%c5, %c0_110, %c0_111] : memref<10x192x192xbf16, #tpu.memory_space<vmem>>, vector<1x192x192xbf16>
    %180 = vector.shape_cast %179 : vector<1x192x192xbf16> to vector<192x192xbf16>
    %cst_112 = arith.constant dense<0.000000e+00> : vector<136x192xf32>
    %181 = tpu.matmul %178, %180, %cst_112 {dimension_numbers = #tpu.dot_dimension_numbers<[1], [0], [0], [1], [0, 0, 1, 1], [], []>} : vector<136x192xbf16>, vector<192x192xbf16>, vector<136x192xf32> -> vector<136x192xf32>
    %182 = vector.extract_strided_slice %181 {offsets = [0, 0], sizes = [128, 64], strides = [1, 1]} : vector<136x192xf32> to vector<128x64xf32>
    %183 = vector.extract_strided_slice %181 {offsets = [1, 64], sizes = [128, 64], strides = [1, 1]} : vector<136x192xf32> to vector<128x64xf32>
    %184 = arith.addf %182, %183 : vector<128x64xf32>
    %185 = vector.extract_strided_slice %181 {offsets = [2, 128], sizes = [128, 64], strides = [1, 1]} : vector<136x192xf32> to vector<128x64xf32>
    %186 = arith.addf %184, %185 : vector<128x64xf32>
    %cst_113 = arith.constant 0.000000e+00 : f32
    %187 = vector.broadcast %cst_113 : f32 to vector<128x64xf32>
    %188 = arith.cmpf oge, %186, %187 : vector<128x64xf32>
    %cst_114 = arith.constant 2.000000e-01 : f32
    %189 = vector.broadcast %cst_114 : f32 to vector<128x64xf32>
    %190 = arith.mulf %189, %186 : vector<128x64xf32>
    %191 = arith.select %188, %186, %190 : vector<128x64xi1>, vector<128x64xf32>
    %cst_115 = arith.constant 0.000000e+00 : f32
    %192 = vector.shape_cast %31 : vector<128x1xi1> to vector<128x1xi1>
    %193 = vector.broadcast %192 : vector<128x1xi1> to vector<128x64xi1>
    %194 = vector.broadcast %cst_115 : f32 to vector<128x64xf32>
    %195 = arith.select %193, %191, %194 : vector<128x64xi1>, vector<128x64xf32>
    %196 = arith.truncf %195 : vector<128x64xf32> to vector<128x64xbf16>
    %c1_116 = arith.constant 1 : index
    %c17_117 = arith.constant 17 : index
    %c0_118 = arith.constant 0 : index
    %197 = vector.load %arg5[%c1_116, %c17_117, %c0_118] : memref<2x168x64xbf16, #tpu.memory_space<vmem>>, vector<1x128x64xbf16>
    %198 = vector.shape_cast %197 : vector<1x128x64xbf16> to vector<128x64xbf16>
    %199 = vector.shape_cast %196 : vector<128x64xbf16> to vector<1x128x64xbf16>
    tpu.vector_store %arg5[%c1_116, %c17_117, %c0_118], %199 {strides = array<i32>} : memref<2x168x64xbf16, #tpu.memory_space<vmem>>, vector<1x128x64xbf16>,
    %c1_119 = arith.constant 1 : index
    %c0_120 = arith.constant 0 : index
    %c0_121 = arith.constant 0 : index
    %200 = vector.load %arg5[%c1_119, %c0_120, %c0_121] : memref<2x168x64xbf16, #tpu.memory_space<vmem>>, vector<1x136x64xbf16>
    %201 = vector.shape_cast %200 : vector<1x136x64xbf16> to vector<136x64xbf16>
    %c1_122 = arith.constant 1 : index
    %c16_123 = arith.constant 16 : index
    %c0_124 = arith.constant 0 : index
    %202 = vector.load %arg5[%c1_122, %c16_123, %c0_124] : memref<2x168x64xbf16, #tpu.memory_space<vmem>>, vector<1x136x64xbf16>
    %203 = vector.shape_cast %202 : vector<1x136x64xbf16> to vector<136x64xbf16>
    %c1_125 = arith.constant 1 : index
    %c32_126 = arith.constant 32 : index
    %c0_127 = arith.constant 0 : index
    %204 = vector.load %arg5[%c1_125, %c32_126, %c0_127] : memref<2x168x64xbf16, #tpu.memory_space<vmem>>, vector<1x136x64xbf16>
    %205 = vector.shape_cast %204 : vector<1x136x64xbf16> to vector<136x64xbf16>
    %206 = tpu.concatenate %201, %203, %205 in 1 : vector<136x64xbf16>, vector<136x64xbf16>, vector<136x64xbf16> -> vector<136x192xbf16>
    %c6 = arith.constant 6 : index
    %c0_128 = arith.constant 0 : index
    %c0_129 = arith.constant 0 : index
    %207 = vector.load %arg2[%c6, %c0_128, %c0_129] : memref<10x192x192xbf16, #tpu.memory_space<vmem>>, vector<1x192x192xbf16>
    %208 = vector.shape_cast %207 : vector<1x192x192xbf16> to vector<192x192xbf16>
    %cst_130 = arith.constant dense<0.000000e+00> : vector<136x192xf32>
    %209 = tpu.matmul %206, %208, %cst_130 {dimension_numbers = #tpu.dot_dimension_numbers<[1], [0], [0], [1], [0, 0, 1, 1], [], []>} : vector<136x192xbf16>, vector<192x192xbf16>, vector<136x192xf32> -> vector<136x192xf32>
    %210 = vector.extract_strided_slice %209 {offsets = [0, 0], sizes = [128, 64], strides = [1, 1]} : vector<136x192xf32> to vector<128x64xf32>
    %211 = vector.extract_strided_slice %209 {offsets = [1, 64], sizes = [128, 64], strides = [1, 1]} : vector<136x192xf32> to vector<128x64xf32>
    %212 = arith.addf %210, %211 : vector<128x64xf32>
    %213 = vector.extract_strided_slice %209 {offsets = [2, 128], sizes = [128, 64], strides = [1, 1]} : vector<136x192xf32> to vector<128x64xf32>
    %214 = arith.addf %212, %213 : vector<128x64xf32>
    %cst_131 = arith.constant 0.000000e+00 : f32
    %215 = vector.broadcast %cst_131 : f32 to vector<128x64xf32>
    %216 = arith.cmpf oge, %214, %215 : vector<128x64xf32>
    %cst_132 = arith.constant 2.000000e-01 : f32
    %217 = vector.broadcast %cst_132 : f32 to vector<128x64xf32>
    %218 = arith.mulf %217, %214 : vector<128x64xf32>
    %219 = arith.select %216, %214, %218 : vector<128x64xi1>, vector<128x64xf32>
    %cst_133 = arith.constant 0.000000e+00 : f32
    %220 = vector.shape_cast %31 : vector<128x1xi1> to vector<128x1xi1>
    %221 = vector.broadcast %220 : vector<128x1xi1> to vector<128x64xi1>
    %222 = vector.broadcast %cst_133 : f32 to vector<128x64xf32>
    %223 = arith.select %221, %219, %222 : vector<128x64xi1>, vector<128x64xf32>
    %224 = arith.truncf %223 : vector<128x64xf32> to vector<128x64xbf16>
    %c0_134 = arith.constant 0 : index
    %c17_135 = arith.constant 17 : index
    %c0_136 = arith.constant 0 : index
    %225 = vector.load %arg5[%c0_134, %c17_135, %c0_136] : memref<2x168x64xbf16, #tpu.memory_space<vmem>>, vector<1x128x64xbf16>
    %226 = vector.shape_cast %225 : vector<1x128x64xbf16> to vector<128x64xbf16>
    %227 = vector.shape_cast %224 : vector<128x64xbf16> to vector<1x128x64xbf16>
    tpu.vector_store %arg5[%c0_134, %c17_135, %c0_136], %227 {strides = array<i32>} : memref<2x168x64xbf16, #tpu.memory_space<vmem>>, vector<1x128x64xbf16>,
    %c0_137 = arith.constant 0 : index
    %c0_138 = arith.constant 0 : index
    %c0_139 = arith.constant 0 : index
    %228 = vector.load %arg5[%c0_137, %c0_138, %c0_139] : memref<2x168x64xbf16, #tpu.memory_space<vmem>>, vector<1x136x64xbf16>
    %229 = vector.shape_cast %228 : vector<1x136x64xbf16> to vector<136x64xbf16>
    %c0_140 = arith.constant 0 : index
    %c16_141 = arith.constant 16 : index
    %c0_142 = arith.constant 0 : index
    %230 = vector.load %arg5[%c0_140, %c16_141, %c0_142] : memref<2x168x64xbf16, #tpu.memory_space<vmem>>, vector<1x136x64xbf16>
    %231 = vector.shape_cast %230 : vector<1x136x64xbf16> to vector<136x64xbf16>
    %c0_143 = arith.constant 0 : index
    %c32_144 = arith.constant 32 : index
    %c0_145 = arith.constant 0 : index
    %232 = vector.load %arg5[%c0_143, %c32_144, %c0_145] : memref<2x168x64xbf16, #tpu.memory_space<vmem>>, vector<1x136x64xbf16>
    %233 = vector.shape_cast %232 : vector<1x136x64xbf16> to vector<136x64xbf16>
    %234 = tpu.concatenate %229, %231, %233 in 1 : vector<136x64xbf16>, vector<136x64xbf16>, vector<136x64xbf16> -> vector<136x192xbf16>
    %c7 = arith.constant 7 : index
    %c0_146 = arith.constant 0 : index
    %c0_147 = arith.constant 0 : index
    %235 = vector.load %arg2[%c7, %c0_146, %c0_147] : memref<10x192x192xbf16, #tpu.memory_space<vmem>>, vector<1x192x192xbf16>
    %236 = vector.shape_cast %235 : vector<1x192x192xbf16> to vector<192x192xbf16>
    %cst_148 = arith.constant dense<0.000000e+00> : vector<136x192xf32>
    %237 = tpu.matmul %234, %236, %cst_148 {dimension_numbers = #tpu.dot_dimension_numbers<[1], [0], [0], [1], [0, 0, 1, 1], [], []>} : vector<136x192xbf16>, vector<192x192xbf16>, vector<136x192xf32> -> vector<136x192xf32>
    %238 = vector.extract_strided_slice %237 {offsets = [0, 0], sizes = [128, 64], strides = [1, 1]} : vector<136x192xf32> to vector<128x64xf32>
    %239 = vector.extract_strided_slice %237 {offsets = [1, 64], sizes = [128, 64], strides = [1, 1]} : vector<136x192xf32> to vector<128x64xf32>
    %240 = arith.addf %238, %239 : vector<128x64xf32>
    %241 = vector.extract_strided_slice %237 {offsets = [2, 128], sizes = [128, 64], strides = [1, 1]} : vector<136x192xf32> to vector<128x64xf32>
    %242 = arith.addf %240, %241 : vector<128x64xf32>
    %cst_149 = arith.constant 0.000000e+00 : f32
    %243 = vector.broadcast %cst_149 : f32 to vector<128x64xf32>
    %244 = arith.cmpf oge, %242, %243 : vector<128x64xf32>
    %cst_150 = arith.constant 2.000000e-01 : f32
    %245 = vector.broadcast %cst_150 : f32 to vector<128x64xf32>
    %246 = arith.mulf %245, %242 : vector<128x64xf32>
    %247 = arith.select %244, %242, %246 : vector<128x64xi1>, vector<128x64xf32>
    %cst_151 = arith.constant 0.000000e+00 : f32
    %248 = vector.shape_cast %31 : vector<128x1xi1> to vector<128x1xi1>
    %249 = vector.broadcast %248 : vector<128x1xi1> to vector<128x64xi1>
    %250 = vector.broadcast %cst_151 : f32 to vector<128x64xf32>
    %251 = arith.select %249, %247, %250 : vector<128x64xi1>, vector<128x64xf32>
    %252 = arith.truncf %251 : vector<128x64xf32> to vector<128x64xbf16>
    %c1_152 = arith.constant 1 : index
    %c17_153 = arith.constant 17 : index
    %c0_154 = arith.constant 0 : index
    %253 = vector.load %arg5[%c1_152, %c17_153, %c0_154] : memref<2x168x64xbf16, #tpu.memory_space<vmem>>, vector<1x128x64xbf16>
    %254 = vector.shape_cast %253 : vector<1x128x64xbf16> to vector<128x64xbf16>
    %255 = vector.shape_cast %252 : vector<128x64xbf16> to vector<1x128x64xbf16>
    tpu.vector_store %arg5[%c1_152, %c17_153, %c0_154], %255 {strides = array<i32>} : memref<2x168x64xbf16, #tpu.memory_space<vmem>>, vector<1x128x64xbf16>,
    %c1_155 = arith.constant 1 : index
    %c0_156 = arith.constant 0 : index
    %c0_157 = arith.constant 0 : index
    %256 = vector.load %arg5[%c1_155, %c0_156, %c0_157] : memref<2x168x64xbf16, #tpu.memory_space<vmem>>, vector<1x136x64xbf16>
    %257 = vector.shape_cast %256 : vector<1x136x64xbf16> to vector<136x64xbf16>
    %c1_158 = arith.constant 1 : index
    %c16_159 = arith.constant 16 : index
    %c0_160 = arith.constant 0 : index
    %258 = vector.load %arg5[%c1_158, %c16_159, %c0_160] : memref<2x168x64xbf16, #tpu.memory_space<vmem>>, vector<1x136x64xbf16>
    %259 = vector.shape_cast %258 : vector<1x136x64xbf16> to vector<136x64xbf16>
    %c1_161 = arith.constant 1 : index
    %c32_162 = arith.constant 32 : index
    %c0_163 = arith.constant 0 : index
    %260 = vector.load %arg5[%c1_161, %c32_162, %c0_163] : memref<2x168x64xbf16, #tpu.memory_space<vmem>>, vector<1x136x64xbf16>
    %261 = vector.shape_cast %260 : vector<1x136x64xbf16> to vector<136x64xbf16>
    %262 = tpu.concatenate %257, %259, %261 in 1 : vector<136x64xbf16>, vector<136x64xbf16>, vector<136x64xbf16> -> vector<136x192xbf16>
    %c8 = arith.constant 8 : index
    %c0_164 = arith.constant 0 : index
    %c0_165 = arith.constant 0 : index
    %263 = vector.load %arg2[%c8, %c0_164, %c0_165] : memref<10x192x192xbf16, #tpu.memory_space<vmem>>, vector<1x192x192xbf16>
    %264 = vector.shape_cast %263 : vector<1x192x192xbf16> to vector<192x192xbf16>
    %cst_166 = arith.constant dense<0.000000e+00> : vector<136x192xf32>
    %265 = tpu.matmul %262, %264, %cst_166 {dimension_numbers = #tpu.dot_dimension_numbers<[1], [0], [0], [1], [0, 0, 1, 1], [], []>} : vector<136x192xbf16>, vector<192x192xbf16>, vector<136x192xf32> -> vector<136x192xf32>
    %266 = vector.extract_strided_slice %265 {offsets = [0, 0], sizes = [128, 64], strides = [1, 1]} : vector<136x192xf32> to vector<128x64xf32>
    %267 = vector.extract_strided_slice %265 {offsets = [1, 64], sizes = [128, 64], strides = [1, 1]} : vector<136x192xf32> to vector<128x64xf32>
    %268 = arith.addf %266, %267 : vector<128x64xf32>
    %269 = vector.extract_strided_slice %265 {offsets = [2, 128], sizes = [128, 64], strides = [1, 1]} : vector<136x192xf32> to vector<128x64xf32>
    %270 = arith.addf %268, %269 : vector<128x64xf32>
    %cst_167 = arith.constant 0.000000e+00 : f32
    %271 = vector.broadcast %cst_167 : f32 to vector<128x64xf32>
    %272 = arith.cmpf oge, %270, %271 : vector<128x64xf32>
    %cst_168 = arith.constant 2.000000e-01 : f32
    %273 = vector.broadcast %cst_168 : f32 to vector<128x64xf32>
    %274 = arith.mulf %273, %270 : vector<128x64xf32>
    %275 = arith.select %272, %270, %274 : vector<128x64xi1>, vector<128x64xf32>
    %cst_169 = arith.constant 0.000000e+00 : f32
    %276 = vector.shape_cast %31 : vector<128x1xi1> to vector<128x1xi1>
    %277 = vector.broadcast %276 : vector<128x1xi1> to vector<128x64xi1>
    %278 = vector.broadcast %cst_169 : f32 to vector<128x64xf32>
    %279 = arith.select %277, %275, %278 : vector<128x64xi1>, vector<128x64xf32>
    %280 = arith.truncf %279 : vector<128x64xf32> to vector<128x64xbf16>
    %c0_170 = arith.constant 0 : index
    %c17_171 = arith.constant 17 : index
    %c0_172 = arith.constant 0 : index
    %281 = vector.load %arg5[%c0_170, %c17_171, %c0_172] : memref<2x168x64xbf16, #tpu.memory_space<vmem>>, vector<1x128x64xbf16>
    %282 = vector.shape_cast %281 : vector<1x128x64xbf16> to vector<128x64xbf16>
    %283 = vector.shape_cast %280 : vector<128x64xbf16> to vector<1x128x64xbf16>
    tpu.vector_store %arg5[%c0_170, %c17_171, %c0_172], %283 {strides = array<i32>} : memref<2x168x64xbf16, #tpu.memory_space<vmem>>, vector<1x128x64xbf16>,
    %c0_173 = arith.constant 0 : index
    %c0_174 = arith.constant 0 : index
    %c0_175 = arith.constant 0 : index
    %284 = vector.load %arg5[%c0_173, %c0_174, %c0_175] : memref<2x168x64xbf16, #tpu.memory_space<vmem>>, vector<1x136x64xbf16>
    %285 = vector.shape_cast %284 : vector<1x136x64xbf16> to vector<136x64xbf16>
    %c0_176 = arith.constant 0 : index
    %c16_177 = arith.constant 16 : index
    %c0_178 = arith.constant 0 : index
    %286 = vector.load %arg5[%c0_176, %c16_177, %c0_178] : memref<2x168x64xbf16, #tpu.memory_space<vmem>>, vector<1x136x64xbf16>
    %287 = vector.shape_cast %286 : vector<1x136x64xbf16> to vector<136x64xbf16>
    %c0_179 = arith.constant 0 : index
    %c32_180 = arith.constant 32 : index
    %c0_181 = arith.constant 0 : index
    %288 = vector.load %arg5[%c0_179, %c32_180, %c0_181] : memref<2x168x64xbf16, #tpu.memory_space<vmem>>, vector<1x136x64xbf16>
    %289 = vector.shape_cast %288 : vector<1x136x64xbf16> to vector<136x64xbf16>
    %290 = tpu.concatenate %285, %287, %289 in 1 : vector<136x64xbf16>, vector<136x64xbf16>, vector<136x64xbf16> -> vector<136x192xbf16>
    %c9 = arith.constant 9 : index
    %c0_182 = arith.constant 0 : index
    %c0_183 = arith.constant 0 : index
    %291 = vector.load %arg2[%c9, %c0_182, %c0_183] : memref<10x192x192xbf16, #tpu.memory_space<vmem>>, vector<1x192x192xbf16>
    %292 = vector.shape_cast %291 : vector<1x192x192xbf16> to vector<192x192xbf16>
    %cst_184 = arith.constant dense<0.000000e+00> : vector<136x192xf32>
    %293 = tpu.matmul %290, %292, %cst_184 {dimension_numbers = #tpu.dot_dimension_numbers<[1], [0], [0], [1], [0, 0, 1, 1], [], []>} : vector<136x192xbf16>, vector<192x192xbf16>, vector<136x192xf32> -> vector<136x192xf32>
    %294 = vector.extract_strided_slice %293 {offsets = [0, 0], sizes = [128, 64], strides = [1, 1]} : vector<136x192xf32> to vector<128x64xf32>
    %295 = vector.extract_strided_slice %293 {offsets = [1, 64], sizes = [128, 64], strides = [1, 1]} : vector<136x192xf32> to vector<128x64xf32>
    %296 = arith.addf %294, %295 : vector<128x64xf32>
    %297 = vector.extract_strided_slice %293 {offsets = [2, 128], sizes = [128, 64], strides = [1, 1]} : vector<136x192xf32> to vector<128x64xf32>
    %298 = arith.addf %296, %297 : vector<128x64xf32>
    %cst_185 = arith.constant 0.000000e+00 : f32
    %299 = vector.broadcast %cst_185 : f32 to vector<128x64xf32>
    %300 = arith.cmpf oge, %298, %299 : vector<128x64xf32>
    %cst_186 = arith.constant 2.000000e-01 : f32
    %301 = vector.broadcast %cst_186 : f32 to vector<128x64xf32>
    %302 = arith.mulf %301, %298 : vector<128x64xf32>
    %303 = arith.select %300, %298, %302 : vector<128x64xi1>, vector<128x64xf32>
    %cst_187 = arith.constant 0.000000e+00 : f32
    %304 = vector.shape_cast %31 : vector<128x1xi1> to vector<128x1xi1>
    %305 = vector.broadcast %304 : vector<128x1xi1> to vector<128x64xi1>
    %306 = vector.broadcast %cst_187 : f32 to vector<128x64xf32>
    %307 = arith.select %305, %303, %306 : vector<128x64xi1>, vector<128x64xf32>
    %308 = arith.truncf %307 : vector<128x64xf32> to vector<128x64xbf16>
    %c1_188 = arith.constant 1 : index
    %c17_189 = arith.constant 17 : index
    %c0_190 = arith.constant 0 : index
    %309 = vector.load %arg5[%c1_188, %c17_189, %c0_190] : memref<2x168x64xbf16, #tpu.memory_space<vmem>>, vector<1x128x64xbf16>
    %310 = vector.shape_cast %309 : vector<1x128x64xbf16> to vector<128x64xbf16>
    %311 = vector.shape_cast %308 : vector<128x64xbf16> to vector<1x128x64xbf16>
    tpu.vector_store %arg5[%c1_188, %c17_189, %c0_190], %311 {strides = array<i32>} : memref<2x168x64xbf16, #tpu.memory_space<vmem>>, vector<1x128x64xbf16>,
    %c1_191 = arith.constant 1 : index
    %c0_192 = arith.constant 0 : index
    %c0_193 = arith.constant 0 : index
    %312 = vector.load %arg5[%c1_191, %c0_192, %c0_193] : memref<2x168x64xbf16, #tpu.memory_space<vmem>>, vector<1x136x64xbf16>
    %313 = vector.shape_cast %312 : vector<1x136x64xbf16> to vector<136x64xbf16>
    %c1_194 = arith.constant 1 : index
    %c16_195 = arith.constant 16 : index
    %c0_196 = arith.constant 0 : index
    %314 = vector.load %arg5[%c1_194, %c16_195, %c0_196] : memref<2x168x64xbf16, #tpu.memory_space<vmem>>, vector<1x136x64xbf16>
    %315 = vector.shape_cast %314 : vector<1x136x64xbf16> to vector<136x64xbf16>
    %c1_197 = arith.constant 1 : index
    %c32_198 = arith.constant 32 : index
    %c0_199 = arith.constant 0 : index
    %316 = vector.load %arg5[%c1_197, %c32_198, %c0_199] : memref<2x168x64xbf16, #tpu.memory_space<vmem>>, vector<1x136x64xbf16>
    %317 = vector.shape_cast %316 : vector<1x136x64xbf16> to vector<136x64xbf16>
    %318 = tpu.concatenate %313, %315, %317 in 1 : vector<136x64xbf16>, vector<136x64xbf16>, vector<136x64xbf16> -> vector<136x192xbf16>
    %c0_200 = arith.constant 0 : index
    %c0_201 = arith.constant 0 : index
    %319 = vector.load %arg3[%c0_200, %c0_201] : memref<192x768xbf16, #tpu.memory_space<vmem>>, vector<192x768xbf16>
    %cst_202 = arith.constant dense<0.000000e+00> : vector<136x768xf32>
    %320 = tpu.matmul %318, %319, %cst_202 {dimension_numbers = #tpu.dot_dimension_numbers<[1], [0], [0], [1], [0, 0, 1, 1], [], []>} : vector<136x192xbf16>, vector<192x768xbf16>, vector<136x768xf32> -> vector<136x768xf32>
    %321 = vector.extract_strided_slice %320 {offsets = [0, 0], sizes = [128, 256], strides = [1, 1]} : vector<136x768xf32> to vector<128x256xf32>
    %322 = vector.extract_strided_slice %320 {offsets = [1, 256], sizes = [128, 256], strides = [1, 1]} : vector<136x768xf32> to vector<128x256xf32>
    %323 = arith.addf %321, %322 : vector<128x256xf32>
    %324 = vector.extract_strided_slice %320 {offsets = [2, 512], sizes = [128, 256], strides = [1, 1]} : vector<136x768xf32> to vector<128x256xf32>
    %325 = arith.addf %323, %324 : vector<128x256xf32>
    %cst_203 = arith.constant 0.000000e+00 : f32
    %326 = vector.broadcast %cst_203 : f32 to vector<128x256xf32>
    %327 = arith.cmpf oge, %325, %326 : vector<128x256xf32>
    %cst_204 = arith.constant 2.000000e-01 : f32
    %328 = vector.broadcast %cst_204 : f32 to vector<128x256xf32>
    %329 = arith.mulf %328, %325 : vector<128x256xf32>
    %330 = arith.select %327, %325, %329 : vector<128x256xi1>, vector<128x256xf32>
    %331 = arith.truncf %330 : vector<128x256xf32> to vector<128x256xbf16>
    %c0_205 = arith.constant 0 : index
    %c0_206 = arith.constant 0 : index
    %c0_207 = arith.constant 0 : index
    %332 = vector.load %arg4[%c0_205, %c0_206, %c0_207] : memref<1x128x256xbf16, #tpu.memory_space<vmem>>, vector<1x128x256xbf16>
    %333 = vector.shape_cast %332 : vector<1x128x256xbf16> to vector<128x256xbf16>
    %334 = vector.shape_cast %331 : vector<128x256xbf16> to vector<1x128x256xbf16>
    tpu.vector_store %arg4[%c0_205, %c0_206, %c0_207], %334 {strides = array<i32>} : memref<1x128x256xbf16, #tpu.memory_space<vmem>>, vector<1x128x256xbf16>,
    return
  }
  func.func @transform_0(%arg0: i32) -> (i32, i32, i32) {
    %c0_i32 = arith.constant 0 : i32
    %c0_i32_0 = arith.constant 0 : i32
    %c0_i32_1 = arith.constant 0 : i32
    return %arg0, %c0_i32, %c0_i32_0 : i32, i32, i32
  }
  func.func @transform_1(%arg0: i32) -> (i32, i32, i32) {
    %c0_i32 = arith.constant 0 : i32
    %c0_i32_0 = arith.constant 0 : i32
    %c0_i32_1 = arith.constant 0 : i32
    %c0_i32_2 = arith.constant 0 : i32
    return %c0_i32, %c0_i32_0, %c0_i32_1 : i32, i32, i32
  }
  func.func @transform_2(%arg0: i32) -> (i32, i32) {
    %c0_i32 = arith.constant 0 : i32
    %c0_i32_0 = arith.constant 0 : i32
    %c0_i32_1 = arith.constant 0 : i32
    return %c0_i32, %c0_i32_0 : i32, i32
  }
  func.func @transform_3(%arg0: i32) -> (i32, i32, i32) {
    %c0_i32 = arith.constant 0 : i32
    %c0_i32_0 = arith.constant 0 : i32
    %c0_i32_1 = arith.constant 0 : i32
    return %arg0, %c0_i32, %c0_i32_0 : i32, i32, i32
  }
}

</mosaic_0001>

<bundles_post_ra>
// kernel: block_forward.1
= control target key start
LH: loop header
LB: loop body
LE: loop exit
PB: predicated region body
PF: predicated region fallthrough
CT: control target
= control target key end

     0   :  { %s12866_s12 = smov 0   ;;  %s16293_s0 = inlined_call_operand.vmem [shape: bf16[2,176,64], index: 0, kind: input, shape index: {}]   ;;  %s16294_s1 = inlined_call_operand.vmem [shape: bf16[10,192,192], index: 1, kind: input, shape index: {}]   ;;  %s16295_s2 = inlined_call_operand.vmem [shape: bf16[192,768], index: 2, kind: input, shape index: {}]   ;;  %s16296_s3 = inlined_call_operand.vmem [shape: bf16[2,128,256], index: 3, kind: output, shape index: {}]  }
   0x1 LB: > { %s11048_s13 = sadd.s32 4294967295, %s12842_s12   ;;  %p11052_p0 = scmp.ge.s32.totalorder %s12842_s12, 1  ;;  %s12842_s12 = sphi %s12866_s12, %s13_s12  }
   0x2   : > { %p137_p1 = scmp.lt.s32.totalorder %s12842_s12, 3 }
   0x4   : > { %p138_p2 = pnand %p11052_p0, %p137_p1 }
   0x5   : > { %p161_p3 = scmp.lt.s32.totalorder (!%p138_p2), %s11048_s13, 1  ;;  %v12243_v0 = vld [vmem:[%s16294_s1 + $0x4] ss:$8 sps:$4 sm:$0xff] (!%p138_p2)   ;;  %v12245_v1 = vld [vmem:[%s16294_s1] ss:$8 sps:$4 sm:$0xff] (!%p138_p2)   ;;  %vm505_vm0 = vcmask (!%p138_p2), 523264  }
   0x6   : > { %141 = sbr.rel (%p138_p2) target bundleno = 5219 (0x1463), region = 32  ;;  %707 = vmatprep.subr.bf16.mxu0 (!%p138_p2), %v12243_v0  ;;  %v12246_v2 = vld [vmem:[%s16294_s1 + $0x14] ss:$8 sps:$4 sm:$0xff] (!%p138_p2)   ;;  %v12248_v3 = vld [vmem:[%s16294_s1 + $0x10] ss:$8 sps:$4 sm:$0xff] (!%p138_p2)   ;;  %s12844_s5 = smov (!%p138_p2), 64  }
   0x7   : > { %708 = vmatpush1.bf16.msra.mxu0 (!%p138_p2), %v12245_v1  ;;  %v12249_v4 = vld [vmem:[%s16294_s1 + $0x24] ss:$8 sps:$4 sm:$0xff] (!%p138_p2)   ;;  %v12251_v5 = vld [vmem:[%s16294_s1 + $0x20] ss:$8 sps:$4 sm:$0xff] (!%p138_p2)   ;;  %v12252_v6 = vld [vmem:[%s16294_s1 + $0x34] ss:$8 sps:$4 sm:$0xff] (!%p138_p2)  }
   0x8   : > { %709 = vmatprep.subr.bf16.mxu0 (!%p138_p2), %v12246_v2  ;;  %v12254_v10 = vld [vmem:[%s16294_s1 + $0x30] ss:$8 sps:$4 sm:$0xff] (!%p138_p2)   ;;  %v12255_v12 = vld [vmem:[%s16294_s1 + $0x44] ss:$8 sps:$4 sm:$0xff] (!%p138_p2)   ;;  %v12257_v14 = vld [vmem:[%s16294_s1 + $0x40] ss:$8 sps:$4 sm:$0xff] (!%p138_p2)  }
   0x9   : > { %v12258_v18 = vld [vmem:[%s16294_s1 + $0x54] ss:$8 sps:$4 sm:$0xff] (!%p138_p2)   ;;  %v12260_v21 = vld [vmem:[%s16294_s1 + $0x50] ss:$8 sps:$4 sm:$0xff] (!%p138_p2)   ;;  %v12261_v22 = vld [vmem:[%s16294_s1 + $0x64] ss:$8 sps:$4 sm:$0xff] (!%p138_p2)  }
   0xa   : > { %v12263_v23 = vld [vmem:[%s16294_s1 + $0x60] ss:$8 sps:$4 sm:$0xff] (!%p138_p2)   ;;  %v12264_v24 = vld [vmem:[%s16294_s1 + $0x74] ss:$8 sps:$4 sm:$0xff] (!%p138_p2)   ;;  %v12266_v25 = vld [vmem:[%s16294_s1 + $0x70] ss:$8 sps:$4 sm:$0xff] (!%p138_p2)  }
   0xb   : > { %710 = vmatpush1.bf16.msra.mxu0 (!%p138_p2), %v12248_v3  ;;  %v12267_v26 = vld [vmem:[%s16294_s1 + $0x84] ss:$8 sps:$4 sm:$0xff] (!%p138_p2)   ;;  %v12269_v27 = vld [vmem:[%s16294_s1 + $0x80] ss:$8 sps:$4 sm:$0xff] (!%p138_p2)   ;;  %v12270_v28 = vld [vmem:[%s16294_s1 + $0x94] ss:$8 sps:$4 sm:$0xff] (!%p138_p2)  }
   0xc   : > { %711 = vmatprep.subr.bf16.mxu0 (!%p138_p2), %v12249_v4  ;;  %v12272_v29 = vld [vmem:[%s16294_s1 + $0x90] ss:$8 sps:$4 sm:$0xff] (!%p138_p2)   ;;  %v12273_v30 = vld [vmem:[%s16294_s1 + $0xa4] ss:$8 sps:$4 sm:$0xff] (!%p138_p2)   ;;  %v12275_v31 = vld [vmem:[%s16294_s1 + $0xa0] ss:$8 sps:$4 sm:$0xff] (!%p138_p2)  }
   0xd   : > { %s16304_s13 = smov (!%p161_p3, %s11048_s13), 1  ;;  %v12276_v32 = vld [vmem:[%s16294_s1 + $0xb4] ss:$8 sps:$4 sm:$0xff]   ;;  %v12278_v33 = vld [vmem:[%s16294_s1 + $0xb0] ss:$8 sps:$4 sm:$0xff]   ;;  %vm172_vm1 = vcmask 519168  }
   0xe   : > { %s12223_s22 = smul.u32 88, %s16304_s13  ;;  %v12845_v54 = vmov 0   ;;  %vm845_vm2 = vcmask 1046528   ;;  %vm960_vm3 = vcmask 1045504   ;;  %vm1170_vm5 = vsmask.f32 256 }
   0xf   : > { %712 = vmatpush1.bf16.msra.mxu0 %v12251_v5  ;;  %175 = vst.msk [vmem:[#allocation2 + $0x8] sm:$0xf] %vm172_vm1, %v12845_v54  ;;  %173 = vst.msk [vmem:[#allocation2] sm:$0xf] %vm172_vm1, %v12845_v54  ;;  %vm1171_vm6 = vsmask.f32 4368 }
  0x10   : > { %s12895_s27 = scalar_lea.vmem %s16293_s0, %s12223_s22  ;;  %713 = vmatprep.subr.bf16.mxu0 %v12252_v6  ;;  %174 = vst.msk [vmem:[#allocation2 + $0x4] sm:$0xf] %vm172_vm1, %v12845_v54  ;;  %176 = vst.msk [vmem:[#allocation2 + $0x48] sm:$0xf] %vm172_vm1, %v12845_v54  ;;  %vm1334_vm7 = vsmask.f32 7938 }
  0x11   : > { %v12904_v7 = vld [vmem:[%s12895_s27 + $0x8] sm:$0xff]   ;;  %v12907_v8 = vld [vmem:[%s12895_s27 + $0x10] sm:$0xff]   ;;  %v12912_v9 = vld [vmem:[%s12895_s27 + $0x18] sm:$0xff]   ;;  %177 = vst.msk [vmem:[#allocation2 + $0x4c] sm:$0xf] %vm172_vm1, %v12845_v54  ;;  %s12022_s21 = sshll.u32 %s16304_s13, 7 }
  0x12   : > { %481 = vrot.lane.b32.xlu0 %v12904_v7, %s12844_s5  ;;  %11093 = vmatprep.mubr.msk.bf16.mxu0 %vm505_vm0, %v12907_v8  ;;  %v12922_v11 = vld [vmem:[%s12895_s27 + $0x20] sm:$0xff]   ;;  %v12930_v13 = vld [vmem:[%s12895_s27 + $0x28] sm:$0xff]   ;;  %v12938_v15 = vld [vmem:[%s12895_s27 + $0x30] sm:$0xff]   ;;  %178 = vst.msk [vmem:[#allocation2 + $0x50] sm:$0xf] %vm172_vm1, %v12845_v54  ;;  %s16152_s13 = scalar_lea.vmem %s16296_s3, %s12022_s21 }
  0x13   : > { %485 = vrot.lane.b32.xlu1 %v12912_v9, %s12844_s5  ;;  %v427_v16 = vld [vmem:[%s12895_s27 + $0x40] sm:$0xf]  ;;  %714 = vmatpush1.bf16.msra.mxu0 %v12254_v10  ;;  %v428_v17 = vld [vmem:[%s12895_s27 + $0x44] sm:$0xf]  ;;  %v12948_v19 = vld [vmem:[%s12895_s27 + $0x38] sm:$0xff]  }
  0x14   : > { %715 = vmatprep.subr.bf16.mxu0 %v12255_v12  ;;  %v11065_v20 = vcombine.low %v427_v16, %v428_v17  ;;  %v12279_v34 = vld [vmem:[%s12895_s27] sm:$0xff]   ;;  %v13018_v48 = vld [vmem:[%s12895_s27 + $0x48] sm:$0xf]  ;;  %v430_v49 = vld [vmem:[%s12895_s27 + $0x4c] sm:$0xf] }
  0x15   : > { %v11067_v51 = vcombine.low %v13018_v48, %v430_v49  ;;  %180 = vst.msk [vmem:[#allocation2 + $0x54] sm:$0xf] %vm172_vm1, %v12845_v54  ;;  %181 = vst.msk [vmem:[#allocation2 + $0x58] sm:$0xf] %vm172_vm1, %v12845_v54 }
  0x16   : > { %483 = vrot.lane.b32.xlu0 %v12907_v8, %s12844_s5  ;;  %182 = vst.msk [vmem:[#allocation2 + $0x5c] sm:$0xf] %vm172_vm1, %v12845_v54  ;;  %183 = vst.msk [vmem:[#allocation2 + $0x9c] sm:$0xf] %vm172_vm1, %v12845_v54 }
  0x17   : > { %487 = vrot.lane.b32.xlu1 %v12922_v11, %s12844_s5  ;;  %716 = vmatpush1.bf16.msra.mxu0 %v12257_v14  ;;  %184 = vst.msk [vmem:[#allocation2 + $0xa0] sm:$0xf] %vm172_vm1, %v12845_v54  ;;  %185 = vst.msk [vmem:[#allocation2 + $0xa4] sm:$0xf] %vm172_vm1, %v12845_v54 }
  0x18   : > { %717 = vmatprep.subr.bf16.mxu0 %v12258_v18  ;;  %vm13192_vm8 = vmor %vm1170_vm5, %vm1171_vm6 }
  0x19   : > { %vm13200_vm9 = vmand %vm172_vm1, %vm1334_vm7 }
  0x1a   : > { %489 = vrot.lane.b32.xlu0 %v12930_v13, %s12844_s5 }
  0x1b   : > { %491 = vrot.lane.b32.xlu1 %v12938_v15, %s12844_s5  ;;  %718 = vmatpush1.bf16.msra.mxu0 %v12260_v21 }
  0x1c   : > { %719 = vmatprep.subr.bf16.mxu0 %v12261_v22 }
  0x1e   : > { %493 = vrot.lane.b32.xlu0 %v12948_v19, %s12844_s5 }
  0x1f   : > { %495 = vrot.lane.b32.xlu1 %v11065_v20, %s12844_s5  ;;  %720 = vmatpush1.bf16.msra.mxu0 %v12263_v23 }
  0x20   : > { %721 = vmatprep.subr.bf16.mxu0 %v12264_v24 }
  0x23   : > { %722 = vmatpush1.bf16.msra.mxu0 %v12266_v25 }
  0x24   : > { %723 = vmatprep.subr.bf16.mxu0 %v12267_v26 }
  0x27   : > { %724 = vmatpush1.bf16.msra.mxu0 %v12269_v27 }
  0x28   : > { %725 = vmatprep.subr.bf16.mxu0 %v12270_v28 }
  0x2b   : > { %726 = vmatpush1.bf16.msra.mxu0 %v12272_v29 }
  0x2c   : > { %727 = vmatprep.subr.bf16.mxu0 %v12273_v30 }
  0x2f   : > { %728 = vmatpush1.bf16.msra.mxu0 %v12275_v31 }
  0x30   : > { %729 = vmatprep.subr.bf16.mxu0 %v12276_v32 }
  0x33   : > { %730 = vmatpush1.bf16.msra.mxu0 %v12278_v33 }
  0x84   : > { %v482_v35 = vpop.permute.xlu0 %481 }
  0x85   : > { %v508_v36 = vsel %vm505_vm0, %v12279_v34, %v482_v35  ;;  %v486_v39 = vpop.permute.xlu1 %485 }
  0x86   : > { %740 = vmatmul.mubr.bf16.vlgmr.msra.gmra.mrb[0].mxu0 %v508_v36  ;;  %v516_v40 = vsel %vm505_vm0, %v12907_v8, %v486_v39 }
  0x87   : > { %11094 = vmatprep.mubr.msk.bf16.mxu0 %vm505_vm0, %v12912_v9 }
  0x88   : > { %v484_v37 = vpop.permute.xlu0 %483 }
  0x89   : > { %v512_v38 = vsel %vm505_vm0, %v12904_v7, %v484_v37  ;;  %v488_v41 = vpop.permute.xlu1 %487 }
  0x8a   : > { %v520_v42 = vsel %vm505_vm0, %v12912_v9, %v488_v41 }
  0x8c   : > { %v490_v43 = vpop.permute.xlu0 %489 }
  0x8d   : > { %v524_v44 = vsel %vm505_vm0, %v12922_v11, %v490_v43  ;;  %v492_v45 = vpop.permute.xlu1 %491 }
  0x8e   : > { %750 = vmatmul.mubr.bf16.gmra.mrb[4].mxu0 %v512_v38  ;;  %v528_v46 = vsel %vm505_vm0, %v12930_v13, %v492_v45 }
  0x8f   : > { %11095 = vmatprep.mubr.msk.bf16.mxu0 %vm505_vm0, %v12922_v11 }
  0x90   : > { %v494_v47 = vpop.permute.xlu0 %493 }
  0x91   : > { %v532_v50 = vsel %vm505_vm0, %v12938_v15, %v494_v47  ;;  %v496_v52 = vpop.permute.xlu1 %495 }
  0x92   : > { %v536_v53 = vsel %vm505_vm0, %v12948_v19, %v496_v52 }
  0x96   : > { %760 = vmatmul.mubr.bf16.gmra.mrb[8].mxu0 %v516_v40 }
  0x97   : > { %11096 = vmatprep.mubr.msk.bf16.mxu0 %vm505_vm0, %v12930_v13 }
  0x9e   : > { %770 = vmatmul.mubr.bf16.gmra.mrb[12].mxu0 %v520_v42 }
  0x9f   : > { %11097 = vmatprep.mubr.msk.bf16.mxu0 %vm505_vm0, %v12938_v15 }
  0xa6   : > { %780 = vmatmul.mubr.bf16.gmra.mrb[16].mxu0 %v524_v44 }
  0xa7   : > { %11098 = vmatprep.mubr.msk.bf16.mxu0 %vm505_vm0, %v12948_v19 }
  0xae   : > { %790 = vmatmul.mubr.bf16.gmra.mrb[20].mxu0 %v528_v46 }
  0xaf   : > { %11099 = vmatprep.mubr.msk.bf16.mxu0 %vm505_vm0, %v11065_v20 }
  0xb6   : > { %800 = vmatmul.mubr.bf16.gmra.mrb[24].mxu0 %v532_v50 }
  0xb7   : > { %11100 = vmatprep.mubr.msk.bf16.mxu0 %vm505_vm0, %v11067_v51 }
  0xbe   : > { %810 = vmatmul.mubr.bf16.gmra.mrb[28].mxu0 %v536_v53 }
 0x159   : > { %v13051_v55 = vpop.f32.mrb[0].mxu0 }
 0x15a   : > { %v743_v56 = vpop.f32.mrb[1].mxu0  ;;  %v846_v58 = vrot.slane %v13051_v55, 1 }
 0x15b   : > { %v745_v57 = vpop.f32.mrb[2].mxu0  ;;  %v961_v61 = vrot.slane %v743_v56, 2 }
 0x15c   : > { %v847_v59 = vrot.slane %v745_v57, 1  ;;  %v747_v60 = vpop.f32.mrb[3].mxu0 }
 0x15d   : > { %v962_v62 = vrot.slane %v747_v60, 2 }
 0x15e   : > { %v848_v63 = vsel %vm845_vm2, %v846_v58, %v847_v59 }
 0x15f   : > { %879 = vrot.lane.b32.xlu0 %v848_v63, %s12844_s5  ;;  %v13057_v0 = vsel %vm960_vm3, %v961_v61, %v962_v62 }
 0x161   : > { %v13059_v1 = vpop.f32.mrb[4].mxu0 }
 0x162   : > { %v753_v2 = vpop.f32.mrb[5].mxu0  ;;  %v849_v4 = vrot.slane %v13059_v1, 1 }
 0x163   : > { %v755_v3 = vpop.f32.mrb[6].mxu0  ;;  %v964_v7 = vrot.slane %v753_v2, 2 }
 0x164   : > { %v851_v5 = vrot.slane %v755_v3, 1  ;;  %v757_v6 = vpop.f32.mrb[7].mxu0 }
 0x165   : > { %v966_v8 = vrot.slane %v757_v6, 2 }
 0x166   : > { %v852_v9 = vsel %vm845_vm2, %v849_v4, %v851_v5 }
 0x167   : > { %883 = vrot.lane.b32.xlu1 %v852_v9, %s12844_s5  ;;  %v13065_v10 = vsel %vm960_vm3, %v964_v7, %v966_v8 }
 0x169   : > { %v13067_v11 = vpop.f32.mrb[8].mxu0 }
 0x16a   : > { %v763_v12 = vpop.f32.mrb[9].mxu0  ;;  %v853_v14 = vrot.slane %v13067_v11, 1 }
 0x16b   : > { %v765_v13 = vpop.f32.mrb[10].mxu0  ;;  %v968_v17 = vrot.slane %v763_v12, 2 }
 0x16c   : > { %v855_v15 = vrot.slane %v765_v13, 1  ;;  %v767_v16 = vpop.f32.mrb[11].mxu0 }
 0x16d   : > { %v970_v18 = vrot.slane %v767_v16, 2  ;;  %v12292_v16 = vld [vmem:[%s16294_s1 + $0xd4] ss:$8 sps:$4 sm:$0xff]  }
 0x16e   : > { %v856_v19 = vsel %vm845_vm2, %v853_v14, %v855_v15  ;;  %v12289_v14 = vld [vmem:[%s16294_s1 + $0xc4] ss:$8 sps:$4 sm:$0xff]   ;;  %v12291_v15 = vld [vmem:[%s16294_s1 + $0xc0] ss:$8 sps:$4 sm:$0xff]  }
 0x16f   : > { %887 = vrot.lane.b32.xlu0 %v856_v19, %s12844_s5  ;;  %v13073_v20 = vsel %vm960_vm3, %v968_v17, %v970_v18  ;;  %1655 = vmatprep.subr.bf16.mxu1 %v12289_v14  ;;  %v12294_v17 = vld [vmem:[%s16294_s1 + $0xd0] ss:$8 sps:$4 sm:$0xff]   ;;  %v12295_v18 = vld [vmem:[%s16294_s1 + $0xe4] ss:$8 sps:$4 sm:$0xff]   ;;  %v12297_v19 = vld [vmem:[%s16294_s1 + $0xe0] ss:$8 sps:$4 sm:$0xff]  }
 0x170   : > { %1656 = vmatpush1.bf16.msra.mxu1 %v12291_v15 }
 0x171   : > { %v13075_v21 = vpop.f32.mrb[12].mxu0  ;;  %1657 = vmatprep.subr.bf16.mxu1 %v12292_v16 }
 0x172   : > { %v773_v22 = vpop.f32.mrb[13].mxu0  ;;  %v857_v24 = vrot.slane %v13075_v21, 1 }
 0x173   : > { %v775_v23 = vpop.f32.mrb[14].mxu0  ;;  %v972_v27 = vrot.slane %v773_v22, 2  ;;  %v12298_v22 = vld [vmem:[%s16294_s1 + $0xf4] ss:$8 sps:$4 sm:$0xff]  }
 0x174   : > { %v859_v25 = vrot.slane %v775_v23, 1  ;;  %v777_v26 = vpop.f32.mrb[15].mxu0  ;;  %1658 = vmatpush1.bf16.msra.mxu1 %v12294_v17  ;;  %v12300_v23 = vld [vmem:[%s16294_s1 + $0xf0] ss:$8 sps:$4 sm:$0xff]  }
 0x175   : > { %v974_v28 = vrot.slane %v777_v26, 2  ;;  %1659 = vmatprep.subr.bf16.mxu1 %v12295_v18  ;;  %v12304_v26 = vld [vmem:[%s16294_s1 + $0x114] ss:$8 sps:$4 sm:$0xff]  }
 0x176   : > { %v860_v29 = vsel %vm845_vm2, %v857_v24, %v859_v25  ;;  %v12301_v24 = vld [vmem:[%s16294_s1 + $0x104] ss:$8 sps:$4 sm:$0xff]   ;;  %v12303_v25 = vld [vmem:[%s16294_s1 + $0x100] ss:$8 sps:$4 sm:$0xff]  }
 0x177   : > { %891 = vrot.lane.b32.xlu1 %v860_v29, %s12844_s5  ;;  %v13081_v30 = vsel %vm960_vm3, %v972_v27, %v974_v28  ;;  %v12306_v27 = vld [vmem:[%s16294_s1 + $0x110] ss:$8 sps:$4 sm:$0xff]   ;;  %v12307_v28 = vld [vmem:[%s16294_s1 + $0x124] ss:$8 sps:$4 sm:$0xff]   ;;  %v12309_v29 = vld [vmem:[%s16294_s1 + $0x120] ss:$8 sps:$4 sm:$0xff]  }
 0x178   : > { %1660 = vmatpush1.bf16.msra.mxu1 %v12297_v19 }
 0x179   : > { %v13083_v31 = vpop.f32.mrb[16].mxu0  ;;  %1661 = vmatprep.subr.bf16.mxu1 %v12298_v22 }
 0x17a   : > { %v783_v32 = vpop.f32.mrb[17].mxu0  ;;  %v861_v34 = vrot.slane %v13083_v31, 1 }
 0x17b   : > { %v785_v33 = vpop.f32.mrb[18].mxu0  ;;  %v976_v37 = vrot.slane %v783_v32, 2  ;;  %v12310_v32 = vld [vmem:[%s16294_s1 + $0x134] ss:$8 sps:$4 sm:$0xff]  }
 0x17c   : > { %v863_v35 = vrot.slane %v785_v33, 1  ;;  %v787_v36 = vpop.f32.mrb[19].mxu0  ;;  %1662 = vmatpush1.bf16.msra.mxu1 %v12300_v23  ;;  %v12312_v33 = vld [vmem:[%s16294_s1 + $0x130] ss:$8 sps:$4 sm:$0xff]  }
 0x17d   : > { %v978_v38 = vrot.slane %v787_v36, 2  ;;  %1663 = vmatprep.subr.bf16.mxu1 %v12301_v24  ;;  %v12316_v36 = vld [vmem:[%s16294_s1 + $0x154] ss:$8 sps:$4 sm:$0xff]  }
 0x17e   : > { %v864_v39 = vsel %vm845_vm2, %v861_v34, %v863_v35  ;;  %v12313_v34 = vld [vmem:[%s16294_s1 + $0x144] ss:$8 sps:$4 sm:$0xff]   ;;  %v12315_v35 = vld [vmem:[%s16294_s1 + $0x140] ss:$8 sps:$4 sm:$0xff]  }
 0x17f   : > { %895 = vrot.lane.b32.xlu0 %v864_v39, %s12844_s5  ;;  %v13089_v40 = vsel %vm960_vm3, %v976_v37, %v978_v38  ;;  %v12318_v37 = vld [vmem:[%s16294_s1 + $0x150] ss:$8 sps:$4 sm:$0xff]   ;;  %v12319_v38 = vld [vmem:[%s16294_s1 + $0x164] ss:$8 sps:$4 sm:$0xff]   ;;  %v12321_v39 = vld [vmem:[%s16294_s1 + $0x160] ss:$8 sps:$4 sm:$0xff]  }
 0x180   : > { %1664 = vmatpush1.bf16.msra.mxu1 %v12303_v25 }
 0x181   : > { %v13091_v41 = vpop.f32.mrb[20].mxu0  ;;  %1665 = vmatprep.subr.bf16.mxu1 %v12304_v26 }
 0x182   : > { %v793_v42 = vpop.f32.mrb[21].mxu0  ;;  %v865_v44 = vrot.slane %v13091_v41, 1 }
 0x183   : > { %v795_v43 = vpop.f32.mrb[22].mxu0  ;;  %v980_v47 = vrot.slane %v793_v42, 2  ;;  %v12322_v42 = vld [vmem:[%s16294_s1 + $0x174] ss:$8 sps:$4 sm:$0xff]  }
 0x184   : > { %v867_v45 = vrot.slane %v795_v43, 1  ;;  %v797_v46 = vpop.f32.mrb[23].mxu0  ;;  %1666 = vmatpush1.bf16.msra.mxu1 %v12306_v27  ;;  %v12324_v43 = vld [vmem:[%s16294_s1 + $0x170] ss:$8 sps:$4 sm:$0xff]  }
 0x185   : > { %v982_v49 = vrot.slane %v797_v46, 2  ;;  %1667 = vmatprep.subr.bf16.mxu1 %v12307_v28 }
 0x186   : > { %v868_v50 = vsel %vm845_vm2, %v865_v44, %v867_v45 }
 0x187   : > { %899 = vrot.lane.b32.xlu1 %v868_v50, %s12844_s5  ;;  %v13097_v51 = vsel %vm960_vm3, %v980_v47, %v982_v49 }
 0x188   : > { %1668 = vmatpush1.bf16.msra.mxu1 %v12309_v29 }
 0x189   : > { %v13099_v52 = vpop.f32.mrb[24].mxu0  ;;  %1669 = vmatprep.subr.bf16.mxu1 %v12310_v32 }
 0x18a   : > { %v803_v53 = vpop.f32.mrb[25].mxu0  ;;  %v869_v57 = vrot.slane %v13099_v52, 1 }
 0x18b   : > { %v805_v56 = vpop.f32.mrb[26].mxu0  ;;  %v984_v60 = vrot.slane %v803_v53, 2 }
 0x18c   : > { %v871_v58 = vrot.slane %v805_v56, 1  ;;  %v807_v59 = vpop.f32.mrb[27].mxu0  ;;  %1670 = vmatpush1.bf16.msra.mxu1 %v12312_v33 }
 0x18d   : > { %v986_v61 = vrot.slane %v807_v59, 2  ;;  %1671 = vmatprep.subr.bf16.mxu1 %v12313_v34  ;;  %v12788_v59 = vld [vmem:[%s16295_s2 + $0x10] ss:$24 sps:$4 sm:$0xff]  }
 0x18e   : > { %v872_v62 = vsel %vm845_vm2, %v869_v57, %v871_v58 }
 0x18f   : > { %903 = vrot.lane.b32.xlu0 %v872_v62, %s12844_s5  ;;  %v13105_v63 = vsel %vm960_vm3, %v984_v60, %v986_v61 }
 0x190   : > { %1672 = vmatpush1.bf16.msra.mxu1 %v12315_v35 }
 0x191   : > { %v13107_v2 = vpop.f32.mrb[28].mxu0  ;;  %1673 = vmatprep.subr.bf16.mxu1 %v12316_v36 }
 0x192   : > { %v813_v3 = vpop.f32.mrb[29].mxu0  ;;  %v873_v5 = vrot.slane %v13107_v2, 1 }
 0x193   : > { %v815_v4 = vpop.f32.mrb[30].mxu0  ;;  %v988_v8 = vrot.slane %v813_v3, 2 }
 0x194   : > { %v875_v6 = vrot.slane %v815_v4, 1  ;;  %v817_v7 = vpop.f32.mrb[31].mxu0  ;;  %1674 = vmatpush1.bf16.msra.mxu1 %v12318_v37 }
 0x195   : > { %v990_v9 = vrot.slane %v817_v7, 2  ;;  %1675 = vmatprep.subr.bf16.mxu1 %v12319_v38 }
 0x196   : > { %v876_v12 = vsel %vm845_vm2, %v873_v5, %v875_v6 }
 0x197   : > { %907 = vrot.lane.b32.xlu1 %v876_v12, %s12844_s5  ;;  %v13113_v13 = vsel %vm960_vm3, %v988_v8, %v990_v9 }
 0x198   : > { %1676 = vmatpush1.bf16.msra.mxu1 %v12321_v39 }
 0x199   : > { %1677 = vmatprep.subr.bf16.mxu1 %v12322_v42 }
 0x19c   : > { %1678 = vmatpush1.bf16.msra.mxu1 %v12324_v43 }
 0x1d1   : > { %v880_v44 = vpop.permute.xlu0 %879 }
 0x1d2   : > { %v927_v45 = vadd.f32 %v880_v44, %v13051_v55  ;;  %v13197_v55 = vrot.slane %v12845_v54, 7 }
 0x1d4   : > { %v1010_v46 = vadd.f32 %v13057_v0, %v927_v45  ;;  %v13213_v14 = vrot.slane %v13197_v55, 4 }
 0x1d6   : > { %vm1026_vm4 = vcmp.ge.f32.partialorder %v1010_v46, 0.0  ;;  %v1042_v47 = vmul.f32 0.2, %v1010_v46 }
 0x1d8   : > { %v1058_v49 = vsel %vm1026_vm4, %v1010_v46, %v1042_v47  ;;  %vm1354_vm4 = vcmask 516096  }
 0x1d9   : > { %v12023_v50 = vpack.c.bf16 %v1058_v49, %v1058_v49  ;;  %v884_v53 = vpop.permute.xlu1 %883  ;;  %vm13287_vm6 = vmand %vm1354_vm4, %vm1170_vm5 }
 0x1da   : > { %v929_v56 = vadd.f32 %v884_v53, %v13059_v1  ;;  %v1336_v1 = vld [vmem:[#allocation2 + $0x8] sm:$0xf] }
 0x1db   : > { %v1174_v57 = vshrl.u32 %v12023_v50, 16  ;;  %v1177_v60 = vshll.u32 %v12023_v50, 16 }
 0x1dc   : > { %v1012_v58 = vadd.f32 %v13065_v10, %v929_v56 }
 0x1dd   : > { %v1176_v0 = vrot.slane %v1174_v57, 7 }
 0x1de   : > { %vm1028_vm10 = vcmp.ge.f32.partialorder %v1012_v58, 0.0  ;;  %v1044_v62 = vmul.f32 0.2, %v1012_v58 }
 0x1df   : > { %v1179_v3 = vor.u32 %v1177_v60, %v1176_v0  ;;  %v1180_v10 = vrot.slane %v1176_v0, 4 }
 0x1e0   : > { %v1060_v4 = vsel %vm1028_vm10, %v1012_v58, %v1044_v62 }
 0x1e1   : > { %v1188_v5 = vsel %vm13192_vm8, %v1180_v10, %v13197_v55  ;;  %v1337_v54 = vsel %vm13200_vm9, %v1179_v3, %v1336_v1  ;;  %v12025_v6 = vpack.c.bf16 %v1060_v4, %v1060_v4  ;;  %v888_v7 = vpop.permute.xlu0 %887 }
 0x1e2   : > { %1338 = vst [vmem:[#allocation2 + $0x8] sm:$0xf] %v1337_v54  ;;  %1339 = vst.msk [vmem:[#allocation2 + $0xc] sm:$0xf] %vm172_vm1, %v1188_v5  ;;  %v931_v8 = vadd.f32 %v888_v7, %v13067_v11 }
 0x1e3   : > { %v1191_v9 = vshrl.u32 %v12025_v6, 16  ;;  %v1194_v16 = vshll.u32 %v12025_v6, 16 }
 0x1e4   : > { %v1014_v12 = vadd.f32 %v13073_v20, %v931_v8 }
 0x1e5   : > { %v1193_v15 = vrot.slane %v1191_v9, 7 }
 0x1e6   : > { %vm1030_vm11 = vcmp.ge.f32.partialorder %v1014_v12, 0.0  ;;  %v1046_v17 = vmul.f32 0.2, %v1014_v12 }
 0x1e7   : > { %v1196_v18 = vor.u32 %v1194_v16, %v1193_v15  ;;  %v1198_v19 = vrot.slane %v1193_v15, 4 }
 0x1e8   : > { %v1062_v22 = vsel %vm1030_vm11, %v1014_v12, %v1046_v17 }
 0x1e9   : > { %v1197_v23 = vsel %vm13192_vm8, %v13213_v14, %v1196_v18  ;;  %v1206_v11 = vsel %vm13192_vm8, %v1198_v19, %v13197_v55  ;;  %v12027_v24 = vpack.c.bf16 %v1062_v22, %v1062_v22  ;;  %v892_v20 = vpop.permute.xlu1 %891  ;;  %v13221_v25 = vld [vmem:[#allocation2 + $0x8] sm:$0xff]  }
 0x1ea   : > { %1340 = vst.msk [vmem:[#allocation2 + $0x10] sm:$0xf] %vm172_vm1, %v1197_v23  ;;  %1341 = vst.msk [vmem:[#allocation2 + $0x14] sm:$0xf] %vm172_vm1, %v1206_v11  ;;  %v933_v26 = vadd.f32 %v892_v20, %v13075_v21  ;;  %1429 = vrot.lane.b32.xlu0 %v13221_v25, %s12844_s5 }
 0x1eb   : > { %v1209_v27 = vshrl.u32 %v12027_v24, 16  ;;  %v1212_v32 = vshll.u32 %v12027_v24, 16 }
 0x1ec   : > { %v1016_v28 = vadd.f32 %v13081_v30, %v933_v26 }
 0x1ed   : > { %v1211_v29 = vrot.slane %v1209_v27, 7 }
 0x1ee   : > { %vm1032_vm12 = vcmp.ge.f32.partialorder %v1016_v28, 0.0  ;;  %v1048_v33 = vmul.f32 0.2, %v1016_v28 }
 0x1ef   : > { %v1214_v34 = vor.u32 %v1212_v32, %v1211_v29  ;;  %v1216_v35 = vrot.slane %v1211_v29, 4  ;;  %v1356_v29 = vld [vmem:[#allocation2 + $0x48] sm:$0x1] }
 0x1f0   : > { %v1064_v36 = vsel %vm1032_vm12, %v1016_v28, %v1048_v33  ;;  %v1357_v33 = vsel %vm13287_vm6, %v13213_v14, %v1356_v29 }
 0x1f1   : > { %v1215_v37 = vsel %vm13192_vm8, %v13213_v14, %v1214_v34  ;;  %v1224_v21 = vsel %vm13192_vm8, %v1216_v35, %v13197_v55  ;;  %v12029_v38 = vpack.c.bf16 %v1064_v36, %v1064_v36  ;;  %v896_v39 = vpop.permute.xlu0 %895  ;;  %v13235_v42 = vld [vmem:[#allocation2 + $0x10] sm:$0xff]   ;;  %1358 = vst [vmem:[#allocation2 + $0x48] sm:$0x1] %v1357_v33 }
 0x1f2   : > { %1342 = vst.msk [vmem:[#allocation2 + $0x18] sm:$0xf] %vm172_vm1, %v1215_v37  ;;  %1343 = vst.msk [vmem:[#allocation2 + $0x1c] sm:$0xf] %vm172_vm1, %v1224_v21  ;;  %v935_v30 = vadd.f32 %v896_v39, %v13083_v31  ;;  %11179 = vmatprep.mubr.msk.bf16.mxu1 %vm505_vm0, %v13235_v42  ;;  %1431 = vrot.lane.b32.xlu1 %v13235_v42, %s12844_s5 }
 0x1f3   : > { %v1227_v43 = vshrl.u32 %v12029_v38, 16  ;;  %v1230_v46 = vshll.u32 %v12029_v38, 16 }
 0x1f4   : > { %v1018_v44 = vadd.f32 %v13089_v40, %v935_v30 }
 0x1f5   : > { %v1229_v45 = vrot.slane %v1227_v43, 7 }
 0x1f6   : > { %vm1034_vm13 = vcmp.ge.f32.partialorder %v1018_v44, 0.0  ;;  %v1050_v47 = vmul.f32 0.2, %v1018_v44 }
 0x1f7   : > { %v1232_v49 = vor.u32 %v1230_v46, %v1229_v45  ;;  %v1234_v50 = vrot.slane %v1229_v45, 4 }
 0x1f8   : > { %v1066_v53 = vsel %vm1034_vm13, %v1018_v44, %v1050_v47  ;;  %v3168_v46 = vld [vmem:[#allocation2 + $0x48] sm:$0x1] }
 0x1f9   : > { %v1233_v31 = vsel %vm13192_vm8, %v13213_v14, %v1232_v49  ;;  %v1242_v56 = vsel %vm13192_vm8, %v1234_v50, %v13197_v55  ;;  %v12031_v57 = vpack.c.bf16 %v1066_v53, %v1066_v53  ;;  %v900_v58 = vpop.permute.xlu1 %899  ;;  %v13251_v0 = vld [vmem:[#allocation2 + $0x18] sm:$0xff]   ;;  %v13304_v50 = vld [vmem:[#allocation2 + $0x48] sm:$0xf]  ;;  %v3169_v53 = vsel %vm13287_vm6, %v13213_v14, %v3168_v46 }
 0x1fa   : > { %1344 = vst.msk [vmem:[#allocation2 + $0x20] sm:$0xf] %vm172_vm1, %v1233_v31  ;;  %1345 = vst.msk [vmem:[#allocation2 + $0x24] sm:$0xf] %vm172_vm1, %v1242_v56  ;;  %v937_v40 = vadd.f32 %v900_v58, %v13091_v41  ;;  %1433 = vrot.lane.b32.xlu0 %v13251_v0, %s12844_s5 }
 0x1fb   : > { %v1245_v60 = vshrl.u32 %v12031_v57, 16  ;;  %v1248_v3 = vshll.u32 %v12031_v57, 16  ;;  %3170 = vst [vmem:[#allocation2 + $0x48] sm:$0x1] %v3169_v53 }
 0x1fc   : > { %v1020_v1 = vadd.f32 %v13097_v51, %v937_v40 }
 0x1fd   : > { %v1247_v62 = vrot.slane %v1245_v60, 7 }
 0x1fe   : > { %vm1036_vm14 = vcmp.ge.f32.partialorder %v1020_v1, 0.0  ;;  %v1052_v10 = vmul.f32 0.2, %v1020_v1 }
 0x1ff   : > { %v1250_v4 = vor.u32 %v1248_v3, %v1247_v62  ;;  %v1252_v5 = vrot.slane %v1247_v62, 4 }
 0x200   : > { %v1068_v54 = vsel %vm1036_vm14, %v1020_v1, %v1052_v10  ;;  %v12325_v1 = vld [vmem:[#allocation2] sm:$0xff]  }
 0x201   : > { %v1251_v6 = vsel %vm13192_vm8, %v13213_v14, %v1250_v4  ;;  %v1260_v41 = vsel %vm13192_vm8, %v1252_v5, %v13197_v55  ;;  %v12033_v7 = vpack.c.bf16 %v1068_v54, %v1068_v54  ;;  %v904_v8 = vpop.permute.xlu0 %903  ;;  %v13265_v9 = vld [vmem:[#allocation2 + $0x20] sm:$0xff]  }
 0x202   : > { %1346 = vst.msk [vmem:[#allocation2 + $0x28] sm:$0xf] %vm172_vm1, %v1251_v6  ;;  %1347 = vst.msk [vmem:[#allocation2 + $0x2c] sm:$0xf] %vm172_vm1, %v1260_v41  ;;  %v939_v51 = vadd.f32 %v904_v8, %v13099_v52  ;;  %1435 = vrot.lane.b32.xlu1 %v13265_v9, %s12844_s5 }
 0x203   : > { %v1263_v12 = vshrl.u32 %v12033_v7, 16  ;;  %v1266_v17 = vshll.u32 %v12033_v7, 16 }
 0x204   : > { %v1022_v15 = vadd.f32 %v13105_v63, %v939_v51  ;;  %v1378_v51 = vld [vmem:[#allocation2 + $0x4c] sm:$0xf] }
 0x205   : > { %v1265_v16 = vrot.slane %v1263_v12, 7 }
 0x206   : > { %vm1038_vm15 = vcmp.ge.f32.partialorder %v1022_v15, 0.0  ;;  %v1054_v18 = vmul.f32 0.2, %v1022_v15 }
 0x207   : > { %v1268_v19 = vor.u32 %v1266_v17, %v1265_v16  ;;  %v1270_v22 = vrot.slane %v1265_v16, 4 }
 0x208   : > { %v1070_v23 = vsel %vm1038_vm15, %v1022_v15, %v1054_v18 }
 0x209   : > { %v1269_v11 = vsel %vm13192_vm8, %v13213_v14, %v1268_v19  ;;  %v1278_v52 = vsel %vm13192_vm8, %v1270_v22, %v13197_v55  ;;  %v12035_v24 = vpack.c.bf16 %v1070_v23, %v1070_v23  ;;  %v908_v20 = vpop.permute.xlu1 %907  ;;  %v13279_v26 = vld [vmem:[#allocation2 + $0x28] sm:$0xff]  }
 0x20a   : > { %1348 = vst.msk [vmem:[#allocation2 + $0x30] sm:$0xf] %vm172_vm1, %v1269_v11  ;;  %1349 = vst.msk [vmem:[#allocation2 + $0x34] sm:$0xf] %vm172_vm1, %v1278_v52  ;;  %v941_v63 = vadd.f32 %v908_v20, %v13107_v2  ;;  %1437 = vrot.lane.b32.xlu0 %v13279_v26, %s12844_s5 }
 0x20b   : > { %v1281_v27 = vshrl.u32 %v12035_v24, 16  ;;  %v1284_v35 = vshll.u32 %v12035_v24, 16 }
 0x20c   : > { %v1024_v32 = vadd.f32 %v13113_v13, %v941_v63 }
 0x20d   : > { %v1283_v34 = vrot.slane %v1281_v27, 7 }
 0x20e   : > { %vm1040_vm7 = vcmp.ge.f32.partialorder %v1024_v32, 0.0  ;;  %v1056_v2 = vmul.f32 0.2, %v1024_v32 }
 0x20f   : > { %v1286_v36 = vor.u32 %v1284_v35, %v1283_v34  ;;  %v1288_v37 = vrot.slane %v1283_v34, 4 }
 0x210   : > { %v1072_v21 = vsel %vm1040_vm7, %v1024_v32, %v1056_v2 }
 0x211   : > { %v1287_v38 = vsel %vm13192_vm8, %v13213_v14, %v1286_v36  ;;  %v1296_v13 = vsel %vm13192_vm8, %v1288_v37, %v13197_v55  ;;  %v12037_v39 = vpack.c.bf16 %v1072_v21, %v1072_v21  ;;  %v12286_v30 = vld [vmem:[#allocation2 + $0x30] sm:$0xff]  }
 0x212   : > { %1350 = vst.msk [vmem:[#allocation2 + $0x38] sm:$0xf] %vm172_vm1, %v1287_v38  ;;  %1351 = vst.msk [vmem:[#allocation2 + $0x3c] sm:$0xf] %vm172_vm1, %v1296_v13  ;;  %1439 = vrot.lane.b32.xlu1 %v12286_v30, %s12844_s5 }
 0x213   : > { %v1299_v43 = vshrl.u32 %v12037_v39, 16  ;;  %v1302_v45 = vshll.u32 %v12037_v39, 16 }
 0x215   : > { %v1301_v44 = vrot.slane %v1299_v43, 7 }
 0x217   : > { %v1304_v47 = vor.u32 %v1302_v45, %v1301_v44  ;;  %v1306_v49 = vrot.slane %v1301_v44, 4 }
 0x219   : > { %v1305_v31 = vsel %vm13192_vm8, %v13213_v14, %v1304_v47  ;;  %v1314_v56 = vsel %vm13192_vm8, %v1306_v49, %v13197_v55  ;;  %v12287_v57 = vld [vmem:[#allocation2 + $0x38] sm:$0xff]  }
 0x21a   : > { %1352 = vst.msk [vmem:[#allocation2 + $0x40] sm:$0xf] %vm172_vm1, %v1305_v31  ;;  %1353 = vst.msk [vmem:[#allocation2 + $0x44] sm:$0xf] %vm172_vm1, %v1314_v56  ;;  %1441 = vrot.lane.b32.xlu0 %v12287_v57, %s12844_s5 }
 0x221   : > { %v1375_v58 = vld [vmem:[#allocation2 + $0x40] sm:$0xf]  ;;  %v1376_v40 = vld [vmem:[#allocation2 + $0x44] sm:$0xf] }
 0x222   : > { %v11127_v60 = vcombine.low %v1375_v58, %v1376_v40 }
 0x224   : > { %1443 = vrot.lane.b32.xlu1 %v11127_v60, %s12844_s5 }
 0x25c   : > { %v1430_v62 = vpop.permute.xlu0 %1429 }
 0x25d   : > { %v1455_v3 = vsel %vm505_vm0, %v12325_v1, %v1430_v62 }
 0x25e   : > { %1688 = vmatmul.mubr.bf16.vlgmr.msra.gmra.mrb[0].mxu1 %v1455_v3 }
 0x25f   : > { %11180 = vmatprep.mubr.msk.bf16.mxu1 %vm505_vm0, %v13251_v0 }
 0x264   : > { %v1432_v10 = vpop.permute.xlu1 %1431 }
 0x265   : > { %v1459_v4 = vsel %vm505_vm0, %v13221_v25, %v1432_v10 }
 0x266   : > { %1698 = vmatmul.mubr.bf16.gmra.mrb[4].mxu1 %v1459_v4 }
 0x267   : > { %11181 = vmatprep.mubr.msk.bf16.mxu1 %vm505_vm0, %v13265_v9 }
 0x26c   : > { %v1434_v5 = vpop.permute.xlu0 %1433 }
 0x26d   : > { %v1463_v54 = vsel %vm505_vm0, %v13235_v42, %v1434_v5 }
 0x26e   : > { %1708 = vmatmul.mubr.bf16.gmra.mrb[8].mxu1 %v1463_v54 }
 0x26f   : > { %11182 = vmatprep.mubr.msk.bf16.mxu1 %vm505_vm0, %v13279_v26 }
 0x274   : > { %v1436_v6 = vpop.permute.xlu1 %1435 }
 0x275   : > { %v1467_v41 = vsel %vm505_vm0, %v13251_v0, %v1436_v6  ;;  %v11129_v0 = vcombine.low %v13304_v50, %v1378_v51 }
 0x276   : > { %1718 = vmatmul.mubr.bf16.gmra.mrb[12].mxu1 %v1467_v41 }
 0x277   : > { %11183 = vmatprep.mubr.msk.bf16.mxu1 %vm505_vm0, %v12286_v30 }
 0x27c   : > { %v1438_v25 = vpop.permute.xlu0 %1437 }
 0x27d   : > { %v1471_v7 = vsel %vm505_vm0, %v13265_v9, %v1438_v25 }
 0x27e   : > { %1728 = vmatmul.mubr.bf16.gmra.mrb[16].mxu1 %v1471_v7 }
 0x27f   : > { %11184 = vmatprep.mubr.msk.bf16.mxu1 %vm505_vm0, %v12287_v57 }
 0x284   : > { %v1440_v8 = vpop.permute.xlu1 %1439 }
 0x285   : > { %v1475_v42 = vsel %vm505_vm0, %v13279_v26, %v1440_v8 }
 0x286   : > { %1738 = vmatmul.mubr.bf16.gmra.mrb[20].mxu1 %v1475_v42 }
 0x287   : > { %11185 = vmatprep.mubr.msk.bf16.mxu1 %vm505_vm0, %v11127_v60 }
 0x28c   : > { %v1442_v12 = vpop.permute.xlu0 %1441 }
 0x28d   : > { %v1479_v15 = vsel %vm505_vm0, %v12286_v30, %v1442_v12 }
 0x28e   : > { %1748 = vmatmul.mubr.bf16.gmra.mrb[24].mxu1 %v1479_v15 }
 0x28f   : > { %11186 = vmatprep.mubr.msk.bf16.mxu1 %vm505_vm0, %v11129_v0 }
 0x296   : > { %v1444_v9 = vpop.permute.xlu1 %1443 }
 0x297   : > { %v1483_v16 = vsel %vm505_vm0, %v12287_v57, %v1444_v9 }
 0x298   : > { %1758 = vmatmul.mubr.bf16.gmra.mrb[28].mxu1 %v1483_v16  ;;  %v12331_v16 = vld [vmem:[%s12895_s27 + $0x50] ss:$0 sps:$4 sm:$0xff]  }
 0x299   : > { %11101 = vmatprep.mubr.msk.bf16.mxu0 %vm505_vm0, %v12331_v16  ;;  %v12366_v16 = vld [vmem:[%s16294_s1 + $0x220] ss:$8 sps:$4 sm:$0xff]  }
 0x331   : > { %v13343_v17 = vpop.f32.mrb[0].mxu1 }
 0x332   : > { %v1691_v18 = vpop.f32.mrb[1].mxu1  ;;  %v1793_v22 = vrot.slane %v13343_v17, 1 }
 0x333   : > { %v1693_v19 = vpop.f32.mrb[2].mxu1  ;;  %v1907_v52 = vrot.slane %v1691_v18, 2 }
 0x334   : > { %v1794_v23 = vrot.slane %v1693_v19, 1  ;;  %v1695_v11 = vpop.f32.mrb[3].mxu1 }
 0x335   : > { %v1908_v24 = vrot.slane %v1695_v11, 2 }
 0x336   : > { %v1795_v20 = vsel %vm845_vm2, %v1793_v22, %v1794_v23 }
 0x337   : > { %1826 = vrot.lane.b32.xlu0 %v1795_v20, %s12844_s5  ;;  %v13349_v26 = vsel %vm960_vm3, %v1907_v52, %v1908_v24 }
 0x339   : > { %v13351_v63 = vpop.f32.mrb[4].mxu1 }
 0x33a   : > { %v1701_v27 = vpop.f32.mrb[5].mxu1  ;;  %v1796_v32 = vrot.slane %v13351_v63, 1 }
 0x33b   : > { %v1703_v29 = vpop.f32.mrb[6].mxu1  ;;  %v1910_v35 = vrot.slane %v1701_v27, 2 }
 0x33c   : > { %v1798_v33 = vrot.slane %v1703_v29, 1  ;;  %v1705_v34 = vpop.f32.mrb[7].mxu1 }
 0x33d   : > { %v1912_v2 = vrot.slane %v1705_v34, 2 }
 0x33e   : > { %v1799_v36 = vsel %vm845_vm2, %v1796_v32, %v1798_v33 }
 0x33f   : > { %1830 = vrot.lane.b32.xlu1 %v1799_v36, %s12844_s5  ;;  %v13357_v37 = vsel %vm960_vm3, %v1910_v35, %v1912_v2  ;;  %v11066_v35 = vcombine.low %v13018_v48, %v13018_v48 }
 0x341   : > { %v13359_v21 = vpop.f32.mrb[8].mxu1 }
 0x342   : > { %v1711_v38 = vpop.f32.mrb[9].mxu1  ;;  %v1800_v39 = vrot.slane %v13359_v21, 1 }
 0x343   : > { %v1713_v13 = vpop.f32.mrb[10].mxu1  ;;  %v1914_v44 = vrot.slane %v1711_v38, 2 }
 0x344   : > { %v1802_v30 = vrot.slane %v1713_v13, 1  ;;  %v1715_v43 = vpop.f32.mrb[11].mxu1 }
 0x345   : > { %v1916_v45 = vrot.slane %v1715_v43, 2 }
 0x346   : > { %v1803_v46 = vsel %vm845_vm2, %v1800_v39, %v1802_v30 }
 0x347   : > { %1834 = vrot.lane.b32.xlu0 %v1803_v46, %s12844_s5  ;;  %v13365_v47 = vsel %vm960_vm3, %v1914_v44, %v1916_v45 }
 0x349   : > { %v13367_v49 = vpop.f32.mrb[12].mxu1 }
 0x34a   : > { %v1721_v53 = vpop.f32.mrb[13].mxu1  ;;  %v1804_v56 = vrot.slane %v13367_v49, 1 }
 0x34b   : > { %v1723_v31 = vpop.f32.mrb[14].mxu1  ;;  %v1918_v40 = vrot.slane %v1721_v53, 2  ;;  %v12334_v53 = vld [vmem:[%s16294_s1 + $0x180] ss:$8 sps:$4 sm:$0xff]  }
 0x34c   : > { %v1806_v57 = vrot.slane %v1723_v31, 1  ;;  %v1725_v58 = vpop.f32.mrb[15].mxu1  ;;  %v12336_v31 = vld [vmem:[%s16294_s1 + $0x184] ss:$8 sps:$4 sm:$0xff]  }
 0x34d   : > { %v1920_v60 = vrot.slane %v1725_v58, 2  ;;  %2561 = vmatprep.subr.bf16.mxu0 %v12336_v31  ;;  %v12343_v58 = vld [vmem:[%s16294_s1 + $0x1a4] ss:$8 sps:$4 sm:$0xff]  }
 0x34e   : > { %v1807_v1 = vsel %vm845_vm2, %v1804_v56, %v1806_v57  ;;  %v12340_v56 = vld [vmem:[%s16294_s1 + $0x194] ss:$8 sps:$4 sm:$0xff]   ;;  %2562 = vmatpush1.bf16.msra.mxu0 %v12334_v53  ;;  %v12338_v57 = vld [vmem:[%s16294_s1 + $0x190] ss:$8 sps:$4 sm:$0xff]  }
 0x34f   : > { %1838 = vrot.lane.b32.xlu1 %v1807_v1, %s12844_s5  ;;  %v13373_v62 = vsel %vm960_vm3, %v1918_v40, %v1920_v60  ;;  %2563 = vmatprep.subr.bf16.mxu0 %v12340_v56  ;;  %v12341_v40 = vld [vmem:[%s16294_s1 + $0x1a0] ss:$8 sps:$4 sm:$0xff]   ;;  %v12347_v60 = vld [vmem:[%s16294_s1 + $0x1b4] ss:$8 sps:$4 sm:$0xff]   ;;  %v12345_v1 = vld [vmem:[%s16294_s1 + $0x1b0] ss:$8 sps:$4 sm:$0xff]  }
 0x351   : > { %v13375_v3 = vpop.f32.mrb[16].mxu1 }
 0x352   : > { %v1731_v10 = vpop.f32.mrb[17].mxu1  ;;  %v1808_v5 = vrot.slane %v13375_v3, 1  ;;  %2564 = vmatpush1.bf16.msra.mxu0 %v12338_v57 }
 0x353   : > { %v1733_v4 = vpop.f32.mrb[18].mxu1  ;;  %v1922_v41 = vrot.slane %v1731_v10, 2  ;;  %2565 = vmatprep.subr.bf16.mxu0 %v12343_v58  ;;  %v12350_v10 = vld [vmem:[%s16294_s1 + $0x1c4] ss:$8 sps:$4 sm:$0xff]  }
 0x354   : > { %v1810_v54 = vrot.slane %v1733_v4, 1  ;;  %v1735_v6 = vpop.f32.mrb[19].mxu1  ;;  %v12348_v4 = vld [vmem:[%s16294_s1 + $0x1c0] ss:$8 sps:$4 sm:$0xff]  }
 0x355   : > { %v1924_v25 = vrot.slane %v1735_v6, 2  ;;  %v12356_v6 = vld [vmem:[%s16294_s1 + $0x1e4] ss:$8 sps:$4 sm:$0xff]  }
 0x356   : > { %v1811_v7 = vsel %vm845_vm2, %v1808_v5, %v1810_v54  ;;  %2566 = vmatpush1.bf16.msra.mxu0 %v12341_v40  ;;  %v12353_v5 = vld [vmem:[%s16294_s1 + $0x1d4] ss:$8 sps:$4 sm:$0xff]   ;;  %v12351_v54 = vld [vmem:[%s16294_s1 + $0x1d0] ss:$8 sps:$4 sm:$0xff]  }
 0x357   : > { %1842 = vrot.lane.b32.xlu0 %v1811_v7, %s12844_s5  ;;  %v13381_v8 = vsel %vm960_vm3, %v1922_v41, %v1924_v25  ;;  %2567 = vmatprep.subr.bf16.mxu0 %v12347_v60  ;;  %v12354_v41 = vld [vmem:[%s16294_s1 + $0x1e0] ss:$8 sps:$4 sm:$0xff]   ;;  %v12359_v25 = vld [vmem:[%s16294_s1 + $0x1f4] ss:$8 sps:$4 sm:$0xff]   ;;  %v12357_v7 = vld [vmem:[%s16294_s1 + $0x1f0] ss:$8 sps:$4 sm:$0xff]  }
 0x359   : > { %v13383_v42 = vpop.f32.mrb[20].mxu1 }
 0x35a   : > { %v1741_v51 = vpop.f32.mrb[21].mxu1  ;;  %v1812_v12 = vrot.slane %v13383_v42, 1  ;;  %2568 = vmatpush1.bf16.msra.mxu0 %v12345_v1 }
 0x35b   : > { %v1743_v0 = vpop.f32.mrb[22].mxu1  ;;  %v1926_v18 = vrot.slane %v1741_v51, 2  ;;  %2569 = vmatprep.subr.bf16.mxu0 %v12350_v10  ;;  %v12362_v51 = vld [vmem:[%s16294_s1 + $0x204] ss:$8 sps:$4 sm:$0xff]  }
 0x35c   : > { %v1814_v15 = vrot.slane %v1743_v0, 1  ;;  %v1745_v9 = vpop.f32.mrb[23].mxu1  ;;  %v12360_v0 = vld [vmem:[%s16294_s1 + $0x200] ss:$8 sps:$4 sm:$0xff]  }
 0x35d   : > { %v1928_v19 = vrot.slane %v1745_v9, 2  ;;  %v12368_v9 = vld [vmem:[%s16294_s1 + $0x224] ss:$8 sps:$4 sm:$0xff]  }
 0x35e   : > { %v1815_v22 = vsel %vm845_vm2, %v1812_v12, %v1814_v15  ;;  %2570 = vmatpush1.bf16.msra.mxu0 %v12348_v4  ;;  %v12365_v12 = vld [vmem:[%s16294_s1 + $0x214] ss:$8 sps:$4 sm:$0xff]   ;;  %v12363_v15 = vld [vmem:[%s16294_s1 + $0x210] ss:$8 sps:$4 sm:$0xff]  }
 0x35f   : > { %1846 = vrot.lane.b32.xlu1 %v1815_v22, %s12844_s5  ;;  %v13391_v23 = vsel %vm960_vm3, %v1926_v18, %v1928_v19  ;;  %2571 = vmatprep.subr.bf16.mxu0 %v12353_v5  ;;  %v12371_v18 = vld [vmem:[%s16294_s1 + $0x234] ss:$8 sps:$4 sm:$0xff]   ;;  %v12369_v19 = vld [vmem:[%s16294_s1 + $0x230] ss:$8 sps:$4 sm:$0xff]  }
 0x361   : > { %v13393_v11 = vpop.f32.mrb[24].mxu1 }
 0x362   : > { %v1751_v52 = vpop.f32.mrb[25].mxu1  ;;  %v1816_v20 = vrot.slane %v13393_v11, 1  ;;  %2572 = vmatpush1.bf16.msra.mxu0 %v12351_v54 }
 0x363   : > { %v1753_v24 = vpop.f32.mrb[26].mxu1  ;;  %v1930_v32 = vrot.slane %v1751_v52, 2  ;;  %2573 = vmatprep.subr.bf16.mxu0 %v12356_v6 }
 0x364   : > { %v1818_v27 = vrot.slane %v1753_v24, 1  ;;  %v1755_v29 = vpop.f32.mrb[27].mxu1 }
 0x365   : > { %v1932_v33 = vrot.slane %v1755_v29, 2 }
 0x366   : > { %v1819_v34 = vsel %vm845_vm2, %v1816_v20, %v1818_v27  ;;  %2574 = vmatpush1.bf16.msra.mxu0 %v12354_v41 }
 0x367   : > { %1850 = vrot.lane.b32.xlu0 %v1819_v34, %s12844_s5  ;;  %v13401_v2 = vsel %vm960_vm3, %v1930_v32, %v1932_v33  ;;  %2575 = vmatprep.subr.bf16.mxu0 %v12359_v25 }
 0x36a   : > { %2576 = vmatpush1.bf16.msra.mxu0 %v12357_v7 }
 0x36b   : > { %v13403_v36 = vpop.f32.mrb[28].mxu1  ;;  %497 = vrot.lane.b32.xlu0 %v11066_v35, %s12844_s5  ;;  %2577 = vmatprep.subr.bf16.mxu0 %v12362_v51 }
 0x36c   : > { %v1761_v38 = vpop.f32.mrb[29].mxu1  ;;  %v1820_v39 = vrot.slane %v13403_v36, 1 }
 0x36d   : > { %v1763_v13 = vpop.f32.mrb[30].mxu1  ;;  %v1934_v44 = vrot.slane %v1761_v38, 2 }
 0x36e   : > { %v1822_v30 = vrot.slane %v1763_v13, 1  ;;  %v1765_v43 = vpop.f32.mrb[31].mxu1  ;;  %2578 = vmatpush1.bf16.msra.mxu0 %v12360_v0 }
 0x36f   : > { %v1936_v45 = vrot.slane %v1765_v43, 2  ;;  %2579 = vmatprep.subr.bf16.mxu0 %v12365_v12 }
 0x370   : > { %v1823_v46 = vsel %vm845_vm2, %v1820_v39, %v1822_v30  ;;  %v2244_v39 = vld [vmem:[#allocation2 + $0x5c] sm:$0xf] }
 0x371   : > { %1854 = vrot.lane.b32.xlu1 %v1823_v46, %s12844_s5  ;;  %v13410_v48 = vsel %vm960_vm3, %v1934_v44, %v1936_v45 }
 0x372   : > { %2580 = vmatpush1.bf16.msra.mxu0 %v12363_v15 }
 0x373   : > { %2581 = vmatprep.subr.bf16.mxu0 %v12368_v9 }
 0x376   : > { %2582 = vmatpush1.bf16.msra.mxu0 %v12366_v16 }
 0x377   : > { %2583 = vmatprep.subr.bf16.mxu0 %v12371_v18 }
 0x37a   : > { %2584 = vmatpush1.bf16.msra.mxu0 %v12369_v19 }
 0x3a9   : > { %v1827_v22 = vpop.permute.xlu0 %1826 }
 0x3aa   : > { %v1874_v52 = vadd.f32 %v1827_v22, %v13343_v17 }
 0x3ac   : > { %v1956_v24 = vadd.f32 %v13349_v26, %v1874_v52 }
 0x3ae   : > { %vm1972_vm5 = vcmp.ge.f32.partialorder %v1956_v24, 0.0  ;;  %v1988_v20 = vmul.f32 0.2, %v1956_v24 }
 0x3b0   : > { %v2004_v27 = vsel %vm1972_vm5, %v1956_v24, %v1988_v20 }
 0x3b1   : > { %v12039_v29 = vpack.c.bf16 %v2004_v27, %v2004_v27  ;;  %v1831_v32 = vpop.permute.xlu1 %1830 }
 0x3b2   : > { %v1876_v33 = vadd.f32 %v1831_v32, %v13351_v63 }
 0x3b3   : > { %v2085_v34 = vshrl.u32 %v12039_v29, 16  ;;  %v2088_v13 = vshll.u32 %v12039_v29, 16 }
 0x3b4   : > { %v1958_v35 = vadd.f32 %v13357_v37, %v1876_v33 }
 0x3b5   : > { %v2087_v38 = vrot.slane %v2085_v34, 7 }
 0x3b6   : > { %vm1974_vm10 = vcmp.ge.f32.partialorder %v1958_v35, 0.0  ;;  %v1990_v30 = vmul.f32 0.2, %v1958_v35 }
 0x3b7   : > { %v2090_v43 = vor.u32 %v2088_v13, %v2087_v38  ;;  %v2091_v44 = vrot.slane %v2087_v38, 4 }
 0x3b8   : > { %v2006_v17 = vsel %vm1974_vm10, %v1958_v35, %v1990_v30 }
 0x3b9   : > { %v2099_v26 = vsel %vm13192_vm8, %v2091_v44, %v13197_v55  ;;  %v2245_v45 = vsel %vm13200_vm9, %v2090_v43, %v2244_v39  ;;  %v12041_v46 = vpack.c.bf16 %v2006_v17, %v2006_v17  ;;  %v1835_v63 = vpop.permute.xlu0 %1834 }
 0x3ba   : > { %2246 = vst [vmem:[#allocation2 + $0x5c] sm:$0xf] %v2245_v45  ;;  %2247 = vst.msk [vmem:[#allocation2 + $0x60] sm:$0xf] %vm172_vm1, %v2099_v26  ;;  %v1878_v37 = vadd.f32 %v1835_v63, %v13359_v21 }
 0x3bb   : > { %v2102_v53 = vshrl.u32 %v12041_v46, 16  ;;  %v2105_v57 = vshll.u32 %v12041_v46, 16 }
 0x3bc   : > { %v1960_v31 = vadd.f32 %v13365_v47, %v1878_v37 }
 0x3bd   : > { %v2104_v56 = vrot.slane %v2102_v53, 7 }
 0x3be   : > { %vm1976_vm11 = vcmp.ge.f32.partialorder %v1960_v31, 0.0  ;;  %v1992_v58 = vmul.f32 0.2, %v1960_v31 }
 0x3bf   : > { %v2107_v40 = vor.u32 %v2105_v57, %v2104_v56  ;;  %v2109_v60 = vrot.slane %v2104_v56, 4 }
 0x3c0   : > { %v2008_v1 = vsel %vm1976_vm11, %v1960_v31, %v1992_v58 }
 0x3c1   : > { %v2108_v10 = vsel %vm13192_vm8, %v13213_v14, %v2107_v40  ;;  %v2117_v4 = vsel %vm13192_vm8, %v2109_v60, %v13197_v55  ;;  %v12043_v5 = vpack.c.bf16 %v2008_v1, %v2008_v1  ;;  %v1839_v21 = vpop.permute.xlu1 %1838  ;;  %v13502_v54 = vld [vmem:[#allocation2 + $0x5c] sm:$0xff]  }
 0x3c2   : > { %2248 = vst.msk [vmem:[#allocation2 + $0x64] sm:$0xf] %vm172_vm1, %v2108_v10  ;;  %2249 = vst.msk [vmem:[#allocation2 + $0x68] sm:$0xf] %vm172_vm1, %v2117_v4  ;;  %v1880_v47 = vadd.f32 %v1839_v21, %v13367_v49  ;;  %2335 = vrot.lane.b32.xlu1 %v13502_v54, %s12844_s5 }
 0x3c3   : > { %v2120_v6 = vshrl.u32 %v12043_v5, 16  ;;  %v2123_v7 = vshll.u32 %v12043_v5, 16 }
 0x3c4   : > { %v1962_v41 = vadd.f32 %v13373_v62, %v1880_v47 }
 0x3c5   : > { %v2122_v25 = vrot.slane %v2120_v6, 7 }
 0x3c6   : > { %vm1978_vm12 = vcmp.ge.f32.partialorder %v1962_v41, 0.0  ;;  %v1994_v51 = vmul.f32 0.2, %v1962_v41 }
 0x3c7   : > { %v2125_v0 = vor.u32 %v2123_v7, %v2122_v25  ;;  %v2127_v12 = vrot.slane %v2122_v25, 4 }
 0x3c8   : > { %v2010_v15 = vsel %vm1978_vm12, %v1962_v41, %v1994_v51 }
 0x3c9   : > { %v2126_v9 = vsel %vm13192_vm8, %v13213_v14, %v2125_v0  ;;  %v2135_v49 = vsel %vm13192_vm8, %v2127_v12, %v13197_v55  ;;  %v12045_v16 = vpack.c.bf16 %v2010_v15, %v2010_v15  ;;  %v1843_v18 = vpop.permute.xlu0 %1842  ;;  %v13516_v19 = vld [vmem:[#allocation2 + $0x64] sm:$0xff]   ;;  %v2262_v12 = vld [vmem:[#allocation2 + $0x9c] sm:$0x1] }
 0x3ca   : > { %2250 = vst.msk [vmem:[#allocation2 + $0x6c] sm:$0xf] %vm172_vm1, %v2126_v9  ;;  %2251 = vst.msk [vmem:[#allocation2 + $0x70] sm:$0xf] %vm172_vm1, %v2135_v49  ;;  %v1882_v62 = vadd.f32 %v1843_v18, %v13375_v3  ;;  %2337 = vrot.lane.b32.xlu0 %v13516_v19, %s12844_s5 }
 0x3cb   : > { %v2138_v22 = vshrl.u32 %v12045_v16, 16  ;;  %v2141_v20 = vshll.u32 %v12045_v16, 16  ;;  %v2263_v16 = vsel %vm13287_vm6, %v13213_v14, %v2262_v12 }
 0x3cc   : > { %v1964_v52 = vadd.f32 %v13381_v8, %v1882_v62  ;;  %2264 = vst [vmem:[#allocation2 + $0x9c] sm:$0x1] %v2263_v16 }
 0x3cd   : > { %v2140_v24 = vrot.slane %v2138_v22, 7 }
 0x3ce   : > { %vm1980_vm13 = vcmp.ge.f32.partialorder %v1964_v52, 0.0  ;;  %v1996_v27 = vmul.f32 0.2, %v1964_v52 }
 0x3cf   : > { %v2143_v29 = vor.u32 %v2141_v20, %v2140_v24  ;;  %v2145_v32 = vrot.slane %v2140_v24, 4 }
 0x3d0   : > { %v2012_v33 = vsel %vm1980_vm13, %v1964_v52, %v1996_v27 }
 0x3d1   : > { %v2144_v34 = vsel %vm13192_vm8, %v13213_v14, %v2143_v29  ;;  %v2153_v3 = vsel %vm13192_vm8, %v2145_v32, %v13197_v55  ;;  %v12047_v35 = vpack.c.bf16 %v2012_v33, %v2012_v33  ;;  %v1847_v38 = vpop.permute.xlu1 %1846  ;;  %v13530_v13 = vld [vmem:[#allocation2 + $0x6c] sm:$0xff]  }
 0x3d2   : > { %2252 = vst.msk [vmem:[#allocation2 + $0x74] sm:$0xf] %vm172_vm1, %v2144_v34  ;;  %2253 = vst.msk [vmem:[#allocation2 + $0x78] sm:$0xf] %vm172_vm1, %v2153_v3  ;;  %v1884_v8 = vadd.f32 %v1847_v38, %v13383_v42  ;;  %2339 = vrot.lane.b32.xlu1 %v13530_v13, %s12844_s5 }
 0x3d3   : > { %v2156_v39 = vshrl.u32 %v12047_v35, 16  ;;  %v2159_v44 = vshll.u32 %v12047_v35, 16  ;;  %v4074_v33 = vld [vmem:[#allocation2 + $0x9c] sm:$0x1] }
 0x3d4   : > { %v1966_v30 = vadd.f32 %v13391_v23, %v1884_v8  ;;  %v12827_v23 = vld [vmem:[%s12895_s27 + $0x40] sm:$0xf]  ;;  %v13582_v35 = vld [vmem:[#allocation2 + $0x9c] sm:$0xf]  ;;  %v4075_v38 = vsel %vm13287_vm6, %v13213_v14, %v4074_v33 }
 0x3d5   : > { %v2158_v43 = vrot.slane %v2156_v39, 7  ;;  %v11064_v56 = vcombine.low %v12827_v23, %v12827_v23  ;;  %4076 = vst [vmem:[#allocation2 + $0x9c] sm:$0x1] %v4075_v38 }
 0x3d6   : > { %vm1982_vm14 = vcmp.ge.f32.partialorder %v1966_v30, 0.0  ;;  %v1998_v17 = vmul.f32 0.2, %v1966_v30 }
 0x3d7   : > { %v2161_v26 = vor.u32 %v2159_v44, %v2158_v43  ;;  %v2163_v45 = vrot.slane %v2158_v43, 4 }
 0x3d8   : > { %v2014_v46 = vsel %vm1982_vm14, %v1966_v30, %v1998_v17 }
 0x3d9   : > { %v2162_v63 = vsel %vm13192_vm8, %v13213_v14, %v2161_v26  ;;  %v2171_v42 = vsel %vm13192_vm8, %v2163_v45, %v13197_v55  ;;  %v12049_v37 = vpack.c.bf16 %v2014_v46, %v2014_v46  ;;  %v1851_v53 = vpop.permute.xlu0 %1850  ;;  %v13544_v31 = vld [vmem:[#allocation2 + $0x74] sm:$0xff]  }
 0x3da   : > { %2254 = vst.msk [vmem:[#allocation2 + $0x7c] sm:$0xf] %vm172_vm1, %v2162_v63  ;;  %2255 = vst.msk [vmem:[#allocation2 + $0x80] sm:$0xf] %vm172_vm1, %v2171_v42  ;;  %v1886_v57 = vadd.f32 %v1851_v53, %v13393_v11  ;;  %2341 = vrot.lane.b32.xlu0 %v13544_v31, %s12844_s5  ;;  %v12372_v26 = vld [vmem:[#allocation2 + $0x54] sm:$0xff]  }
 0x3db   : > { %v2174_v58 = vshrl.u32 %v12049_v37, 16  ;;  %v2177_v1 = vshll.u32 %v12049_v37, 16 }
 0x3dc   : > { %v1968_v40 = vadd.f32 %v13401_v2, %v1886_v57 }
 0x3dd   : > { %v2176_v60 = vrot.slane %v2174_v58, 7  ;;  %v498_v10 = vpop.permute.xlu0 %497 }
 0x3de   : > { %vm1984_vm15 = vcmp.ge.f32.partialorder %v1968_v40, 0.0  ;;  %v2000_v4 = vmul.f32 0.2, %v1968_v40  ;;  %v540_v5 = vsel %vm505_vm0, %v11064_v56, %v498_v10 }
 0x3df   : > { %v2179_v21 = vor.u32 %v2177_v1, %v2176_v60  ;;  %v2181_v47 = vrot.slane %v2176_v60, 4  ;;  %820 = vmatmul.mubr.bf16.gmra.mrb[32].mxu0 %v540_v5 }
 0x3e0   : > { %v2016_v6 = vsel %vm1984_vm15, %v1968_v40, %v2000_v4  ;;  %11265 = vmatprep.mubr.msk.bf16.mxu0 %vm505_vm0, %v13516_v19  ;;  %v2284_v40 = vld [vmem:[#allocation2 + $0xa0] sm:$0xf] }
 0x3e1   : > { %v2180_v11 = vsel %vm13192_vm8, %v13213_v14, %v2179_v21  ;;  %v2189_v2 = vsel %vm13192_vm8, %v2181_v47, %v13197_v55  ;;  %v12051_v41 = vpack.c.bf16 %v2016_v6, %v2016_v6  ;;  %v13562_v25 = vld [vmem:[#allocation2 + $0x7c] sm:$0xff]  }
 0x3e2   : > { %2256 = vst.msk [vmem:[#allocation2 + $0x84] sm:$0xf] %vm172_vm1, %v2180_v11  ;;  %2257 = vst.msk [vmem:[#allocation2 + $0x88] sm:$0xf] %vm172_vm1, %v2189_v2  ;;  %2343 = vrot.lane.b32.xlu1 %v13562_v25, %s12844_s5 }
 0x3e3   : > { %v1855_v7 = vpop.permute.xlu1 %1854  ;;  %v2192_v51 = vshrl.u32 %v12051_v41, 16  ;;  %v2195_v9 = vshll.u32 %v12051_v41, 16 }
 0x3e4   : > { %v1888_v0 = vadd.f32 %v1855_v7, %v13403_v36 }
 0x3e5   : > { %v2194_v15 = vrot.slane %v2192_v51, 7 }
 0x3e6   : > { %v1970_v49 = vadd.f32 %v13410_v48, %v1888_v0 }
 0x3e7   : > { %v2197_v18 = vor.u32 %v2195_v9, %v2194_v15  ;;  %v2199_v62 = vrot.slane %v2194_v15, 4 }
 0x3e8   : > { %vm1986_vm4 = vcmp.ge.f32.partialorder %v1970_v49, 0.0  ;;  %v2002_v22 = vmul.f32 0.2, %v1970_v49 }
 0x3e9   : > { %v2198_v36 = vsel %vm13192_vm8, %v13213_v14, %v2197_v18  ;;  %v2207_v52 = vsel %vm13192_vm8, %v2199_v62, %v13197_v55  ;;  %v12333_v20 = vld [vmem:[#allocation2 + $0x84] sm:$0xff]  }
 0x3ea   : > { %v2018_v24 = vsel %vm1986_vm4, %v1970_v49, %v2002_v22  ;;  %2258 = vst.msk [vmem:[#allocation2 + $0x8c] sm:$0xf] %vm172_vm1, %v2198_v36  ;;  %2259 = vst.msk [vmem:[#allocation2 + $0x90] sm:$0xf] %vm172_vm1, %v2207_v52  ;;  %2345 = vrot.lane.b32.xlu0 %v12333_v20, %s12844_s5 }
 0x3eb   : > { %v12053_v48 = vpack.c.bf16 %v2018_v24, %v2018_v24 }
 0x3ed   : > { %v2210_v27 = vshrl.u32 %v12053_v48, 16  ;;  %v2213_v32 = vshll.u32 %v12053_v48, 16 }
 0x3ef   : > { %v2212_v29 = vrot.slane %v2210_v27, 7 }
 0x3f1   : > { %v2215_v34 = vor.u32 %v2213_v32, %v2212_v29  ;;  %v2217_v3 = vrot.slane %v2212_v29, 4  ;;  %v12337_v8 = vld [vmem:[#allocation2 + $0x8c] sm:$0xff]  }
 0x3f2   : > { %2347 = vrot.lane.b32.xlu1 %v12337_v8, %s12844_s5 }
 0x3f3   : > { %v2216_v39 = vsel %vm13192_vm8, %v13213_v14, %v2215_v34  ;;  %v2225_v30 = vsel %vm13192_vm8, %v2217_v3, %v13197_v55 }
 0x3f4   : > { %2260 = vst.msk [vmem:[#allocation2 + $0x94] sm:$0xf] %vm172_vm1, %v2216_v39  ;;  %2261 = vst.msk [vmem:[#allocation2 + $0x98] sm:$0xf] %vm172_vm1, %v2225_v30 }
 0x3fb   : > { %v2281_v43 = vld [vmem:[#allocation2 + $0x94] sm:$0xf]  ;;  %v2282_v44 = vld [vmem:[#allocation2 + $0x98] sm:$0xf] }
 0x3fc   : > { %v11213_v17 = vcombine.low %v2281_v43, %v2282_v44 }
 0x3fe   : > { %2349 = vrot.lane.b32.xlu0 %v11213_v17, %s12844_s5 }
 0x434   : > { %v2336_v45 = vpop.permute.xlu1 %2335 }
 0x435   : > { %v2361_v46 = vsel %vm505_vm0, %v12372_v26, %v2336_v45 }
 0x436   : > { %2594 = vmatmul.mubr.bf16.vlgmr.msra.gmra.mrb[36].mxu0 %v2361_v46 }
 0x437   : > { %11266 = vmatprep.mubr.msk.bf16.mxu0 %vm505_vm0, %v13530_v13 }
 0x43c   : > { %v2338_v63 = vpop.permute.xlu0 %2337 }
 0x43d   : > { %v2365_v42 = vsel %vm505_vm0, %v13502_v54, %v2338_v63 }
 0x43e   : > { %2604 = vmatmul.mubr.bf16.gmra.mrb[40].mxu0 %v2365_v42 }
 0x43f   : > { %11267 = vmatprep.mubr.msk.bf16.mxu0 %vm505_vm0, %v13544_v31 }
 0x444   : > { %v2340_v37 = vpop.permute.xlu1 %2339 }
 0x445   : > { %v2369_v53 = vsel %vm505_vm0, %v13516_v19, %v2340_v37 }
 0x446   : > { %2614 = vmatmul.mubr.bf16.gmra.mrb[44].mxu0 %v2369_v53 }
 0x447   : > { %11268 = vmatprep.mubr.msk.bf16.mxu0 %vm505_vm0, %v13562_v25 }
 0x44c   : > { %v2342_v23 = vpop.permute.xlu0 %2341 }
 0x44d   : > { %v2373_v56 = vsel %vm505_vm0, %v13530_v13, %v2342_v23  ;;  %v11215_v13 = vcombine.low %v13582_v35, %v2284_v40 }
 0x44e   : > { %2624 = vmatmul.mubr.bf16.gmra.mrb[48].mxu0 %v2373_v56 }
 0x44f   : > { %11269 = vmatprep.mubr.msk.bf16.mxu0 %vm505_vm0, %v12333_v20 }
 0x454   : > { %v2344_v54 = vpop.permute.xlu1 %2343 }
 0x455   : > { %v2377_v57 = vsel %vm505_vm0, %v13544_v31, %v2344_v54 }
 0x456   : > { %2634 = vmatmul.mubr.bf16.gmra.mrb[52].mxu0 %v2377_v57 }
 0x457   : > { %11270 = vmatprep.mubr.msk.bf16.mxu0 %vm505_vm0, %v12337_v8 }
 0x45c   : > { %v2346_v58 = vpop.permute.xlu0 %2345 }
 0x45d   : > { %v2381_v19 = vsel %vm505_vm0, %v13562_v25, %v2346_v58 }
 0x45e   : > { %2644 = vmatmul.mubr.bf16.gmra.mrb[56].mxu0 %v2381_v19 }
 0x45f   : > { %11271 = vmatprep.mubr.msk.bf16.mxu0 %vm505_vm0, %v11213_v17 }
 0x464   : > { %v2348_v60 = vpop.permute.xlu1 %2347 }
 0x465   : > { %v2385_v1 = vsel %vm505_vm0, %v12333_v20, %v2348_v60 }
 0x466   : > { %2654 = vmatmul.mubr.bf16.gmra.mrb[60].mxu0 %v2385_v1 }
 0x467   : > { %11272 = vmatprep.mubr.msk.bf16.mxu0 %vm505_vm0, %v11215_v13 }
 0x470   : > { %v2350_v31 = vpop.permute.xlu0 %2349 }
 0x471   : > { %v2389_v10 = vsel %vm505_vm0, %v12337_v8, %v2350_v31 }
 0x472   : > { %2664 = vmatmul.mubr.bf16.gmra.mrb[64].mxu0 %v2389_v10 }
 0x4b2   : > { %v821_v4 = vpop.f32.mrb[32].mxu0 }
 0x4b3   : > { %v823_v5 = vpop.f32.mrb[33].mxu0 }
 0x4b4   : > { %v825_v21 = vpop.f32.mrb[34].mxu0 }
 0x4b5   : > { %v826_v47 = vpop.f32.mrb[35].mxu0 }
 0x509   : > { %v13621_v6 = vpop.f32.mrb[36].mxu0 }
 0x50a   : > { %v2597_v11 = vpop.f32.mrb[37].mxu0  ;;  %v2699_v41 = vrot.slane %v13621_v6, 1 }
 0x50b   : > { %v2599_v2 = vpop.f32.mrb[38].mxu0  ;;  %v2813_v51 = vrot.slane %v2597_v11, 2 }
 0x50c   : > { %v2700_v25 = vrot.slane %v2599_v2, 1  ;;  %v2601_v7 = vpop.f32.mrb[39].mxu0  ;;  %v12378_v2 = vld [vmem:[#allocation2 + $0x50] ss:$0 sps:$4 sm:$0xff]  }
 0x50d   : > { %v2814_v0 = vrot.slane %v2601_v7, 2  ;;  %11187 = vmatprep.mubr.msk.bf16.mxu1 %vm505_vm0, %v12378_v2  ;;  %v12416_v2 = vld [vmem:[%s16294_s1 + $0x2f0] ss:$8 sps:$4 sm:$0xff]  }
 0x50e   : > { %v2701_v12 = vsel %vm845_vm2, %v2699_v41, %v2700_v25 }
 0x50f   : > { %2732 = vrot.lane.b32.xlu1 %v2701_v12, %s12844_s5  ;;  %v13627_v15 = vsel %vm960_vm3, %v2813_v51, %v2814_v0 }
 0x511   : > { %v13629_v9 = vpop.f32.mrb[40].mxu0 }
 0x512   : > { %v2607_v49 = vpop.f32.mrb[41].mxu0  ;;  %v2702_v18 = vrot.slane %v13629_v9, 1 }
 0x513   : > { %v2609_v16 = vpop.f32.mrb[42].mxu0  ;;  %v2816_v36 = vrot.slane %v2607_v49, 2 }
 0x514   : > { %v2704_v62 = vrot.slane %v2609_v16, 1  ;;  %v2611_v22 = vpop.f32.mrb[43].mxu0 }
 0x515   : > { %v2818_v52 = vrot.slane %v2611_v22, 2 }
 0x516   : > { %v2705_v24 = vsel %vm845_vm2, %v2702_v18, %v2704_v62 }
 0x517   : > { %2736 = vrot.lane.b32.xlu0 %v2705_v24, %s12844_s5  ;;  %v13635_v20 = vsel %vm960_vm3, %v2816_v36, %v2818_v52  ;;  %v11128_v36 = vcombine.low %v13304_v50, %v13304_v50 }
 0x519   : > { %v13637_v48 = vpop.f32.mrb[44].mxu0 }
 0x51a   : > { %v2617_v27 = vpop.f32.mrb[45].mxu0  ;;  %v2706_v32 = vrot.slane %v13637_v48, 1 }
 0x51b   : > { %v2619_v29 = vpop.f32.mrb[46].mxu0  ;;  %v2820_v3 = vrot.slane %v2617_v27, 2 }
 0x51c   : > { %v2708_v33 = vrot.slane %v2619_v29, 1  ;;  %v2621_v34 = vpop.f32.mrb[47].mxu0 }
 0x51d   : > { %v2822_v38 = vrot.slane %v2621_v34, 2 }
 0x51e   : > { %v2709_v8 = vsel %vm845_vm2, %v2706_v32, %v2708_v33 }
 0x51f   : > { %2740 = vrot.lane.b32.xlu1 %v2709_v8, %s12844_s5  ;;  %v13643_v39 = vsel %vm960_vm3, %v2820_v3, %v2822_v38 }
 0x521   : > { %v13645_v30 = vpop.f32.mrb[48].mxu0 }
 0x522   : > { %v2627_v43 = vpop.f32.mrb[49].mxu0  ;;  %v2710_v17 = vrot.slane %v13645_v30, 1 }
 0x523   : > { %v2629_v44 = vpop.f32.mrb[50].mxu0  ;;  %v2824_v46 = vrot.slane %v2627_v43, 2  ;;  %v12381_v43 = vld [vmem:[%s16294_s1 + $0x240] ss:$8 sps:$4 sm:$0xff]  }
 0x524   : > { %v2712_v26 = vrot.slane %v2629_v44, 1  ;;  %v2631_v45 = vpop.f32.mrb[51].mxu0  ;;  %v12383_v44 = vld [vmem:[%s16294_s1 + $0x244] ss:$8 sps:$4 sm:$0xff]  }
 0x525   : > { %v2826_v63 = vrot.slane %v2631_v45, 2  ;;  %3467 = vmatprep.subr.bf16.mxu1 %v12383_v44  ;;  %v12390_v45 = vld [vmem:[%s16294_s1 + $0x264] ss:$8 sps:$4 sm:$0xff]  }
 0x526   : > { %v2713_v42 = vsel %vm845_vm2, %v2710_v17, %v2712_v26  ;;  %v12387_v17 = vld [vmem:[%s16294_s1 + $0x254] ss:$8 sps:$4 sm:$0xff]   ;;  %3468 = vmatpush1.bf16.msra.mxu1 %v12381_v43  ;;  %v12385_v26 = vld [vmem:[%s16294_s1 + $0x250] ss:$8 sps:$4 sm:$0xff]  }
 0x527   : > { %2744 = vrot.lane.b32.xlu0 %v2713_v42, %s12844_s5  ;;  %v13651_v37 = vsel %vm960_vm3, %v2824_v46, %v2826_v63  ;;  %3469 = vmatprep.subr.bf16.mxu1 %v12387_v17  ;;  %v12388_v46 = vld [vmem:[%s16294_s1 + $0x260] ss:$8 sps:$4 sm:$0xff]   ;;  %v12394_v63 = vld [vmem:[%s16294_s1 + $0x274] ss:$8 sps:$4 sm:$0xff]   ;;  %v12392_v42 = vld [vmem:[%s16294_s1 + $0x270] ss:$8 sps:$4 sm:$0xff]  }
 0x529   : > { %v13653_v53 = vpop.f32.mrb[52].mxu0 }
 0x52a   : > { %v2637_v23 = vpop.f32.mrb[53].mxu0  ;;  %v2714_v54 = vrot.slane %v13653_v53, 1  ;;  %3470 = vmatpush1.bf16.msra.mxu1 %v12385_v26 }
 0x52b   : > { %v2639_v56 = vpop.f32.mrb[54].mxu0  ;;  %v2828_v19 = vrot.slane %v2637_v23, 2  ;;  %3471 = vmatprep.subr.bf16.mxu1 %v12390_v45  ;;  %v12397_v23 = vld [vmem:[%s16294_s1 + $0x284] ss:$8 sps:$4 sm:$0xff]  }
 0x52c   : > { %v2716_v57 = vrot.slane %v2639_v56, 1  ;;  %v2641_v58 = vpop.f32.mrb[55].mxu0  ;;  %v12395_v56 = vld [vmem:[%s16294_s1 + $0x280] ss:$8 sps:$4 sm:$0xff]  }
 0x52d   : > { %v2830_v40 = vrot.slane %v2641_v58, 2  ;;  %v12403_v58 = vld [vmem:[%s16294_s1 + $0x2a4] ss:$8 sps:$4 sm:$0xff]  }
 0x52e   : > { %v2717_v13 = vsel %vm845_vm2, %v2714_v54, %v2716_v57  ;;  %3472 = vmatpush1.bf16.msra.mxu1 %v12388_v46  ;;  %v12400_v54 = vld [vmem:[%s16294_s1 + $0x294] ss:$8 sps:$4 sm:$0xff]   ;;  %v12398_v57 = vld [vmem:[%s16294_s1 + $0x290] ss:$8 sps:$4 sm:$0xff]  }
 0x52f   : > { %2748 = vrot.lane.b32.xlu1 %v2717_v13, %s12844_s5  ;;  %v13659_v60 = vsel %vm960_vm3, %v2828_v19, %v2830_v40  ;;  %3473 = vmatprep.subr.bf16.mxu1 %v12394_v63  ;;  %v12401_v19 = vld [vmem:[%s16294_s1 + $0x2a0] ss:$8 sps:$4 sm:$0xff]   ;;  %v12406_v40 = vld [vmem:[%s16294_s1 + $0x2b4] ss:$8 sps:$4 sm:$0xff]   ;;  %v12404_v13 = vld [vmem:[%s16294_s1 + $0x2b0] ss:$8 sps:$4 sm:$0xff]  }
 0x531   : > { %v13661_v1 = vpop.f32.mrb[56].mxu0 }
 0x532   : > { %v2647_v31 = vpop.f32.mrb[57].mxu0  ;;  %v2718_v4 = vrot.slane %v13661_v1, 1  ;;  %3474 = vmatpush1.bf16.msra.mxu1 %v12392_v42 }
 0x533   : > { %v2649_v10 = vpop.f32.mrb[58].mxu0  ;;  %v2832_v47 = vrot.slane %v2647_v31, 2  ;;  %3475 = vmatprep.subr.bf16.mxu1 %v12397_v23  ;;  %v12409_v31 = vld [vmem:[%s16294_s1 + $0x2c4] ss:$8 sps:$4 sm:$0xff]  }
 0x534   : > { %v2720_v5 = vrot.slane %v2649_v10, 1  ;;  %v2651_v21 = vpop.f32.mrb[59].mxu0  ;;  %v12407_v10 = vld [vmem:[%s16294_s1 + $0x2c0] ss:$8 sps:$4 sm:$0xff]  }
 0x535   : > { %v2834_v11 = vrot.slane %v2651_v21, 2  ;;  %v12415_v21 = vld [vmem:[%s16294_s1 + $0x2e4] ss:$8 sps:$4 sm:$0xff]  }
 0x536   : > { %v2721_v41 = vsel %vm845_vm2, %v2718_v4, %v2720_v5  ;;  %3476 = vmatpush1.bf16.msra.mxu1 %v12395_v56  ;;  %v12412_v4 = vld [vmem:[%s16294_s1 + $0x2d4] ss:$8 sps:$4 sm:$0xff]   ;;  %v12410_v5 = vld [vmem:[%s16294_s1 + $0x2d0] ss:$8 sps:$4 sm:$0xff]  }
 0x537   : > { %2752 = vrot.lane.b32.xlu0 %v2721_v41, %s12844_s5  ;;  %v13667_v25 = vsel %vm960_vm3, %v2832_v47, %v2834_v11  ;;  %3477 = vmatprep.subr.bf16.mxu1 %v12400_v54  ;;  %v12413_v47 = vld [vmem:[%s16294_s1 + $0x2e0] ss:$8 sps:$4 sm:$0xff]   ;;  %v12418_v11 = vld [vmem:[%s16294_s1 + $0x2f4] ss:$8 sps:$4 sm:$0xff]  }
 0x539   : > { %v13670_v7 = vpop.f32.mrb[60].mxu0 }
 0x53a   : > { %v2657_v51 = vpop.f32.mrb[61].mxu0  ;;  %v2722_v12 = vrot.slane %v13670_v7, 1  ;;  %3478 = vmatpush1.bf16.msra.mxu1 %v12398_v57 }
 0x53b   : > { %v2659_v0 = vpop.f32.mrb[62].mxu0  ;;  %v2836_v18 = vrot.slane %v2657_v51, 2  ;;  %3479 = vmatprep.subr.bf16.mxu1 %v12403_v58 }
 0x53c   : > { %v2724_v49 = vrot.slane %v2659_v0, 1  ;;  %v2661_v16 = vpop.f32.mrb[63].mxu0 }
 0x53d   : > { %v2838_v62 = vrot.slane %v2661_v16, 2 }
 0x53e   : > { %v2725_v22 = vsel %vm845_vm2, %v2722_v12, %v2724_v49  ;;  %3480 = vmatpush1.bf16.msra.mxu1 %v12401_v19 }
 0x53f   : > { %2756 = vrot.lane.b32.xlu1 %v2725_v22, %s12844_s5  ;;  %v13678_v52 = vsel %vm960_vm3, %v2836_v18, %v2838_v62  ;;  %3481 = vmatprep.subr.bf16.mxu1 %v12406_v40 }
 0x542   : > { %3482 = vmatpush1.bf16.msra.mxu1 %v12404_v13 }
 0x543   : > { %1445 = vrot.lane.b32.xlu1 %v11128_v36, %s12844_s5  ;;  %3483 = vmatprep.subr.bf16.mxu1 %v12409_v31 }
 0x545   : > { %v13680_v24 = vpop.f32.mrb[64].mxu0 }
 0x546   : > { %v2667_v27 = vpop.f32.mrb[65].mxu0  ;;  %v2726_v32 = vrot.slane %v13680_v24, 1  ;;  %3484 = vmatpush1.bf16.msra.mxu1 %v12407_v10 }
 0x547   : > { %v2669_v29 = vpop.f32.mrb[66].mxu0  ;;  %v2840_v3 = vrot.slane %v2667_v27, 2  ;;  %3485 = vmatprep.subr.bf16.mxu1 %v12412_v4 }
 0x548   : > { %v2728_v33 = vrot.slane %v2669_v29, 1  ;;  %v2671_v34 = vpop.f32.mrb[67].mxu0 }
 0x549   : > { %v2842_v38 = vrot.slane %v2671_v34, 2 }
 0x54a   : > { %v2729_v8 = vsel %vm845_vm2, %v2726_v32, %v2728_v33  ;;  %3486 = vmatpush1.bf16.msra.mxu1 %v12410_v5 }
 0x54b   : > { %2760 = vrot.lane.b32.xlu0 %v2729_v8, %s12844_s5  ;;  %v13687_v50 = vsel %vm960_vm3, %v2840_v3, %v2842_v38  ;;  %3487 = vmatprep.subr.bf16.mxu1 %v12415_v21  ;;  %v3150_v3 = vld [vmem:[#allocation2 + $0x8] sm:$0xf] }
 0x54e   : > { %3488 = vmatpush1.bf16.msra.mxu1 %v12413_v47 }
 0x54f   : > { %3489 = vmatprep.subr.bf16.mxu1 %v12418_v11 }
 0x552   : > { %3490 = vmatpush1.bf16.msra.mxu1 %v12416_v2 }
 0x581   : > { %v2733_v41 = vpop.permute.xlu1 %2732 }
 0x582   : > { %v2780_v51 = vadd.f32 %v2733_v41, %v13621_v6 }
 0x584   : > { %v2862_v0 = vadd.f32 %v13627_v15, %v2780_v51 }
 0x586   : > { %vm2878_vm7 = vcmp.ge.f32.partialorder %v2862_v0, 0.0  ;;  %v2894_v12 = vmul.f32 0.2, %v2862_v0 }
 0x588   : > { %v2910_v49 = vsel %vm2878_vm7, %v2862_v0, %v2894_v12 }
 0x589   : > { %v12055_v16 = vpack.c.bf16 %v2910_v49, %v2910_v49  ;;  %v2737_v18 = vpop.permute.xlu0 %2736 }
 0x58a   : > { %v2782_v62 = vadd.f32 %v2737_v18, %v13629_v9 }
 0x58b   : > { %v2991_v22 = vshrl.u32 %v12055_v16, 16  ;;  %v2994_v29 = vshll.u32 %v12055_v16, 16 }
 0x58c   : > { %v2864_v36 = vadd.f32 %v13635_v20, %v2782_v62 }
 0x58d   : > { %v2993_v27 = vrot.slane %v2991_v22, 7 }
 0x58e   : > { %vm2880_vm5 = vcmp.ge.f32.partialorder %v2864_v36, 0.0  ;;  %v2896_v32 = vmul.f32 0.2, %v2864_v36 }
 0x58f   : > { %v2996_v33 = vor.u32 %v2994_v29, %v2993_v27  ;;  %v2997_v34 = vrot.slane %v2993_v27, 4 }
 0x590   : > { %v2912_v6 = vsel %vm2880_vm5, %v2864_v36, %v2896_v32 }
 0x591   : > { %v3005_v15 = vsel %vm13192_vm8, %v2997_v34, %v13197_v55  ;;  %v3151_v38 = vsel %vm13200_vm9, %v2996_v33, %v3150_v3  ;;  %v12057_v8 = vpack.c.bf16 %v2912_v6, %v2912_v6  ;;  %v2741_v9 = vpop.permute.xlu1 %2740 }
 0x592   : > { %3152 = vst [vmem:[#allocation2 + $0x8] sm:$0xf] %v3151_v38  ;;  %3153 = vst.msk [vmem:[#allocation2 + $0xc] sm:$0xf] %vm172_vm1, %v3005_v15  ;;  %v2784_v20 = vadd.f32 %v2741_v9, %v13637_v48 }
 0x593   : > { %v3008_v43 = vshrl.u32 %v12057_v8, 16  ;;  %v3011_v26 = vshll.u32 %v12057_v8, 16 }
 0x594   : > { %v2866_v44 = vadd.f32 %v13643_v39, %v2784_v20 }
 0x595   : > { %v3010_v17 = vrot.slane %v3008_v43, 7 }
 0x596   : > { %vm2882_vm10 = vcmp.ge.f32.partialorder %v2866_v44, 0.0  ;;  %v2898_v45 = vmul.f32 0.2, %v2866_v44 }
 0x597   : > { %v3013_v46 = vor.u32 %v3011_v26, %v3010_v17  ;;  %v3015_v63 = vrot.slane %v3010_v17, 4 }
 0x598   : > { %v2914_v42 = vsel %vm2882_vm10, %v2866_v44, %v2898_v45  ;;  %v12828_v45 = vld [vmem:[#allocation2 + $0x40] sm:$0xf] }
 0x599   : > { %v3014_v23 = vsel %vm13192_vm8, %v13213_v14, %v3013_v46  ;;  %v3023_v56 = vsel %vm13192_vm8, %v3015_v63, %v13197_v55  ;;  %v12059_v54 = vpack.c.bf16 %v2914_v42, %v2914_v42  ;;  %v2745_v48 = vpop.permute.xlu0 %2744  ;;  %v13779_v57 = vld [vmem:[#allocation2 + $0x8] sm:$0xff]   ;;  %v11126_v46 = vcombine.low %v12828_v45, %v12828_v45 }
 0x59a   : > { %3154 = vst.msk [vmem:[#allocation2 + $0x10] sm:$0xf] %vm172_vm1, %v3014_v23  ;;  %3155 = vst.msk [vmem:[#allocation2 + $0x14] sm:$0xf] %vm172_vm1, %v3023_v56  ;;  %v2786_v39 = vadd.f32 %v2745_v48, %v13645_v30  ;;  %3241 = vrot.lane.b32.xlu0 %v13779_v57, %s12844_s5 }
 0x59b   : > { %v3026_v58 = vshrl.u32 %v12059_v54, 16  ;;  %v3029_v13 = vshll.u32 %v12059_v54, 16 }
 0x59c   : > { %v2868_v19 = vadd.f32 %v13651_v37, %v2786_v39 }
 0x59d   : > { %v3028_v40 = vrot.slane %v3026_v58, 7 }
 0x59e   : > { %vm2884_vm11 = vcmp.ge.f32.partialorder %v2868_v19, 0.0  ;;  %v2900_v31 = vmul.f32 0.2, %v2868_v19 }
 0x59f   : > { %v3031_v10 = vor.u32 %v3029_v13, %v3028_v40  ;;  %v3033_v4 = vrot.slane %v3028_v40, 4 }
 0x5a0   : > { %v2916_v5 = vsel %vm2884_vm11, %v2868_v19, %v2900_v31 }
 0x5a1   : > { %v3032_v21 = vsel %vm13192_vm8, %v13213_v14, %v3031_v10  ;;  %v3041_v30 = vsel %vm13192_vm8, %v3033_v4, %v13197_v55  ;;  %v12061_v47 = vpack.c.bf16 %v2916_v5, %v2916_v5  ;;  %v2749_v11 = vpop.permute.xlu1 %2748  ;;  %v13793_v2 = vld [vmem:[#allocation2 + $0x10] sm:$0xff]  }
 0x5a2   : > { %3156 = vst.msk [vmem:[#allocation2 + $0x18] sm:$0xf] %vm172_vm1, %v3032_v21  ;;  %3157 = vst.msk [vmem:[#allocation2 + $0x1c] sm:$0xf] %vm172_vm1, %v3041_v30  ;;  %v2788_v37 = vadd.f32 %v2749_v11, %v13653_v53  ;;  %3243 = vrot.lane.b32.xlu1 %v13793_v2, %s12844_s5 }
 0x5a3   : > { %v3044_v41 = vshrl.u32 %v12061_v47, 16  ;;  %v3047_v12 = vshll.u32 %v12061_v47, 16 }
 0x5a4   : > { %v2870_v51 = vadd.f32 %v13659_v60, %v2788_v37 }
 0x5a5   : > { %v3046_v0 = vrot.slane %v3044_v41, 7 }
 0x5a6   : > { %vm2886_vm12 = vcmp.ge.f32.partialorder %v2870_v51, 0.0  ;;  %v2902_v49 = vmul.f32 0.2, %v2870_v51 }
 0x5a7   : > { %v3049_v16 = vor.u32 %v3047_v12, %v3046_v0  ;;  %v3051_v18 = vrot.slane %v3046_v0, 4 }
 0x5a8   : > { %v2918_v62 = vsel %vm2886_vm12, %v2870_v51, %v2902_v49 }
 0x5a9   : > { %v3050_v22 = vsel %vm13192_vm8, %v13213_v14, %v3049_v16  ;;  %v3059_v53 = vsel %vm13192_vm8, %v3051_v18, %v13197_v55  ;;  %v12063_v36 = vpack.c.bf16 %v2918_v62, %v2918_v62  ;;  %v2753_v27 = vpop.permute.xlu0 %2752  ;;  %v13807_v29 = vld [vmem:[#allocation2 + $0x18] sm:$0xff]   ;;  %v13855_v16 = vld [vmem:[#allocation2 + $0x48] sm:$0xf] }
 0x5aa   : > { %3158 = vst.msk [vmem:[#allocation2 + $0x20] sm:$0xf] %vm172_vm1, %v3050_v22  ;;  %3159 = vst.msk [vmem:[#allocation2 + $0x24] sm:$0xf] %vm172_vm1, %v3059_v53  ;;  %v2790_v60 = vadd.f32 %v2753_v27, %v13661_v1  ;;  %3245 = vrot.lane.b32.xlu0 %v13807_v29, %s12844_s5  ;;  %v4980_v18 = vld [vmem:[#allocation2 + $0x48] sm:$0x1] }
 0x5ab   : > { %v3062_v32 = vshrl.u32 %v12063_v36, 16  ;;  %v3065_v3 = vshll.u32 %v12063_v36, 16  ;;  %v4981_v36 = vsel %vm13287_vm6, %v13213_v14, %v4980_v18 }
 0x5ac   : > { %v2872_v33 = vadd.f32 %v13667_v25, %v2790_v60  ;;  %4982 = vst [vmem:[#allocation2 + $0x48] sm:$0x1] %v4981_v36 }
 0x5ad   : > { %v3064_v34 = vrot.slane %v3062_v32, 7 }
 0x5ae   : > { %vm2888_vm13 = vcmp.ge.f32.partialorder %v2872_v33, 0.0  ;;  %v2904_v6 = vmul.f32 0.2, %v2872_v33 }
 0x5af   : > { %v3067_v15 = vor.u32 %v3065_v3, %v3064_v34  ;;  %v3069_v38 = vrot.slane %v3064_v34, 4  ;;  %v12419_v3 = vld [vmem:[#allocation2] sm:$0xff]  }
 0x5b0   : > { %v2920_v8 = vsel %vm2888_vm13, %v2872_v33, %v2904_v6 }
 0x5b1   : > { %v3068_v9 = vsel %vm13192_vm8, %v13213_v14, %v3067_v15  ;;  %v3077_v1 = vsel %vm13192_vm8, %v3069_v38, %v13197_v55  ;;  %v12065_v20 = vpack.c.bf16 %v2920_v8, %v2920_v8  ;;  %v2757_v43 = vpop.permute.xlu1 %2756  ;;  %v13821_v44 = vld [vmem:[#allocation2 + $0x20] sm:$0xff]  }
 0x5b2   : > { %3160 = vst.msk [vmem:[#allocation2 + $0x28] sm:$0xf] %vm172_vm1, %v3068_v9  ;;  %3161 = vst.msk [vmem:[#allocation2 + $0x2c] sm:$0xf] %vm172_vm1, %v3077_v1  ;;  %v2792_v25 = vadd.f32 %v2757_v43, %v13670_v7  ;;  %3247 = vrot.lane.b32.xlu1 %v13821_v44, %s12844_s5 }
 0x5b3   : > { %v3080_v17 = vshrl.u32 %v12065_v20, 16  ;;  %v3083_v42 = vshll.u32 %v12065_v20, 16 }
 0x5b4   : > { %v2874_v26 = vadd.f32 %v13678_v52, %v2792_v25 }
 0x5b5   : > { %v3082_v63 = vrot.slane %v3080_v17, 7  ;;  %v1446_v23 = vpop.permute.xlu1 %1445 }
 0x5b6   : > { %vm2890_vm14 = vcmp.ge.f32.partialorder %v2874_v26, 0.0  ;;  %v2906_v56 = vmul.f32 0.2, %v2874_v26  ;;  %v1487_v54 = vsel %vm505_vm0, %v11126_v46, %v1446_v23 }
 0x5b7   : > { %v3085_v48 = vor.u32 %v3083_v42, %v3082_v63  ;;  %v3087_v39 = vrot.slane %v3082_v63, 4  ;;  %1768 = vmatmul.mubr.bf16.gmra.mrb[32].mxu1 %v1487_v54 }
 0x5b8   : > { %v2922_v58 = vsel %vm2890_vm14, %v2874_v26, %v2906_v56  ;;  %11351 = vmatprep.mubr.msk.bf16.mxu1 %vm505_vm0, %v13793_v2  ;;  %v3190_v26 = vld [vmem:[#allocation2 + $0x4c] sm:$0xf] }
 0x5b9   : > { %v3086_v7 = vsel %vm13192_vm8, %v13213_v14, %v3085_v48  ;;  %v3095_v52 = vsel %vm13192_vm8, %v3087_v39, %v13197_v55  ;;  %v12067_v19 = vpack.c.bf16 %v2922_v58, %v2922_v58  ;;  %v13838_v40 = vld [vmem:[#allocation2 + $0x28] sm:$0xff]  }
 0x5ba   : > { %3162 = vst.msk [vmem:[#allocation2 + $0x30] sm:$0xf] %vm172_vm1, %v3086_v7  ;;  %3163 = vst.msk [vmem:[#allocation2 + $0x34] sm:$0xf] %vm172_vm1, %v3095_v52  ;;  %3249 = vrot.lane.b32.xlu0 %v13838_v40, %s12844_s5 }
 0x5bb   : > { %v3098_v13 = vshrl.u32 %v12067_v19, 16  ;;  %v3101_v5 = vshll.u32 %v12067_v19, 16 }
 0x5bd   : > { %v2761_v31 = vpop.permute.xlu0 %2760  ;;  %v3100_v4 = vrot.slane %v3098_v13, 7 }
 0x5be   : > { %v2794_v10 = vadd.f32 %v2761_v31, %v13680_v24 }
 0x5bf   : > { %v3103_v30 = vor.u32 %v3101_v5, %v3100_v4  ;;  %v3105_v47 = vrot.slane %v3100_v4, 4 }
 0x5c0   : > { %v2876_v21 = vadd.f32 %v13687_v50, %v2794_v10 }
 0x5c1   : > { %v3104_v37 = vsel %vm13192_vm8, %v13213_v14, %v3103_v30  ;;  %v3113_v41 = vsel %vm13192_vm8, %v3105_v47, %v13197_v55  ;;  %v12380_v51 = vld [vmem:[#allocation2 + $0x30] sm:$0xff]  }
 0x5c2   : > { %vm2892_vm15 = vcmp.ge.f32.partialorder %v2876_v21, 0.0  ;;  %v2908_v11 = vmul.f32 0.2, %v2876_v21  ;;  %3164 = vst.msk [vmem:[#allocation2 + $0x38] sm:$0xf] %vm172_vm1, %v3104_v37  ;;  %3251 = vrot.lane.b32.xlu1 %v12380_v51, %s12844_s5 }
 0x5c3   : > { %3165 = vst.msk [vmem:[#allocation2 + $0x3c] sm:$0xf] %vm172_vm1, %v3113_v41 }
 0x5c4   : > { %v2924_v24 = vsel %vm2892_vm15, %v2876_v21, %v2908_v11 }
 0x5c5   : > { %v12069_v0 = vpack.c.bf16 %v2924_v24, %v2924_v24 }
 0x5c7   : > { %v3116_v50 = vshrl.u32 %v12069_v0, 16  ;;  %v3119_v49 = vshll.u32 %v12069_v0, 16 }
 0x5c9   : > { %v3118_v12 = vrot.slane %v3116_v50, 7 }
 0x5ca   : > { %v12384_v53 = vld [vmem:[#allocation2 + $0x38] sm:$0xff]  }
 0x5cb   : > { %v3121_v62 = vor.u32 %v3119_v49, %v3118_v12  ;;  %v3123_v22 = vrot.slane %v3118_v12, 4  ;;  %3253 = vrot.lane.b32.xlu0 %v12384_v53, %s12844_s5 }
 0x5cd   : > { %v3122_v27 = vsel %vm13192_vm8, %v13213_v14, %v3121_v62  ;;  %v3131_v60 = vsel %vm13192_vm8, %v3123_v22, %v13197_v55 }
 0x5ce   : > { %3166 = vst.msk [vmem:[#allocation2 + $0x40] sm:$0xf] %vm172_vm1, %v3122_v27  ;;  %3167 = vst.msk [vmem:[#allocation2 + $0x44] sm:$0xf] %vm172_vm1, %v3131_v60 }
 0x5d5   : > { %v3187_v32 = vld [vmem:[#allocation2 + $0x40] sm:$0xf]  ;;  %v3188_v33 = vld [vmem:[#allocation2 + $0x44] sm:$0xf] }
 0x5d6   : > { %v11299_v34 = vcombine.low %v3187_v32, %v3188_v33 }
 0x5d8   : > { %3255 = vrot.lane.b32.xlu1 %v11299_v34, %s12844_s5 }
 0x60c   : > { %v3242_v6 = vpop.permute.xlu0 %3241 }
 0x60d   : > { %v3267_v15 = vsel %vm505_vm0, %v12419_v3, %v3242_v6 }
 0x60e   : > { %3500 = vmatmul.mubr.bf16.vlgmr.msra.gmra.mrb[36].mxu1 %v3267_v15 }
 0x60f   : > { %11352 = vmatprep.mubr.msk.bf16.mxu1 %vm505_vm0, %v13807_v29 }
 0x614   : > { %v3244_v38 = vpop.permute.xlu1 %3243 }
 0x615   : > { %v3271_v8 = vsel %vm505_vm0, %v13779_v57, %v3244_v38 }
 0x616   : > { %3510 = vmatmul.mubr.bf16.gmra.mrb[40].mxu1 %v3271_v8 }
 0x617   : > { %11353 = vmatprep.mubr.msk.bf16.mxu1 %vm505_vm0, %v13821_v44 }
 0x61c   : > { %v3246_v9 = vpop.permute.xlu0 %3245 }
 0x61d   : > { %v3275_v1 = vsel %vm505_vm0, %v13793_v2, %v3246_v9 }
 0x61e   : > { %3520 = vmatmul.mubr.bf16.gmra.mrb[44].mxu1 %v3275_v1 }
 0x61f   : > { %11354 = vmatprep.mubr.msk.bf16.mxu1 %vm505_vm0, %v13838_v40 }
 0x624   : > { %v3248_v20 = vpop.permute.xlu1 %3247 }
 0x625   : > { %v3279_v43 = vsel %vm505_vm0, %v13807_v29, %v3248_v20  ;;  %v11301_v29 = vcombine.low %v13855_v16, %v3190_v26 }
 0x626   : > { %3530 = vmatmul.mubr.bf16.gmra.mrb[48].mxu1 %v3279_v43 }
 0x627   : > { %11355 = vmatprep.mubr.msk.bf16.mxu1 %vm505_vm0, %v12380_v51 }
 0x62c   : > { %v3250_v57 = vpop.permute.xlu0 %3249 }
 0x62d   : > { %v3283_v25 = vsel %vm505_vm0, %v13821_v44, %v3250_v57 }
 0x62e   : > { %3540 = vmatmul.mubr.bf16.gmra.mrb[52].mxu1 %v3283_v25 }
 0x62f   : > { %11356 = vmatprep.mubr.msk.bf16.mxu1 %vm505_vm0, %v12384_v53 }
 0x634   : > { %v3252_v17 = vpop.permute.xlu1 %3251 }
 0x635   : > { %v3287_v2 = vsel %vm505_vm0, %v13838_v40, %v3252_v17 }
 0x636   : > { %3550 = vmatmul.mubr.bf16.gmra.mrb[56].mxu1 %v3287_v2 }
 0x637   : > { %11357 = vmatprep.mubr.msk.bf16.mxu1 %vm505_vm0, %v11299_v34 }
 0x63d   : > { %v3254_v45 = vpop.permute.xlu0 %3253 }
 0x63e   : > { %v3291_v46 = vsel %vm505_vm0, %v12380_v51, %v3254_v45 }
 0x63f   : > { %3560 = vmatmul.mubr.bf16.gmra.mrb[60].mxu1 %v3291_v46 }
 0x640   : > { %11358 = vmatprep.mubr.msk.bf16.mxu1 %vm505_vm0, %v11301_v29 }
 0x64a   : > { %v3256_v44 = vpop.permute.xlu1 %3255 }
 0x64b   : > { %v3295_v63 = vsel %vm505_vm0, %v12384_v53, %v3256_v44 }
 0x64c   : > { %3570 = vmatmul.mubr.bf16.gmra.mrb[64].mxu1 %v3295_v63 }
 0x68a   : > { %v1769_v42 = vpop.f32.mrb[32].mxu1 }
 0x68b   : > { %v1771_v23 = vpop.f32.mrb[33].mxu1 }
 0x68c   : > { %v1773_v56 = vpop.f32.mrb[34].mxu1 }
 0x68d   : > { %v1774_v54 = vpop.f32.mrb[35].mxu1 }
 0x6e1   : > { %v13894_v48 = vpop.f32.mrb[36].mxu1 }
 0x6e2   : > { %v3503_v39 = vpop.f32.mrb[37].mxu1  ;;  %v3605_v7 = vrot.slane %v13894_v48, 1 }
 0x6e3   : > { %v3505_v58 = vpop.f32.mrb[38].mxu1  ;;  %v3719_v40 = vrot.slane %v3503_v39, 2 }
 0x6e4   : > { %v3606_v52 = vrot.slane %v3505_v58, 1  ;;  %v3507_v19 = vpop.f32.mrb[39].mxu1  ;;  %v12425_v58 = vld [vmem:[#allocation2 + $0xa4] ss:$0 sps:$4 sm:$0xff]  }
 0x6e5   : > { %v3720_v13 = vrot.slane %v3507_v19, 2  ;;  %11273 = vmatprep.mubr.msk.bf16.mxu0 %vm505_vm0, %v12425_v58  ;;  %v12463_v58 = vld [vmem:[%s16294_s1 + $0x3b0] ss:$8 sps:$4 sm:$0xff]  }
 0x6e6   : > { %v3607_v31 = vsel %vm845_vm2, %v3605_v7, %v3606_v52 }
 0x6e7   : > { %3638 = vrot.lane.b32.xlu0 %v3607_v31, %s12844_s5  ;;  %v13900_v10 = vsel %vm960_vm3, %v3719_v40, %v3720_v13 }
 0x6e9   : > { %v13902_v4 = vpop.f32.mrb[40].mxu1 }
 0x6ea   : > { %v3513_v5 = vpop.f32.mrb[41].mxu1  ;;  %v3608_v30 = vrot.slane %v13902_v4, 1 }
 0x6eb   : > { %v3515_v21 = vpop.f32.mrb[42].mxu1  ;;  %v3722_v37 = vrot.slane %v3513_v5, 2 }
 0x6ec   : > { %v3610_v47 = vrot.slane %v3515_v21, 1  ;;  %v3517_v11 = vpop.f32.mrb[43].mxu1 }
 0x6ed   : > { %v3724_v41 = vrot.slane %v3517_v11, 2 }
 0x6ee   : > { %v3611_v51 = vsel %vm845_vm2, %v3608_v30, %v3610_v47 }
 0x6ef   : > { %3642 = vrot.lane.b32.xlu1 %v3611_v51, %s12844_s5  ;;  %v13908_v24 = vsel %vm960_vm3, %v3722_v37, %v3724_v41  ;;  %v11214_v37 = vcombine.low %v13582_v35, %v13582_v35 }
 0x6f1   : > { %v13910_v0 = vpop.f32.mrb[44].mxu1 }
 0x6f2   : > { %v3523_v50 = vpop.f32.mrb[45].mxu1  ;;  %v3612_v49 = vrot.slane %v13910_v0, 1 }
 0x6f3   : > { %v3525_v12 = vpop.f32.mrb[46].mxu1  ;;  %v3726_v22 = vrot.slane %v3523_v50, 2 }
 0x6f4   : > { %v3614_v18 = vrot.slane %v3525_v12, 1  ;;  %v3527_v62 = vpop.f32.mrb[47].mxu1 }
 0x6f5   : > { %v3728_v53 = vrot.slane %v3527_v62, 2 }
 0x6f6   : > { %v3615_v36 = vsel %vm845_vm2, %v3612_v49, %v3614_v18 }
 0x6f7   : > { %3646 = vrot.lane.b32.xlu0 %v3615_v36, %s12844_s5  ;;  %v13916_v27 = vsel %vm960_vm3, %v3726_v22, %v3728_v53 }
 0x6f9   : > { %v13918_v60 = vpop.f32.mrb[48].mxu1 }
 0x6fa   : > { %v3533_v32 = vpop.f32.mrb[49].mxu1  ;;  %v3616_v34 = vrot.slane %v13918_v60, 1 }
 0x6fb   : > { %v3535_v33 = vpop.f32.mrb[50].mxu1  ;;  %v3730_v15 = vrot.slane %v3533_v32, 2  ;;  %v12428_v32 = vld [vmem:[%s16294_s1 + $0x300] ss:$8 sps:$4 sm:$0xff]  }
 0x6fc   : > { %v3618_v3 = vrot.slane %v3535_v33, 1  ;;  %v3537_v6 = vpop.f32.mrb[51].mxu1  ;;  %v12430_v33 = vld [vmem:[%s16294_s1 + $0x304] ss:$8 sps:$4 sm:$0xff]  }
 0x6fd   : > { %v3732_v38 = vrot.slane %v3537_v6, 2  ;;  %4373 = vmatprep.subr.bf16.mxu0 %v12430_v33  ;;  %v12437_v6 = vld [vmem:[%s16294_s1 + $0x324] ss:$8 sps:$4 sm:$0xff]  }
 0x6fe   : > { %v3619_v8 = vsel %vm845_vm2, %v3616_v34, %v3618_v3  ;;  %v12434_v34 = vld [vmem:[%s16294_s1 + $0x314] ss:$8 sps:$4 sm:$0xff]   ;;  %4374 = vmatpush1.bf16.msra.mxu0 %v12428_v32  ;;  %v12432_v3 = vld [vmem:[%s16294_s1 + $0x310] ss:$8 sps:$4 sm:$0xff]  }
 0x6ff   : > { %3650 = vrot.lane.b32.xlu1 %v3619_v8, %s12844_s5  ;;  %v13924_v9 = vsel %vm960_vm3, %v3730_v15, %v3732_v38  ;;  %4375 = vmatprep.subr.bf16.mxu0 %v12434_v34  ;;  %v12435_v15 = vld [vmem:[%s16294_s1 + $0x320] ss:$8 sps:$4 sm:$0xff]   ;;  %v12441_v38 = vld [vmem:[%s16294_s1 + $0x334] ss:$8 sps:$4 sm:$0xff]   ;;  %v12439_v8 = vld [vmem:[%s16294_s1 + $0x330] ss:$8 sps:$4 sm:$0xff]  }
 0x701   : > { %v13926_v1 = vpop.f32.mrb[52].mxu1 }
 0x702   : > { %v3543_v20 = vpop.f32.mrb[53].mxu1  ;;  %v3620_v57 = vrot.slane %v13926_v1, 1  ;;  %4376 = vmatpush1.bf16.msra.mxu0 %v12432_v3 }
 0x703   : > { %v3545_v43 = vpop.f32.mrb[54].mxu1  ;;  %v3734_v2 = vrot.slane %v3543_v20, 2  ;;  %4377 = vmatprep.subr.bf16.mxu0 %v12437_v6  ;;  %v12444_v20 = vld [vmem:[%s16294_s1 + $0x344] ss:$8 sps:$4 sm:$0xff]  }
 0x704   : > { %v3622_v25 = vrot.slane %v3545_v43, 1  ;;  %v3547_v17 = vpop.f32.mrb[55].mxu1  ;;  %v12442_v43 = vld [vmem:[%s16294_s1 + $0x340] ss:$8 sps:$4 sm:$0xff]  }
 0x705   : > { %v3736_v26 = vrot.slane %v3547_v17, 2  ;;  %v12450_v17 = vld [vmem:[%s16294_s1 + $0x364] ss:$8 sps:$4 sm:$0xff]  }
 0x706   : > { %v3623_v29 = vsel %vm845_vm2, %v3620_v57, %v3622_v25  ;;  %4378 = vmatpush1.bf16.msra.mxu0 %v12435_v15  ;;  %v12447_v57 = vld [vmem:[%s16294_s1 + $0x354] ss:$8 sps:$4 sm:$0xff]   ;;  %v12445_v25 = vld [vmem:[%s16294_s1 + $0x350] ss:$8 sps:$4 sm:$0xff]  }
 0x707   : > { %3654 = vrot.lane.b32.xlu0 %v3623_v29, %s12844_s5  ;;  %v13932_v45 = vsel %vm960_vm3, %v3734_v2, %v3736_v26  ;;  %4379 = vmatprep.subr.bf16.mxu0 %v12441_v38  ;;  %v12448_v2 = vld [vmem:[%s16294_s1 + $0x360] ss:$8 sps:$4 sm:$0xff]   ;;  %v12453_v26 = vld [vmem:[%s16294_s1 + $0x374] ss:$8 sps:$4 sm:$0xff]   ;;  %v12451_v29 = vld [vmem:[%s16294_s1 + $0x370] ss:$8 sps:$4 sm:$0xff]  }
 0x709   : > { %v13934_v46 = vpop.f32.mrb[56].mxu1 }
 0x70a   : > { %v3553_v44 = vpop.f32.mrb[57].mxu1  ;;  %v3624_v42 = vrot.slane %v13934_v46, 1  ;;  %4380 = vmatpush1.bf16.msra.mxu0 %v12439_v8 }
 0x70b   : > { %v3555_v63 = vpop.f32.mrb[58].mxu1  ;;  %v3738_v54 = vrot.slane %v3553_v44, 2  ;;  %4381 = vmatprep.subr.bf16.mxu0 %v12444_v20  ;;  %v12456_v44 = vld [vmem:[%s16294_s1 + $0x384] ss:$8 sps:$4 sm:$0xff]  }
 0x70c   : > { %v3626_v23 = vrot.slane %v3555_v63, 1  ;;  %v3557_v56 = vpop.f32.mrb[59].mxu1  ;;  %v12454_v63 = vld [vmem:[%s16294_s1 + $0x380] ss:$8 sps:$4 sm:$0xff]  }
 0x70d   : > { %v3740_v39 = vrot.slane %v3557_v56, 2  ;;  %v12462_v56 = vld [vmem:[%s16294_s1 + $0x3a4] ss:$8 sps:$4 sm:$0xff]  }
 0x70e   : > { %v3627_v7 = vsel %vm845_vm2, %v3624_v42, %v3626_v23  ;;  %4382 = vmatpush1.bf16.msra.mxu0 %v12442_v43  ;;  %v12459_v42 = vld [vmem:[%s16294_s1 + $0x394] ss:$8 sps:$4 sm:$0xff]   ;;  %v12457_v23 = vld [vmem:[%s16294_s1 + $0x390] ss:$8 sps:$4 sm:$0xff]  }
 0x70f   : > { %3658 = vrot.lane.b32.xlu1 %v3627_v7, %s12844_s5  ;;  %v13940_v52 = vsel %vm960_vm3, %v3738_v54, %v3740_v39  ;;  %4383 = vmatprep.subr.bf16.mxu0 %v12447_v57  ;;  %v12460_v54 = vld [vmem:[%s16294_s1 + $0x3a0] ss:$8 sps:$4 sm:$0xff]   ;;  %v12465_v39 = vld [vmem:[%s16294_s1 + $0x3b4] ss:$8 sps:$4 sm:$0xff]  }
 0x712   : > { %v13943_v19 = vpop.f32.mrb[60].mxu1  ;;  %4384 = vmatpush1.bf16.msra.mxu0 %v12445_v25 }
 0x713   : > { %v3563_v40 = vpop.f32.mrb[61].mxu1  ;;  %v3628_v31 = vrot.slane %v13943_v19, 1  ;;  %4385 = vmatprep.subr.bf16.mxu0 %v12450_v17 }
 0x714   : > { %v3565_v13 = vpop.f32.mrb[62].mxu1  ;;  %v3742_v30 = vrot.slane %v3563_v40, 2 }
 0x715   : > { %v3630_v5 = vrot.slane %v3565_v13, 1  ;;  %v3567_v21 = vpop.f32.mrb[63].mxu1 }
 0x716   : > { %v3744_v47 = vrot.slane %v3567_v21, 2  ;;  %4386 = vmatpush1.bf16.msra.mxu0 %v12448_v2 }
 0x717   : > { %v3631_v11 = vsel %vm845_vm2, %v3628_v31, %v3630_v5  ;;  %4387 = vmatprep.subr.bf16.mxu0 %v12453_v26 }
 0x718   : > { %3662 = vrot.lane.b32.xlu0 %v3631_v11, %s12844_s5  ;;  %v13951_v41 = vsel %vm960_vm3, %v3742_v30, %v3744_v47 }
 0x71a   : > { %4388 = vmatpush1.bf16.msra.mxu0 %v12451_v29 }
 0x71b   : > { %4389 = vmatprep.subr.bf16.mxu0 %v12456_v44 }
 0x71c   : > { %2351 = vrot.lane.b32.xlu0 %v11214_v37, %s12844_s5 }
 0x71e   : > { %4390 = vmatpush1.bf16.msra.mxu0 %v12454_v63 }
 0x71f   : > { %v13954_v51 = vpop.f32.mrb[64].mxu1  ;;  %4391 = vmatprep.subr.bf16.mxu0 %v12459_v42 }
 0x720   : > { %v3573_v50 = vpop.f32.mrb[65].mxu1  ;;  %v3632_v49 = vrot.slane %v13954_v51, 1 }
 0x721   : > { %v3575_v12 = vpop.f32.mrb[66].mxu1  ;;  %v3746_v22 = vrot.slane %v3573_v50, 2 }
 0x722   : > { %v3634_v18 = vrot.slane %v3575_v12, 1  ;;  %v3577_v62 = vpop.f32.mrb[67].mxu1  ;;  %4392 = vmatpush1.bf16.msra.mxu0 %v12457_v23 }
 0x723   : > { %v3748_v53 = vrot.slane %v3577_v62, 2  ;;  %4393 = vmatprep.subr.bf16.mxu0 %v12462_v56 }
 0x724   : > { %v3635_v36 = vsel %vm845_vm2, %v3632_v49, %v3634_v18 }
 0x725   : > { %3666 = vrot.lane.b32.xlu1 %v3635_v36, %s12844_s5  ;;  %v13960_v35 = vsel %vm960_vm3, %v3746_v22, %v3748_v53  ;;  %v4056_v22 = vld [vmem:[#allocation2 + $0x5c] sm:$0xf] }
 0x726   : > { %4394 = vmatpush1.bf16.msra.mxu0 %v12460_v54 }
 0x727   : > { %4395 = vmatprep.subr.bf16.mxu0 %v12465_v39 }
 0x72a   : > { %4396 = vmatpush1.bf16.msra.mxu0 %v12463_v58 }
 0x759   : > { %v3639_v7 = vpop.permute.xlu0 %3638 }
 0x75a   : > { %v3686_v40 = vadd.f32 %v3639_v7, %v13894_v48 }
 0x75c   : > { %v3768_v13 = vadd.f32 %v13900_v10, %v3686_v40 }
 0x75e   : > { %vm3784_vm4 = vcmp.ge.f32.partialorder %v3768_v13, 0.0  ;;  %v3800_v31 = vmul.f32 0.2, %v3768_v13 }
 0x760   : > { %v3816_v5 = vsel %vm3784_vm4, %v3768_v13, %v3800_v31 }
 0x761   : > { %v12071_v21 = vpack.c.bf16 %v3816_v5, %v3816_v5  ;;  %v3643_v30 = vpop.permute.xlu1 %3642 }
 0x762   : > { %v3688_v47 = vadd.f32 %v3643_v30, %v13902_v4 }
 0x763   : > { %v3897_v11 = vshrl.u32 %v12071_v21, 16  ;;  %v3900_v12 = vshll.u32 %v12071_v21, 16 }
 0x764   : > { %v3770_v37 = vadd.f32 %v13908_v24, %v3688_v47 }
 0x765   : > { %v3899_v50 = vrot.slane %v3897_v11, 7 }
 0x766   : > { %vm3786_vm7 = vcmp.ge.f32.partialorder %v3770_v37, 0.0  ;;  %v3802_v49 = vmul.f32 0.2, %v3770_v37 }
 0x767   : > { %v3902_v18 = vor.u32 %v3900_v12, %v3899_v50  ;;  %v3903_v62 = vrot.slane %v3899_v50, 4 }
 0x768   : > { %v3818_v48 = vsel %vm3786_vm7, %v3770_v37, %v3802_v49 }
 0x769   : > { %v3911_v10 = vsel %vm13192_vm8, %v3903_v62, %v13197_v55  ;;  %v4057_v53 = vsel %vm13200_vm9, %v3902_v18, %v4056_v22  ;;  %v12073_v36 = vpack.c.bf16 %v3818_v48, %v3818_v48  ;;  %v3647_v4 = vpop.permute.xlu0 %3646 }
 0x76a   : > { %4058 = vst [vmem:[#allocation2 + $0x5c] sm:$0xf] %v4057_v53  ;;  %4059 = vst.msk [vmem:[#allocation2 + $0x60] sm:$0xf] %vm172_vm1, %v3911_v10  ;;  %v3690_v24 = vadd.f32 %v3647_v4, %v13910_v0 }
 0x76b   : > { %v3914_v32 = vshrl.u32 %v12073_v36, 16  ;;  %v3917_v3 = vshll.u32 %v12073_v36, 16 }
 0x76c   : > { %v3772_v33 = vadd.f32 %v13916_v27, %v3690_v24 }
 0x76d   : > { %v3916_v34 = vrot.slane %v3914_v32, 7 }
 0x76e   : > { %vm3788_vm5 = vcmp.ge.f32.partialorder %v3772_v33, 0.0  ;;  %v3804_v6 = vmul.f32 0.2, %v3772_v33 }
 0x76f   : > { %v3919_v15 = vor.u32 %v3917_v3, %v3916_v34  ;;  %v3921_v38 = vrot.slane %v3916_v34, 4 }
 0x770   : > { %v3820_v8 = vsel %vm3788_vm5, %v3772_v33, %v3804_v6  ;;  %v12829_v6 = vld [vmem:[#allocation2 + $0x94] sm:$0xf] }
 0x771   : > { %v3920_v20 = vsel %vm13192_vm8, %v13213_v14, %v3919_v15  ;;  %v3929_v43 = vsel %vm13192_vm8, %v3921_v38, %v13197_v55  ;;  %v12075_v57 = vpack.c.bf16 %v3820_v8, %v3820_v8  ;;  %v3651_v0 = vpop.permute.xlu1 %3650  ;;  %v14052_v25 = vld [vmem:[#allocation2 + $0x5c] sm:$0xff]   ;;  %v11212_v15 = vcombine.low %v12829_v6, %v12829_v6 }
 0x772   : > { %4060 = vst.msk [vmem:[#allocation2 + $0x64] sm:$0xf] %vm172_vm1, %v3920_v20  ;;  %4061 = vst.msk [vmem:[#allocation2 + $0x68] sm:$0xf] %vm172_vm1, %v3929_v43  ;;  %v3692_v27 = vadd.f32 %v3651_v0, %v13918_v60  ;;  %4147 = vrot.lane.b32.xlu1 %v14052_v25, %s12844_s5 }
 0x773   : > { %v3932_v17 = vshrl.u32 %v12075_v57, 16  ;;  %v3935_v29 = vshll.u32 %v12075_v57, 16 }
 0x774   : > { %v3774_v2 = vadd.f32 %v13924_v9, %v3692_v27 }
 0x775   : > { %v3934_v26 = vrot.slane %v3932_v17, 7 }
 0x776   : > { %vm3790_vm10 = vcmp.ge.f32.partialorder %v3774_v2, 0.0  ;;  %v3806_v44 = vmul.f32 0.2, %v3774_v2 }
 0x777   : > { %v3937_v63 = vor.u32 %v3935_v29, %v3934_v26  ;;  %v3939_v42 = vrot.slane %v3934_v26, 4 }
 0x778   : > { %v3822_v23 = vsel %vm3790_vm10, %v3774_v2, %v3806_v44 }
 0x779   : > { %v3938_v56 = vsel %vm13192_vm8, %v13213_v14, %v3937_v63  ;;  %v3947_v60 = vsel %vm13192_vm8, %v3939_v42, %v13197_v55  ;;  %v12077_v54 = vpack.c.bf16 %v3822_v23, %v3822_v23  ;;  %v3655_v39 = vpop.permute.xlu0 %3654  ;;  %v14066_v58 = vld [vmem:[#allocation2 + $0x64] sm:$0xff]  }
 0x77a   : > { %4062 = vst.msk [vmem:[#allocation2 + $0x6c] sm:$0xf] %vm172_vm1, %v3938_v56  ;;  %4063 = vst.msk [vmem:[#allocation2 + $0x70] sm:$0xf] %vm172_vm1, %v3947_v60  ;;  %v3694_v9 = vadd.f32 %v3655_v39, %v13926_v1  ;;  %4149 = vrot.lane.b32.xlu0 %v14066_v58, %s12844_s5 }
 0x77b   : > { %v3950_v7 = vshrl.u32 %v12077_v54, 16  ;;  %v3953_v31 = vshll.u32 %v12077_v54, 16 }
 0x77c   : > { %v3776_v40 = vadd.f32 %v13932_v45, %v3694_v9 }
 0x77d   : > { %v3952_v13 = vrot.slane %v3950_v7, 7 }
 0x77e   : > { %vm3792_vm11 = vcmp.ge.f32.partialorder %v3776_v40, 0.0  ;;  %v3808_v5 = vmul.f32 0.2, %v3776_v40 }
 0x77f   : > { %v3955_v21 = vor.u32 %v3953_v31, %v3952_v13  ;;  %v3957_v30 = vrot.slane %v3952_v13, 4 }
 0x780   : > { %v3824_v47 = vsel %vm3792_vm11, %v3776_v40, %v3808_v5 }
 0x781   : > { %v3956_v11 = vsel %vm13192_vm8, %v13213_v14, %v3955_v21  ;;  %v3965_v1 = vsel %vm13192_vm8, %v3957_v30, %v13197_v55  ;;  %v12079_v37 = vpack.c.bf16 %v3824_v47, %v3824_v47  ;;  %v3659_v50 = vpop.permute.xlu1 %3658  ;;  %v14080_v12 = vld [vmem:[#allocation2 + $0x6c] sm:$0xff]  }
 0x782   : > { %4064 = vst.msk [vmem:[#allocation2 + $0x74] sm:$0xf] %vm172_vm1, %v3956_v11  ;;  %4065 = vst.msk [vmem:[#allocation2 + $0x78] sm:$0xf] %vm172_vm1, %v3965_v1  ;;  %v3696_v45 = vadd.f32 %v3659_v50, %v13934_v46  ;;  %4151 = vrot.lane.b32.xlu1 %v14080_v12, %s12844_s5  ;;  %v5886_v11 = vld [vmem:[#allocation2 + $0x9c] sm:$0x1] }
 0x783   : > { %v3968_v49 = vshrl.u32 %v12079_v37, 16  ;;  %v3971_v22 = vshll.u32 %v12079_v37, 16  ;;  %v14129_v1 = vld [vmem:[#allocation2 + $0x9c] sm:$0xf]  ;;  %v5887_v37 = vsel %vm13287_vm6, %v13213_v14, %v5886_v11 }
 0x784   : > { %v3778_v18 = vadd.f32 %v13940_v52, %v3696_v45  ;;  %5888 = vst [vmem:[#allocation2 + $0x9c] sm:$0x1] %v5887_v37 }
 0x785   : > { %v3970_v62 = vrot.slane %v3968_v49, 7 }
 0x786   : > { %vm3794_vm12 = vcmp.ge.f32.partialorder %v3778_v18, 0.0  ;;  %v3810_v48 = vmul.f32 0.2, %v3778_v18 }
 0x787   : > { %v3973_v10 = vor.u32 %v3971_v22, %v3970_v62  ;;  %v3975_v53 = vrot.slane %v3970_v62, 4  ;;  %v12466_v22 = vld [vmem:[#allocation2 + $0x54] sm:$0xff]  }
 0x788   : > { %v3826_v36 = vsel %vm3794_vm12, %v3778_v18, %v3810_v48 }
 0x789   : > { %v3974_v4 = vsel %vm13192_vm8, %v13213_v14, %v3973_v10  ;;  %v3983_v46 = vsel %vm13192_vm8, %v3975_v53, %v13197_v55  ;;  %v12081_v24 = vpack.c.bf16 %v3826_v36, %v3826_v36  ;;  %v14094_v33 = vld [vmem:[#allocation2 + $0x74] sm:$0xff]  }
 0x78a   : > { %v3663_v32 = vpop.permute.xlu0 %3662  ;;  %4066 = vst.msk [vmem:[#allocation2 + $0x7c] sm:$0xf] %vm172_vm1, %v3974_v4  ;;  %4067 = vst.msk [vmem:[#allocation2 + $0x80] sm:$0xf] %vm172_vm1, %v3983_v46  ;;  %4153 = vrot.lane.b32.xlu0 %v14094_v33, %s12844_s5 }
 0x78b   : > { %v3698_v52 = vadd.f32 %v3663_v32, %v13943_v19  ;;  %v3986_v34 = vshrl.u32 %v12081_v24, 16  ;;  %v3989_v8 = vshll.u32 %v12081_v24, 16 }
 0x78d   : > { %v3780_v3 = vadd.f32 %v13951_v41, %v3698_v52  ;;  %v3988_v38 = vrot.slane %v3986_v34, 7 }
 0x78e   : > { %v2352_v20 = vpop.permute.xlu0 %2351 }
 0x78f   : > { %vm3796_vm13 = vcmp.ge.f32.partialorder %v3780_v3, 0.0  ;;  %v3812_v43 = vmul.f32 0.2, %v3780_v3  ;;  %v2393_v57 = vsel %vm505_vm0, %v11212_v15, %v2352_v20  ;;  %v3991_v0 = vor.u32 %v3989_v8, %v3988_v38 }
 0x790   : > { %v3993_v27 = vrot.slane %v3988_v38, 4  ;;  %2674 = vmatmul.mubr.bf16.gmra.mrb[68].mxu0 %v2393_v57 }
 0x791   : > { %v3828_v17 = vsel %vm3796_vm13, %v3780_v3, %v3812_v43  ;;  %11437 = vmatprep.mubr.msk.bf16.mxu0 %vm505_vm0, %v14066_v58  ;;  %v3992_v19 = vsel %vm13192_vm8, %v13213_v14, %v3991_v0  ;;  %v14111_v26 = vld [vmem:[#allocation2 + $0x7c] sm:$0xff]  }
 0x792   : > { %v4001_v41 = vsel %vm13192_vm8, %v3993_v27, %v13197_v55  ;;  %v12083_v2 = vpack.c.bf16 %v3828_v17, %v3828_v17  ;;  %4068 = vst.msk [vmem:[#allocation2 + $0x84] sm:$0xf] %vm172_vm1, %v3992_v19  ;;  %4155 = vrot.lane.b32.xlu1 %v14111_v26, %s12844_s5  ;;  %v4096_v3 = vld [vmem:[#allocation2 + $0xa0] sm:$0xf] }
 0x793   : > { %4069 = vst.msk [vmem:[#allocation2 + $0x88] sm:$0xf] %vm172_vm1, %v4001_v41 }
 0x794   : > { %v4004_v29 = vshrl.u32 %v12083_v2, 16  ;;  %v4007_v42 = vshll.u32 %v12083_v2, 16 }
 0x796   : > { %v4006_v63 = vrot.slane %v4004_v29, 7 }
 0x797   : > { %v3667_v44 = vpop.permute.xlu1 %3666 }
 0x798   : > { %v3700_v23 = vadd.f32 %v3667_v44, %v13954_v51  ;;  %v4009_v56 = vor.u32 %v4007_v42, %v4006_v63  ;;  %v4011_v60 = vrot.slane %v4006_v63, 4 }
 0x79a   : > { %v3782_v54 = vadd.f32 %v13960_v35, %v3700_v23  ;;  %v4010_v39 = vsel %vm13192_vm8, %v13213_v14, %v4009_v56  ;;  %v4019_v9 = vsel %vm13192_vm8, %v4011_v60, %v13197_v55  ;;  %v12427_v40 = vld [vmem:[#allocation2 + $0x84] sm:$0xff]  }
 0x79b   : > { %4070 = vst.msk [vmem:[#allocation2 + $0x8c] sm:$0xf] %vm172_vm1, %v4010_v39  ;;  %4071 = vst.msk [vmem:[#allocation2 + $0x90] sm:$0xf] %vm172_vm1, %v4019_v9  ;;  %4157 = vrot.lane.b32.xlu0 %v12427_v40, %s12844_s5 }
 0x79c   : > { %vm3798_vm14 = vcmp.ge.f32.partialorder %v3782_v54, 0.0  ;;  %v3814_v7 = vmul.f32 0.2, %v3782_v54 }
 0x79e   : > { %v3830_v51 = vsel %vm3798_vm14, %v3782_v54, %v3814_v7 }
 0x79f   : > { %v12085_v13 = vpack.c.bf16 %v3830_v51, %v3830_v51 }
 0x7a1   : > { %v4022_v35 = vshrl.u32 %v12085_v13, 16  ;;  %v4025_v5 = vshll.u32 %v12085_v13, 16 }
 0x7a2   : > { %v12431_v21 = vld [vmem:[#allocation2 + $0x8c] sm:$0xff]  }
 0x7a3   : > { %v4024_v31 = vrot.slane %v4022_v35, 7  ;;  %4159 = vrot.lane.b32.xlu1 %v12431_v21, %s12844_s5 }
 0x7a5   : > { %v4027_v30 = vor.u32 %v4025_v5, %v4024_v31  ;;  %v4029_v47 = vrot.slane %v4024_v31, 4 }
 0x7a7   : > { %v4028_v50 = vsel %vm13192_vm8, %v13213_v14, %v4027_v30  ;;  %v4037_v45 = vsel %vm13192_vm8, %v4029_v47, %v13197_v55 }
 0x7a8   : > { %4072 = vst.msk [vmem:[#allocation2 + $0x94] sm:$0xf] %vm172_vm1, %v4028_v50  ;;  %4073 = vst.msk [vmem:[#allocation2 + $0x98] sm:$0xf] %vm172_vm1, %v4037_v45 }
 0x7af   : > { %v4093_v49 = vld [vmem:[#allocation2 + $0x94] sm:$0xf]  ;;  %v4094_v18 = vld [vmem:[#allocation2 + $0x98] sm:$0xf] }
 0x7b0   : > { %v11385_v62 = vcombine.low %v4093_v49, %v4094_v18 }
 0x7b2   : > { %4161 = vrot.lane.b32.xlu0 %v11385_v62, %s12844_s5 }
 0x7e4   : > { %v4148_v48 = vpop.permute.xlu1 %4147 }
 0x7e5   : > { %v4173_v10 = vsel %vm505_vm0, %v12466_v22, %v4148_v48 }
 0x7e6   : > { %4406 = vmatmul.mubr.bf16.vlgmr.msra.gmra.mrb[72].mxu0 %v4173_v10 }
 0x7e7   : > { %11438 = vmatprep.mubr.msk.bf16.mxu0 %vm505_vm0, %v14080_v12 }
 0x7ec   : > { %v4150_v53 = vpop.permute.xlu0 %4149 }
 0x7ed   : > { %v4177_v36 = vsel %vm505_vm0, %v14052_v25, %v4150_v53 }
 0x7ee   : > { %4416 = vmatmul.mubr.bf16.gmra.mrb[76].mxu0 %v4177_v36 }
 0x7ef   : > { %11439 = vmatprep.mubr.msk.bf16.mxu0 %vm505_vm0, %v14094_v33 }
 0x7f4   : > { %v4152_v4 = vpop.permute.xlu1 %4151 }
 0x7f5   : > { %v4181_v46 = vsel %vm505_vm0, %v14066_v58, %v4152_v4 }
 0x7f6   : > { %4426 = vmatmul.mubr.bf16.gmra.mrb[80].mxu0 %v4181_v46 }
 0x7f7   : > { %11440 = vmatprep.mubr.msk.bf16.mxu0 %vm505_vm0, %v14111_v26 }
 0x7fc   : > { %v4154_v24 = vpop.permute.xlu0 %4153 }
 0x7fd   : > { %v4185_v32 = vsel %vm505_vm0, %v14080_v12, %v4154_v24  ;;  %v11387_v12 = vcombine.low %v14129_v1, %v4096_v3 }
 0x7fe   : > { %4436 = vmatmul.mubr.bf16.gmra.mrb[84].mxu0 %v4185_v32 }
 0x7ff   : > { %11441 = vmatprep.mubr.msk.bf16.mxu0 %vm505_vm0, %v12427_v40 }
 0x804   : > { %v4156_v25 = vpop.permute.xlu1 %4155 }
 0x805   : > { %v4189_v52 = vsel %vm505_vm0, %v14094_v33, %v4156_v25 }
 0x806   : > { %4446 = vmatmul.mubr.bf16.gmra.mrb[88].mxu0 %v4189_v52 }
 0x807   : > { %11442 = vmatprep.mubr.msk.bf16.mxu0 %vm505_vm0, %v12431_v21 }
 0x80d   : > { %v4158_v34 = vpop.permute.xlu0 %4157 }
 0x80e   : > { %v4193_v58 = vsel %vm505_vm0, %v14111_v26, %v4158_v34 }
 0x80f   : > { %4456 = vmatmul.mubr.bf16.gmra.mrb[92].mxu0 %v4193_v58 }
 0x810   : > { %11443 = vmatprep.mubr.msk.bf16.mxu0 %vm505_vm0, %v11385_v62 }
 0x815   : > { %v4160_v6 = vpop.permute.xlu1 %4159 }
 0x816   : > { %v4197_v15 = vsel %vm505_vm0, %v12427_v40, %v4160_v6 }
 0x817   : > { %4466 = vmatmul.mubr.bf16.gmra.mrb[96].mxu0 %v4197_v15 }
 0x818   : > { %11444 = vmatprep.mubr.msk.bf16.mxu0 %vm505_vm0, %v11387_v12 }
 0x824   : > { %v4162_v33 = vpop.permute.xlu0 %4161 }
 0x825   : > { %v4201_v38 = vsel %vm505_vm0, %v12431_v21, %v4162_v33 }
 0x826   : > { %4476 = vmatmul.mubr.bf16.gmra.mrb[100].mxu0 %v4201_v38 }
 0x863   : > { %v2675_v8 = vpop.f32.mrb[68].mxu0 }
 0x864   : > { %v2677_v20 = vpop.f32.mrb[69].mxu0 }
 0x865   : > { %v2679_v43 = vpop.f32.mrb[70].mxu0 }
 0x866   : > { %v2680_v57 = vpop.f32.mrb[71].mxu0 }
 0x8b9   : > { %v14167_v0 = vpop.f32.mrb[72].mxu0 }
 0x8ba   : > { %v4409_v27 = vpop.f32.mrb[73].mxu0  ;;  %v4511_v19 = vrot.slane %v14167_v0, 1 }
 0x8bb   : > { %v4411_v17 = vpop.f32.mrb[74].mxu0  ;;  %v4625_v26 = vrot.slane %v4409_v27, 2 }
 0x8bc   : > { %v4512_v41 = vrot.slane %v4411_v17, 1  ;;  %v4413_v2 = vpop.f32.mrb[75].mxu0  ;;  %v12472_v17 = vld [vmem:[#allocation2 + $0x50] ss:$0 sps:$4 sm:$0xff]  }
 0x8bd   : > { %v4626_v29 = vrot.slane %v4413_v2, 2  ;;  %11359 = vmatprep.mubr.msk.bf16.mxu1 %vm505_vm0, %v12472_v17  ;;  %v12510_v17 = vld [vmem:[%s16294_s1 + $0x470] ss:$8 sps:$4 sm:$0xff]  }
 0x8be   : > { %v4513_v44 = vsel %vm845_vm2, %v4511_v19, %v4512_v41 }
 0x8bf   : > { %4544 = vrot.lane.b32.xlu1 %v4513_v44, %s12844_s5  ;;  %v14173_v63 = vsel %vm960_vm3, %v4625_v26, %v4626_v29 }
 0x8c1   : > { %v14175_v42 = vpop.f32.mrb[76].mxu0 }
 0x8c2   : > { %v4419_v23 = vpop.f32.mrb[77].mxu0  ;;  %v4514_v60 = vrot.slane %v14175_v42, 1 }
 0x8c3   : > { %v4421_v56 = vpop.f32.mrb[78].mxu0  ;;  %v4628_v9 = vrot.slane %v4419_v23, 2 }
 0x8c4   : > { %v4516_v54 = vrot.slane %v4421_v56, 1  ;;  %v4423_v39 = vpop.f32.mrb[79].mxu0 }
 0x8c5   : > { %v4630_v7 = vrot.slane %v4423_v39, 2 }
 0x8c6   : > { %v4517_v40 = vsel %vm845_vm2, %v4514_v60, %v4516_v54 }
 0x8c7   : > { %4548 = vrot.lane.b32.xlu0 %v4517_v40, %s12844_s5  ;;  %v14181_v51 = vsel %vm960_vm3, %v4628_v9, %v4630_v7  ;;  %v11300_v9 = vcombine.low %v13855_v16, %v13855_v16 }
 0x8c9   : > { %v14183_v13 = vpop.f32.mrb[80].mxu0 }
 0x8ca   : > { %v4429_v35 = vpop.f32.mrb[81].mxu0  ;;  %v4518_v5 = vrot.slane %v14183_v13, 1 }
 0x8cb   : > { %v4431_v31 = vpop.f32.mrb[82].mxu0  ;;  %v4632_v47 = vrot.slane %v4429_v35, 2 }
 0x8cc   : > { %v4520_v21 = vrot.slane %v4431_v31, 1  ;;  %v4433_v30 = vpop.f32.mrb[83].mxu0 }
 0x8cd   : > { %v4634_v11 = vrot.slane %v4433_v30, 2 }
 0x8ce   : > { %v4521_v37 = vsel %vm845_vm2, %v4518_v5, %v4520_v21 }
 0x8cf   : > { %4552 = vrot.lane.b32.xlu1 %v4521_v37, %s12844_s5  ;;  %v14189_v50 = vsel %vm960_vm3, %v4632_v47, %v4634_v11 }
 0x8d1   : > { %v14191_v45 = vpop.f32.mrb[84].mxu0 }
 0x8d2   : > { %v4439_v49 = vpop.f32.mrb[85].mxu0  ;;  %v4522_v62 = vrot.slane %v14191_v45, 1 }
 0x8d3   : > { %v4441_v18 = vpop.f32.mrb[86].mxu0  ;;  %v4636_v10 = vrot.slane %v4439_v49, 2  ;;  %v12475_v49 = vld [vmem:[%s16294_s1 + $0x3c0] ss:$8 sps:$4 sm:$0xff]  }
 0x8d4   : > { %v4524_v22 = vrot.slane %v4441_v18, 1  ;;  %v4443_v48 = vpop.f32.mrb[87].mxu0  ;;  %v12477_v18 = vld [vmem:[%s16294_s1 + $0x3c4] ss:$8 sps:$4 sm:$0xff]  }
 0x8d5   : > { %v4638_v53 = vrot.slane %v4443_v48, 2  ;;  %5279 = vmatprep.subr.bf16.mxu1 %v12477_v18  ;;  %v12484_v48 = vld [vmem:[%s16294_s1 + $0x3e4] ss:$8 sps:$4 sm:$0xff]  }
 0x8d6   : > { %v4525_v36 = vsel %vm845_vm2, %v4522_v62, %v4524_v22  ;;  %v12481_v62 = vld [vmem:[%s16294_s1 + $0x3d4] ss:$8 sps:$4 sm:$0xff]   ;;  %5280 = vmatpush1.bf16.msra.mxu1 %v12475_v49  ;;  %v12479_v22 = vld [vmem:[%s16294_s1 + $0x3d0] ss:$8 sps:$4 sm:$0xff]  }
 0x8d7   : > { %4556 = vrot.lane.b32.xlu0 %v4525_v36, %s12844_s5  ;;  %v14197_v4 = vsel %vm960_vm3, %v4636_v10, %v4638_v53  ;;  %5281 = vmatprep.subr.bf16.mxu1 %v12481_v62  ;;  %v12482_v10 = vld [vmem:[%s16294_s1 + $0x3e0] ss:$8 sps:$4 sm:$0xff]   ;;  %v12488_v53 = vld [vmem:[%s16294_s1 + $0x3f4] ss:$8 sps:$4 sm:$0xff]   ;;  %v12486_v36 = vld [vmem:[%s16294_s1 + $0x3f0] ss:$8 sps:$4 sm:$0xff]  }
 0x8d9   : > { %v14199_v46 = vpop.f32.mrb[88].mxu0 }
 0x8da   : > { %v4449_v24 = vpop.f32.mrb[89].mxu0  ;;  %v4526_v25 = vrot.slane %v14199_v46, 1  ;;  %5282 = vmatpush1.bf16.msra.mxu1 %v12479_v22 }
 0x8db   : > { %v4451_v32 = vpop.f32.mrb[90].mxu0  ;;  %v4640_v58 = vrot.slane %v4449_v24, 2  ;;  %5283 = vmatprep.subr.bf16.mxu1 %v12484_v48  ;;  %v12491_v24 = vld [vmem:[%s16294_s1 + $0x404] ss:$8 sps:$4 sm:$0xff]  }
 0x8dc   : > { %v4528_v52 = vrot.slane %v4451_v32, 1  ;;  %v4453_v34 = vpop.f32.mrb[91].mxu0  ;;  %v12489_v32 = vld [vmem:[%s16294_s1 + $0x400] ss:$8 sps:$4 sm:$0xff]  }
 0x8dd   : > { %v4642_v3 = vrot.slane %v4453_v34, 2  ;;  %v12497_v34 = vld [vmem:[%s16294_s1 + $0x424] ss:$8 sps:$4 sm:$0xff]  }
 0x8de   : > { %v4529_v12 = vsel %vm845_vm2, %v4526_v25, %v4528_v52  ;;  %5284 = vmatpush1.bf16.msra.mxu1 %v12482_v10  ;;  %v12494_v25 = vld [vmem:[%s16294_s1 + $0x414] ss:$8 sps:$4 sm:$0xff]   ;;  %v12492_v52 = vld [vmem:[%s16294_s1 + $0x410] ss:$8 sps:$4 sm:$0xff]  }
 0x8df   : > { %4560 = vrot.lane.b32.xlu1 %v4529_v12, %s12844_s5  ;;  %v14205_v6 = vsel %vm960_vm3, %v4640_v58, %v4642_v3  ;;  %5285 = vmatprep.subr.bf16.mxu1 %v12488_v53  ;;  %v12495_v58 = vld [vmem:[%s16294_s1 + $0x420] ss:$8 sps:$4 sm:$0xff]   ;;  %v12500_v3 = vld [vmem:[%s16294_s1 + $0x434] ss:$8 sps:$4 sm:$0xff]   ;;  %v12498_v12 = vld [vmem:[%s16294_s1 + $0x430] ss:$8 sps:$4 sm:$0xff]  }
 0x8e2   : > { %v14207_v15 = vpop.f32.mrb[92].mxu0  ;;  %5286 = vmatpush1.bf16.msra.mxu1 %v12486_v36 }
 0x8e3   : > { %v4459_v33 = vpop.f32.mrb[93].mxu0  ;;  %v4530_v8 = vrot.slane %v14207_v15, 1  ;;  %5287 = vmatprep.subr.bf16.mxu1 %v12491_v24 }
 0x8e4   : > { %v4461_v38 = vpop.f32.mrb[94].mxu0  ;;  %v4644_v57 = vrot.slane %v4459_v33, 2  ;;  %v12503_v33 = vld [vmem:[%s16294_s1 + $0x444] ss:$8 sps:$4 sm:$0xff]  }
 0x8e5   : > { %v4532_v20 = vrot.slane %v4461_v38, 1  ;;  %v4463_v43 = vpop.f32.mrb[95].mxu0  ;;  %v12501_v38 = vld [vmem:[%s16294_s1 + $0x440] ss:$8 sps:$4 sm:$0xff]  }
 0x8e6   : > { %v4646_v27 = vrot.slane %v4463_v43, 2  ;;  %5288 = vmatpush1.bf16.msra.mxu1 %v12489_v32  ;;  %v12509_v43 = vld [vmem:[%s16294_s1 + $0x464] ss:$8 sps:$4 sm:$0xff]  }
 0x8e7   : > { %v4533_v19 = vsel %vm845_vm2, %v4530_v8, %v4532_v20  ;;  %5289 = vmatprep.subr.bf16.mxu1 %v12494_v25  ;;  %v12506_v8 = vld [vmem:[%s16294_s1 + $0x454] ss:$8 sps:$4 sm:$0xff]   ;;  %v12504_v20 = vld [vmem:[%s16294_s1 + $0x450] ss:$8 sps:$4 sm:$0xff]  }
 0x8e8   : > { %4564 = vrot.lane.b32.xlu0 %v4533_v19, %s12844_s5  ;;  %v14213_v41 = vsel %vm960_vm3, %v4644_v57, %v4646_v27  ;;  %v12507_v57 = vld [vmem:[%s16294_s1 + $0x460] ss:$8 sps:$4 sm:$0xff]   ;;  %v12512_v27 = vld [vmem:[%s16294_s1 + $0x474] ss:$8 sps:$4 sm:$0xff]  }
 0x8ea   : > { %v14216_v2 = vpop.f32.mrb[96].mxu0  ;;  %5290 = vmatpush1.bf16.msra.mxu1 %v12492_v52 }
 0x8eb   : > { %v4469_v26 = vpop.f32.mrb[97].mxu0  ;;  %v4534_v44 = vrot.slane %v14216_v2, 1  ;;  %5291 = vmatprep.subr.bf16.mxu1 %v12497_v34 }
 0x8ec   : > { %v4471_v29 = vpop.f32.mrb[98].mxu0  ;;  %v4648_v60 = vrot.slane %v4469_v26, 2 }
 0x8ed   : > { %v4536_v23 = vrot.slane %v4471_v29, 1  ;;  %v4473_v56 = vpop.f32.mrb[99].mxu0 }
 0x8ee   : > { %v4650_v54 = vrot.slane %v4473_v56, 2  ;;  %5292 = vmatpush1.bf16.msra.mxu1 %v12495_v58 }
 0x8ef   : > { %v4537_v39 = vsel %vm845_vm2, %v4534_v44, %v4536_v23  ;;  %5293 = vmatprep.subr.bf16.mxu1 %v12500_v3 }
 0x8f0   : > { %4568 = vrot.lane.b32.xlu1 %v4537_v39, %s12844_s5  ;;  %v14224_v7 = vsel %vm960_vm3, %v4648_v60, %v4650_v54 }
 0x8f2   : > { %5294 = vmatpush1.bf16.msra.mxu1 %v12498_v12 }
 0x8f3   : > { %5295 = vmatprep.subr.bf16.mxu1 %v12503_v33 }
 0x8f4   : > { %3257 = vrot.lane.b32.xlu1 %v11300_v9, %s12844_s5 }
 0x8f6   : > { %5296 = vmatpush1.bf16.msra.mxu1 %v12501_v38 }
 0x8f7   : > { %5297 = vmatprep.subr.bf16.mxu1 %v12506_v8 }
 0x8f9   : > { %v14227_v40 = vpop.f32.mrb[100].mxu0 }
 0x8fa   : > { %v4479_v35 = vpop.f32.mrb[101].mxu0  ;;  %v4538_v5 = vrot.slane %v14227_v40, 1  ;;  %5298 = vmatpush1.bf16.msra.mxu1 %v12504_v20 }
 0x8fb   : > { %v4481_v31 = vpop.f32.mrb[102].mxu0  ;;  %v4652_v47 = vrot.slane %v4479_v35, 2  ;;  %5299 = vmatprep.subr.bf16.mxu1 %v12509_v43 }
 0x8fc   : > { %v4540_v21 = vrot.slane %v4481_v31, 1  ;;  %v4483_v30 = vpop.f32.mrb[103].mxu0 }
 0x8fd   : > { %v4654_v11 = vrot.slane %v4483_v30, 2 }
 0x8fe   : > { %v4541_v37 = vsel %vm845_vm2, %v4538_v5, %v4540_v21  ;;  %5300 = vmatpush1.bf16.msra.mxu1 %v12507_v57 }
 0x8ff   : > { %4572 = vrot.lane.b32.xlu0 %v4541_v37, %s12844_s5  ;;  %v14233_v16 = vsel %vm960_vm3, %v4652_v47, %v4654_v11  ;;  %5301 = vmatprep.subr.bf16.mxu1 %v12512_v27  ;;  %v4962_v47 = vld [vmem:[#allocation2 + $0x8] sm:$0xf] }
 0x902   : > { %5302 = vmatpush1.bf16.msra.mxu1 %v12510_v17 }
 0x931   : > { %v4545_v19 = vpop.permute.xlu1 %4544 }
 0x932   : > { %v4592_v26 = vadd.f32 %v4545_v19, %v14167_v0 }
 0x934   : > { %v4674_v29 = vadd.f32 %v14173_v63, %v4592_v26 }
 0x936   : > { %vm4690_vm15 = vcmp.ge.f32.partialorder %v4674_v29, 0.0  ;;  %v4706_v44 = vmul.f32 0.2, %v4674_v29 }
 0x938   : > { %v4722_v23 = vsel %vm4690_vm15, %v4674_v29, %v4706_v44 }
 0x939   : > { %v12087_v56 = vpack.c.bf16 %v4722_v23, %v4722_v23  ;;  %v4549_v60 = vpop.permute.xlu0 %4548 }
 0x93a   : > { %v4594_v54 = vadd.f32 %v4549_v60, %v14175_v42 }
 0x93b   : > { %v4803_v39 = vshrl.u32 %v12087_v56, 16  ;;  %v4806_v31 = vshll.u32 %v12087_v56, 16 }
 0x93c   : > { %v4676_v9 = vadd.f32 %v14181_v51, %v4594_v54 }
 0x93d   : > { %v4805_v35 = vrot.slane %v4803_v39, 7 }
 0x93e   : > { %vm4692_vm4 = vcmp.ge.f32.partialorder %v4676_v9, 0.0  ;;  %v4708_v5 = vmul.f32 0.2, %v4676_v9 }
 0x93f   : > { %v4808_v21 = vor.u32 %v4806_v31, %v4805_v35  ;;  %v4809_v30 = vrot.slane %v4805_v35, 4 }
 0x940   : > { %v4724_v0 = vsel %vm4692_vm4, %v4676_v9, %v4708_v5 }
 0x941   : > { %v4817_v63 = vsel %vm13192_vm8, %v4809_v30, %v13197_v55  ;;  %v4963_v11 = vsel %vm13200_vm9, %v4808_v21, %v4962_v47  ;;  %v12089_v37 = vpack.c.bf16 %v4724_v0, %v4724_v0  ;;  %v4553_v42 = vpop.permute.xlu1 %4552 }
 0x942   : > { %4964 = vst [vmem:[#allocation2 + $0x8] sm:$0xf] %v4963_v11  ;;  %4965 = vst.msk [vmem:[#allocation2 + $0xc] sm:$0xf] %vm172_vm1, %v4817_v63  ;;  %v4596_v51 = vadd.f32 %v4553_v42, %v14183_v13 }
 0x943   : > { %v4820_v49 = vshrl.u32 %v12089_v37, 16  ;;  %v4823_v22 = vshll.u32 %v12089_v37, 16 }
 0x944   : > { %v4678_v18 = vadd.f32 %v14189_v50, %v4596_v51 }
 0x945   : > { %v4822_v62 = vrot.slane %v4820_v49, 7 }
 0x946   : > { %vm4694_vm7 = vcmp.ge.f32.partialorder %v4678_v18, 0.0  ;;  %v4710_v48 = vmul.f32 0.2, %v4678_v18 }
 0x947   : > { %v4825_v10 = vor.u32 %v4823_v22, %v4822_v62  ;;  %v4827_v53 = vrot.slane %v4822_v62, 4 }
 0x948   : > { %v4726_v36 = vsel %vm4694_vm7, %v4678_v18, %v4710_v48  ;;  %v12830_v48 = vld [vmem:[#allocation2 + $0x40] sm:$0xf] }
 0x949   : > { %v4826_v24 = vsel %vm13192_vm8, %v13213_v14, %v4825_v10  ;;  %v4835_v32 = vsel %vm13192_vm8, %v4827_v53, %v13197_v55  ;;  %v12091_v25 = vpack.c.bf16 %v4726_v36, %v4726_v36  ;;  %v4557_v13 = vpop.permute.xlu0 %4556  ;;  %v14325_v52 = vld [vmem:[#allocation2 + $0x8] sm:$0xff]   ;;  %v11298_v10 = vcombine.low %v12830_v48, %v12830_v48 }
 0x94a   : > { %4966 = vst.msk [vmem:[#allocation2 + $0x10] sm:$0xf] %vm172_vm1, %v4826_v24  ;;  %4967 = vst.msk [vmem:[#allocation2 + $0x14] sm:$0xf] %vm172_vm1, %v4835_v32  ;;  %v4598_v50 = vadd.f32 %v4557_v13, %v14191_v45  ;;  %5053 = vrot.lane.b32.xlu0 %v14325_v52, %s12844_s5 }
 0x94b   : > { %v4838_v34 = vshrl.u32 %v12091_v25, 16  ;;  %v4841_v12 = vshll.u32 %v12091_v25, 16 }
 0x94c   : > { %v4680_v58 = vadd.f32 %v14197_v4, %v4598_v50 }
 0x94d   : > { %v4840_v3 = vrot.slane %v4838_v34, 7 }
 0x94e   : > { %vm4696_vm5 = vcmp.ge.f32.partialorder %v4680_v58, 0.0  ;;  %v4712_v33 = vmul.f32 0.2, %v4680_v58 }
 0x94f   : > { %v4843_v38 = vor.u32 %v4841_v12, %v4840_v3  ;;  %v4845_v8 = vrot.slane %v4840_v3, 4 }
 0x950   : > { %v4728_v20 = vsel %vm4696_vm5, %v4680_v58, %v4712_v33 }
 0x951   : > { %v4844_v43 = vsel %vm13192_vm8, %v13213_v14, %v4843_v38  ;;  %v4853_v45 = vsel %vm13192_vm8, %v4845_v8, %v13197_v55  ;;  %v12093_v57 = vpack.c.bf16 %v4728_v20, %v4728_v20  ;;  %v4561_v27 = vpop.permute.xlu1 %4560  ;;  %v14339_v17 = vld [vmem:[#allocation2 + $0x10] sm:$0xff]  }
 0x952   : > { %4968 = vst.msk [vmem:[#allocation2 + $0x18] sm:$0xf] %vm172_vm1, %v4844_v43  ;;  %4969 = vst.msk [vmem:[#allocation2 + $0x1c] sm:$0xf] %vm172_vm1, %v4853_v45  ;;  %v4600_v4 = vadd.f32 %v4561_v27, %v14199_v46  ;;  %5055 = vrot.lane.b32.xlu1 %v14339_v17, %s12844_s5 }
 0x953   : > { %v4856_v19 = vshrl.u32 %v12093_v57, 16  ;;  %v4859_v44 = vshll.u32 %v12093_v57, 16 }
 0x954   : > { %v4682_v26 = vadd.f32 %v14205_v6, %v4600_v4 }
 0x955   : > { %v4858_v29 = vrot.slane %v4856_v19, 7 }
 0x956   : > { %vm4698_vm10 = vcmp.ge.f32.partialorder %v4682_v26, 0.0  ;;  %v4714_v23 = vmul.f32 0.2, %v4682_v26 }
 0x957   : > { %v4861_v56 = vor.u32 %v4859_v44, %v4858_v29  ;;  %v4863_v60 = vrot.slane %v4858_v29, 4 }
 0x958   : > { %v4730_v54 = vsel %vm4698_vm10, %v4682_v26, %v4714_v23 }
 0x959   : > { %v4862_v39 = vsel %vm13192_vm8, %v13213_v14, %v4861_v56  ;;  %v4871_v46 = vsel %vm13192_vm8, %v4863_v60, %v13197_v55  ;;  %v12095_v9 = vpack.c.bf16 %v4730_v54, %v4730_v54  ;;  %v14353_v31 = vld [vmem:[#allocation2 + $0x18] sm:$0xff]   ;;  %v6792_v60 = vld [vmem:[#allocation2 + $0x48] sm:$0x1] }
 0x95a   : > { %v4565_v35 = vpop.permute.xlu0 %4564  ;;  %4970 = vst.msk [vmem:[#allocation2 + $0x20] sm:$0xf] %vm172_vm1, %v4862_v39  ;;  %4971 = vst.msk [vmem:[#allocation2 + $0x24] sm:$0xf] %vm172_vm1, %v4871_v46  ;;  %5057 = vrot.lane.b32.xlu0 %v14353_v31, %s12844_s5  ;;  %v14402_v46 = vld [vmem:[#allocation2 + $0x48] sm:$0xf] }
 0x95b   : > { %v4602_v6 = vadd.f32 %v4565_v35, %v14207_v15  ;;  %v4874_v5 = vshrl.u32 %v12095_v9, 16  ;;  %v4877_v47 = vshll.u32 %v12095_v9, 16  ;;  %v6793_v9 = vsel %vm13287_vm6, %v13213_v14, %v6792_v60 }
 0x95c   : > { %6794 = vst [vmem:[#allocation2 + $0x48] sm:$0x1] %v6793_v9 }
 0x95d   : > { %v4684_v21 = vadd.f32 %v14213_v41, %v4602_v6  ;;  %v4876_v30 = vrot.slane %v4874_v5, 7 }
 0x95f   : > { %vm4700_vm11 = vcmp.ge.f32.partialorder %v4684_v21, 0.0  ;;  %v4716_v0 = vmul.f32 0.2, %v4684_v21  ;;  %v4879_v63 = vor.u32 %v4877_v47, %v4876_v30  ;;  %v4881_v11 = vrot.slane %v4876_v30, 4  ;;  %v12513_v47 = vld [vmem:[#allocation2] sm:$0xff]  }
 0x961   : > { %v4732_v37 = vsel %vm4700_vm11, %v4684_v21, %v4716_v0  ;;  %v4880_v42 = vsel %vm13192_vm8, %v13213_v14, %v4879_v63  ;;  %v4889_v15 = vsel %vm13192_vm8, %v4881_v11, %v13197_v55  ;;  %v14367_v18 = vld [vmem:[#allocation2 + $0x20] sm:$0xff]  }
 0x962   : > { %v12097_v51 = vpack.c.bf16 %v4732_v37, %v4732_v37  ;;  %v4569_v49 = vpop.permute.xlu1 %4568  ;;  %4972 = vst.msk [vmem:[#allocation2 + $0x28] sm:$0xf] %vm172_vm1, %v4880_v42  ;;  %4973 = vst.msk [vmem:[#allocation2 + $0x2c] sm:$0xf] %vm172_vm1, %v4889_v15  ;;  %5059 = vrot.lane.b32.xlu1 %v14367_v18, %s12844_s5 }
 0x963   : > { %v4604_v41 = vadd.f32 %v4569_v49, %v14216_v2 }
 0x964   : > { %v4892_v62 = vshrl.u32 %v12097_v51, 16  ;;  %v4895_v36 = vshll.u32 %v12097_v51, 16 }
 0x965   : > { %v4686_v22 = vadd.f32 %v14224_v7, %v4604_v41 }
 0x966   : > { %v4894_v53 = vrot.slane %v4892_v62, 7  ;;  %v3258_v24 = vpop.permute.xlu1 %3257 }
 0x967   : > { %vm4702_vm12 = vcmp.ge.f32.partialorder %v4686_v22, 0.0  ;;  %v4718_v32 = vmul.f32 0.2, %v4686_v22  ;;  %v3299_v25 = vsel %vm505_vm0, %v11298_v10, %v3258_v24 }
 0x968   : > { %v4897_v13 = vor.u32 %v4895_v36, %v4894_v53  ;;  %v4899_v50 = vrot.slane %v4894_v53, 4  ;;  %3580 = vmatmul.mubr.bf16.gmra.mrb[68].mxu1 %v3299_v25 }
 0x969   : > { %v4734_v34 = vsel %vm4702_vm12, %v4686_v22, %v4718_v32  ;;  %11523 = vmatprep.mubr.msk.bf16.mxu1 %vm505_vm0, %v14339_v17  ;;  %v14384_v3 = vld [vmem:[#allocation2 + $0x28] sm:$0xff]  }
 0x96a   : > { %v4898_v2 = vsel %vm13192_vm8, %v13213_v14, %v4897_v13  ;;  %v4907_v7 = vsel %vm13192_vm8, %v4899_v50, %v13197_v55  ;;  %v12099_v58 = vpack.c.bf16 %v4734_v34, %v4734_v34  ;;  %5061 = vrot.lane.b32.xlu0 %v14384_v3, %s12844_s5  ;;  %v5002_v22 = vld [vmem:[#allocation2 + $0x4c] sm:$0xf] }
 0x96b   : > { %4974 = vst.msk [vmem:[#allocation2 + $0x30] sm:$0xf] %vm172_vm1, %v4898_v2  ;;  %4975 = vst.msk [vmem:[#allocation2 + $0x34] sm:$0xf] %vm172_vm1, %v4907_v7 }
 0x96c   : > { %v4910_v12 = vshrl.u32 %v12099_v58, 16  ;;  %v4913_v38 = vshll.u32 %v12099_v58, 16 }
 0x96e   : > { %v4912_v33 = vrot.slane %v4910_v12, 7 }
 0x970   : > { %v4915_v43 = vor.u32 %v4913_v38, %v4912_v33  ;;  %v4917_v45 = vrot.slane %v4912_v33, 4 }
 0x971   : > { %v4573_v8 = vpop.permute.xlu0 %4572 }
 0x972   : > { %v4606_v20 = vadd.f32 %v4573_v8, %v14227_v40  ;;  %v4916_v27 = vsel %vm13192_vm8, %v13213_v14, %v4915_v43  ;;  %v4925_v4 = vsel %vm13192_vm8, %v4917_v45, %v13197_v55  ;;  %v12474_v19 = vld [vmem:[#allocation2 + $0x30] sm:$0xff]  }
 0x973   : > { %4976 = vst.msk [vmem:[#allocation2 + $0x38] sm:$0xf] %vm172_vm1, %v4916_v27  ;;  %4977 = vst.msk [vmem:[#allocation2 + $0x3c] sm:$0xf] %vm172_vm1, %v4925_v4  ;;  %5063 = vrot.lane.b32.xlu1 %v12474_v19, %s12844_s5 }
 0x974   : > { %v4688_v57 = vadd.f32 %v14233_v16, %v4606_v20 }
 0x976   : > { %vm4704_vm13 = vcmp.ge.f32.partialorder %v4688_v57, 0.0  ;;  %v4720_v26 = vmul.f32 0.2, %v4688_v57 }
 0x978   : > { %v4736_v40 = vsel %vm4704_vm13, %v4688_v57, %v4720_v26 }
 0x979   : > { %v12101_v29 = vpack.c.bf16 %v4736_v40, %v4736_v40 }
 0x97a   : > { %v12478_v56 = vld [vmem:[#allocation2 + $0x38] sm:$0xff]  }
 0x97b   : > { %v4928_v16 = vshrl.u32 %v12101_v29, 16  ;;  %v4931_v44 = vshll.u32 %v12101_v29, 16  ;;  %5065 = vrot.lane.b32.xlu0 %v12478_v56, %s12844_s5 }
 0x97d   : > { %v4930_v23 = vrot.slane %v4928_v16, 7 }
 0x97f   : > { %v4933_v54 = vor.u32 %v4931_v44, %v4930_v23  ;;  %v4935_v39 = vrot.slane %v4930_v23, 4 }
 0x981   : > { %v4934_v35 = vsel %vm13192_vm8, %v13213_v14, %v4933_v54  ;;  %v4943_v6 = vsel %vm13192_vm8, %v4935_v39, %v13197_v55 }
 0x982   : > { %4978 = vst.msk [vmem:[#allocation2 + $0x40] sm:$0xf] %vm172_vm1, %v4934_v35  ;;  %4979 = vst.msk [vmem:[#allocation2 + $0x44] sm:$0xf] %vm172_vm1, %v4943_v6 }
 0x989   : > { %v4999_v5 = vld [vmem:[#allocation2 + $0x40] sm:$0xf]  ;;  %v5000_v21 = vld [vmem:[#allocation2 + $0x44] sm:$0xf] }
 0x98a   : > { %v11471_v30 = vcombine.low %v4999_v5, %v5000_v21 }
 0x98c   : > { %5067 = vrot.lane.b32.xlu1 %v11471_v30, %s12844_s5 }
 0x9bc   : > { %v5054_v0 = vpop.permute.xlu0 %5053 }
 0x9bd   : > { %v5079_v63 = vsel %vm505_vm0, %v12513_v47, %v5054_v0 }
 0x9be   : > { %5312 = vmatmul.mubr.bf16.vlgmr.msra.gmra.mrb[72].mxu1 %v5079_v63 }
 0x9bf   : > { %11524 = vmatprep.mubr.msk.bf16.mxu1 %vm505_vm0, %v14353_v31 }
 0x9c4   : > { %v5056_v11 = vpop.permute.xlu1 %5055 }
 0x9c5   : > { %v5083_v37 = vsel %vm505_vm0, %v14325_v52, %v5056_v11 }
 0x9c6   : > { %5322 = vmatmul.mubr.bf16.gmra.mrb[76].mxu1 %v5083_v37 }
 0x9c7   : > { %11525 = vmatprep.mubr.msk.bf16.mxu1 %vm505_vm0, %v14367_v18 }
 0x9cc   : > { %v5058_v42 = vpop.permute.xlu0 %5057 }
 0x9cd   : > { %v5087_v15 = vsel %vm505_vm0, %v14339_v17, %v5058_v42 }
 0x9ce   : > { %5332 = vmatmul.mubr.bf16.gmra.mrb[80].mxu1 %v5087_v15 }
 0x9cf   : > { %11526 = vmatprep.mubr.msk.bf16.mxu1 %vm505_vm0, %v14384_v3 }
 0x9d4   : > { %v5060_v51 = vpop.permute.xlu1 %5059 }
 0x9d5   : > { %v5091_v49 = vsel %vm505_vm0, %v14353_v31, %v5060_v51  ;;  %v11473_v31 = vcombine.low %v14402_v46, %v5002_v22 }
 0x9d6   : > { %5342 = vmatmul.mubr.bf16.gmra.mrb[84].mxu1 %v5091_v49 }
 0x9d7   : > { %11527 = vmatprep.mubr.msk.bf16.mxu1 %vm505_vm0, %v12474_v19 }
 0x9dc   : > { %v5062_v52 = vpop.permute.xlu0 %5061 }
 0x9dd   : > { %v5095_v41 = vsel %vm505_vm0, %v14367_v18, %v5062_v52 }
 0x9de   : > { %5352 = vmatmul.mubr.bf16.gmra.mrb[88].mxu1 %v5095_v41 }
 0x9df   : > { %11528 = vmatprep.mubr.msk.bf16.mxu1 %vm505_vm0, %v12478_v56 }
 0x9e5   : > { %v5064_v62 = vpop.permute.xlu1 %5063 }
 0x9e6   : > { %v5099_v17 = vsel %vm505_vm0, %v14384_v3, %v5064_v62 }
 0x9e7   : > { %5362 = vmatmul.mubr.bf16.gmra.mrb[92].mxu1 %v5099_v17 }
 0x9e8   : > { %11529 = vmatprep.mubr.msk.bf16.mxu1 %vm505_vm0, %v11471_v30 }
 0x9ed   : > { %v5066_v48 = vpop.permute.xlu0 %5065 }
 0x9ee   : > { %v5103_v10 = vsel %vm505_vm0, %v12474_v19, %v5066_v48 }
 0x9ef   : > { %5372 = vmatmul.mubr.bf16.gmra.mrb[96].mxu1 %v5103_v10 }
 0x9f0   : > { %11530 = vmatprep.mubr.msk.bf16.mxu1 %vm505_vm0, %v11473_v31 }
 0x9fe   : > { %v5068_v18 = vpop.permute.xlu1 %5067 }
 0x9ff   : > { %v5107_v53 = vsel %vm505_vm0, %v12478_v56, %v5068_v18 }
 0xa00   : > { %5382 = vmatmul.mubr.bf16.gmra.mrb[100].mxu1 %v5107_v53 }
 0xa3b   : > { %v3581_v36 = vpop.f32.mrb[68].mxu1 }
 0xa3c   : > { %v3583_v24 = vpop.f32.mrb[69].mxu1 }
 0xa3d   : > { %v3585_v32 = vpop.f32.mrb[70].mxu1 }
 0xa3e   : > { %v3586_v25 = vpop.f32.mrb[71].mxu1 }
 0xa91   : > { %v14440_v13 = vpop.f32.mrb[72].mxu1 }
 0xa92   : > { %v5315_v50 = vpop.f32.mrb[73].mxu1  ;;  %v5417_v2 = vrot.slane %v14440_v13, 1 }
 0xa93   : > { %v5317_v34 = vpop.f32.mrb[74].mxu1  ;;  %v5531_v3 = vrot.slane %v5315_v50, 2 }
 0xa94   : > { %v5418_v7 = vrot.slane %v5317_v34, 1  ;;  %v5319_v58 = vpop.f32.mrb[75].mxu1  ;;  %v12519_v34 = vld [vmem:[#allocation2 + $0xa4] ss:$0 sps:$4 sm:$0xff]  }
 0xa95   : > { %v5532_v12 = vrot.slane %v5319_v58, 2  ;;  %11445 = vmatprep.mubr.msk.bf16.mxu0 %vm505_vm0, %v12519_v34  ;;  %v12557_v34 = vld [vmem:[%s16294_s1 + $0x530] ss:$8 sps:$4 sm:$0xff]  }
 0xa96   : > { %v5419_v33 = vsel %vm845_vm2, %v5417_v2, %v5418_v7 }
 0xa97   : > { %5450 = vrot.lane.b32.xlu0 %v5419_v33, %s12844_s5  ;;  %v14446_v38 = vsel %vm960_vm3, %v5531_v3, %v5532_v12 }
 0xa99   : > { %v14448_v8 = vpop.f32.mrb[76].mxu1 }
 0xa9a   : > { %v5325_v20 = vpop.f32.mrb[77].mxu1  ;;  %v5420_v45 = vrot.slane %v14448_v8, 1 }
 0xa9b   : > { %v5327_v43 = vpop.f32.mrb[78].mxu1  ;;  %v5534_v4 = vrot.slane %v5325_v20, 2 }
 0xa9c   : > { %v5422_v57 = vrot.slane %v5327_v43, 1  ;;  %v5329_v27 = vpop.f32.mrb[79].mxu1 }
 0xa9d   : > { %v5536_v19 = vrot.slane %v5329_v27, 2 }
 0xa9e   : > { %v5423_v26 = vsel %vm845_vm2, %v5420_v45, %v5422_v57 }
 0xa9f   : > { %5454 = vrot.lane.b32.xlu1 %v5423_v26, %s12844_s5  ;;  %v14454_v40 = vsel %vm960_vm3, %v5534_v4, %v5536_v19  ;;  %v11386_v4 = vcombine.low %v14129_v1, %v14129_v1 }
 0xaa1   : > { %v14456_v29 = vpop.f32.mrb[80].mxu1 }
 0xaa2   : > { %v5335_v16 = vpop.f32.mrb[81].mxu1  ;;  %v5424_v23 = vrot.slane %v14456_v29, 1 }
 0xaa3   : > { %v5337_v44 = vpop.f32.mrb[82].mxu1  ;;  %v5538_v54 = vrot.slane %v5335_v16, 2 }
 0xaa4   : > { %v5426_v56 = vrot.slane %v5337_v44, 1  ;;  %v5339_v60 = vpop.f32.mrb[83].mxu1 }
 0xaa5   : > { %v5540_v39 = vrot.slane %v5339_v60, 2 }
 0xaa6   : > { %v5427_v9 = vsel %vm845_vm2, %v5424_v23, %v5426_v56 }
 0xaa7   : > { %5458 = vrot.lane.b32.xlu0 %v5427_v9, %s12844_s5  ;;  %v14462_v35 = vsel %vm960_vm3, %v5538_v54, %v5540_v39 }
 0xaa9   : > { %v14464_v6 = vpop.f32.mrb[84].mxu1 }
 0xaaa   : > { %v5345_v5 = vpop.f32.mrb[85].mxu1  ;;  %v5428_v30 = vrot.slane %v14464_v6, 1 }
 0xaab   : > { %v5347_v21 = vpop.f32.mrb[86].mxu1  ;;  %v5542_v63 = vrot.slane %v5345_v5, 2  ;;  %v12522_v5 = vld [vmem:[%s16294_s1 + $0x480] ss:$8 sps:$4 sm:$0xff]  }
 0xaac   : > { %v5430_v47 = vrot.slane %v5347_v21, 1  ;;  %v5349_v0 = vpop.f32.mrb[87].mxu1  ;;  %v12524_v21 = vld [vmem:[%s16294_s1 + $0x484] ss:$8 sps:$4 sm:$0xff]  }
 0xaad   : > { %v5544_v11 = vrot.slane %v5349_v0, 2  ;;  %6185 = vmatprep.subr.bf16.mxu0 %v12524_v21  ;;  %v12531_v0 = vld [vmem:[%s16294_s1 + $0x4a4] ss:$8 sps:$4 sm:$0xff]  }
 0xaae   : > { %v5431_v37 = vsel %vm845_vm2, %v5428_v30, %v5430_v47  ;;  %v12528_v30 = vld [vmem:[%s16294_s1 + $0x494] ss:$8 sps:$4 sm:$0xff]   ;;  %6186 = vmatpush1.bf16.msra.mxu0 %v12522_v5  ;;  %v12526_v47 = vld [vmem:[%s16294_s1 + $0x490] ss:$8 sps:$4 sm:$0xff]  }
 0xaaf   : > { %5462 = vrot.lane.b32.xlu1 %v5431_v37, %s12844_s5  ;;  %v14470_v42 = vsel %vm960_vm3, %v5542_v63, %v5544_v11  ;;  %6187 = vmatprep.subr.bf16.mxu0 %v12528_v30  ;;  %v12529_v63 = vld [vmem:[%s16294_s1 + $0x4a0] ss:$8 sps:$4 sm:$0xff]   ;;  %v12535_v11 = vld [vmem:[%s16294_s1 + $0x4b4] ss:$8 sps:$4 sm:$0xff]   ;;  %v12533_v37 = vld [vmem:[%s16294_s1 + $0x4b0] ss:$8 sps:$4 sm:$0xff]  }
 0xab1   : > { %v14472_v15 = vpop.f32.mrb[88].mxu1 }
 0xab2   : > { %v5355_v51 = vpop.f32.mrb[89].mxu1  ;;  %v5432_v52 = vrot.slane %v14472_v15, 1  ;;  %6188 = vmatpush1.bf16.msra.mxu0 %v12526_v47 }
 0xab3   : > { %v5357_v49 = vpop.f32.mrb[90].mxu1  ;;  %v5546_v17 = vrot.slane %v5355_v51, 2  ;;  %6189 = vmatprep.subr.bf16.mxu0 %v12531_v0  ;;  %v12538_v51 = vld [vmem:[%s16294_s1 + $0x4c4] ss:$8 sps:$4 sm:$0xff]  }
 0xab4   : > { %v5434_v41 = vrot.slane %v5357_v49, 1  ;;  %v5359_v62 = vpop.f32.mrb[91].mxu1  ;;  %v12536_v49 = vld [vmem:[%s16294_s1 + $0x4c0] ss:$8 sps:$4 sm:$0xff]  }
 0xab5   : > { %v5548_v22 = vrot.slane %v5359_v62, 2  ;;  %v12544_v62 = vld [vmem:[%s16294_s1 + $0x4e4] ss:$8 sps:$4 sm:$0xff]  }
 0xab6   : > { %v5435_v31 = vsel %vm845_vm2, %v5432_v52, %v5434_v41  ;;  %6190 = vmatpush1.bf16.msra.mxu0 %v12529_v63  ;;  %v12541_v52 = vld [vmem:[%s16294_s1 + $0x4d4] ss:$8 sps:$4 sm:$0xff]   ;;  %v12539_v41 = vld [vmem:[%s16294_s1 + $0x4d0] ss:$8 sps:$4 sm:$0xff]  }
 0xab7   : > { %5466 = vrot.lane.b32.xlu0 %v5435_v31, %s12844_s5  ;;  %v14478_v48 = vsel %vm960_vm3, %v5546_v17, %v5548_v22  ;;  %6191 = vmatprep.subr.bf16.mxu0 %v12535_v11  ;;  %v12542_v17 = vld [vmem:[%s16294_s1 + $0x4e0] ss:$8 sps:$4 sm:$0xff]   ;;  %v12547_v22 = vld [vmem:[%s16294_s1 + $0x4f4] ss:$8 sps:$4 sm:$0xff]   ;;  %v12545_v31 = vld [vmem:[%s16294_s1 + $0x4f0] ss:$8 sps:$4 sm:$0xff]  }
 0xaba   : > { %v14480_v10 = vpop.f32.mrb[92].mxu1  ;;  %6192 = vmatpush1.bf16.msra.mxu0 %v12533_v37 }
 0xabb   : > { %v5365_v18 = vpop.f32.mrb[93].mxu1  ;;  %v5436_v36 = vrot.slane %v14480_v10, 1  ;;  %6193 = vmatprep.subr.bf16.mxu0 %v12538_v51 }
 0xabc   : > { %v5367_v53 = vpop.f32.mrb[94].mxu1  ;;  %v5550_v25 = vrot.slane %v5365_v18, 2  ;;  %v12550_v18 = vld [vmem:[%s16294_s1 + $0x504] ss:$8 sps:$4 sm:$0xff]  }
 0xabd   : > { %v5438_v24 = vrot.slane %v5367_v53, 1  ;;  %v5369_v32 = vpop.f32.mrb[95].mxu1  ;;  %v12548_v53 = vld [vmem:[%s16294_s1 + $0x500] ss:$8 sps:$4 sm:$0xff]  }
 0xabe   : > { %v5552_v50 = vrot.slane %v5369_v32, 2  ;;  %6194 = vmatpush1.bf16.msra.mxu0 %v12536_v49  ;;  %v12556_v32 = vld [vmem:[%s16294_s1 + $0x524] ss:$8 sps:$4 sm:$0xff]  }
 0xabf   : > { %v5439_v2 = vsel %vm845_vm2, %v5436_v36, %v5438_v24  ;;  %6195 = vmatprep.subr.bf16.mxu0 %v12541_v52  ;;  %v12553_v36 = vld [vmem:[%s16294_s1 + $0x514] ss:$8 sps:$4 sm:$0xff]   ;;  %v12551_v24 = vld [vmem:[%s16294_s1 + $0x510] ss:$8 sps:$4 sm:$0xff]  }
 0xac0   : > { %5470 = vrot.lane.b32.xlu1 %v5439_v2, %s12844_s5  ;;  %v14486_v7 = vsel %vm960_vm3, %v5550_v25, %v5552_v50  ;;  %v12554_v25 = vld [vmem:[%s16294_s1 + $0x520] ss:$8 sps:$4 sm:$0xff]   ;;  %v12559_v50 = vld [vmem:[%s16294_s1 + $0x534] ss:$8 sps:$4 sm:$0xff]  }
 0xac2   : > { %v14489_v58 = vpop.f32.mrb[96].mxu1  ;;  %6196 = vmatpush1.bf16.msra.mxu0 %v12539_v41 }
 0xac3   : > { %v5375_v3 = vpop.f32.mrb[97].mxu1  ;;  %v5440_v33 = vrot.slane %v14489_v58, 1  ;;  %6197 = vmatprep.subr.bf16.mxu0 %v12544_v62 }
 0xac4   : > { %v5377_v12 = vpop.f32.mrb[98].mxu1  ;;  %v5554_v45 = vrot.slane %v5375_v3, 2 }
 0xac5   : > { %v5442_v20 = vrot.slane %v5377_v12, 1  ;;  %v5379_v43 = vpop.f32.mrb[99].mxu1 }
 0xac6   : > { %v5556_v57 = vrot.slane %v5379_v43, 2  ;;  %6198 = vmatpush1.bf16.msra.mxu0 %v12542_v17 }
 0xac7   : > { %v5443_v27 = vsel %vm845_vm2, %v5440_v33, %v5442_v20  ;;  %6199 = vmatprep.subr.bf16.mxu0 %v12547_v22 }
 0xac8   : > { %5474 = vrot.lane.b32.xlu0 %v5443_v27, %s12844_s5  ;;  %v14497_v19 = vsel %vm960_vm3, %v5554_v45, %v5556_v57 }
 0xaca   : > { %6200 = vmatpush1.bf16.msra.mxu0 %v12545_v31 }
 0xacb   : > { %6201 = vmatprep.subr.bf16.mxu0 %v12550_v18 }
 0xacc   : > { %4163 = vrot.lane.b32.xlu0 %v11386_v4, %s12844_s5 }
 0xace   : > { %6202 = vmatpush1.bf16.msra.mxu0 %v12548_v53 }
 0xacf   : > { %6203 = vmatprep.subr.bf16.mxu0 %v12553_v36 }
 0xad2   : > { %6204 = vmatpush1.bf16.msra.mxu0 %v12551_v24 }
 0xad3   : > { %v14500_v26 = vpop.f32.mrb[100].mxu1  ;;  %6205 = vmatprep.subr.bf16.mxu0 %v12556_v32 }
 0xad4   : > { %v5385_v16 = vpop.f32.mrb[101].mxu1  ;;  %v5444_v23 = vrot.slane %v14500_v26, 1 }
 0xad5   : > { %v5387_v44 = vpop.f32.mrb[102].mxu1  ;;  %v5558_v54 = vrot.slane %v5385_v16, 2 }
 0xad6   : > { %v5446_v56 = vrot.slane %v5387_v44, 1  ;;  %v5389_v60 = vpop.f32.mrb[103].mxu1  ;;  %6206 = vmatpush1.bf16.msra.mxu0 %v12554_v25 }
 0xad7   : > { %v5560_v39 = vrot.slane %v5389_v60, 2  ;;  %6207 = vmatprep.subr.bf16.mxu0 %v12559_v50 }
 0xad8   : > { %v5447_v9 = vsel %vm845_vm2, %v5444_v23, %v5446_v56 }
 0xad9   : > { %5478 = vrot.lane.b32.xlu1 %v5447_v9, %s12844_s5  ;;  %v14506_v1 = vsel %vm960_vm3, %v5558_v54, %v5560_v39  ;;  %v5868_v54 = vld [vmem:[#allocation2 + $0x5c] sm:$0xf] }
 0xada   : > { %6208 = vmatpush1.bf16.msra.mxu0 %v12557_v34 }
 0xb09   : > { %v5451_v2 = vpop.permute.xlu0 %5450 }
 0xb0a   : > { %v5498_v3 = vadd.f32 %v5451_v2, %v14440_v13 }
 0xb0c   : > { %v5580_v12 = vadd.f32 %v14446_v38, %v5498_v3 }
 0xb0e   : > { %vm5596_vm14 = vcmp.ge.f32.partialorder %v5580_v12, 0.0  ;;  %v5612_v33 = vmul.f32 0.2, %v5580_v12 }
 0xb10   : > { %v5628_v20 = vsel %vm5596_vm14, %v5580_v12, %v5612_v33 }
 0xb11   : > { %v12103_v43 = vpack.c.bf16 %v5628_v20, %v5628_v20  ;;  %v5455_v45 = vpop.permute.xlu1 %5454 }
 0xb12   : > { %v5500_v57 = vadd.f32 %v5455_v45, %v14448_v8 }
 0xb13   : > { %v5709_v27 = vshrl.u32 %v12103_v43, 16  ;;  %v5712_v44 = vshll.u32 %v12103_v43, 16 }
 0xb14   : > { %v5582_v4 = vadd.f32 %v14454_v40, %v5500_v57 }
 0xb15   : > { %v5711_v16 = vrot.slane %v5709_v27, 7 }
 0xb16   : > { %vm5598_vm15 = vcmp.ge.f32.partialorder %v5582_v4, 0.0  ;;  %v5614_v23 = vmul.f32 0.2, %v5582_v4 }
 0xb17   : > { %v5714_v56 = vor.u32 %v5712_v44, %v5711_v16  ;;  %v5715_v60 = vrot.slane %v5711_v16, 4 }
 0xb18   : > { %v5630_v13 = vsel %vm5598_vm15, %v5582_v4, %v5614_v23 }
 0xb19   : > { %v5723_v38 = vsel %vm13192_vm8, %v5715_v60, %v13197_v55  ;;  %v5869_v39 = vsel %vm13200_vm9, %v5714_v56, %v5868_v54  ;;  %v12105_v9 = vpack.c.bf16 %v5630_v13, %v5630_v13  ;;  %v5459_v8 = vpop.permute.xlu0 %5458 }
 0xb1a   : > { %5870 = vst [vmem:[#allocation2 + $0x5c] sm:$0xf] %v5869_v39  ;;  %5871 = vst.msk [vmem:[#allocation2 + $0x60] sm:$0xf] %vm172_vm1, %v5723_v38  ;;  %v5502_v40 = vadd.f32 %v5459_v8, %v14456_v29 }
 0xb1b   : > { %v5726_v5 = vshrl.u32 %v12105_v9, 16  ;;  %v5729_v47 = vshll.u32 %v12105_v9, 16 }
 0xb1c   : > { %v5584_v21 = vadd.f32 %v14462_v35, %v5502_v40 }
 0xb1d   : > { %v5728_v30 = vrot.slane %v5726_v5, 7 }
 0xb1e   : > { %vm5600_vm4 = vcmp.ge.f32.partialorder %v5584_v21, 0.0  ;;  %v5616_v0 = vmul.f32 0.2, %v5584_v21 }
 0xb1f   : > { %v5731_v63 = vor.u32 %v5729_v47, %v5728_v30  ;;  %v5733_v11 = vrot.slane %v5728_v30, 4 }
 0xb20   : > { %v5632_v37 = vsel %vm5600_vm4, %v5584_v21, %v5616_v0  ;;  %v12831_v0 = vld [vmem:[#allocation2 + $0x94] sm:$0xf] }
 0xb21   : > { %v5732_v51 = vsel %vm13192_vm8, %v13213_v14, %v5731_v63  ;;  %v5741_v49 = vsel %vm13192_vm8, %v5733_v11, %v13197_v55  ;;  %v12107_v52 = vpack.c.bf16 %v5632_v37, %v5632_v37  ;;  %v5463_v29 = vpop.permute.xlu1 %5462  ;;  %v14598_v41 = vld [vmem:[#allocation2 + $0x5c] sm:$0xff]   ;;  %v11384_v63 = vcombine.low %v12831_v0, %v12831_v0 }
 0xb22   : > { %5872 = vst.msk [vmem:[#allocation2 + $0x64] sm:$0xf] %vm172_vm1, %v5732_v51  ;;  %5873 = vst.msk [vmem:[#allocation2 + $0x68] sm:$0xf] %vm172_vm1, %v5741_v49  ;;  %v5504_v35 = vadd.f32 %v5463_v29, %v14464_v6  ;;  %5959 = vrot.lane.b32.xlu1 %v14598_v41, %s12844_s5 }
 0xb23   : > { %v5744_v62 = vshrl.u32 %v12107_v52, 16  ;;  %v5747_v31 = vshll.u32 %v12107_v52, 16 }
 0xb24   : > { %v5586_v17 = vadd.f32 %v14470_v42, %v5504_v35 }
 0xb25   : > { %v5746_v22 = vrot.slane %v5744_v62, 7 }
 0xb26   : > { %vm5602_vm7 = vcmp.ge.f32.partialorder %v5586_v17, 0.0  ;;  %v5618_v18 = vmul.f32 0.2, %v5586_v17 }
 0xb27   : > { %v5749_v53 = vor.u32 %v5747_v31, %v5746_v22  ;;  %v5751_v36 = vrot.slane %v5746_v22, 4 }
 0xb28   : > { %v5634_v24 = vsel %vm5602_vm7, %v5586_v17, %v5618_v18 }
 0xb29   : > { %v5750_v32 = vsel %vm13192_vm8, %v13213_v14, %v5749_v53  ;;  %v5759_v6 = vsel %vm13192_vm8, %v5751_v36, %v13197_v55  ;;  %v12109_v25 = vpack.c.bf16 %v5634_v24, %v5634_v24  ;;  %v5467_v50 = vpop.permute.xlu0 %5466  ;;  %v14612_v34 = vld [vmem:[#allocation2 + $0x64] sm:$0xff]  }
 0xb2a   : > { %5874 = vst.msk [vmem:[#allocation2 + $0x6c] sm:$0xf] %vm172_vm1, %v5750_v32  ;;  %5875 = vst.msk [vmem:[#allocation2 + $0x70] sm:$0xf] %vm172_vm1, %v5759_v6  ;;  %v5506_v42 = vadd.f32 %v5467_v50, %v14472_v15  ;;  %5961 = vrot.lane.b32.xlu0 %v14612_v34, %s12844_s5 }
 0xb2b   : > { %v5762_v2 = vshrl.u32 %v12109_v25, 16  ;;  %v5765_v33 = vshll.u32 %v12109_v25, 16 }
 0xb2c   : > { %v5588_v3 = vadd.f32 %v14478_v48, %v5506_v42 }
 0xb2d   : > { %v5764_v12 = vrot.slane %v5762_v2, 7 }
 0xb2e   : > { %vm5604_vm5 = vcmp.ge.f32.partialorder %v5588_v3, 0.0  ;;  %v5620_v20 = vmul.f32 0.2, %v5588_v3 }
 0xb2f   : > { %v5767_v43 = vor.u32 %v5765_v33, %v5764_v12  ;;  %v5769_v45 = vrot.slane %v5764_v12, 4 }
 0xb30   : > { %v5636_v57 = vsel %vm5604_vm5, %v5588_v3, %v5620_v20 }
 0xb31   : > { %v5768_v27 = vsel %vm13192_vm8, %v13213_v14, %v5767_v43  ;;  %v5777_v15 = vsel %vm13192_vm8, %v5769_v45, %v13197_v55  ;;  %v12111_v4 = vpack.c.bf16 %v5636_v57, %v5636_v57  ;;  %v14626_v44 = vld [vmem:[#allocation2 + $0x6c] sm:$0xff]   ;;  %v7698_v57 = vld [vmem:[#allocation2 + $0x9c] sm:$0x1] }
 0xb32   : > { %v5471_v16 = vpop.permute.xlu1 %5470  ;;  %5876 = vst.msk [vmem:[#allocation2 + $0x74] sm:$0xf] %vm172_vm1, %v5768_v27  ;;  %5877 = vst.msk [vmem:[#allocation2 + $0x78] sm:$0xf] %vm172_vm1, %v5777_v15  ;;  %5963 = vrot.lane.b32.xlu1 %v14626_v44, %s12844_s5  ;;  %v14675_v15 = vld [vmem:[#allocation2 + $0x9c] sm:$0xf] }
 0xb33   : > { %v5508_v48 = vadd.f32 %v5471_v16, %v14480_v10  ;;  %v5780_v23 = vshrl.u32 %v12111_v4, 16  ;;  %v5783_v54 = vshll.u32 %v12111_v4, 16  ;;  %v7699_v4 = vsel %vm13287_vm6, %v13213_v14, %v7698_v57 }
 0xb34   : > { %7700 = vst [vmem:[#allocation2 + $0x9c] sm:$0x1] %v7699_v4 }
 0xb35   : > { %v5590_v56 = vadd.f32 %v14486_v7, %v5508_v48  ;;  %v5782_v60 = vrot.slane %v5780_v23, 7 }
 0xb37   : > { %vm5606_vm10 = vcmp.ge.f32.partialorder %v5590_v56, 0.0  ;;  %v5622_v13 = vmul.f32 0.2, %v5590_v56  ;;  %v5785_v38 = vor.u32 %v5783_v54, %v5782_v60  ;;  %v5787_v39 = vrot.slane %v5782_v60, 4  ;;  %v12560_v54 = vld [vmem:[#allocation2 + $0x54] sm:$0xff]  }
 0xb39   : > { %v5638_v9 = vsel %vm5606_vm10, %v5590_v56, %v5622_v13  ;;  %v5786_v8 = vsel %vm13192_vm8, %v13213_v14, %v5785_v38  ;;  %v5795_v10 = vsel %vm13192_vm8, %v5787_v39, %v13197_v55  ;;  %v14640_v21 = vld [vmem:[#allocation2 + $0x74] sm:$0xff]  }
 0xb3a   : > { %v12113_v40 = vpack.c.bf16 %v5638_v9, %v5638_v9  ;;  %v5475_v5 = vpop.permute.xlu0 %5474  ;;  %5878 = vst.msk [vmem:[#allocation2 + $0x7c] sm:$0xf] %vm172_vm1, %v5786_v8  ;;  %5879 = vst.msk [vmem:[#allocation2 + $0x80] sm:$0xf] %vm172_vm1, %v5795_v10  ;;  %5965 = vrot.lane.b32.xlu0 %v14640_v21, %s12844_s5 }
 0xb3b   : > { %v5510_v7 = vadd.f32 %v5475_v5, %v14489_v58 }
 0xb3c   : > { %v5798_v30 = vshrl.u32 %v12113_v40, 16  ;;  %v5801_v37 = vshll.u32 %v12113_v40, 16 }
 0xb3d   : > { %v5592_v47 = vadd.f32 %v14497_v19, %v5510_v7 }
 0xb3e   : > { %v5800_v11 = vrot.slane %v5798_v30, 7  ;;  %v4164_v51 = vpop.permute.xlu0 %4163 }
 0xb3f   : > { %vm5608_vm11 = vcmp.ge.f32.partialorder %v5592_v47, 0.0  ;;  %v5624_v49 = vmul.f32 0.2, %v5592_v47  ;;  %v4205_v52 = vsel %vm505_vm0, %v11384_v63, %v4164_v51 }
 0xb40   : > { %v5803_v29 = vor.u32 %v5801_v37, %v5800_v11  ;;  %v5805_v35 = vrot.slane %v5800_v11, 4  ;;  %4486 = vmatmul.mubr.bf16.gmra.mrb[104].mxu0 %v4205_v52 }
 0xb41   : > { %v5640_v62 = vsel %vm5608_vm11, %v5592_v47, %v5624_v49  ;;  %11609 = vmatprep.mubr.msk.bf16.mxu0 %vm505_vm0, %v14612_v34  ;;  %v14657_v22 = vld [vmem:[#allocation2 + $0x7c] sm:$0xff]  }
 0xb42   : > { %v5804_v58 = vsel %vm13192_vm8, %v13213_v14, %v5803_v29  ;;  %v5813_v19 = vsel %vm13192_vm8, %v5805_v35, %v13197_v55  ;;  %v12115_v17 = vpack.c.bf16 %v5640_v62, %v5640_v62  ;;  %5967 = vrot.lane.b32.xlu1 %v14657_v22, %s12844_s5  ;;  %v5908_v47 = vld [vmem:[#allocation2 + $0xa0] sm:$0xf] }
 0xb43   : > { %5880 = vst.msk [vmem:[#allocation2 + $0x84] sm:$0xf] %vm172_vm1, %v5804_v58  ;;  %5881 = vst.msk [vmem:[#allocation2 + $0x88] sm:$0xf] %vm172_vm1, %v5813_v19 }
 0xb44   : > { %v5816_v31 = vshrl.u32 %v12115_v17, 16  ;;  %v5819_v53 = vshll.u32 %v12115_v17, 16 }
 0xb46   : > { %v5818_v18 = vrot.slane %v5816_v31, 7 }
 0xb48   : > { %v5821_v24 = vor.u32 %v5819_v53, %v5818_v18  ;;  %v5823_v32 = vrot.slane %v5818_v18, 4 }
 0xb4a   : > { %v5822_v25 = vsel %vm13192_vm8, %v13213_v14, %v5821_v24  ;;  %v5831_v50 = vsel %vm13192_vm8, %v5823_v32, %v13197_v55  ;;  %v12521_v2 = vld [vmem:[#allocation2 + $0x84] sm:$0xff]  }
 0xb4b   : > { %v5479_v36 = vpop.permute.xlu1 %5478  ;;  %5882 = vst.msk [vmem:[#allocation2 + $0x8c] sm:$0xf] %vm172_vm1, %v5822_v25  ;;  %5883 = vst.msk [vmem:[#allocation2 + $0x90] sm:$0xf] %vm172_vm1, %v5831_v50  ;;  %5969 = vrot.lane.b32.xlu0 %v12521_v2, %s12844_s5 }
 0xb4c   : > { %v5512_v6 = vadd.f32 %v5479_v36, %v14500_v26 }
 0xb4e   : > { %v5594_v42 = vadd.f32 %v14506_v1, %v5512_v6 }
 0xb50   : > { %vm5610_vm12 = vcmp.ge.f32.partialorder %v5594_v42, 0.0  ;;  %v5626_v3 = vmul.f32 0.2, %v5594_v42 }
 0xb52   : > { %v5642_v26 = vsel %vm5610_vm12, %v5594_v42, %v5626_v3  ;;  %v12525_v20 = vld [vmem:[#allocation2 + $0x8c] sm:$0xff]  }
 0xb53   : > { %v12117_v12 = vpack.c.bf16 %v5642_v26, %v5642_v26  ;;  %5971 = vrot.lane.b32.xlu1 %v12525_v20, %s12844_s5 }
 0xb55   : > { %v5834_v33 = vshrl.u32 %v12117_v12, 16  ;;  %v5837_v45 = vshll.u32 %v12117_v12, 16 }
 0xb57   : > { %v5836_v43 = vrot.slane %v5834_v33, 7 }
 0xb59   : > { %v5839_v27 = vor.u32 %v5837_v45, %v5836_v43  ;;  %v5841_v1 = vrot.slane %v5836_v43, 4 }
 0xb5b   : > { %v5840_v16 = vsel %vm13192_vm8, %v13213_v14, %v5839_v27  ;;  %v5849_v48 = vsel %vm13192_vm8, %v5841_v1, %v13197_v55 }
 0xb5c   : > { %5884 = vst.msk [vmem:[#allocation2 + $0x94] sm:$0xf] %vm172_vm1, %v5840_v16  ;;  %5885 = vst.msk [vmem:[#allocation2 + $0x98] sm:$0xf] %vm172_vm1, %v5849_v48 }
 0xb63   : > { %v5905_v23 = vld [vmem:[#allocation2 + $0x94] sm:$0xf]  ;;  %v5906_v56 = vld [vmem:[#allocation2 + $0x98] sm:$0xf] }
 0xb64   : > { %v11557_v60 = vcombine.low %v5905_v23, %v5906_v56 }
 0xb66   : > { %5973 = vrot.lane.b32.xlu0 %v11557_v60, %s12844_s5 }
 0xb94   : > { %v5960_v13 = vpop.permute.xlu1 %5959 }
 0xb95   : > { %v5985_v38 = vsel %vm505_vm0, %v12560_v54, %v5960_v13 }
 0xb96   : > { %6218 = vmatmul.mubr.bf16.vlgmr.msra.gmra.mrb[108].mxu0 %v5985_v38 }
 0xb97   : > { %11610 = vmatprep.mubr.msk.bf16.mxu0 %vm505_vm0, %v14626_v44 }
 0xb9c   : > { %v5962_v39 = vpop.permute.xlu0 %5961 }
 0xb9d   : > { %v5989_v9 = vsel %vm505_vm0, %v14598_v41, %v5962_v39 }
 0xb9e   : > { %6228 = vmatmul.mubr.bf16.gmra.mrb[112].mxu0 %v5989_v9 }
 0xb9f   : > { %11611 = vmatprep.mubr.msk.bf16.mxu0 %vm505_vm0, %v14640_v21 }
 0xba4   : > { %v5964_v8 = vpop.permute.xlu1 %5963 }
 0xba5   : > { %v5993_v10 = vsel %vm505_vm0, %v14612_v34, %v5964_v8 }
 0xba6   : > { %6238 = vmatmul.mubr.bf16.gmra.mrb[116].mxu0 %v5993_v10 }
 0xba7   : > { %11612 = vmatprep.mubr.msk.bf16.mxu0 %vm505_vm0, %v14657_v22 }
 0xbac   : > { %v5966_v40 = vpop.permute.xlu0 %5965 }
 0xbad   : > { %v5997_v5 = vsel %vm505_vm0, %v14626_v44, %v5966_v40  ;;  %v11559_v44 = vcombine.low %v14675_v15, %v5908_v47 }
 0xbae   : > { %6248 = vmatmul.mubr.bf16.gmra.mrb[120].mxu0 %v5997_v5 }
 0xbaf   : > { %11613 = vmatprep.mubr.msk.bf16.mxu0 %vm505_vm0, %v12521_v2 }
 0xbb4   : > { %v5968_v41 = vpop.permute.xlu1 %5967 }
 0xbb5   : > { %v6001_v7 = vsel %vm505_vm0, %v14640_v21, %v5968_v41 }
 0xbb6   : > { %6258 = vmatmul.mubr.bf16.gmra.mrb[124].mxu0 %v6001_v7 }
 0xbb7   : > { %11614 = vmatprep.mubr.msk.bf16.mxu0 %vm505_vm0, %v12525_v20 }
 0xbbd   : > { %v5970_v30 = vpop.permute.xlu0 %5969 }
 0xbbe   : > { %v6005_v34 = vsel %vm505_vm0, %v14657_v22, %v5970_v30 }
 0xbbf   : > { %6268 = vmatmul.mubr.bf16.gmra.mrb[128].mxu0 %v6005_v34 }
 0xbc0   : > { %11615 = vmatprep.mubr.msk.bf16.mxu0 %vm505_vm0, %v11557_v60 }
 0xbc5   : > { %v5972_v0 = vpop.permute.xlu1 %5971 }
 0xbc6   : > { %v6009_v63 = vsel %vm505_vm0, %v12521_v2, %v5972_v0 }
 0xbc7   : > { %6278 = vmatmul.mubr.bf16.gmra.mrb[132].mxu0 %v6009_v63 }
 0xbc8   : > { %11616 = vmatprep.mubr.msk.bf16.mxu0 %vm505_vm0, %v11559_v44 }
 0xbd8   : > { %v5974_v21 = vpop.permute.xlu0 %5973 }
 0xbd9   : > { %v6013_v11 = vsel %vm505_vm0, %v12525_v20, %v5974_v21 }
 0xbda   : > { %6288 = vmatmul.mubr.bf16.gmra.mrb[136].mxu0 %v6013_v11 }
 0xc13   : > { %v4487_v37 = vpop.f32.mrb[104].mxu0 }
 0xc14   : > { %v4489_v51 = vpop.f32.mrb[105].mxu0 }
 0xc15   : > { %v4491_v49 = vpop.f32.mrb[106].mxu0 }
 0xc16   : > { %v4492_v52 = vpop.f32.mrb[107].mxu0 }
 0xc69   : > { %v14713_v29 = vpop.f32.mrb[108].mxu0 }
 0xc6a   : > { %v6221_v35 = vpop.f32.mrb[109].mxu0  ;;  %v6323_v58 = vrot.slane %v14713_v29, 1 }
 0xc6b   : > { %v6223_v62 = vpop.f32.mrb[110].mxu0  ;;  %v6437_v22 = vrot.slane %v6221_v35, 2 }
 0xc6c   : > { %v6324_v19 = vrot.slane %v6223_v62, 1  ;;  %v6225_v17 = vpop.f32.mrb[111].mxu0  ;;  %v12566_v62 = vld [vmem:[#allocation2 + $0x50] ss:$0 sps:$4 sm:$0xff]  }
 0xc6d   : > { %v6438_v31 = vrot.slane %v6225_v17, 2  ;;  %11531 = vmatprep.mubr.msk.bf16.mxu1 %vm505_vm0, %v12566_v62  ;;  %v12604_v62 = vld [vmem:[%s16294_s1 + $0x5f0] ss:$8 sps:$4 sm:$0xff]  }
 0xc6e   : > { %v6325_v18 = vsel %vm845_vm2, %v6323_v58, %v6324_v19 }
 0xc6f   : > { %6356 = vrot.lane.b32.xlu1 %v6325_v18, %s12844_s5  ;;  %v14719_v53 = vsel %vm960_vm3, %v6437_v22, %v6438_v31 }
 0xc71   : > { %v14721_v36 = vpop.f32.mrb[112].mxu0 }
 0xc72   : > { %v6231_v24 = vpop.f32.mrb[113].mxu0  ;;  %v6326_v6 = vrot.slane %v14721_v36, 1 }
 0xc73   : > { %v6233_v32 = vpop.f32.mrb[114].mxu0  ;;  %v6440_v42 = vrot.slane %v6231_v24, 2 }
 0xc74   : > { %v6328_v25 = vrot.slane %v6233_v32, 1  ;;  %v6235_v50 = vpop.f32.mrb[115].mxu0 }
 0xc75   : > { %v6442_v2 = vrot.slane %v6235_v50, 2 }
 0xc76   : > { %v6329_v3 = vsel %vm845_vm2, %v6326_v6, %v6328_v25 }
 0xc77   : > { %6360 = vrot.lane.b32.xlu0 %v6329_v3, %s12844_s5  ;;  %v14727_v26 = vsel %vm960_vm3, %v6440_v42, %v6442_v2  ;;  %v11472_v42 = vcombine.low %v14402_v46, %v14402_v46 }
 0xc79   : > { %v14729_v12 = vpop.f32.mrb[116].mxu0 }
 0xc7a   : > { %v6241_v33 = vpop.f32.mrb[117].mxu0  ;;  %v6330_v43 = vrot.slane %v14729_v12, 1 }
 0xc7b   : > { %v6243_v20 = vpop.f32.mrb[118].mxu0  ;;  %v6444_v27 = vrot.slane %v6241_v33, 2 }
 0xc7c   : > { %v6332_v45 = vrot.slane %v6243_v20, 1  ;;  %v6245_v57 = vpop.f32.mrb[119].mxu0 }
 0xc7d   : > { %v6446_v1 = vrot.slane %v6245_v57, 2 }
 0xc7e   : > { %v6333_v4 = vsel %vm845_vm2, %v6330_v43, %v6332_v45 }
 0xc7f   : > { %6364 = vrot.lane.b32.xlu1 %v6333_v4, %s12844_s5  ;;  %v14735_v16 = vsel %vm960_vm3, %v6444_v27, %v6446_v1 }
 0xc81   : > { %v14737_v48 = vpop.f32.mrb[120].mxu0 }
 0xc82   : > { %v6251_v23 = vpop.f32.mrb[121].mxu0  ;;  %v6334_v60 = vrot.slane %v14737_v48, 1 }
 0xc83   : > { %v6253_v56 = vpop.f32.mrb[122].mxu0  ;;  %v6448_v38 = vrot.slane %v6251_v23, 2  ;;  %v12569_v23 = vld [vmem:[%s16294_s1 + $0x540] ss:$8 sps:$4 sm:$0xff]  }
 0xc84   : > { %v6336_v54 = vrot.slane %v6253_v56, 1  ;;  %v6255_v13 = vpop.f32.mrb[123].mxu0  ;;  %v12571_v56 = vld [vmem:[%s16294_s1 + $0x544] ss:$8 sps:$4 sm:$0xff]  }
 0xc85   : > { %v6450_v39 = vrot.slane %v6255_v13, 2  ;;  %7091 = vmatprep.subr.bf16.mxu1 %v12571_v56  ;;  %v12578_v13 = vld [vmem:[%s16294_s1 + $0x564] ss:$8 sps:$4 sm:$0xff]  }
 0xc86   : > { %v6337_v9 = vsel %vm845_vm2, %v6334_v60, %v6336_v54  ;;  %v12575_v60 = vld [vmem:[%s16294_s1 + $0x554] ss:$8 sps:$4 sm:$0xff]   ;;  %7092 = vmatpush1.bf16.msra.mxu1 %v12569_v23  ;;  %v12573_v54 = vld [vmem:[%s16294_s1 + $0x550] ss:$8 sps:$4 sm:$0xff]  }
 0xc87   : > { %6368 = vrot.lane.b32.xlu0 %v6337_v9, %s12844_s5  ;;  %v14743_v8 = vsel %vm960_vm3, %v6448_v38, %v6450_v39  ;;  %7093 = vmatprep.subr.bf16.mxu1 %v12575_v60  ;;  %v12576_v38 = vld [vmem:[%s16294_s1 + $0x560] ss:$8 sps:$4 sm:$0xff]   ;;  %v12582_v39 = vld [vmem:[%s16294_s1 + $0x574] ss:$8 sps:$4 sm:$0xff]   ;;  %v12580_v9 = vld [vmem:[%s16294_s1 + $0x570] ss:$8 sps:$4 sm:$0xff]  }
 0xc89   : > { %v14745_v10 = vpop.f32.mrb[124].mxu0 }
 0xc8a   : > { %v6261_v40 = vpop.f32.mrb[125].mxu0  ;;  %v6338_v41 = vrot.slane %v14745_v10, 1  ;;  %7094 = vmatpush1.bf16.msra.mxu1 %v12573_v54 }
 0xc8b   : > { %v6263_v5 = vpop.f32.mrb[126].mxu0  ;;  %v6452_v34 = vrot.slane %v6261_v40, 2  ;;  %7095 = vmatprep.subr.bf16.mxu1 %v12578_v13  ;;  %v12585_v40 = vld [vmem:[%s16294_s1 + $0x584] ss:$8 sps:$4 sm:$0xff]  }
 0xc8c   : > { %v6340_v7 = vrot.slane %v6263_v5, 1  ;;  %v6265_v30 = vpop.f32.mrb[127].mxu0  ;;  %v12583_v5 = vld [vmem:[%s16294_s1 + $0x580] ss:$8 sps:$4 sm:$0xff]  }
 0xc8d   : > { %v6454_v47 = vrot.slane %v6265_v30, 2  ;;  %v12591_v30 = vld [vmem:[%s16294_s1 + $0x5a4] ss:$8 sps:$4 sm:$0xff]  }
 0xc8e   : > { %v6341_v44 = vsel %vm845_vm2, %v6338_v41, %v6340_v7  ;;  %7096 = vmatpush1.bf16.msra.mxu1 %v12576_v38  ;;  %v12588_v41 = vld [vmem:[%s16294_s1 + $0x594] ss:$8 sps:$4 sm:$0xff]   ;;  %v12586_v7 = vld [vmem:[%s16294_s1 + $0x590] ss:$8 sps:$4 sm:$0xff]  }
 0xc8f   : > { %6372 = vrot.lane.b32.xlu1 %v6341_v44, %s12844_s5  ;;  %v14751_v0 = vsel %vm960_vm3, %v6452_v34, %v6454_v47  ;;  %7097 = vmatprep.subr.bf16.mxu1 %v12582_v39  ;;  %v12589_v34 = vld [vmem:[%s16294_s1 + $0x5a0] ss:$8 sps:$4 sm:$0xff]   ;;  %v12594_v47 = vld [vmem:[%s16294_s1 + $0x5b4] ss:$8 sps:$4 sm:$0xff]   ;;  %v12592_v44 = vld [vmem:[%s16294_s1 + $0x5b0] ss:$8 sps:$4 sm:$0xff]  }
 0xc92   : > { %v14753_v63 = vpop.f32.mrb[128].mxu0  ;;  %7098 = vmatpush1.bf16.msra.mxu1 %v12580_v9 }
 0xc93   : > { %v6271_v21 = vpop.f32.mrb[129].mxu0  ;;  %v6342_v37 = vrot.slane %v14753_v63, 1  ;;  %7099 = vmatprep.subr.bf16.mxu1 %v12585_v40 }
 0xc94   : > { %v6273_v11 = vpop.f32.mrb[130].mxu0  ;;  %v6456_v52 = vrot.slane %v6271_v21, 2  ;;  %v12597_v21 = vld [vmem:[%s16294_s1 + $0x5c4] ss:$8 sps:$4 sm:$0xff]  }
 0xc95   : > { %v6344_v51 = vrot.slane %v6273_v11, 1  ;;  %v6275_v49 = vpop.f32.mrb[131].mxu0  ;;  %v12595_v11 = vld [vmem:[%s16294_s1 + $0x5c0] ss:$8 sps:$4 sm:$0xff]  }
 0xc96   : > { %v6458_v35 = vrot.slane %v6275_v49, 2  ;;  %7100 = vmatpush1.bf16.msra.mxu1 %v12583_v5  ;;  %v12603_v49 = vld [vmem:[%s16294_s1 + $0x5e4] ss:$8 sps:$4 sm:$0xff]  }
 0xc97   : > { %v6345_v58 = vsel %vm845_vm2, %v6342_v37, %v6344_v51  ;;  %7101 = vmatprep.subr.bf16.mxu1 %v12588_v41  ;;  %v12600_v37 = vld [vmem:[%s16294_s1 + $0x5d4] ss:$8 sps:$4 sm:$0xff]   ;;  %v12598_v51 = vld [vmem:[%s16294_s1 + $0x5d0] ss:$8 sps:$4 sm:$0xff]  }
 0xc98   : > { %6376 = vrot.lane.b32.xlu0 %v6345_v58, %s12844_s5  ;;  %v14759_v19 = vsel %vm960_vm3, %v6456_v52, %v6458_v35  ;;  %v12601_v52 = vld [vmem:[%s16294_s1 + $0x5e0] ss:$8 sps:$4 sm:$0xff]   ;;  %v12606_v35 = vld [vmem:[%s16294_s1 + $0x5f4] ss:$8 sps:$4 sm:$0xff]  }
 0xc9a   : > { %v14762_v17 = vpop.f32.mrb[132].mxu0  ;;  %7102 = vmatpush1.bf16.msra.mxu1 %v12586_v7 }
 0xc9b   : > { %v6281_v22 = vpop.f32.mrb[133].mxu0  ;;  %v6346_v18 = vrot.slane %v14762_v17, 1  ;;  %7103 = vmatprep.subr.bf16.mxu1 %v12591_v30 }
 0xc9c   : > { %v6283_v31 = vpop.f32.mrb[134].mxu0  ;;  %v6460_v6 = vrot.slane %v6281_v22, 2 }
 0xc9d   : > { %v6348_v24 = vrot.slane %v6283_v31, 1  ;;  %v6285_v32 = vpop.f32.mrb[135].mxu0 }
 0xc9e   : > { %v6462_v25 = vrot.slane %v6285_v32, 2  ;;  %7104 = vmatpush1.bf16.msra.mxu1 %v12589_v34 }
 0xc9f   : > { %v6349_v50 = vsel %vm845_vm2, %v6346_v18, %v6348_v24  ;;  %7105 = vmatprep.subr.bf16.mxu1 %v12594_v47 }
 0xca0   : > { %6380 = vrot.lane.b32.xlu1 %v6349_v50, %s12844_s5  ;;  %v14770_v2 = vsel %vm960_vm3, %v6460_v6, %v6462_v25 }
 0xca2   : > { %7106 = vmatpush1.bf16.msra.mxu1 %v12592_v44 }
 0xca3   : > { %7107 = vmatprep.subr.bf16.mxu1 %v12597_v21 }
 0xca4   : > { %5069 = vrot.lane.b32.xlu1 %v11472_v42, %s12844_s5 }
 0xca6   : > { %7108 = vmatpush1.bf16.msra.mxu1 %v12595_v11 }
 0xca7   : > { %7109 = vmatprep.subr.bf16.mxu1 %v12600_v37 }
 0xcaa   : > { %7110 = vmatpush1.bf16.msra.mxu1 %v12598_v51 }
 0xcab   : > { %7111 = vmatprep.subr.bf16.mxu1 %v12603_v49 }
 0xcad   : > { %v14773_v3 = vpop.f32.mrb[136].mxu0 }
 0xcae   : > { %v6291_v33 = vpop.f32.mrb[137].mxu0  ;;  %v6350_v43 = vrot.slane %v14773_v3, 1  ;;  %7112 = vmatpush1.bf16.msra.mxu1 %v12601_v52 }
 0xcaf   : > { %v6293_v20 = vpop.f32.mrb[138].mxu0  ;;  %v6464_v27 = vrot.slane %v6291_v33, 2  ;;  %7113 = vmatprep.subr.bf16.mxu1 %v12606_v35 }
 0xcb0   : > { %v6352_v45 = vrot.slane %v6293_v20, 1  ;;  %v6295_v57 = vpop.f32.mrb[139].mxu0 }
 0xcb1   : > { %v6466_v1 = vrot.slane %v6295_v57, 2 }
 0xcb2   : > { %v6353_v4 = vsel %vm845_vm2, %v6350_v43, %v6352_v45  ;;  %7114 = vmatpush1.bf16.msra.mxu1 %v12604_v62 }
 0xcb3   : > { %6384 = vrot.lane.b32.xlu0 %v6353_v4, %s12844_s5  ;;  %v14779_v46 = vsel %vm960_vm3, %v6464_v27, %v6466_v1  ;;  %v6774_v27 = vld [vmem:[#allocation2 + $0x8] sm:$0xf] }
 0xce1   : > { %v6357_v58 = vpop.permute.xlu1 %6356 }
 0xce2   : > { %v6404_v22 = vadd.f32 %v6357_v58, %v14713_v29 }
 0xce4   : > { %v6486_v31 = vadd.f32 %v14719_v53, %v6404_v22 }
 0xce6   : > { %vm6502_vm13 = vcmp.ge.f32.partialorder %v6486_v31, 0.0  ;;  %v6518_v18 = vmul.f32 0.2, %v6486_v31 }
 0xce8   : > { %v6534_v24 = vsel %vm6502_vm13, %v6486_v31, %v6518_v18 }
 0xce9   : > { %v12119_v32 = vpack.c.bf16 %v6534_v24, %v6534_v24  ;;  %v6361_v6 = vpop.permute.xlu0 %6360 }
 0xcea   : > { %v6406_v25 = vadd.f32 %v6361_v6, %v14721_v36 }
 0xceb   : > { %v6615_v50 = vshrl.u32 %v12119_v32, 16  ;;  %v6618_v20 = vshll.u32 %v12119_v32, 16 }
 0xcec   : > { %v6488_v42 = vadd.f32 %v14727_v26, %v6406_v25 }
 0xced   : > { %v6617_v33 = vrot.slane %v6615_v50, 7 }
 0xcee   : > { %vm6504_vm14 = vcmp.ge.f32.partialorder %v6488_v42, 0.0  ;;  %v6520_v43 = vmul.f32 0.2, %v6488_v42 }
 0xcef   : > { %v6620_v45 = vor.u32 %v6618_v20, %v6617_v33  ;;  %v6621_v57 = vrot.slane %v6617_v33, 4 }
 0xcf0   : > { %v6536_v29 = vsel %vm6504_vm14, %v6488_v42, %v6520_v43 }
 0xcf1   : > { %v6629_v53 = vsel %vm13192_vm8, %v6621_v57, %v13197_v55  ;;  %v6775_v1 = vsel %vm13200_vm9, %v6620_v45, %v6774_v27  ;;  %v12121_v4 = vpack.c.bf16 %v6536_v29, %v6536_v29  ;;  %v6365_v36 = vpop.permute.xlu1 %6364 }
 0xcf2   : > { %6776 = vst [vmem:[#allocation2 + $0x8] sm:$0xf] %v6775_v1  ;;  %6777 = vst.msk [vmem:[#allocation2 + $0xc] sm:$0xf] %vm172_vm1, %v6629_v53  ;;  %v6408_v26 = vadd.f32 %v6365_v36, %v14729_v12 }
 0xcf3   : > { %v6632_v23 = vshrl.u32 %v12121_v4, 16  ;;  %v6635_v54 = vshll.u32 %v12121_v4, 16 }
 0xcf4   : > { %v6490_v56 = vadd.f32 %v14735_v16, %v6408_v26 }
 0xcf5   : > { %v6634_v60 = vrot.slane %v6632_v23, 7 }
 0xcf6   : > { %vm6506_vm15 = vcmp.ge.f32.partialorder %v6490_v56, 0.0  ;;  %v6522_v13 = vmul.f32 0.2, %v6490_v56 }
 0xcf7   : > { %v6637_v38 = vor.u32 %v6635_v54, %v6634_v60  ;;  %v6639_v39 = vrot.slane %v6634_v60, 4 }
 0xcf8   : > { %v6538_v9 = vsel %vm6506_vm15, %v6490_v56, %v6522_v13  ;;  %v12832_v13 = vld [vmem:[#allocation2 + $0x40] sm:$0xf] }
 0xcf9   : > { %v6638_v40 = vsel %vm13192_vm8, %v13213_v14, %v6637_v38  ;;  %v6647_v5 = vsel %vm13192_vm8, %v6639_v39, %v13197_v55  ;;  %v12123_v41 = vpack.c.bf16 %v6538_v9, %v6538_v9  ;;  %v6369_v12 = vpop.permute.xlu0 %6368  ;;  %v14871_v7 = vld [vmem:[#allocation2 + $0x8] sm:$0xff]   ;;  %v11470_v38 = vcombine.low %v12832_v13, %v12832_v13 }
 0xcfa   : > { %6778 = vst.msk [vmem:[#allocation2 + $0x10] sm:$0xf] %vm172_vm1, %v6638_v40  ;;  %6779 = vst.msk [vmem:[#allocation2 + $0x14] sm:$0xf] %vm172_vm1, %v6647_v5  ;;  %v6410_v16 = vadd.f32 %v6369_v12, %v14737_v48  ;;  %6865 = vrot.lane.b32.xlu0 %v14871_v7, %s12844_s5 }
 0xcfb   : > { %v6650_v30 = vshrl.u32 %v12123_v41, 16  ;;  %v6653_v44 = vshll.u32 %v12123_v41, 16 }
 0xcfc   : > { %v6492_v34 = vadd.f32 %v14743_v8, %v6410_v16 }
 0xcfd   : > { %v6652_v47 = vrot.slane %v6650_v30, 7 }
 0xcfe   : > { %vm6508_vm4 = vcmp.ge.f32.partialorder %v6492_v34, 0.0  ;;  %v6524_v21 = vmul.f32 0.2, %v6492_v34 }
 0xcff   : > { %v6655_v11 = vor.u32 %v6653_v44, %v6652_v47  ;;  %v6657_v37 = vrot.slane %v6652_v47, 4 }
 0xd00   : > { %v6540_v51 = vsel %vm6508_vm4, %v6492_v34, %v6524_v21 }
 0xd01   : > { %v6656_v49 = vsel %vm13192_vm8, %v13213_v14, %v6655_v11  ;;  %v6665_v48 = vsel %vm13192_vm8, %v6657_v37, %v13197_v55  ;;  %v12125_v52 = vpack.c.bf16 %v6540_v51, %v6540_v51  ;;  %v6373_v35 = vpop.permute.xlu1 %6372  ;;  %v14885_v62 = vld [vmem:[#allocation2 + $0x10] sm:$0xff]  }
 0xd02   : > { %6780 = vst.msk [vmem:[#allocation2 + $0x18] sm:$0xf] %vm172_vm1, %v6656_v49  ;;  %6781 = vst.msk [vmem:[#allocation2 + $0x1c] sm:$0xf] %vm172_vm1, %v6665_v48  ;;  %v6412_v8 = vadd.f32 %v6373_v35, %v14745_v10  ;;  %6867 = vrot.lane.b32.xlu1 %v14885_v62, %s12844_s5 }
 0xd03   : > { %v6668_v58 = vshrl.u32 %v12125_v52, 16  ;;  %v6671_v18 = vshll.u32 %v12125_v52, 16 }
 0xd04   : > { %v6494_v22 = vadd.f32 %v14751_v0, %v6412_v8 }
 0xd05   : > { %v6670_v31 = vrot.slane %v6668_v58, 7 }
 0xd06   : > { %vm6510_vm7 = vcmp.ge.f32.partialorder %v6494_v22, 0.0  ;;  %v6526_v24 = vmul.f32 0.2, %v6494_v22 }
 0xd07   : > { %v6673_v32 = vor.u32 %v6671_v18, %v6670_v31  ;;  %v6675_v6 = vrot.slane %v6670_v31, 4 }
 0xd08   : > { %v6542_v25 = vsel %vm6510_vm7, %v6494_v22, %v6526_v24 }
 0xd09   : > { %v6674_v50 = vsel %vm13192_vm8, %v13213_v14, %v6673_v32  ;;  %v6683_v10 = vsel %vm13192_vm8, %v6675_v6, %v13197_v55  ;;  %v12127_v42 = vpack.c.bf16 %v6542_v25, %v6542_v25  ;;  %v14899_v20 = vld [vmem:[#allocation2 + $0x18] sm:$0xff]  }
 0xd0a   : > { %v6377_v33 = vpop.permute.xlu0 %6376  ;;  %6782 = vst.msk [vmem:[#allocation2 + $0x20] sm:$0xf] %vm172_vm1, %v6674_v50  ;;  %6783 = vst.msk [vmem:[#allocation2 + $0x24] sm:$0xf] %vm172_vm1, %v6683_v10  ;;  %6869 = vrot.lane.b32.xlu0 %v14899_v20, %s12844_s5  ;;  %v14950_v10 = vld [vmem:[#allocation2 + $0x48] sm:$0xf] }
 0xd0b   : > { %v6414_v0 = vadd.f32 %v6377_v33, %v14753_v63  ;;  %v6686_v43 = vshrl.u32 %v12127_v42, 16  ;;  %v6689_v27 = vshll.u32 %v12127_v42, 16 }
 0xd0d   : > { %v6496_v45 = vadd.f32 %v14759_v19, %v6414_v0  ;;  %v6688_v57 = vrot.slane %v6686_v43, 7 }
 0xd0f   : > { %vm6512_vm5 = vcmp.ge.f32.partialorder %v6496_v45, 0.0  ;;  %v6528_v29 = vmul.f32 0.2, %v6496_v45  ;;  %v6691_v53 = vor.u32 %v6689_v27, %v6688_v57  ;;  %v6693_v1 = vrot.slane %v6688_v57, 4  ;;  %v12607_v27 = vld [vmem:[#allocation2] sm:$0xff]  }
 0xd11   : > { %v6544_v4 = vsel %vm6512_vm5, %v6496_v45, %v6528_v29  ;;  %v6692_v36 = vsel %vm13192_vm8, %v13213_v14, %v6691_v53  ;;  %v6701_v63 = vsel %vm13192_vm8, %v6693_v1, %v13197_v55  ;;  %v14913_v56 = vld [vmem:[#allocation2 + $0x20] sm:$0xff]  }
 0xd12   : > { %v12129_v26 = vpack.c.bf16 %v6544_v4, %v6544_v4  ;;  %v6381_v23 = vpop.permute.xlu1 %6380  ;;  %6784 = vst.msk [vmem:[#allocation2 + $0x28] sm:$0xf] %vm172_vm1, %v6692_v36  ;;  %6785 = vst.msk [vmem:[#allocation2 + $0x2c] sm:$0xf] %vm172_vm1, %v6701_v63  ;;  %6871 = vrot.lane.b32.xlu1 %v14913_v56, %s12844_s5 }
 0xd13   : > { %v6416_v19 = vadd.f32 %v6381_v23, %v14762_v17 }
 0xd14   : > { %v6704_v60 = vshrl.u32 %v12129_v26, 16  ;;  %v6707_v9 = vshll.u32 %v12129_v26, 16 }
 0xd15   : > { %v6498_v54 = vadd.f32 %v14770_v2, %v6416_v19 }
 0xd16   : > { %v6706_v39 = vrot.slane %v6704_v60, 7  ;;  %v5070_v40 = vpop.permute.xlu1 %5069 }
 0xd17   : > { %vm6514_vm10 = vcmp.ge.f32.partialorder %v6498_v54, 0.0  ;;  %v6530_v5 = vmul.f32 0.2, %v6498_v54  ;;  %v5111_v41 = vsel %vm505_vm0, %v11470_v38, %v5070_v40 }
 0xd18   : > { %v6709_v12 = vor.u32 %v6707_v9, %v6706_v39  ;;  %v6711_v16 = vrot.slane %v6706_v39, 4  ;;  %5392 = vmatmul.mubr.bf16.gmra.mrb[104].mxu1 %v5111_v41 }
 0xd19   : > { %v6546_v30 = vsel %vm6514_vm10, %v6498_v54, %v6530_v5  ;;  %11695 = vmatprep.mubr.msk.bf16.mxu1 %vm505_vm0, %v14885_v62  ;;  %v14930_v47 = vld [vmem:[#allocation2 + $0x28] sm:$0xff]  }
 0xd1a   : > { %v6710_v17 = vsel %vm13192_vm8, %v13213_v14, %v6709_v12  ;;  %v6719_v2 = vsel %vm13192_vm8, %v6711_v16, %v13197_v55  ;;  %v12131_v34 = vpack.c.bf16 %v6546_v30, %v6546_v30  ;;  %6873 = vrot.lane.b32.xlu0 %v14930_v47, %s12844_s5  ;;  %v6814_v54 = vld [vmem:[#allocation2 + $0x4c] sm:$0xf] }
 0xd1b   : > { %6786 = vst.msk [vmem:[#allocation2 + $0x30] sm:$0xf] %vm172_vm1, %v6710_v17  ;;  %6787 = vst.msk [vmem:[#allocation2 + $0x34] sm:$0xf] %vm172_vm1, %v6719_v2 }
 0xd1c   : > { %v6722_v44 = vshrl.u32 %v12131_v34, 16  ;;  %v6725_v11 = vshll.u32 %v12131_v34, 16 }
 0xd1e   : > { %v6724_v21 = vrot.slane %v6722_v44, 7 }
 0xd20   : > { %v6727_v37 = vor.u32 %v6725_v11, %v6724_v21  ;;  %v6729_v51 = vrot.slane %v6724_v21, 4 }
 0xd22   : > { %v6728_v52 = vsel %vm13192_vm8, %v13213_v14, %v6727_v37  ;;  %v6737_v35 = vsel %vm13192_vm8, %v6729_v51, %v13197_v55  ;;  %v12568_v8 = vld [vmem:[#allocation2 + $0x30] sm:$0xff]  }
 0xd23   : > { %6788 = vst.msk [vmem:[#allocation2 + $0x38] sm:$0xf] %vm172_vm1, %v6728_v52  ;;  %6789 = vst.msk [vmem:[#allocation2 + $0x3c] sm:$0xf] %vm172_vm1, %v6737_v35  ;;  %6875 = vrot.lane.b32.xlu1 %v12568_v8, %s12844_s5 }
 0xd25   : > { %v6385_v49 = vpop.permute.xlu0 %6384 }
 0xd26   : > { %v6418_v48 = vadd.f32 %v6385_v49, %v14773_v3  ;;  %v8604_v3 = vld [vmem:[#allocation2 + $0x48] sm:$0x1] }
 0xd27   : > { %v8605_v24 = vsel %vm13287_vm6, %v13213_v14, %v8604_v3 }
 0xd28   : > { %v6500_v58 = vadd.f32 %v14779_v46, %v6418_v48  ;;  %8606 = vst [vmem:[#allocation2 + $0x48] sm:$0x1] %v8605_v24 }
 0xd2a   : > { %vm6516_vm11 = vcmp.ge.f32.partialorder %v6500_v58, 0.0  ;;  %v6532_v22 = vmul.f32 0.2, %v6500_v58  ;;  %v12572_v6 = vld [vmem:[#allocation2 + $0x38] sm:$0xff]  }
 0xd2b   : > { %6877 = vrot.lane.b32.xlu0 %v12572_v6, %s12844_s5 }
 0xd2c   : > { %v6548_v31 = vsel %vm6516_vm11, %v6500_v58, %v6532_v22 }
 0xd2d   : > { %v12133_v18 = vpack.c.bf16 %v6548_v31, %v6548_v31 }
 0xd2f   : > { %v6740_v32 = vshrl.u32 %v12133_v18, 16  ;;  %v6743_v50 = vshll.u32 %v12133_v18, 16 }
 0xd31   : > { %v6742_v25 = vrot.slane %v6740_v32, 7 }
 0xd33   : > { %v6745_v46 = vor.u32 %v6743_v50, %v6742_v25  ;;  %v6747_v42 = vrot.slane %v6742_v25, 4 }
 0xd35   : > { %v6746_v33 = vsel %vm13192_vm8, %v13213_v14, %v6745_v46  ;;  %v6755_v0 = vsel %vm13192_vm8, %v6747_v42, %v13197_v55 }
 0xd36   : > { %6790 = vst.msk [vmem:[#allocation2 + $0x40] sm:$0xf] %vm172_vm1, %v6746_v33  ;;  %6791 = vst.msk [vmem:[#allocation2 + $0x44] sm:$0xf] %vm172_vm1, %v6755_v0 }
 0xd3d   : > { %v6811_v43 = vld [vmem:[#allocation2 + $0x40] sm:$0xf]  ;;  %v6812_v45 = vld [vmem:[#allocation2 + $0x44] sm:$0xf] }
 0xd3e   : > { %v11643_v57 = vcombine.low %v6811_v43, %v6812_v45 }
 0xd40   : > { %6879 = vrot.lane.b32.xlu1 %v11643_v57, %s12844_s5 }
 0xd6c   : > { %v6866_v29 = vpop.permute.xlu0 %6865 }
 0xd6d   : > { %v6891_v53 = vsel %vm505_vm0, %v12607_v27, %v6866_v29 }
 0xd6e   : > { %7124 = vmatmul.mubr.bf16.vlgmr.msra.gmra.mrb[108].mxu1 %v6891_v53 }
 0xd6f   : > { %11696 = vmatprep.mubr.msk.bf16.mxu1 %vm505_vm0, %v14899_v20 }
 0xd74   : > { %v6868_v1 = vpop.permute.xlu1 %6867 }
 0xd75   : > { %v6895_v4 = vsel %vm505_vm0, %v14871_v7, %v6868_v1 }
 0xd76   : > { %7134 = vmatmul.mubr.bf16.gmra.mrb[112].mxu1 %v6895_v4 }
 0xd77   : > { %11697 = vmatprep.mubr.msk.bf16.mxu1 %vm505_vm0, %v14913_v56 }
 0xd7c   : > { %v6870_v36 = vpop.permute.xlu0 %6869 }
 0xd7d   : > { %v6899_v63 = vsel %vm505_vm0, %v14885_v62, %v6870_v36 }
 0xd7e   : > { %7144 = vmatmul.mubr.bf16.gmra.mrb[116].mxu1 %v6899_v63 }
 0xd7f   : > { %11698 = vmatprep.mubr.msk.bf16.mxu1 %vm505_vm0, %v14930_v47 }
 0xd84   : > { %v6872_v26 = vpop.permute.xlu1 %6871 }
 0xd85   : > { %v6903_v23 = vsel %vm505_vm0, %v14899_v20, %v6872_v26  ;;  %v11645_v20 = vcombine.low %v14950_v10, %v6814_v54 }
 0xd86   : > { %7154 = vmatmul.mubr.bf16.gmra.mrb[120].mxu1 %v6903_v23 }
 0xd87   : > { %11699 = vmatprep.mubr.msk.bf16.mxu1 %vm505_vm0, %v12568_v8 }
 0xd8c   : > { %v6874_v7 = vpop.permute.xlu0 %6873 }
 0xd8d   : > { %v6907_v19 = vsel %vm505_vm0, %v14913_v56, %v6874_v7 }
 0xd8e   : > { %7164 = vmatmul.mubr.bf16.gmra.mrb[124].mxu1 %v6907_v19 }
 0xd8f   : > { %11700 = vmatprep.mubr.msk.bf16.mxu1 %vm505_vm0, %v12572_v6 }
 0xd95   : > { %v6876_v60 = vpop.permute.xlu1 %6875 }
 0xd96   : > { %v6911_v62 = vsel %vm505_vm0, %v14930_v47, %v6876_v60 }
 0xd97   : > { %7174 = vmatmul.mubr.bf16.gmra.mrb[128].mxu1 %v6911_v62 }
 0xd98   : > { %11701 = vmatprep.mubr.msk.bf16.mxu1 %vm505_vm0, %v11643_v57 }
 0xd9d   : > { %v6878_v13 = vpop.permute.xlu0 %6877 }
 0xd9e   : > { %v6915_v38 = vsel %vm505_vm0, %v12568_v8, %v6878_v13 }
 0xd9f   : > { %7184 = vmatmul.mubr.bf16.gmra.mrb[132].mxu1 %v6915_v38 }
 0xda0   : > { %11702 = vmatprep.mubr.msk.bf16.mxu1 %vm505_vm0, %v11645_v20 }
 0xdb2   : > { %v6880_v56 = vpop.permute.xlu1 %6879 }
 0xdb3   : > { %v6919_v39 = vsel %vm505_vm0, %v12572_v6, %v6880_v56 }
 0xdb4   : > { %7194 = vmatmul.mubr.bf16.gmra.mrb[136].mxu1 %v6919_v39 }
 0xdeb   : > { %v5393_v9 = vpop.f32.mrb[104].mxu1 }
 0xdec   : > { %v5395_v40 = vpop.f32.mrb[105].mxu1 }
 0xded   : > { %v5397_v5 = vpop.f32.mrb[106].mxu1 }
 0xdee   : > { %v5398_v41 = vpop.f32.mrb[107].mxu1 }
 0xe41   : > { %v14986_v12 = vpop.f32.mrb[108].mxu1 }
 0xe42   : > { %v7127_v16 = vpop.f32.mrb[109].mxu1  ;;  %v7229_v17 = vrot.slane %v14986_v12, 1 }
 0xe43   : > { %v7129_v30 = vpop.f32.mrb[110].mxu1  ;;  %v7343_v47 = vrot.slane %v7127_v16, 2 }
 0xe44   : > { %v7230_v2 = vrot.slane %v7129_v30, 1  ;;  %v7131_v34 = vpop.f32.mrb[111].mxu1  ;;  %v12613_v30 = vld [vmem:[#allocation2 + $0xa4] ss:$0 sps:$4 sm:$0xff]  }
 0xe45   : > { %v7344_v44 = vrot.slane %v7131_v34, 2  ;;  %11617 = vmatprep.mubr.msk.bf16.mxu0 %vm505_vm0, %v12613_v30  ;;  %v12651_v30 = vld [vmem:[%s16294_s1 + $0x6b0] ss:$8 sps:$4 sm:$0xff]  }
 0xe46   : > { %v7231_v21 = vsel %vm845_vm2, %v7229_v17, %v7230_v2 }
 0xe47   : > { %7262 = vrot.lane.b32.xlu0 %v7231_v21, %s12844_s5  ;;  %v14992_v11 = vsel %vm960_vm3, %v7343_v47, %v7344_v44 }
 0xe49   : > { %v14994_v37 = vpop.f32.mrb[112].mxu1 }
 0xe4a   : > { %v7137_v51 = vpop.f32.mrb[113].mxu1  ;;  %v7232_v48 = vrot.slane %v14994_v37, 1 }
 0xe4b   : > { %v7139_v49 = vpop.f32.mrb[114].mxu1  ;;  %v7346_v8 = vrot.slane %v7137_v51, 2 }
 0xe4c   : > { %v7234_v52 = vrot.slane %v7139_v49, 1  ;;  %v7141_v35 = vpop.f32.mrb[115].mxu1 }
 0xe4d   : > { %v7348_v58 = vrot.slane %v7141_v35, 2 }
 0xe4e   : > { %v7235_v22 = vsel %vm845_vm2, %v7232_v48, %v7234_v52 }
 0xe4f   : > { %7266 = vrot.lane.b32.xlu1 %v7235_v22, %s12844_s5  ;;  %v15000_v3 = vsel %vm960_vm3, %v7346_v8, %v7348_v58  ;;  %v11558_v8 = vcombine.low %v14675_v15, %v14675_v15 }
 0xe51   : > { %v15002_v31 = vpop.f32.mrb[116].mxu1 }
 0xe52   : > { %v7147_v18 = vpop.f32.mrb[117].mxu1  ;;  %v7236_v32 = vrot.slane %v15002_v31, 1 }
 0xe53   : > { %v7149_v24 = vpop.f32.mrb[118].mxu1  ;;  %v7350_v50 = vrot.slane %v7147_v18, 2 }
 0xe54   : > { %v7238_v6 = vrot.slane %v7149_v24, 1  ;;  %v7151_v25 = vpop.f32.mrb[119].mxu1 }
 0xe55   : > { %v7352_v46 = vrot.slane %v7151_v25, 2 }
 0xe56   : > { %v7239_v42 = vsel %vm845_vm2, %v7236_v32, %v7238_v6 }
 0xe57   : > { %7270 = vrot.lane.b32.xlu0 %v7239_v42, %s12844_s5  ;;  %v15008_v33 = vsel %vm960_vm3, %v7350_v50, %v7352_v46 }
 0xe59   : > { %v15010_v0 = vpop.f32.mrb[120].mxu1 }
 0xe5a   : > { %v7157_v43 = vpop.f32.mrb[121].mxu1  ;;  %v7240_v57 = vrot.slane %v15010_v0, 1 }
 0xe5b   : > { %v7159_v45 = vpop.f32.mrb[122].mxu1  ;;  %v7354_v53 = vrot.slane %v7157_v43, 2  ;;  %v12616_v43 = vld [vmem:[%s16294_s1 + $0x600] ss:$8 sps:$4 sm:$0xff]  }
 0xe5c   : > { %v7242_v27 = vrot.slane %v7159_v45, 1  ;;  %v7161_v29 = vpop.f32.mrb[123].mxu1  ;;  %v12618_v45 = vld [vmem:[%s16294_s1 + $0x604] ss:$8 sps:$4 sm:$0xff]  }
 0xe5d   : > { %v7356_v1 = vrot.slane %v7161_v29, 2  ;;  %7997 = vmatprep.subr.bf16.mxu0 %v12618_v45  ;;  %v12625_v29 = vld [vmem:[%s16294_s1 + $0x624] ss:$8 sps:$4 sm:$0xff]  }
 0xe5e   : > { %v7243_v4 = vsel %vm845_vm2, %v7240_v57, %v7242_v27  ;;  %v12622_v57 = vld [vmem:[%s16294_s1 + $0x614] ss:$8 sps:$4 sm:$0xff]   ;;  %7998 = vmatpush1.bf16.msra.mxu0 %v12616_v43  ;;  %v12620_v27 = vld [vmem:[%s16294_s1 + $0x610] ss:$8 sps:$4 sm:$0xff]  }
 0xe5f   : > { %7274 = vrot.lane.b32.xlu1 %v7243_v4, %s12844_s5  ;;  %v15016_v36 = vsel %vm960_vm3, %v7354_v53, %v7356_v1  ;;  %7999 = vmatprep.subr.bf16.mxu0 %v12622_v57  ;;  %v12623_v53 = vld [vmem:[%s16294_s1 + $0x620] ss:$8 sps:$4 sm:$0xff]   ;;  %v12629_v1 = vld [vmem:[%s16294_s1 + $0x634] ss:$8 sps:$4 sm:$0xff]   ;;  %v12627_v4 = vld [vmem:[%s16294_s1 + $0x630] ss:$8 sps:$4 sm:$0xff]  }
 0xe61   : > { %v15018_v63 = vpop.f32.mrb[124].mxu1 }
 0xe62   : > { %v7167_v26 = vpop.f32.mrb[125].mxu1  ;;  %v7244_v7 = vrot.slane %v15018_v63, 1  ;;  %8000 = vmatpush1.bf16.msra.mxu0 %v12620_v27 }
 0xe63   : > { %v7169_v23 = vpop.f32.mrb[126].mxu1  ;;  %v7358_v62 = vrot.slane %v7167_v26, 2  ;;  %8001 = vmatprep.subr.bf16.mxu0 %v12625_v29  ;;  %v12632_v26 = vld [vmem:[%s16294_s1 + $0x644] ss:$8 sps:$4 sm:$0xff]  }
 0xe64   : > { %v7246_v19 = vrot.slane %v7169_v23, 1  ;;  %v7171_v60 = vpop.f32.mrb[127].mxu1  ;;  %v12630_v23 = vld [vmem:[%s16294_s1 + $0x640] ss:$8 sps:$4 sm:$0xff]  }
 0xe65   : > { %v7360_v54 = vrot.slane %v7171_v60, 2  ;;  %v12638_v60 = vld [vmem:[%s16294_s1 + $0x664] ss:$8 sps:$4 sm:$0xff]  }
 0xe66   : > { %v7247_v20 = vsel %vm845_vm2, %v7244_v7, %v7246_v19  ;;  %8002 = vmatpush1.bf16.msra.mxu0 %v12623_v53  ;;  %v12635_v7 = vld [vmem:[%s16294_s1 + $0x654] ss:$8 sps:$4 sm:$0xff]   ;;  %v12633_v19 = vld [vmem:[%s16294_s1 + $0x650] ss:$8 sps:$4 sm:$0xff]  }
 0xe67   : > { %7278 = vrot.lane.b32.xlu0 %v7247_v20, %s12844_s5  ;;  %v15024_v13 = vsel %vm960_vm3, %v7358_v62, %v7360_v54  ;;  %8003 = vmatprep.subr.bf16.mxu0 %v12629_v1  ;;  %v12636_v62 = vld [vmem:[%s16294_s1 + $0x660] ss:$8 sps:$4 sm:$0xff]   ;;  %v12641_v54 = vld [vmem:[%s16294_s1 + $0x674] ss:$8 sps:$4 sm:$0xff]   ;;  %v12639_v20 = vld [vmem:[%s16294_s1 + $0x670] ss:$8 sps:$4 sm:$0xff]  }
 0xe6a   : > { %v15026_v38 = vpop.f32.mrb[128].mxu1  ;;  %8004 = vmatpush1.bf16.msra.mxu0 %v12627_v4 }
 0xe6b   : > { %v7177_v56 = vpop.f32.mrb[129].mxu1  ;;  %v7248_v9 = vrot.slane %v15026_v38, 1  ;;  %8005 = vmatprep.subr.bf16.mxu0 %v12632_v26 }
 0xe6c   : > { %v7179_v39 = vpop.f32.mrb[130].mxu1  ;;  %v7362_v41 = vrot.slane %v7177_v56, 2  ;;  %v12644_v56 = vld [vmem:[%s16294_s1 + $0x684] ss:$8 sps:$4 sm:$0xff]  }
 0xe6d   : > { %v7250_v40 = vrot.slane %v7179_v39, 1  ;;  %v7181_v5 = vpop.f32.mrb[131].mxu1  ;;  %v12642_v39 = vld [vmem:[%s16294_s1 + $0x680] ss:$8 sps:$4 sm:$0xff]  }
 0xe6e   : > { %v7364_v16 = vrot.slane %v7181_v5, 2  ;;  %8006 = vmatpush1.bf16.msra.mxu0 %v12630_v23  ;;  %v12650_v5 = vld [vmem:[%s16294_s1 + $0x6a4] ss:$8 sps:$4 sm:$0xff]  }
 0xe6f   : > { %v7251_v17 = vsel %vm845_vm2, %v7248_v9, %v7250_v40  ;;  %8007 = vmatprep.subr.bf16.mxu0 %v12635_v7  ;;  %v12647_v9 = vld [vmem:[%s16294_s1 + $0x694] ss:$8 sps:$4 sm:$0xff]   ;;  %v12645_v40 = vld [vmem:[%s16294_s1 + $0x690] ss:$8 sps:$4 sm:$0xff]  }
 0xe70   : > { %7282 = vrot.lane.b32.xlu1 %v7251_v17, %s12844_s5  ;;  %v15032_v2 = vsel %vm960_vm3, %v7362_v41, %v7364_v16  ;;  %v12648_v41 = vld [vmem:[%s16294_s1 + $0x6a0] ss:$8 sps:$4 sm:$0xff]   ;;  %v12653_v16 = vld [vmem:[%s16294_s1 + $0x6b4] ss:$8 sps:$4 sm:$0xff]  }
 0xe72   : > { %v15035_v34 = vpop.f32.mrb[132].mxu1  ;;  %8008 = vmatpush1.bf16.msra.mxu0 %v12633_v19 }
 0xe73   : > { %v7187_v47 = vpop.f32.mrb[133].mxu1  ;;  %v7252_v21 = vrot.slane %v15035_v34, 1  ;;  %8009 = vmatprep.subr.bf16.mxu0 %v12638_v60 }
 0xe74   : > { %v7189_v44 = vpop.f32.mrb[134].mxu1  ;;  %v7366_v48 = vrot.slane %v7187_v47, 2 }
 0xe75   : > { %v7254_v51 = vrot.slane %v7189_v44, 1  ;;  %v7191_v49 = vpop.f32.mrb[135].mxu1 }
 0xe76   : > { %v7368_v52 = vrot.slane %v7191_v49, 2  ;;  %8010 = vmatpush1.bf16.msra.mxu0 %v12636_v62 }
 0xe77   : > { %v7255_v35 = vsel %vm845_vm2, %v7252_v21, %v7254_v51  ;;  %8011 = vmatprep.subr.bf16.mxu0 %v12641_v54 }
 0xe78   : > { %7286 = vrot.lane.b32.xlu0 %v7255_v35, %s12844_s5  ;;  %v15043_v58 = vsel %vm960_vm3, %v7366_v48, %v7368_v52 }
 0xe7a   : > { %8012 = vmatpush1.bf16.msra.mxu0 %v12639_v20 }
 0xe7b   : > { %8013 = vmatprep.subr.bf16.mxu0 %v12644_v56 }
 0xe7c   : > { %5975 = vrot.lane.b32.xlu0 %v11558_v8, %s12844_s5 }
 0xe7e   : > { %8014 = vmatpush1.bf16.msra.mxu0 %v12642_v39 }
 0xe7f   : > { %8015 = vmatprep.subr.bf16.mxu0 %v12647_v9 }
 0xe82   : > { %8016 = vmatpush1.bf16.msra.mxu0 %v12645_v40 }
 0xe83   : > { %8017 = vmatprep.subr.bf16.mxu0 %v12650_v5 }
 0xe86   : > { %8018 = vmatpush1.bf16.msra.mxu0 %v12648_v41 }
 0xe87   : > { %v15046_v22 = vpop.f32.mrb[136].mxu1  ;;  %8019 = vmatprep.subr.bf16.mxu0 %v12653_v16 }
 0xe88   : > { %v7197_v18 = vpop.f32.mrb[137].mxu1  ;;  %v7256_v32 = vrot.slane %v15046_v22, 1 }
 0xe89   : > { %v7199_v24 = vpop.f32.mrb[138].mxu1  ;;  %v7370_v50 = vrot.slane %v7197_v18, 2 }
 0xe8a   : > { %v7258_v6 = vrot.slane %v7199_v24, 1  ;;  %v7201_v25 = vpop.f32.mrb[139].mxu1  ;;  %8020 = vmatpush1.bf16.msra.mxu0 %v12651_v30 }
 0xe8b   : > { %v7372_v46 = vrot.slane %v7201_v25, 2 }
 0xe8c   : > { %v7259_v42 = vsel %vm845_vm2, %v7256_v32, %v7258_v6 }
 0xe8d   : > { %7290 = vrot.lane.b32.xlu1 %v7259_v42, %s12844_s5  ;;  %v15052_v15 = vsel %vm960_vm3, %v7370_v50, %v7372_v46  ;;  %v7680_v50 = vld [vmem:[#allocation2 + $0x5c] sm:$0xf] }
 0xeb9   : > { %v7263_v17 = vpop.permute.xlu0 %7262 }
 0xeba   : > { %v7310_v47 = vadd.f32 %v7263_v17, %v14986_v12 }
 0xebc   : > { %v7392_v44 = vadd.f32 %v14992_v11, %v7310_v47 }
 0xebe   : > { %vm7408_vm12 = vcmp.ge.f32.partialorder %v7392_v44, 0.0  ;;  %v7424_v21 = vmul.f32 0.2, %v7392_v44 }
 0xec0   : > { %v7440_v51 = vsel %vm7408_vm12, %v7392_v44, %v7424_v21 }
 0xec1   : > { %v12135_v49 = vpack.c.bf16 %v7440_v51, %v7440_v51  ;;  %v7267_v48 = vpop.permute.xlu1 %7266 }
 0xec2   : > { %v7312_v52 = vadd.f32 %v7267_v48, %v14994_v37 }
 0xec3   : > { %v7521_v35 = vshrl.u32 %v12135_v49, 16  ;;  %v7524_v24 = vshll.u32 %v12135_v49, 16 }
 0xec4   : > { %v7394_v8 = vadd.f32 %v15000_v3, %v7312_v52 }
 0xec5   : > { %v7523_v18 = vrot.slane %v7521_v35, 7 }
 0xec6   : > { %vm7410_vm13 = vcmp.ge.f32.partialorder %v7394_v8, 0.0  ;;  %v7426_v32 = vmul.f32 0.2, %v7394_v8 }
 0xec7   : > { %v7526_v6 = vor.u32 %v7524_v24, %v7523_v18  ;;  %v7527_v25 = vrot.slane %v7523_v18, 4 }
 0xec8   : > { %v7442_v12 = vsel %vm7410_vm13, %v7394_v8, %v7426_v32 }
 0xec9   : > { %v7535_v11 = vsel %vm13192_vm8, %v7527_v25, %v13197_v55  ;;  %v7681_v46 = vsel %vm13200_vm9, %v7526_v6, %v7680_v50  ;;  %v12137_v42 = vpack.c.bf16 %v7442_v12, %v7442_v12  ;;  %v7271_v37 = vpop.permute.xlu0 %7270 }
 0xeca   : > { %7682 = vst [vmem:[#allocation2 + $0x5c] sm:$0xf] %v7681_v46  ;;  %7683 = vst.msk [vmem:[#allocation2 + $0x60] sm:$0xf] %vm172_vm1, %v7535_v11  ;;  %v7314_v3 = vadd.f32 %v7271_v37, %v15002_v31 }
 0xecb   : > { %v7538_v43 = vshrl.u32 %v12137_v42, 16  ;;  %v7541_v27 = vshll.u32 %v12137_v42, 16 }
 0xecc   : > { %v7396_v45 = vadd.f32 %v15008_v33, %v7314_v3 }
 0xecd   : > { %v7540_v57 = vrot.slane %v7538_v43, 7 }
 0xece   : > { %vm7412_vm14 = vcmp.ge.f32.partialorder %v7396_v45, 0.0  ;;  %v7428_v29 = vmul.f32 0.2, %v7396_v45 }
 0xecf   : > { %v7543_v53 = vor.u32 %v7541_v27, %v7540_v57  ;;  %v7545_v1 = vrot.slane %v7540_v57, 4 }
 0xed0   : > { %v7444_v4 = vsel %vm7412_vm14, %v7396_v45, %v7428_v29 }
 0xed1   : > { %v7544_v26 = vsel %vm13192_vm8, %v13213_v14, %v7543_v53  ;;  %v7553_v23 = vsel %vm13192_vm8, %v7545_v1, %v13197_v55  ;;  %v12139_v7 = vpack.c.bf16 %v7444_v4, %v7444_v4  ;;  %v7275_v31 = vpop.permute.xlu1 %7274  ;;  %v15144_v19 = vld [vmem:[#allocation2 + $0x5c] sm:$0xff]   ;;  %v12833_v4 = vld [vmem:[#allocation2 + $0x94] sm:$0xf] }
 0xed2   : > { %7684 = vst.msk [vmem:[#allocation2 + $0x64] sm:$0xf] %vm172_vm1, %v7544_v26  ;;  %7685 = vst.msk [vmem:[#allocation2 + $0x68] sm:$0xf] %vm172_vm1, %v7553_v23  ;;  %v7316_v33 = vadd.f32 %v7275_v31, %v15010_v0  ;;  %7771 = vrot.lane.b32.xlu1 %v15144_v19, %s12844_s5  ;;  %v11556_v26 = vcombine.low %v12833_v4, %v12833_v4 }
 0xed3   : > { %v7556_v60 = vshrl.u32 %v12139_v7, 16  ;;  %v7559_v20 = vshll.u32 %v12139_v7, 16 }
 0xed4   : > { %v7398_v62 = vadd.f32 %v15016_v36, %v7316_v33 }
 0xed5   : > { %v7558_v54 = vrot.slane %v7556_v60, 7 }
 0xed6   : > { %vm7414_vm15 = vcmp.ge.f32.partialorder %v7398_v62, 0.0  ;;  %v7430_v56 = vmul.f32 0.2, %v7398_v62 }
 0xed7   : > { %v7561_v39 = vor.u32 %v7559_v20, %v7558_v54  ;;  %v7563_v9 = vrot.slane %v7558_v54, 4 }
 0xed8   : > { %v7446_v40 = vsel %vm7414_vm15, %v7398_v62, %v7430_v56 }
 0xed9   : > { %v7562_v5 = vsel %vm13192_vm8, %v13213_v14, %v7561_v39  ;;  %v7571_v0 = vsel %vm13192_vm8, %v7563_v9, %v13197_v55  ;;  %v12141_v41 = vpack.c.bf16 %v7446_v40, %v7446_v40  ;;  %v7279_v16 = vpop.permute.xlu0 %7278  ;;  %v15158_v30 = vld [vmem:[#allocation2 + $0x64] sm:$0xff]  }
 0xeda   : > { %7686 = vst.msk [vmem:[#allocation2 + $0x6c] sm:$0xf] %vm172_vm1, %v7562_v5  ;;  %7687 = vst.msk [vmem:[#allocation2 + $0x70] sm:$0xf] %vm172_vm1, %v7571_v0  ;;  %v7318_v36 = vadd.f32 %v7279_v16, %v15018_v63  ;;  %7773 = vrot.lane.b32.xlu0 %v15158_v30, %s12844_s5 }
 0xedb   : > { %v7574_v17 = vshrl.u32 %v12141_v41, 16  ;;  %v7577_v21 = vshll.u32 %v12141_v41, 16 }
 0xedc   : > { %v7400_v47 = vadd.f32 %v15024_v13, %v7318_v36 }
 0xedd   : > { %v7576_v44 = vrot.slane %v7574_v17, 7 }
 0xede   : > { %vm7416_vm4 = vcmp.ge.f32.partialorder %v7400_v47, 0.0  ;;  %v7432_v51 = vmul.f32 0.2, %v7400_v47 }
 0xedf   : > { %v7579_v49 = vor.u32 %v7577_v21, %v7576_v44  ;;  %v7581_v48 = vrot.slane %v7576_v44, 4  ;;  %v9510_v44 = vld [vmem:[#allocation2 + $0x9c] sm:$0x1] }
 0xee0   : > { %v7448_v52 = vsel %vm7416_vm4, %v7400_v47, %v7432_v51 }
 0xee1   : > { %v7580_v35 = vsel %vm13192_vm8, %v13213_v14, %v7579_v49  ;;  %v7589_v63 = vsel %vm13192_vm8, %v7581_v48, %v13197_v55  ;;  %v12143_v8 = vpack.c.bf16 %v7448_v52, %v7448_v52  ;;  %v15172_v24 = vld [vmem:[#allocation2 + $0x6c] sm:$0xff]   ;;  %v9511_v49 = vsel %vm13287_vm6, %v13213_v14, %v9510_v44 }
 0xee2   : > { %v7283_v18 = vpop.permute.xlu1 %7282  ;;  %7688 = vst.msk [vmem:[#allocation2 + $0x74] sm:$0xf] %vm172_vm1, %v7580_v35  ;;  %7689 = vst.msk [vmem:[#allocation2 + $0x78] sm:$0xf] %vm172_vm1, %v7589_v63  ;;  %7775 = vrot.lane.b32.xlu1 %v15172_v24, %s12844_s5  ;;  %v15224_v63 = vld [vmem:[#allocation2 + $0x9c] sm:$0xf] }
 0xee3   : > { %v7320_v13 = vadd.f32 %v7283_v18, %v15026_v38  ;;  %v7592_v32 = vshrl.u32 %v12143_v8, 16  ;;  %v7595_v50 = vshll.u32 %v12143_v8, 16  ;;  %9512 = vst [vmem:[#allocation2 + $0x9c] sm:$0x1] %v9511_v49 }
 0xee5   : > { %v7402_v6 = vadd.f32 %v15032_v2, %v7320_v13  ;;  %v7594_v25 = vrot.slane %v7592_v32, 7 }
 0xee7   : > { %vm7418_vm7 = vcmp.ge.f32.partialorder %v7402_v6, 0.0  ;;  %v7434_v12 = vmul.f32 0.2, %v7402_v6  ;;  %v7597_v11 = vor.u32 %v7595_v50, %v7594_v25  ;;  %v7599_v46 = vrot.slane %v7594_v25, 4  ;;  %v12654_v25 = vld [vmem:[#allocation2 + $0x54] sm:$0xff]  }
 0xee9   : > { %v7450_v42 = vsel %vm7418_vm7, %v7402_v6, %v7434_v12  ;;  %v7598_v37 = vsel %vm13192_vm8, %v13213_v14, %v7597_v11  ;;  %v7607_v38 = vsel %vm13192_vm8, %v7599_v46, %v13197_v55  ;;  %v15186_v43 = vld [vmem:[#allocation2 + $0x74] sm:$0xff]  }
 0xeea   : > { %v12145_v3 = vpack.c.bf16 %v7450_v42, %v7450_v42  ;;  %7690 = vst.msk [vmem:[#allocation2 + $0x7c] sm:$0xf] %vm172_vm1, %v7598_v37  ;;  %7691 = vst.msk [vmem:[#allocation2 + $0x80] sm:$0xf] %vm172_vm1, %v7607_v38  ;;  %v7287_v2 = vpop.permute.xlu0 %7286  ;;  %7777 = vrot.lane.b32.xlu0 %v15186_v43, %s12844_s5 }
 0xeeb   : > { %v7322_v57 = vadd.f32 %v7287_v2, %v15035_v34 }
 0xeec   : > { %v7610_v45 = vshrl.u32 %v12145_v3, 16  ;;  %v7613_v29 = vshll.u32 %v12145_v3, 16 }
 0xeed   : > { %v7404_v53 = vadd.f32 %v15043_v58, %v7322_v57  ;;  %v7720_v57 = vld [vmem:[#allocation2 + $0xa0] sm:$0xf] }
 0xeee   : > { %v7612_v27 = vrot.slane %v7610_v45, 7  ;;  %v5976_v1 = vpop.permute.xlu0 %5975 }
 0xeef   : > { %vm7420_vm5 = vcmp.ge.f32.partialorder %v7404_v53, 0.0  ;;  %v7436_v31 = vmul.f32 0.2, %v7404_v53  ;;  %v6017_v33 = vsel %vm505_vm0, %v11556_v26, %v5976_v1 }
 0xef0   : > { %v7615_v23 = vor.u32 %v7613_v29, %v7612_v27  ;;  %v7617_v7 = vrot.slane %v7612_v27, 4  ;;  %6298 = vmatmul.mubr.bf16.gmra.mrb[140].mxu0 %v6017_v33 }
 0xef1   : > { %v7452_v62 = vsel %vm7420_vm5, %v7404_v53, %v7436_v31  ;;  %v15201_v58 = vld [vmem:[#allocation2 + $0x7c] sm:$0xff]   ;;  %11781 = vmatprep.mubr.msk.bf16.mxu0 %vm505_vm0, %v15158_v30 }
 0xef2   : > { %v7616_v34 = vsel %vm13192_vm8, %v13213_v14, %v7615_v23  ;;  %v7625_v60 = vsel %vm13192_vm8, %v7617_v7, %v13197_v55  ;;  %v12147_v54 = vpack.c.bf16 %v7452_v62, %v7452_v62  ;;  %7779 = vrot.lane.b32.xlu1 %v15201_v58, %s12844_s5 }
 0xef3   : > { %7692 = vst.msk [vmem:[#allocation2 + $0x84] sm:$0xf] %vm172_vm1, %v7616_v34  ;;  %7693 = vst.msk [vmem:[#allocation2 + $0x88] sm:$0xf] %vm172_vm1, %v7625_v60 }
 0xef4   : > { %v7628_v20 = vshrl.u32 %v12147_v54, 16  ;;  %v7631_v39 = vshll.u32 %v12147_v54, 16 }
 0xef6   : > { %v7630_v56 = vrot.slane %v7628_v20, 7 }
 0xef8   : > { %v7633_v9 = vor.u32 %v7631_v39, %v7630_v56  ;;  %v7635_v40 = vrot.slane %v7630_v56, 4 }
 0xefa   : > { %v12615_v41 = vld [vmem:[#allocation2 + $0x84] sm:$0xff]   ;;  %v7634_v16 = vsel %vm13192_vm8, %v13213_v14, %v7633_v9  ;;  %v7643_v36 = vsel %vm13192_vm8, %v7635_v40, %v13197_v55 }
 0xefb   : > { %7694 = vst.msk [vmem:[#allocation2 + $0x8c] sm:$0xf] %vm172_vm1, %v7634_v16  ;;  %7695 = vst.msk [vmem:[#allocation2 + $0x90] sm:$0xf] %vm172_vm1, %v7643_v36  ;;  %7781 = vrot.lane.b32.xlu0 %v12615_v41, %s12844_s5 }
 0xeff   : > { %v7291_v5 = vpop.permute.xlu1 %7290 }
 0xf00   : > { %v7324_v0 = vadd.f32 %v7291_v5, %v15046_v22 }
 0xf02   : > { %v7406_v17 = vadd.f32 %v15052_v15, %v7324_v0  ;;  %v12619_v48 = vld [vmem:[#allocation2 + $0x8c] sm:$0xff]  }
 0xf03   : > { %7783 = vrot.lane.b32.xlu1 %v12619_v48, %s12844_s5 }
 0xf04   : > { %vm7422_vm10 = vcmp.ge.f32.partialorder %v7406_v17, 0.0  ;;  %v7438_v47 = vmul.f32 0.2, %v7406_v17 }
 0xf06   : > { %v7454_v22 = vsel %vm7422_vm10, %v7406_v17, %v7438_v47 }
 0xf07   : > { %v12149_v21 = vpack.c.bf16 %v7454_v22, %v7454_v22 }
 0xf09   : > { %v7646_v51 = vshrl.u32 %v12149_v21, 16  ;;  %v7649_v35 = vshll.u32 %v12149_v21, 16 }
 0xf0b   : > { %v7648_v52 = vrot.slane %v7646_v51, 7 }
 0xf0d   : > { %v7651_v15 = vor.u32 %v7649_v35, %v7648_v52  ;;  %v7653_v8 = vrot.slane %v7648_v52, 4 }
 0xf0f   : > { %v7652_v18 = vsel %vm13192_vm8, %v13213_v14, %v7651_v15  ;;  %v7661_v13 = vsel %vm13192_vm8, %v7653_v8, %v13197_v55 }
 0xf10   : > { %7696 = vst.msk [vmem:[#allocation2 + $0x94] sm:$0xf] %vm172_vm1, %v7652_v18  ;;  %7697 = vst.msk [vmem:[#allocation2 + $0x98] sm:$0xf] %vm172_vm1, %v7661_v13 }
 0xf17   : > { %v7717_v28 = vld [vmem:[#allocation2 + $0x94] sm:$0xf]  ;;  %v7718_v32 = vld [vmem:[#allocation2 + $0x98] sm:$0xf] }
 0xf18   : > { %v11729_v6 = vcombine.low %v7717_v28, %v7718_v32 }
 0xf1a   : > { %7785 = vrot.lane.b32.xlu0 %v11729_v6, %s12844_s5 }
 0xf44   : > { %v7772_v50 = vpop.permute.xlu1 %7771 }
 0xf45   : > { %v7797_v12 = vsel %vm505_vm0, %v12654_v25, %v7772_v50 }
 0xf46   : > { %8030 = vmatmul.mubr.bf16.vlgmr.msra.gmra.mrb[144].mxu0 %v7797_v12 }
 0xf47   : > { %11782 = vmatprep.mubr.msk.bf16.mxu0 %vm505_vm0, %v15172_v24 }
 0xf4c   : > { %v7774_v11 = vpop.permute.xlu0 %7773 }
 0xf4d   : > { %v7801_v46 = vsel %vm505_vm0, %v15144_v19, %v7774_v11 }
 0xf4e   : > { %8040 = vmatmul.mubr.bf16.gmra.mrb[148].mxu0 %v7801_v46 }
 0xf4f   : > { %11783 = vmatprep.mubr.msk.bf16.mxu0 %vm505_vm0, %v15186_v43 }
 0xf54   : > { %v7776_v42 = vpop.permute.xlu1 %7775 }
 0xf55   : > { %v7805_v37 = vsel %vm505_vm0, %v15158_v30, %v7776_v42 }
 0xf56   : > { %8050 = vmatmul.mubr.bf16.gmra.mrb[152].mxu0 %v7805_v37 }
 0xf57   : > { %11784 = vmatprep.mubr.msk.bf16.mxu0 %vm505_vm0, %v15201_v58 }
 0xf5c   : > { %v7778_v38 = vpop.permute.xlu0 %7777 }
 0xf5d   : > { %v7809_v3 = vsel %vm505_vm0, %v15172_v24, %v7778_v38  ;;  %v11731_v24 = vcombine.low %v15224_v63, %v7720_v57 }
 0xf5e   : > { %8060 = vmatmul.mubr.bf16.gmra.mrb[156].mxu0 %v7809_v3 }
 0xf5f   : > { %11785 = vmatprep.mubr.msk.bf16.mxu0 %vm505_vm0, %v12615_v41 }
 0xf64   : > { %v7780_v19 = vpop.permute.xlu1 %7779 }
 0xf65   : > { %v7813_v2 = vsel %vm505_vm0, %v15186_v43, %v7780_v19 }
 0xf66   : > { %8070 = vmatmul.mubr.bf16.gmra.mrb[160].mxu0 %v7813_v2 }
 0xf67   : > { %11786 = vmatprep.mubr.msk.bf16.mxu0 %vm505_vm0, %v12619_v48 }
 0xf6d   : > { %v7782_v45 = vpop.permute.xlu0 %7781 }
 0xf6e   : > { %v7817_v30 = vsel %vm505_vm0, %v15201_v58, %v7782_v45 }
 0xf6f   : > { %8080 = vmatmul.mubr.bf16.gmra.mrb[164].mxu0 %v7817_v30 }
 0xf70   : > { %11787 = vmatprep.mubr.msk.bf16.mxu0 %vm505_vm0, %v11729_v6 }
 0xf75   : > { %v7784_v27 = vpop.permute.xlu1 %7783 }
 0xf76   : > { %v7821_v29 = vsel %vm505_vm0, %v12615_v41, %v7784_v27 }
 0xf77   : > { %8090 = vmatmul.mubr.bf16.gmra.mrb[168].mxu0 %v7821_v29 }
 0xf78   : > { %11788 = vmatprep.mubr.msk.bf16.mxu0 %vm505_vm0, %v11731_v24 }
 0xf8c   : > { %v7786_v43 = vpop.permute.xlu0 %7785 }
 0xf8d   : > { %v7825_v53 = vsel %vm505_vm0, %v12619_v48, %v7786_v43 }
 0xf8e   : > { %8100 = vmatmul.mubr.bf16.gmra.mrb[172].mxu0 %v7825_v53 }
 0xfc3   : > { %v6299_v1 = vpop.f32.mrb[140].mxu0 }
 0xfc4   : > { %v6301_v4 = vpop.f32.mrb[141].mxu0 }
 0xfc5   : > { %v6303_v26 = vpop.f32.mrb[142].mxu0 }
 0xfc6   : > { %v6304_v23 = vpop.f32.mrb[143].mxu0 }
0x1019   : > { %v15259_v7 = vpop.f32.mrb[144].mxu0 }
0x101a   : > { %v8033_v31 = vpop.f32.mrb[145].mxu0  ;;  %v8135_v34 = vrot.slane %v15259_v7, 1 }
0x101b   : > { %v8035_v33 = vpop.f32.mrb[146].mxu0  ;;  %v8249_v58 = vrot.slane %v8033_v31, 2 }
0x101c   : > { %v8136_v60 = vrot.slane %v8035_v33, 1  ;;  %v8037_v62 = vpop.f32.mrb[147].mxu0  ;;  %v12660_v33 = vld [vmem:[#allocation2 + $0x50] ss:$0 sps:$4 sm:$0xff]  }
0x101d   : > { %v8250_v54 = vrot.slane %v8037_v62, 2  ;;  %11703 = vmatprep.mubr.msk.bf16.mxu1 %vm505_vm0, %v12660_v33 }
0x101e   : > { %v8137_v20 = vsel %vm845_vm2, %v8135_v34, %v8136_v60 }
0x101f   : > { %8168 = vrot.lane.b32.xlu1 %v8137_v20, %s12844_s5  ;;  %v15265_v56 = vsel %vm960_vm3, %v8249_v58, %v8250_v54 }
0x1021   : > { %v15267_v39 = vpop.f32.mrb[148].mxu0 }
0x1022   : > { %v8043_v9 = vpop.f32.mrb[149].mxu0  ;;  %v8138_v5 = vrot.slane %v15267_v39, 1 }
0x1023   : > { %v8045_v40 = vpop.f32.mrb[150].mxu0  ;;  %v8252_v16 = vrot.slane %v8043_v9, 2 }
0x1024   : > { %v8140_v0 = vrot.slane %v8045_v40, 1  ;;  %v8047_v41 = vpop.f32.mrb[151].mxu0 }
0x1025   : > { %v8254_v36 = vrot.slane %v8047_v41, 2  ;;  %v11644_v41 = vcombine.low %v14950_v10, %v14950_v10 }
0x1026   : > { %v8141_v17 = vsel %vm845_vm2, %v8138_v5, %v8140_v0 }
0x1027   : > { %8172 = vrot.lane.b32.xlu0 %v8141_v17, %s12844_s5  ;;  %v15273_v47 = vsel %vm960_vm3, %v8252_v16, %v8254_v36 }
0x1029   : > { %v15275_v22 = vpop.f32.mrb[152].mxu0 }
0x102a   : > { %v8053_v44 = vpop.f32.mrb[153].mxu0  ;;  %v8142_v51 = vrot.slane %v15275_v22, 1 }
0x102b   : > { %v8055_v21 = vpop.f32.mrb[154].mxu0  ;;  %v8256_v52 = vrot.slane %v8053_v44, 2 }
0x102c   : > { %v8144_v49 = vrot.slane %v8055_v21, 1  ;;  %v8057_v48 = vpop.f32.mrb[155].mxu0 }
0x102d   : > { %v8258_v35 = vrot.slane %v8057_v48, 2 }
0x102e   : > { %v8145_v15 = vsel %vm845_vm2, %v8142_v51, %v8144_v49 }
0x102f   : > { %8176 = vrot.lane.b32.xlu1 %v8145_v15, %s12844_s5  ;;  %v15281_v8 = vsel %vm960_vm3, %v8256_v52, %v8258_v35  ;;  %v12663_v15 = vld [vmem:[%s16294_s1 + $0x6c0] ss:$8 sps:$4 sm:$0xff]  }
0x1031   : > { %v15283_v18 = vpop.f32.mrb[156].mxu0 }
0x1032   : > { %v8063_v13 = vpop.f32.mrb[157].mxu0  ;;  %v8146_v32 = vrot.slane %v15283_v18, 1 }
0x1033   : > { %v8065_v28 = vpop.f32.mrb[158].mxu0  ;;  %v8260_v50 = vrot.slane %v8063_v13, 2  ;;  %v12665_v13 = vld [vmem:[%s16294_s1 + $0x6c4] ss:$8 sps:$4 sm:$0xff]  }
0x1034   : > { %v8148_v6 = vrot.slane %v8065_v28, 1  ;;  %v8067_v25 = vpop.f32.mrb[159].mxu0  ;;  %v12669_v28 = vld [vmem:[%s16294_s1 + $0x6d4] ss:$8 sps:$4 sm:$0xff]   ;;  %8903 = vmatprep.subr.bf16.mxu1 %v12665_v13 }
0x1035   : > { %v8262_v12 = vrot.slane %v8067_v25, 2  ;;  %8904 = vmatpush1.bf16.msra.mxu1 %v12663_v15  ;;  %v12670_v25 = vld [vmem:[%s16294_s1 + $0x6e0] ss:$8 sps:$4 sm:$0xff]  }
0x1036   : > { %v8149_v11 = vsel %vm845_vm2, %v8146_v32, %v8148_v6  ;;  %v12667_v32 = vld [vmem:[%s16294_s1 + $0x6d0] ss:$8 sps:$4 sm:$0xff]   ;;  %8905 = vmatprep.subr.bf16.mxu1 %v12669_v28  ;;  %v12672_v6 = vld [vmem:[%s16294_s1 + $0x6e4] ss:$8 sps:$4 sm:$0xff]  }
0x1037   : > { %8180 = vrot.lane.b32.xlu0 %v8149_v11, %s12844_s5  ;;  %v15289_v46 = vsel %vm960_vm3, %v8260_v50, %v8262_v12  ;;  %v12676_v50 = vld [vmem:[%s16294_s1 + $0x6f4] ss:$8 sps:$4 sm:$0xff]   ;;  %v12674_v12 = vld [vmem:[%s16294_s1 + $0x6f0] ss:$8 sps:$4 sm:$0xff]   ;;  %v12679_v11 = vld [vmem:[%s16294_s1 + $0x704] ss:$8 sps:$4 sm:$0xff]  }
0x1039   : > { %v15291_v42 = vpop.f32.mrb[160].mxu0  ;;  %8906 = vmatpush1.bf16.msra.mxu1 %v12667_v32 }
0x103a   : > { %v8073_v37 = vpop.f32.mrb[161].mxu0  ;;  %v8150_v3 = vrot.slane %v15291_v42, 1  ;;  %8907 = vmatprep.subr.bf16.mxu1 %v12672_v6 }
0x103b   : > { %v8075_v38 = vpop.f32.mrb[162].mxu0  ;;  %v8264_v45 = vrot.slane %v8073_v37, 2  ;;  %v12677_v37 = vld [vmem:[%s16294_s1 + $0x700] ss:$8 sps:$4 sm:$0xff]  }
0x103c   : > { %v8152_v19 = vrot.slane %v8075_v38, 1  ;;  %v8077_v2 = vpop.f32.mrb[163].mxu0  ;;  %v12682_v38 = vld [vmem:[%s16294_s1 + $0x714] ss:$8 sps:$4 sm:$0xff]  }
0x103d   : > { %v8266_v30 = vrot.slane %v8077_v2, 2  ;;  %8908 = vmatpush1.bf16.msra.mxu1 %v12670_v25  ;;  %v12683_v2 = vld [vmem:[%s16294_s1 + $0x720] ss:$8 sps:$4 sm:$0xff]  }
0x103e   : > { %v8153_v57 = vsel %vm845_vm2, %v8150_v3, %v8152_v19  ;;  %8909 = vmatprep.subr.bf16.mxu1 %v12676_v50  ;;  %v12680_v3 = vld [vmem:[%s16294_s1 + $0x710] ss:$8 sps:$4 sm:$0xff]   ;;  %v12685_v19 = vld [vmem:[%s16294_s1 + $0x724] ss:$8 sps:$4 sm:$0xff]  }
0x103f   : > { %8184 = vrot.lane.b32.xlu1 %v8153_v57, %s12844_s5  ;;  %v15297_v24 = vsel %vm960_vm3, %v8264_v45, %v8266_v30  ;;  %v12688_v45 = vld [vmem:[%s16294_s1 + $0x734] ss:$8 sps:$4 sm:$0xff]   ;;  %v12686_v30 = vld [vmem:[%s16294_s1 + $0x730] ss:$8 sps:$4 sm:$0xff]   ;;  %v12691_v57 = vld [vmem:[%s16294_s1 + $0x744] ss:$8 sps:$4 sm:$0xff]  }
0x1041   : > { %8910 = vmatpush1.bf16.msra.mxu1 %v12674_v12 }
0x1042   : > { %v15299_v27 = vpop.f32.mrb[164].mxu0  ;;  %8911 = vmatprep.subr.bf16.mxu1 %v12679_v11 }
0x1043   : > { %v8083_v29 = vpop.f32.mrb[165].mxu0  ;;  %v8154_v53 = vrot.slane %v15299_v27, 1 }
0x1044   : > { %v8085_v43 = vpop.f32.mrb[166].mxu0  ;;  %v8268_v26 = vrot.slane %v8083_v29, 2  ;;  %v12689_v29 = vld [vmem:[%s16294_s1 + $0x740] ss:$8 sps:$4 sm:$0xff]  }
0x1045   : > { %v8156_v1 = vrot.slane %v8085_v43, 1  ;;  %v8087_v4 = vpop.f32.mrb[167].mxu0  ;;  %8912 = vmatpush1.bf16.msra.mxu1 %v12677_v37  ;;  %v12694_v43 = vld [vmem:[%s16294_s1 + $0x754] ss:$8 sps:$4 sm:$0xff]  }
0x1046   : > { %v8270_v23 = vrot.slane %v8087_v4, 2  ;;  %8913 = vmatprep.subr.bf16.mxu1 %v12682_v38  ;;  %v12695_v4 = vld [vmem:[%s16294_s1 + $0x760] ss:$8 sps:$4 sm:$0xff]  }
0x1047   : > { %v8157_v31 = vsel %vm845_vm2, %v8154_v53, %v8156_v1  ;;  %v12692_v53 = vld [vmem:[%s16294_s1 + $0x750] ss:$8 sps:$4 sm:$0xff]   ;;  %v12697_v1 = vld [vmem:[%s16294_s1 + $0x764] ss:$8 sps:$4 sm:$0xff]  }
0x1048   : > { %8188 = vrot.lane.b32.xlu0 %v8157_v31, %s12844_s5  ;;  %v15305_v34 = vsel %vm960_vm3, %v8268_v26, %v8270_v23  ;;  %v12700_v26 = vld [vmem:[%s16294_s1 + $0x774] ss:$8 sps:$4 sm:$0xff]   ;;  %v12698_v23 = vld [vmem:[%s16294_s1 + $0x770] ss:$8 sps:$4 sm:$0xff]  }
0x1049   : > { %8914 = vmatpush1.bf16.msra.mxu1 %v12680_v3 }
0x104a   : > { %v15308_v60 = vpop.f32.mrb[168].mxu0  ;;  %8915 = vmatprep.subr.bf16.mxu1 %v12685_v19 }
0x104b   : > { %v8093_v62 = vpop.f32.mrb[169].mxu0  ;;  %v8158_v54 = vrot.slane %v15308_v60, 1 }
0x104c   : > { %v8095_v58 = vpop.f32.mrb[170].mxu0  ;;  %v8272_v40 = vrot.slane %v8093_v62, 2 }
0x104d   : > { %v8160_v20 = vrot.slane %v8095_v58, 1  ;;  %v8097_v9 = vpop.f32.mrb[171].mxu0  ;;  %8916 = vmatpush1.bf16.msra.mxu1 %v12683_v2 }
0x104e   : > { %v8274_v5 = vrot.slane %v8097_v9, 2  ;;  %8917 = vmatprep.subr.bf16.mxu1 %v12688_v45 }
0x104f   : > { %v8161_v0 = vsel %vm845_vm2, %v8158_v54, %v8160_v20 }
0x1050   : > { %8192 = vrot.lane.b32.xlu1 %v8161_v0, %s12844_s5  ;;  %v15316_v16 = vsel %vm960_vm3, %v8272_v40, %v8274_v5 }
0x1051   : > { %8918 = vmatpush1.bf16.msra.mxu1 %v12686_v30 }
0x1052   : > { %8919 = vmatprep.subr.bf16.mxu1 %v12691_v57 }
0x1054   : > { %6881 = vrot.lane.b32.xlu1 %v11644_v41, %s12844_s5 }
0x1055   : > { %8920 = vmatpush1.bf16.msra.mxu1 %v12689_v29 }
0x1056   : > { %8921 = vmatprep.subr.bf16.mxu1 %v12694_v43 }
0x1059   : > { %8922 = vmatpush1.bf16.msra.mxu1 %v12692_v53 }
0x105a   : > { %8923 = vmatprep.subr.bf16.mxu1 %v12697_v1 }
0x105d   : > { %8924 = vmatpush1.bf16.msra.mxu1 %v12695_v4 }
0x105e   : > { %8925 = vmatprep.subr.bf16.mxu1 %v12700_v26 }
0x1061   : > { %v15319_v36 = vpop.f32.mrb[172].mxu0  ;;  %8926 = vmatpush1.bf16.msra.mxu1 %v12698_v23 }
0x1062   : > { %v8103_v17 = vpop.f32.mrb[173].mxu0  ;;  %v8162_v21 = vrot.slane %v15319_v36, 1 }
0x1063   : > { %v8105_v44 = vpop.f32.mrb[174].mxu0  ;;  %v8276_v48 = vrot.slane %v8103_v17, 2 }
0x1064   : > { %v8164_v51 = vrot.slane %v8105_v44, 1  ;;  %v8107_v49 = vpop.f32.mrb[175].mxu0 }
0x1065   : > { %v8278_v52 = vrot.slane %v8107_v49, 2  ;;  %v8586_v49 = vld [vmem:[#allocation2 + $0x8] sm:$0xf] }
0x1066   : > { %v8165_v35 = vsel %vm845_vm2, %v8162_v21, %v8164_v51 }
0x1067   : > { %8196 = vrot.lane.b32.xlu0 %v8165_v35, %s12844_s5  ;;  %v15325_v10 = vsel %vm960_vm3, %v8276_v48, %v8278_v52 }
0x1091   : > { %v8169_v31 = vpop.permute.xlu1 %8168 }
0x1092   : > { %v8216_v33 = vadd.f32 %v8169_v31, %v15259_v7 }
0x1094   : > { %v8298_v62 = vadd.f32 %v15265_v56, %v8216_v33 }
0x1096   : > { %vm8314_vm6 = vcmp.ge.f32.partialorder %v8298_v62, 0.0  ;;  %v8330_v58 = vmul.f32 0.2, %v8298_v62 }
0x1098   : > { %v8346_v54 = vsel %vm8314_vm6, %v8298_v62, %v8330_v58 }
0x1099   : > { %v12151_v20 = vpack.c.bf16 %v8346_v54, %v8346_v54  ;;  %v8173_v9 = vpop.permute.xlu0 %8172 }
0x109a   : > { %v8218_v40 = vadd.f32 %v8173_v9, %v15267_v39 }
0x109b   : > { %v8427_v5 = vshrl.u32 %v12151_v20, 16  ;;  %v8430_v17 = vshll.u32 %v12151_v20, 16 }
0x109c   : > { %v8300_v0 = vadd.f32 %v15273_v47, %v8218_v40 }
0x109d   : > { %v8429_v41 = vrot.slane %v8427_v5, 7 }
0x109e   : > { %vm8316_vm11 = vcmp.ge.f32.partialorder %v8300_v0, 0.0  ;;  %v8332_v44 = vmul.f32 0.2, %v8300_v0 }
0x109f   : > { %v8432_v21 = vor.u32 %v8430_v17, %v8429_v41  ;;  %v8433_v51 = vrot.slane %v8429_v41, 4 }
0x10a0   : > { %v8348_v7 = vsel %vm8316_vm11, %v8300_v0, %v8332_v44 }
0x10a1   : > { %v8441_v56 = vsel %vm13192_vm8, %v8433_v51, %v13197_v55  ;;  %v8587_v48 = vsel %vm13200_vm9, %v8432_v21, %v8586_v49  ;;  %v12153_v52 = vpack.c.bf16 %v8348_v7, %v8348_v7  ;;  %v8177_v39 = vpop.permute.xlu1 %8176 }
0x10a2   : > { %8589 = vst.msk [vmem:[#allocation2 + $0xc] sm:$0xf] %vm172_vm1, %v8441_v56  ;;  %8588 = vst [vmem:[#allocation2 + $0x8] sm:$0xf] %v8587_v48  ;;  %v8220_v47 = vadd.f32 %v8177_v39, %v15275_v22 }
0x10a3   : > { %v8444_v35 = vshrl.u32 %v12153_v52, 16  ;;  %v8447_v28 = vshll.u32 %v12153_v52, 16 }
0x10a4   : > { %v8302_v15 = vadd.f32 %v15281_v8, %v8220_v47 }
0x10a5   : > { %v8446_v13 = vrot.slane %v8444_v35, 7 }
0x10a6   : > { %vm8318_vm12 = vcmp.ge.f32.partialorder %v8302_v15, 0.0  ;;  %v8334_v32 = vmul.f32 0.2, %v8302_v15 }
0x10a7   : > { %v8449_v6 = vor.u32 %v8447_v28, %v8446_v13  ;;  %v8451_v25 = vrot.slane %v8446_v13, 4 }
0x10a8   : > { %v8350_v50 = vsel %vm8318_vm12, %v8302_v15, %v8334_v32 }
0x10a9   : > { %v8450_v12 = vsel %vm13192_vm8, %v13213_v14, %v8449_v6  ;;  %v8459_v11 = vsel %vm13192_vm8, %v8451_v25, %v13197_v55  ;;  %v12155_v37 = vpack.c.bf16 %v8350_v50, %v8350_v50  ;;  %v8181_v22 = vpop.permute.xlu0 %8180  ;;  %v15417_v38 = vld [vmem:[#allocation2 + $0x8] sm:$0xff]   ;;  %v12834_v6 = vld [vmem:[#allocation2 + $0x40] sm:$0xf] }
0x10aa   : > { %8590 = vst.msk [vmem:[#allocation2 + $0x10] sm:$0xf] %vm172_vm1, %v8450_v12  ;;  %8591 = vst.msk [vmem:[#allocation2 + $0x14] sm:$0xf] %vm172_vm1, %v8459_v11  ;;  %v8222_v8 = vadd.f32 %v8181_v22, %v15283_v18  ;;  %8677 = vrot.lane.b32.xlu0 %v15417_v38, %s12844_s5  ;;  %v11642_v25 = vcombine.low %v12834_v6, %v12834_v6 }
0x10ab   : > { %v8462_v3 = vshrl.u32 %v12155_v37, 16  ;;  %v8465_v45 = vshll.u32 %v12155_v37, 16 }
0x10ac   : > { %v8304_v19 = vadd.f32 %v15289_v46, %v8222_v8 }
0x10ad   : > { %v8464_v2 = vrot.slane %v8462_v3, 7 }
0x10ae   : > { %vm8320_vm13 = vcmp.ge.f32.partialorder %v8304_v19, 0.0  ;;  %v8336_v30 = vmul.f32 0.2, %v8304_v19 }
0x10af   : > { %v8467_v57 = vor.u32 %v8465_v45, %v8464_v2  ;;  %v8469_v29 = vrot.slane %v8464_v2, 4 }
0x10b0   : > { %v8352_v43 = vsel %vm8320_vm13, %v8304_v19, %v8336_v30 }
0x10b1   : > { %v8468_v53 = vsel %vm13192_vm8, %v13213_v14, %v8467_v57  ;;  %v8477_v18 = vsel %vm13192_vm8, %v8469_v29, %v13197_v55  ;;  %v12157_v1 = vpack.c.bf16 %v8352_v43, %v8352_v43  ;;  %v8185_v4 = vpop.permute.xlu1 %8184  ;;  %v15431_v26 = vld [vmem:[#allocation2 + $0x10] sm:$0xff]  }
0x10b2   : > { %8592 = vst.msk [vmem:[#allocation2 + $0x18] sm:$0xf] %vm172_vm1, %v8468_v53  ;;  %8593 = vst.msk [vmem:[#allocation2 + $0x1c] sm:$0xf] %vm172_vm1, %v8477_v18  ;;  %v8224_v46 = vadd.f32 %v8185_v4, %v15291_v42  ;;  %8679 = vrot.lane.b32.xlu1 %v15431_v26, %s12844_s5 }
0x10b3   : > { %v8480_v23 = vshrl.u32 %v12157_v1, 16  ;;  %v8483_v62 = vshll.u32 %v12157_v1, 16 }
0x10b4   : > { %v8306_v31 = vadd.f32 %v15297_v24, %v8224_v46 }
0x10b5   : > { %v8482_v33 = vrot.slane %v8480_v23, 7 }
0x10b6   : > { %vm8322_vm14 = vcmp.ge.f32.partialorder %v8306_v31, 0.0  ;;  %v8338_v58 = vmul.f32 0.2, %v8306_v31 }
0x10b7   : > { %v8485_v54 = vor.u32 %v8483_v62, %v8482_v33  ;;  %v8487_v20 = vrot.slane %v8482_v33, 4 }
0x10b8   : > { %v8354_v9 = vsel %vm8322_vm14, %v8306_v31, %v8338_v58 }
0x10b9   : > { %v8486_v40 = vsel %vm13192_vm8, %v13213_v14, %v8485_v54  ;;  %v8495_v42 = vsel %vm13192_vm8, %v8487_v20, %v13197_v55  ;;  %v12159_v5 = vpack.c.bf16 %v8354_v9, %v8354_v9  ;;  %v15445_v41 = vld [vmem:[#allocation2 + $0x18] sm:$0xff]  }
0x10ba   : > { %v8189_v0 = vpop.permute.xlu0 %8188  ;;  %8594 = vst.msk [vmem:[#allocation2 + $0x20] sm:$0xf] %vm172_vm1, %v8486_v40  ;;  %8595 = vst.msk [vmem:[#allocation2 + $0x24] sm:$0xf] %vm172_vm1, %v8495_v42  ;;  %8681 = vrot.lane.b32.xlu0 %v15445_v41, %s12844_s5 }
0x10bb   : > { %v8226_v24 = vadd.f32 %v8189_v0, %v15299_v27  ;;  %v8498_v17 = vshrl.u32 %v12159_v5, 16  ;;  %v8501_v51 = vshll.u32 %v12159_v5, 16 }
0x10bd   : > { %v8308_v44 = vadd.f32 %v15305_v34, %v8226_v24  ;;  %v8500_v21 = vrot.slane %v8498_v17, 7  ;;  %v12701_v24 = vld [vmem:[#allocation2] sm:$0xff]  }
0x10bf   : > { %vm8324_vm15 = vcmp.ge.f32.partialorder %v8308_v44, 0.0  ;;  %v8340_v49 = vmul.f32 0.2, %v8308_v44  ;;  %v8503_v7 = vor.u32 %v8501_v51, %v8500_v21  ;;  %v8505_v56 = vrot.slane %v8500_v21, 4 }
0x10c1   : > { %v8356_v48 = vsel %vm8324_vm15, %v8308_v44, %v8340_v49  ;;  %v8504_v52 = vsel %vm13192_vm8, %v13213_v14, %v8503_v7  ;;  %v8513_v27 = vsel %vm13192_vm8, %v8505_v56, %v13197_v55  ;;  %v15459_v47 = vld [vmem:[#allocation2 + $0x20] sm:$0xff]  }
0x10c2   : > { %v12161_v39 = vpack.c.bf16 %v8356_v48, %v8356_v48  ;;  %8596 = vst.msk [vmem:[#allocation2 + $0x28] sm:$0xf] %vm172_vm1, %v8504_v52  ;;  %8597 = vst.msk [vmem:[#allocation2 + $0x2c] sm:$0xf] %vm172_vm1, %v8513_v27  ;;  %v8193_v35 = vpop.permute.xlu1 %8192  ;;  %8683 = vrot.lane.b32.xlu1 %v15459_v47, %s12844_s5 }
0x10c3   : > { %v8228_v15 = vadd.f32 %v8193_v35, %v15308_v60 }
0x10c4   : > { %v8516_v34 = vshrl.u32 %v12161_v39, 16  ;;  %v8519_v28 = vshll.u32 %v12161_v39, 16  ;;  %v15526_v39 = vld [vmem:[#allocation2 + $0x48] sm:$0xf] }
0x10c5   : > { %v8310_v32 = vadd.f32 %v15316_v16, %v8228_v15 }
0x10c6   : > { %v8518_v13 = vrot.slane %v8516_v34, 7  ;;  %v6882_v11 = vpop.permute.xlu1 %6881 }
0x10c7   : > { %vm8326_vm4 = vcmp.ge.f32.partialorder %v8310_v32, 0.0  ;;  %v8342_v37 = vmul.f32 0.2, %v8310_v32  ;;  %v6923_v22 = vsel %vm505_vm0, %v11642_v25, %v6882_v11 }
0x10c8   : > { %v8521_v50 = vor.u32 %v8519_v28, %v8518_v13  ;;  %v8523_v12 = vrot.slane %v8518_v13, 4  ;;  %7204 = vmatmul.mubr.bf16.gmra.mrb[140].mxu1 %v6923_v22 }
0x10c9   : > { %v15474_v3 = vld [vmem:[#allocation2 + $0x28] sm:$0xff]   ;;  %v8358_v16 = vsel %vm8326_vm4, %v8310_v32, %v8342_v37  ;;  %11867 = vmatprep.mubr.msk.bf16.mxu1 %vm505_vm0, %v15431_v26 }
0x10ca   : > { %v8522_v8 = vsel %vm13192_vm8, %v13213_v14, %v8521_v50  ;;  %v8531_v60 = vsel %vm13192_vm8, %v8523_v12, %v13197_v55  ;;  %v12163_v19 = vpack.c.bf16 %v8358_v16, %v8358_v16  ;;  %8685 = vrot.lane.b32.xlu0 %v15474_v3, %s12844_s5 }
0x10cb   : > { %8598 = vst.msk [vmem:[#allocation2 + $0x30] sm:$0xf] %vm172_vm1, %v8522_v8  ;;  %8599 = vst.msk [vmem:[#allocation2 + $0x34] sm:$0xf] %vm172_vm1, %v8531_v60 }
0x10cc   : > { %v8534_v2 = vshrl.u32 %v12163_v19, 16  ;;  %v8537_v30 = vshll.u32 %v12163_v19, 16 }
0x10ce   : > { %v8536_v45 = vrot.slane %v8534_v2, 7 }
0x10d0   : > { %v8539_v57 = vor.u32 %v8537_v30, %v8536_v45  ;;  %v8541_v29 = vrot.slane %v8536_v45, 4 }
0x10d2   : > { %v12662_v53 = vld [vmem:[#allocation2 + $0x30] sm:$0xff]   ;;  %v8540_v1 = vsel %vm13192_vm8, %v13213_v14, %v8539_v57  ;;  %v8549_v4 = vsel %vm13192_vm8, %v8541_v29, %v13197_v55 }
0x10d3   : > { %8687 = vrot.lane.b32.xlu1 %v12662_v53, %s12844_s5  ;;  %8600 = vst.msk [vmem:[#allocation2 + $0x38] sm:$0xf] %vm172_vm1, %v8540_v1  ;;  %8601 = vst.msk [vmem:[#allocation2 + $0x3c] sm:$0xf] %vm172_vm1, %v8549_v4 }
0x10d9   : > { %v8197_v43 = vpop.permute.xlu0 %8196 }
0x10da   : > { %v8230_v18 = vadd.f32 %v8197_v43, %v15319_v36  ;;  %v12666_v62 = vld [vmem:[#allocation2 + $0x38] sm:$0xff]  }
0x10db   : > { %8689 = vrot.lane.b32.xlu0 %v12666_v62, %s12844_s5 }
0x10dc   : > { %v8312_v46 = vadd.f32 %v15325_v10, %v8230_v18 }
0x10de   : > { %vm8328_vm7 = vcmp.ge.f32.partialorder %v8312_v46, 0.0  ;;  %v8344_v23 = vmul.f32 0.2, %v8312_v46 }
0x10e0   : > { %v8360_v31 = vsel %vm8328_vm7, %v8312_v46, %v8344_v23 }
0x10e1   : > { %v12165_v36 = vpack.c.bf16 %v8360_v31, %v8360_v31 }
0x10e3   : > { %v8552_v33 = vshrl.u32 %v12165_v36, 16  ;;  %v8555_v54 = vshll.u32 %v12165_v36, 16 }
0x10e5   : > { %v8554_v58 = vrot.slane %v8552_v33, 7 }
0x10e7   : > { %v8557_v20 = vor.u32 %v8555_v54, %v8554_v58  ;;  %v8559_v9 = vrot.slane %v8554_v58, 4 }
0x10e9   : > { %v8558_v40 = vsel %vm13192_vm8, %v13213_v14, %v8557_v20  ;;  %v8567_v10 = vsel %vm13192_vm8, %v8559_v9, %v13197_v55 }
0x10ea   : > { %8602 = vst.msk [vmem:[#allocation2 + $0x40] sm:$0xf] %vm172_vm1, %v8558_v40  ;;  %8603 = vst.msk [vmem:[#allocation2 + $0x44] sm:$0xf] %vm172_vm1, %v8567_v10 }
0x10f1   : > { %v15502_v42 = vld [vmem:[#allocation2 + $0x40] sm:$0xf]  ;;  %v8624_v5 = vld [vmem:[#allocation2 + $0x44] sm:$0xf] }
0x10f2   : > { %v11815_v0 = vcombine.low %v15502_v42, %v8624_v5 }
0x10f4   : > { %8691 = vrot.lane.b32.xlu1 %v11815_v0, %s12844_s5 }
0x111c   : > { %v8678_v17 = vpop.permute.xlu0 %8677 }
0x111d   : > { %v8703_v44 = vsel %vm505_vm0, %v12701_v24, %v8678_v17 }
0x111e   : > { %8936 = vmatmul.mubr.bf16.vlgmr.msra.gmra.mrb[144].mxu1 %v8703_v44 }
0x111f   : > { %11868 = vmatprep.mubr.msk.bf16.mxu1 %vm505_vm0, %v15445_v41 }
0x1124   : > { %v8680_v21 = vpop.permute.xlu1 %8679 }
0x1125   : > { %v8707_v51 = vsel %vm505_vm0, %v15417_v38, %v8680_v21 }
0x1126   : > { %8946 = vmatmul.mubr.bf16.gmra.mrb[148].mxu1 %v8707_v51 }
0x1127   : > { %11869 = vmatprep.mubr.msk.bf16.mxu1 %vm505_vm0, %v15459_v47 }
0x112c   : > { %v8682_v49 = vpop.permute.xlu0 %8681 }
0x112d   : > { %v8711_v7 = vsel %vm505_vm0, %v15431_v26, %v8682_v49 }
0x112e   : > { %8956 = vmatmul.mubr.bf16.gmra.mrb[152].mxu1 %v8711_v7 }
0x112f   : > { %11870 = vmatprep.mubr.msk.bf16.mxu1 %vm505_vm0, %v15474_v3 }
0x1134   : > { %v8684_v56 = vpop.permute.xlu1 %8683 }
0x1135   : > { %v8715_v48 = vsel %vm505_vm0, %v15445_v41, %v8684_v56  ;;  %v8626_v41 = vld [vmem:[#allocation2 + $0x4c] sm:$0xf] }
0x1136   : > { %8966 = vmatmul.mubr.bf16.gmra.mrb[156].mxu1 %v8715_v48  ;;  %v11817_v34 = vcombine.low %v15526_v39, %v8626_v41 }
0x1137   : > { %11871 = vmatprep.mubr.msk.bf16.mxu1 %vm505_vm0, %v12662_v53 }
0x113c   : > { %v8686_v38 = vpop.permute.xlu0 %8685 }
0x113d   : > { %v8719_v52 = vsel %vm505_vm0, %v15459_v47, %v8686_v38 }
0x113e   : > { %8976 = vmatmul.mubr.bf16.gmra.mrb[160].mxu1 %v8719_v52 }
0x113f   : > { %11872 = vmatprep.mubr.msk.bf16.mxu1 %vm505_vm0, %v12666_v62 }
0x1145   : > { %v8688_v27 = vpop.permute.xlu1 %8687 }
0x1146   : > { %v8723_v26 = vsel %vm505_vm0, %v15474_v3, %v8688_v27 }
0x1147   : > { %8986 = vmatmul.mubr.bf16.gmra.mrb[164].mxu1 %v8723_v26 }
0x1148   : > { %11873 = vmatprep.mubr.msk.bf16.mxu1 %vm505_vm0, %v11815_v0 }
0x114d   : > { %v8690_v35 = vpop.permute.xlu0 %8689 }
0x114e   : > { %v8727_v15 = vsel %vm505_vm0, %v12662_v53, %v8690_v35 }
0x114f   : > { %8996 = vmatmul.mubr.bf16.gmra.mrb[168].mxu1 %v8727_v15 }
0x1150   : > { %11874 = vmatprep.mubr.msk.bf16.mxu1 %vm505_vm0, %v11817_v34 }
0x1166   : > { %v8692_v47 = vpop.permute.xlu1 %8691 }
0x1167   : > { %v8731_v13 = vsel %vm505_vm0, %v12666_v62, %v8692_v47 }
0x1168   : > { %9006 = vmatmul.mubr.bf16.gmra.mrb[172].mxu1 %v8731_v13 }
0x119b   : > { %v7205_v28 = vpop.f32.mrb[140].mxu1 }
0x119c   : > { %v7207_v32 = vpop.f32.mrb[141].mxu1 }
0x119d   : > { %v7209_v6 = vpop.f32.mrb[142].mxu1 }
0x119e   : > { %v7210_v25 = vpop.f32.mrb[143].mxu1 }
0x11f1   : > { %v15532_v50 = vpop.f32.mrb[144].mxu1 }
0x11f2   : > { %v8939_v12 = vpop.f32.mrb[145].mxu1  ;;  %v9041_v37 = vrot.slane %v15532_v50, 1 }
0x11f3   : > { %v8941_v11 = vpop.f32.mrb[146].mxu1  ;;  %v9155_v60 = vrot.slane %v8939_v12, 2 }
0x11f4   : > { %v9042_v22 = vrot.slane %v8941_v11, 1  ;;  %v8943_v8 = vpop.f32.mrb[147].mxu1 }
0x11f5   : > { %v9156_v3 = vrot.slane %v8943_v8, 2 }
0x11f6   : > { %v9043_v16 = vsel %vm845_vm2, %v9041_v37, %v9042_v22  ;;  %v12708_v22 = vld [vmem:[#allocation2 + $0xa4] ss:$0 sps:$4 sm:$0xff]  }
0x11f7   : > { %9074 = vrot.lane.b32.xlu0 %v9043_v16, %s12844_s5  ;;  %v15538_v19 = vsel %vm960_vm3, %v9155_v60, %v9156_v3  ;;  %11789 = vmatprep.mubr.msk.bf16.mxu0 %vm505_vm0, %v12708_v22  ;;  %v12709_v60 = vld [vmem:[#allocation2 + $0x50] ss:$0 sps:$4 sm:$0xff]   ;;  %v12753_v22 = vld [vmem:[%s16295_s2 + $0xfc] ss:$24 sps:$4 sm:$0xff]  }
0x11f8   : > { %11875 = vmatprep.mubr.msk.bf16.mxu1 %vm505_vm0, %v12709_v60  ;;  %v12748_v60 = vld [vmem:[%s16295_s2 + $0x120] ss:$24 sps:$4 sm:$0xff]  }
0x11f9   : > { %v15540_v2 = vpop.f32.mrb[148].mxu1 }
0x11fa   : > { %v8949_v45 = vpop.f32.mrb[149].mxu1  ;;  %v9044_v57 = vrot.slane %v15540_v2, 1 }
0x11fb   : > { %v8951_v30 = vpop.f32.mrb[150].mxu1  ;;  %v9158_v53 = vrot.slane %v8949_v45, 2 }
0x11fc   : > { %v9046_v29 = vrot.slane %v8951_v30, 1  ;;  %v8953_v43 = vpop.f32.mrb[151].mxu1 }
0x11fd   : > { %v9160_v18 = vrot.slane %v8953_v43, 2 }
0x11fe   : > { %v9047_v1 = vsel %vm845_vm2, %v9044_v57, %v9046_v29 }
0x11ff   : > { %9078 = vrot.lane.b32.xlu1 %v9047_v1, %s12844_s5  ;;  %v15546_v4 = vsel %vm960_vm3, %v9158_v53, %v9160_v18  ;;  %v11730_v18 = vcombine.low %v15224_v63, %v15224_v63 }
0x1201   : > { %v15548_v46 = vpop.f32.mrb[152].mxu1 }
0x1202   : > { %v8959_v23 = vpop.f32.mrb[153].mxu1  ;;  %v9048_v36 = vrot.slane %v15548_v46, 1 }
0x1203   : > { %v8961_v31 = vpop.f32.mrb[154].mxu1  ;;  %v9162_v58 = vrot.slane %v8959_v23, 2  ;;  %v11816_v23 = vcombine.low %v15526_v39, %v15526_v39  ;;  %v12712_v39 = vld [vmem:[%s16295_s2] ss:$24 sps:$4 sm:$0xff]  }
0x1204   : > { %v9050_v33 = vrot.slane %v8961_v31, 1  ;;  %v8963_v62 = vpop.f32.mrb[155].mxu1 }
0x1205   : > { %v9164_v54 = vrot.slane %v8963_v62, 2 }
0x1206   : > { %v9051_v20 = vsel %vm845_vm2, %v9048_v36, %v9050_v33 }
0x1207   : > { %9082 = vrot.lane.b32.xlu0 %v9051_v20, %s12844_s5  ;;  %v15554_v9 = vsel %vm960_vm3, %v9162_v58, %v9164_v54 }
0x1209   : > { %v15556_v40 = vpop.f32.mrb[156].mxu1 }
0x120a   : > { %v8969_v10 = vpop.f32.mrb[157].mxu1  ;;  %v9052_v0 = vrot.slane %v15556_v40, 1 }
0x120b   : > { %v8971_v5 = vpop.f32.mrb[158].mxu1  ;;  %v9166_v44 = vrot.slane %v8969_v10, 2 }
0x120c   : > { %v9054_v24 = vrot.slane %v8971_v5, 1  ;;  %v8973_v17 = vpop.f32.mrb[159].mxu1 }
0x120d   : > { %v9168_v21 = vrot.slane %v8973_v17, 2  ;;  %v12720_v17 = vld [vmem:[%s16295_s2 + $0x8] ss:$24 sps:$4 sm:$0xff]  }
0x120e   : > { %v9055_v51 = vsel %vm845_vm2, %v9052_v0, %v9054_v24  ;;  %v12714_v0 = vld [vmem:[%s16295_s2 + $0x4] ss:$24 sps:$4 sm:$0xff]   ;;  %v12718_v24 = vld [vmem:[%s16295_s2 + $0x34] ss:$24 sps:$4 sm:$0xff]  }
0x120f   : > { %9086 = vrot.lane.b32.xlu1 %v9055_v51, %s12844_s5  ;;  %v15562_v49 = vsel %vm960_vm3, %v9166_v44, %v9168_v21  ;;  %v12722_v44 = vld [vmem:[%s16295_s2 + $0xc] ss:$24 sps:$4 sm:$0xff]   ;;  %10096 = vmatprep.subr.bf16.mxu0 %v12714_v0  ;;  %v12716_v21 = vld [vmem:[%s16295_s2 + $0x30] ss:$24 sps:$4 sm:$0xff]  }
0x1210   : > { %10097 = vmatpush1.bf16.msra.mxu0 %v12712_v39  ;;  %10215 = vmatprep.subr.bf16.mxu1 %v12722_v44  ;;  %v12725_v51 = vld [vmem:[%s16295_s2 + $0x64] ss:$24 sps:$4 sm:$0xff]   ;;  %v12781_v0 = vld [vmem:[%s16295_s2 + $0x210] ss:$24 sps:$4 sm:$0xff]  }
0x1211   : > { %v15564_v7 = vpop.f32.mrb[160].mxu1  ;;  %10098 = vmatprep.subr.bf16.mxu0 %v12718_v24  ;;  %10216 = vmatpush1.bf16.msra.mxu1 %v12720_v17  ;;  %v12780_v39 = vld [vmem:[%s16295_s2 + $0x1ec] ss:$24 sps:$4 sm:$0xff]   ;;  %v12778_v24 = vld [vmem:[%s16295_s2 + $0x1e8] ss:$24 sps:$4 sm:$0xff]  }
0x1212   : > { %v8979_v56 = vpop.f32.mrb[161].mxu1  ;;  %v9056_v38 = vrot.slane %v15564_v7, 1  ;;  %v12786_v44 = vld [vmem:[%s16295_s2 + $0x21c] ss:$24 sps:$4 sm:$0xff]  }
0x1213   : > { %v8981_v48 = vpop.f32.mrb[162].mxu1  ;;  %v9170_v26 = vrot.slane %v8979_v56, 2  ;;  %v12723_v56 = vld [vmem:[%s16295_s2 + $0x60] ss:$24 sps:$4 sm:$0xff]  }
0x1214   : > { %v9058_v52 = vrot.slane %v8981_v48, 1  ;;  %v8983_v27 = vpop.f32.mrb[163].mxu1  ;;  %10099 = vmatpush1.bf16.msra.mxu0 %v12716_v21  ;;  %v12727_v48 = vld [vmem:[%s16295_s2 + $0x38] ss:$24 sps:$4 sm:$0xff]  }
0x1215   : > { %v9172_v41 = vrot.slane %v8983_v27, 2  ;;  %10100 = vmatprep.subr.bf16.mxu0 %v12725_v51  ;;  %v12732_v27 = vld [vmem:[%s16295_s2 + $0x94] ss:$24 sps:$4 sm:$0xff]  }
0x1216   : > { %v9059_v34 = vsel %vm845_vm2, %v9056_v38, %v9058_v52  ;;  %v12729_v38 = vld [vmem:[%s16295_s2 + $0x3c] ss:$24 sps:$4 sm:$0xff]   ;;  %v12730_v52 = vld [vmem:[%s16295_s2 + $0x90] ss:$24 sps:$4 sm:$0xff]  }
0x1217   : > { %9090 = vrot.lane.b32.xlu0 %v9059_v34, %s12844_s5  ;;  %v15570_v35 = vsel %vm960_vm3, %v9170_v26, %v9172_v41  ;;  %v12735_v26 = vld [vmem:[%s16295_s2 + $0x6c] ss:$24 sps:$4 sm:$0xff]   ;;  %10217 = vmatprep.subr.bf16.mxu1 %v12729_v38  ;;  %v12733_v34 = vld [vmem:[%s16295_s2 + $0x68] ss:$24 sps:$4 sm:$0xff]  }
0x1218   : > { %10101 = vmatpush1.bf16.msra.mxu0 %v12723_v56  ;;  %v12738_v41 = vld [vmem:[%s16295_s2 + $0xc4] ss:$24 sps:$4 sm:$0xff]   ;;  %10218 = vmatpush1.bf16.msra.mxu1 %v12727_v48  ;;  %v12784_v56 = vld [vmem:[%s16295_s2 + $0x218] ss:$24 sps:$4 sm:$0xff]  }
0x1219   : > { %10102 = vmatprep.subr.bf16.mxu0 %v12732_v27  ;;  %10219 = vmatprep.subr.bf16.mxu1 %v12735_v26 }
0x121a   : > { %v15572_v15 = vpop.f32.mrb[164].mxu1 }
0x121b   : > { %v8989_v47 = vpop.f32.mrb[165].mxu1  ;;  %v9060_v28 = vrot.slane %v15572_v15, 1 }
0x121c   : > { %v8991_v13 = vpop.f32.mrb[166].mxu1  ;;  %v9174_v25 = vrot.slane %v8989_v47, 2  ;;  %v12741_v47 = vld [vmem:[%s16295_s2 + $0x9c] ss:$24 sps:$4 sm:$0xff]   ;;  %10103 = vmatpush1.bf16.msra.mxu0 %v12730_v52  ;;  %10220 = vmatpush1.bf16.msra.mxu1 %v12733_v34 }
0x121d   : > { %v9062_v32 = vrot.slane %v8991_v13, 1  ;;  %v8993_v6 = vpop.f32.mrb[167].mxu1  ;;  %v12736_v13 = vld [vmem:[%s16295_s2 + $0xc0] ss:$24 sps:$4 sm:$0xff]   ;;  %10104 = vmatprep.subr.bf16.mxu0 %v12738_v41  ;;  %10221 = vmatprep.subr.bf16.mxu1 %v12741_v47 }
0x121e   : > { %v9176_v12 = vrot.slane %v8993_v6, 2  ;;  %v12747_v6 = vld [vmem:[%s16295_s2 + $0xcc] ss:$24 sps:$4 sm:$0xff]  }
0x121f   : > { %v9063_v11 = vsel %vm845_vm2, %v9060_v28, %v9062_v32  ;;  %v12744_v28 = vld [vmem:[%s16295_s2 + $0xf4] ss:$24 sps:$4 sm:$0xff]   ;;  %v12739_v32 = vld [vmem:[%s16295_s2 + $0x98] ss:$24 sps:$4 sm:$0xff]  }
0x1220   : > { %9094 = vrot.lane.b32.xlu1 %v9063_v11, %s12844_s5  ;;  %v15578_v37 = vsel %vm960_vm3, %v9174_v25, %v9176_v12  ;;  %10105 = vmatpush1.bf16.msra.mxu0 %v12736_v13  ;;  %v12742_v25 = vld [vmem:[%s16295_s2 + $0xf0] ss:$24 sps:$4 sm:$0xff]   ;;  %v12750_v12 = vld [vmem:[%s16295_s2 + $0x124] ss:$24 sps:$4 sm:$0xff]  }
0x1221   : > { %10106 = vmatprep.subr.bf16.mxu0 %v12744_v28  ;;  %10222 = vmatpush1.bf16.msra.mxu1 %v12739_v32  ;;  %v12745_v11 = vld [vmem:[%s16295_s2 + $0xc8] ss:$24 sps:$4 sm:$0xff]   ;;  %v12790_v32 = vld [vmem:[%s16295_s2 + $0x14] ss:$24 sps:$4 sm:$0xff]  }
0x1222   : > { %v15581_v8 = vpop.f32.mrb[168].mxu1  ;;  %10223 = vmatprep.subr.bf16.mxu1 %v12747_v6  ;;  %v9492_v6 = vld [vmem:[#allocation2 + $0x5c] sm:$0xf] }
0x1223   : > { %v8999_v3 = vpop.f32.mrb[169].mxu1  ;;  %v9064_v45 = vrot.slane %v15581_v8, 1 }
0x1224   : > { %v9001_v16 = vpop.f32.mrb[170].mxu1  ;;  %v9178_v29 = vrot.slane %v8999_v3, 2  ;;  %10107 = vmatpush1.bf16.msra.mxu0 %v12742_v25  ;;  %v12756_v3 = vld [vmem:[%s16295_s2 + $0x154] ss:$24 sps:$4 sm:$0xff]  }
0x1225   : > { %v9066_v30 = vrot.slane %v9001_v16, 1  ;;  %v9003_v57 = vpop.f32.mrb[171].mxu1  ;;  %10108 = vmatprep.subr.bf16.mxu0 %v12750_v12  ;;  %10224 = vmatpush1.bf16.msra.mxu1 %v12745_v11  ;;  %v12751_v16 = vld [vmem:[%s16295_s2 + $0xf8] ss:$24 sps:$4 sm:$0xff]  }
0x1226   : > { %v9180_v43 = vrot.slane %v9003_v57, 2  ;;  %10225 = vmatprep.subr.bf16.mxu1 %v12753_v22  ;;  %v12762_v57 = vld [vmem:[%s16295_s2 + $0x184] ss:$24 sps:$4 sm:$0xff]  }
0x1227   : > { %v9067_v53 = vsel %vm845_vm2, %v9064_v45, %v9066_v30  ;;  %v12759_v45 = vld [vmem:[%s16295_s2 + $0x12c] ss:$24 sps:$4 sm:$0xff]   ;;  %v12754_v30 = vld [vmem:[%s16295_s2 + $0x150] ss:$24 sps:$4 sm:$0xff]  }
0x1228   : > { %9098 = vrot.lane.b32.xlu0 %v9067_v53, %s12844_s5  ;;  %v15590_v1 = vsel %vm960_vm3, %v9178_v29, %v9180_v43  ;;  %10109 = vmatpush1.bf16.msra.mxu0 %v12748_v60  ;;  %v12757_v29 = vld [vmem:[%s16295_s2 + $0x128] ss:$24 sps:$4 sm:$0xff]   ;;  %v12765_v43 = vld [vmem:[%s16295_s2 + $0x15c] ss:$24 sps:$4 sm:$0xff]  }
0x1229   : > { %10110 = vmatprep.subr.bf16.mxu0 %v12756_v3  ;;  %10226 = vmatpush1.bf16.msra.mxu1 %v12751_v16  ;;  %v12760_v53 = vld [vmem:[%s16295_s2 + $0x180] ss:$24 sps:$4 sm:$0xff]  }
0x122a   : > { %10227 = vmatprep.subr.bf16.mxu1 %v12759_v45 }
0x122c   : > { %7787 = vrot.lane.b32.xlu0 %v11730_v18, %s12844_s5  ;;  %10111 = vmatpush1.bf16.msra.mxu0 %v12754_v30  ;;  %v12768_v18 = vld [vmem:[%s16295_s2 + $0x1b4] ss:$24 sps:$4 sm:$0xff]  }
0x122d   : > { %10112 = vmatprep.subr.bf16.mxu0 %v12762_v57  ;;  %10228 = vmatpush1.bf16.msra.mxu1 %v12757_v29 }
0x122e   : > { %10229 = vmatprep.subr.bf16.mxu1 %v12765_v43 }
0x1230   : > { %8693 = vrot.lane.b32.xlu0 %v11816_v23, %s12844_s5  ;;  %v12763_v23 = vld [vmem:[%s16295_s2 + $0x158] ss:$24 sps:$4 sm:$0xff]   ;;  %10113 = vmatpush1.bf16.msra.mxu0 %v12760_v53 }
0x1231   : > { %10114 = vmatprep.subr.bf16.mxu0 %v12768_v18  ;;  %10230 = vmatpush1.bf16.msra.mxu1 %v12763_v23 }
0x123b   : > { %v15595_v31 = vpop.f32.mrb[172].mxu1 }
0x123c   : > { %v9009_v36 = vpop.f32.mrb[173].mxu1  ;;  %v9068_v62 = vrot.slane %v15595_v31, 1 }
0x123d   : > { %v9011_v33 = vpop.f32.mrb[174].mxu1  ;;  %v9182_v20 = vrot.slane %v9009_v36, 2  ;;  %v12771_v36 = vld [vmem:[%s16295_s2 + $0x18c] ss:$24 sps:$4 sm:$0xff]  }
0x123e   : > { %v9070_v58 = vrot.slane %v9011_v33, 1  ;;  %v9013_v54 = vpop.f32.mrb[175].mxu1  ;;  %v12766_v33 = vld [vmem:[%s16295_s2 + $0x1b0] ss:$24 sps:$4 sm:$0xff]   ;;  %10231 = vmatprep.subr.bf16.mxu1 %v12771_v36 }
0x123f   : > { %v9184_v63 = vrot.slane %v9013_v54, 2  ;;  %v12777_v54 = vld [vmem:[%s16295_s2 + $0x1bc] ss:$24 sps:$4 sm:$0xff]   ;;  %10115 = vmatpush1.bf16.msra.mxu0 %v12766_v33 }
0x1240   : > { %v9071_v10 = vsel %vm845_vm2, %v9068_v62, %v9070_v58  ;;  %v12774_v62 = vld [vmem:[%s16295_s2 + $0x1e4] ss:$24 sps:$4 sm:$0xff]   ;;  %v12769_v58 = vld [vmem:[%s16295_s2 + $0x188] ss:$24 sps:$4 sm:$0xff]  }
0x1241   : > { %9102 = vrot.lane.b32.xlu1 %v9071_v10, %s12844_s5  ;;  %v15602_v5 = vsel %vm960_vm3, %v9182_v20, %v9184_v63  ;;  %v12772_v20 = vld [vmem:[%s16295_s2 + $0x1e0] ss:$24 sps:$4 sm:$0xff]   ;;  %10116 = vmatprep.subr.bf16.mxu0 %v12774_v62  ;;  %v12783_v63 = vld [vmem:[%s16295_s2 + $0x214] ss:$24 sps:$4 sm:$0xff]  }
0x1242   : > { %10232 = vmatpush1.bf16.msra.mxu1 %v12769_v58  ;;  %v12775_v10 = vld [vmem:[%s16295_s2 + $0x1b8] ss:$24 sps:$4 sm:$0xff]  }
0x1243   : > { %10233 = vmatprep.subr.bf16.mxu1 %v12777_v54  ;;  %10117 = vmatpush1.bf16.msra.mxu0 %v12772_v20 }
0x1244   : > { %10118 = vmatprep.subr.bf16.mxu0 %v12783_v63 }
0x1246   : > { %10234 = vmatpush1.bf16.msra.mxu1 %v12775_v10 }
0x1247   : > { %10235 = vmatprep.subr.bf16.mxu1 %v12780_v39  ;;  %10119 = vmatpush1.bf16.msra.mxu0 %v12781_v0 }
0x1248   : > { %10336 = vmatprep.subr.bf16.mxu0 %v12790_v32 }
0x124a   : > { %10236 = vmatpush1.bf16.msra.mxu1 %v12778_v24 }
0x124b   : > { %10237 = vmatprep.subr.bf16.mxu1 %v12786_v44 }
0x124e   : > { %10238 = vmatpush1.bf16.msra.mxu1 %v12784_v56 }
0x124f   : > { %12199 = vmatprep.subr.bf16.mxu1 %v12790_v32 }
0x1269   : > { %v9075_v17 = vpop.permute.xlu0 %9074 }
0x126a   : > { %v9122_v21 = vadd.f32 %v9075_v17, %v15532_v50 }
0x126c   : > { %v9204_v51 = vadd.f32 %v15538_v19, %v9122_v21 }
0x126e   : > { %vm9220_vm5 = vcmp.ge.f32.partialorder %v9204_v51, 0.0  ;;  %v9236_v48 = vmul.f32 0.2, %v9204_v51 }
0x1270   : > { %v9252_v38 = vsel %vm9220_vm5, %v9204_v51, %v9236_v48 }
0x1271   : > { %v12167_v52 = vpack.c.bf16 %v9252_v38, %v9252_v38  ;;  %v9079_v27 = vpop.permute.xlu1 %9078 }
0x1272   : > { %v9124_v26 = vadd.f32 %v9079_v27, %v15540_v2 }
0x1273   : > { %v9333_v41 = vshrl.u32 %v12167_v52, 16  ;;  %v9336_v47 = vshll.u32 %v12167_v52, 16 }
0x1274   : > { %v9206_v50 = vadd.f32 %v15546_v4, %v9124_v26 }
0x1275   : > { %v9335_v34 = vrot.slane %v9333_v41, 7 }
0x1276   : > { %vm9222_vm10 = vcmp.ge.f32.partialorder %v9206_v50, 0.0  ;;  %v9238_v19 = vmul.f32 0.2, %v9206_v50 }
0x1277   : > { %v9338_v13 = vor.u32 %v9336_v47, %v9335_v34  ;;  %v9339_v28 = vrot.slane %v9335_v34, 4 }
0x1278   : > { %v9254_v25 = vsel %vm9222_vm10, %v9206_v50, %v9238_v19 }
0x1279   : > { %v9347_v12 = vsel %vm13192_vm8, %v9339_v28, %v13197_v55  ;;  %v9493_v2 = vsel %vm13200_vm9, %v9338_v13, %v9492_v6  ;;  %v12169_v4 = vpack.c.bf16 %v9254_v25, %v9254_v25  ;;  %v9083_v11 = vpop.permute.xlu0 %9082 }
0x127a   : > { %9495 = vst.msk [vmem:[#allocation2 + $0x60] sm:$0xf] %vm172_vm1, %v9347_v12  ;;  %9494 = vst [vmem:[#allocation2 + $0x5c] sm:$0xf] %v9493_v2  ;;  %v9126_v22 = vadd.f32 %v9083_v11, %v15548_v46 }
0x127b   : > { %v9350_v60 = vshrl.u32 %v12169_v4, 16  ;;  %v9353_v45 = vshll.u32 %v12169_v4, 16 }
0x127c   : > { %v9208_v3 = vadd.f32 %v15554_v9, %v9126_v22 }
0x127d   : > { %v9352_v16 = vrot.slane %v9350_v60, 7 }
0x127e   : > { %vm9224_vm6 = vcmp.ge.f32.partialorder %v9208_v3, 0.0  ;;  %v9240_v30 = vmul.f32 0.2, %v9208_v3 }
0x127f   : > { %v9355_v57 = vor.u32 %v9353_v45, %v9352_v16  ;;  %v9357_v29 = vrot.slane %v9352_v16, 4 }
0x1280   : > { %v9256_v61 = vsel %vm9224_vm6, %v9208_v3, %v9240_v30 }
0x1281   : > { %v9356_v43 = vsel %vm13192_vm8, %v13213_v14, %v9355_v57  ;;  %v9365_v53 = vsel %vm13192_vm8, %v9357_v29, %v13197_v55  ;;  %v12171_v18 = vpack.c.bf16 %v9256_v61, %v9256_v61  ;;  %v9087_v46 = vpop.permute.xlu1 %9086  ;;  %v15769_v23 = vld [vmem:[#allocation2 + $0x5c] sm:$0xff]   ;;  %v12835_v61 = vld [vmem:[#allocation2 + $0x94] sm:$0xf] }
0x1282   : > { %9496 = vst.msk [vmem:[#allocation2 + $0x64] sm:$0xf] %vm172_vm1, %v9356_v43  ;;  %9497 = vst.msk [vmem:[#allocation2 + $0x68] sm:$0xf] %vm172_vm1, %v9365_v53  ;;  %v9128_v9 = vadd.f32 %v9087_v46, %v15556_v40  ;;  %9583 = vrot.lane.b32.xlu1 %v15769_v23, %s12844_s5  ;;  %v11728_v43 = vcombine.low %v12835_v61, %v12835_v61  ;;  %v12811_v61 = vld [vmem:[%s16295_s2 + $0x164] ss:$24 sps:$4 sm:$0xff]  }
0x1283   : > { %v9368_v36 = vshrl.u32 %v12171_v18, 16  ;;  %v9371_v58 = vshll.u32 %v12171_v18, 16 }
0x1284   : > { %v9210_v33 = vadd.f32 %v15562_v49, %v9128_v9 }
0x1285   : > { %v9370_v62 = vrot.slane %v9368_v36, 7  ;;  %v11814_v36 = vcombine.low %v15502_v42, %v15502_v42 }
0x1286   : > { %vm9226_vm9 = vcmp.ge.f32.partialorder %v9210_v33, 0.0  ;;  %v9242_v54 = vmul.f32 0.2, %v9210_v33 }
0x1287   : > { %v9373_v20 = vor.u32 %v9371_v58, %v9370_v62  ;;  %v9375_v63 = vrot.slane %v9370_v62, 4 }
0x1288   : > { %v9258_v10 = vsel %vm9226_vm9, %v9210_v33, %v9242_v54 }
0x1289   : > { %v9374_v39 = vsel %vm13192_vm8, %v13213_v14, %v9373_v20  ;;  %v9383_v40 = vsel %vm13192_vm8, %v9375_v63, %v13197_v55  ;;  %v12173_v0 = vpack.c.bf16 %v9258_v10, %v9258_v10  ;;  %v9091_v24 = vpop.permute.xlu0 %9090  ;;  %v15783_v17 = vld [vmem:[#allocation2 + $0x64] sm:$0xff]  }
0x128a   : > { %9498 = vst.msk [vmem:[#allocation2 + $0x6c] sm:$0xf] %vm172_vm1, %v9374_v39  ;;  %9499 = vst.msk [vmem:[#allocation2 + $0x70] sm:$0xf] %vm172_vm1, %v9383_v40  ;;  %v9130_v49 = vadd.f32 %v9091_v24, %v15564_v7  ;;  %9585 = vrot.lane.b32.xlu1 %v15783_v17, %s12844_s5 }
0x128b   : > { %v9386_v44 = vshrl.u32 %v12173_v0, 16  ;;  %v9389_v56 = vshll.u32 %v12173_v0, 16 }
0x128c   : > { %v9212_v21 = vadd.f32 %v15570_v35, %v9130_v49 }
0x128d   : > { %v9388_v51 = vrot.slane %v9386_v44, 7 }
0x128e   : > { %vm9228_vm11 = vcmp.ge.f32.partialorder %v9212_v21, 0.0  ;;  %v9244_v48 = vmul.f32 0.2, %v9212_v21 }
0x128f   : > { %v9391_v38 = vor.u32 %v9389_v56, %v9388_v51  ;;  %v9393_v52 = vrot.slane %v9388_v51, 4  ;;  %v15853_v56 = vld [vmem:[#allocation2 + $0x9c] sm:$0xf] }
0x1290   : > { %v9260_v27 = vsel %vm9228_vm11, %v9212_v21, %v9244_v48 }
0x1291   : > { %v9392_v26 = vsel %vm13192_vm8, %v13213_v14, %v9391_v38  ;;  %v9401_v7 = vsel %vm13192_vm8, %v9393_v52, %v13197_v55  ;;  %v12175_v41 = vpack.c.bf16 %v9260_v27, %v9260_v27  ;;  %v15797_v34 = vld [vmem:[#allocation2 + $0x6c] sm:$0xff]  }
0x1292   : > { %v9095_v50 = vpop.permute.xlu1 %9094  ;;  %9500 = vst.msk [vmem:[#allocation2 + $0x74] sm:$0xf] %vm172_vm1, %v9392_v26  ;;  %9501 = vst.msk [vmem:[#allocation2 + $0x78] sm:$0xf] %vm172_vm1, %v9401_v7  ;;  %9587 = vrot.lane.b32.xlu0 %v15797_v34, %s12844_s5  ;;  %v11902_v26 = vcombine.low %v15853_v56, %v15853_v56 }
0x1293   : > { %v9132_v35 = vadd.f32 %v9095_v50, %v15572_v15  ;;  %v9404_v47 = vshrl.u32 %v12175_v41, 16  ;;  %v9407_v28 = vshll.u32 %v12175_v41, 16 }
0x1295   : > { %v9214_v19 = vadd.f32 %v15578_v37, %v9132_v35  ;;  %v9406_v13 = vrot.slane %v9404_v47, 7 }
0x1297   : > { %vm9230_vm12 = vcmp.ge.f32.partialorder %v9214_v19, 0.0  ;;  %v9246_v32 = vmul.f32 0.2, %v9214_v19  ;;  %v9409_v6 = vor.u32 %v9407_v28, %v9406_v13  ;;  %v9411_v25 = vrot.slane %v9406_v13, 4  ;;  %v12793_v13 = vld [vmem:[%s16295_s2 + $0x44] ss:$24 sps:$4 sm:$0xff]  }
0x1299   : > { %v9262_v12 = vsel %vm9230_vm12, %v9214_v19, %v9246_v32  ;;  %v9410_v2 = vsel %vm13192_vm8, %v13213_v14, %v9409_v6  ;;  %v9419_v15 = vsel %vm13192_vm8, %v9411_v25, %v13197_v55  ;;  %v15811_v11 = vld [vmem:[#allocation2 + $0x74] sm:$0xff]  }
0x129a   : > { %v12177_v4 = vpack.c.bf16 %v9262_v12, %v9262_v12  ;;  %9502 = vst.msk [vmem:[#allocation2 + $0x7c] sm:$0xf] %vm172_vm1, %v9410_v2  ;;  %9503 = vst.msk [vmem:[#allocation2 + $0x80] sm:$0xf] %vm172_vm1, %v9419_v15  ;;  %9589 = vrot.lane.b32.xlu1 %v15811_v11, %s12844_s5  ;;  %v9099_v22 = vpop.permute.xlu0 %9098  ;;  %v12791_v32 = vld [vmem:[%s16295_s2 + $0x40] ss:$24 sps:$4 sm:$0xff]  }
0x129b   : > { %v9134_v16 = vadd.f32 %v9099_v22, %v15581_v8  ;;  %v12796_v6 = vld [vmem:[%s16295_s2 + $0x74] ss:$24 sps:$4 sm:$0xff]   ;;  %v12794_v12 = vld [vmem:[%s16295_s2 + $0x70] ss:$24 sps:$4 sm:$0xff]   ;;  %v12799_v15 = vld [vmem:[%s16295_s2 + $0xa4] ss:$24 sps:$4 sm:$0xff]  }
0x129c   : > { %v9422_v37 = vshrl.u32 %v12177_v4, 16  ;;  %v9425_v3 = vshll.u32 %v12177_v4, 16  ;;  %v12802_v4 = vld [vmem:[%s16295_s2 + $0xd4] ss:$24 sps:$4 sm:$0xff]   ;;  %v12800_v22 = vld [vmem:[%s16295_s2 + $0xd0] ss:$24 sps:$4 sm:$0xff]  }
0x129d   : > { %v9216_v57 = vadd.f32 %v15590_v1, %v9134_v16  ;;  %v12803_v16 = vld [vmem:[%s16295_s2 + $0x100] ss:$24 sps:$4 sm:$0xff]  }
0x129e   : > { %v9424_v60 = vrot.slane %v9422_v37, 7  ;;  %v7788_v29 = vpop.permute.xlu0 %7787 }
0x129f   : > { %vm9232_vm13 = vcmp.ge.f32.partialorder %v9216_v57, 0.0  ;;  %v9248_v46 = vmul.f32 0.2, %v9216_v57  ;;  %v7829_v8 = vsel %vm505_vm0, %v11728_v43, %v7788_v29  ;;  %v12809_v43 = vld [vmem:[%s16295_s2 + $0x160] ss:$24 sps:$4 sm:$0xff]  }
0x12a0   : > { %v9427_v45 = vor.u32 %v9425_v3, %v9424_v60  ;;  %v9429_v30 = vrot.slane %v9424_v60, 4  ;;  %8110 = vmatmul.mubr.bf16.gmra.mrb[176].mxu0 %v7829_v8  ;;  %v12805_v3 = vld [vmem:[%s16295_s2 + $0x104] ss:$24 sps:$4 sm:$0xff]  }
0x12a1   : > { %v15825_v9 = vld [vmem:[#allocation2 + $0x7c] sm:$0xff]   ;;  %v9264_v1 = vsel %vm9232_vm13, %v9216_v57, %v9248_v46  ;;  %11977 = vmatprep.mubr.msk.bf16.mxu0 %vm505_vm0, %v15783_v17  ;;  %v12806_v57 = vld [vmem:[%s16295_s2 + $0x130] ss:$24 sps:$4 sm:$0xff]  }
0x12a2   : > { %v9428_v53 = vsel %vm13192_vm8, %v13213_v14, %v9427_v45  ;;  %v9437_v18 = vsel %vm13192_vm8, %v9429_v30, %v13197_v55  ;;  %9591 = vrot.lane.b32.xlu0 %v15825_v9, %s12844_s5  ;;  %v12179_v33 = vpack.c.bf16 %v9264_v1, %v9264_v1  ;;  %v8694_v62 = vpop.permute.xlu0 %8693  ;;  %v12808_v45 = vld [vmem:[%s16295_s2 + $0x134] ss:$24 sps:$4 sm:$0xff]   ;;  %v12812_v46 = vld [vmem:[%s16295_s2 + $0x190] ss:$24 sps:$4 sm:$0xff]   ;;  %v12817_v1 = vld [vmem:[%s16295_s2 + $0x1c4] ss:$24 sps:$4 sm:$0xff]  }
0x12a3   : > { %9504 = vst.msk [vmem:[#allocation2 + $0x84] sm:$0xf] %vm172_vm1, %v9428_v53  ;;  %9505 = vst.msk [vmem:[#allocation2 + $0x88] sm:$0xf] %vm172_vm1, %v9437_v18  ;;  %v8735_v58 = vsel %vm505_vm0, %v11814_v36, %v8694_v62  ;;  %v12814_v53 = vld [vmem:[%s16295_s2 + $0x194] ss:$24 sps:$4 sm:$0xff]  }
0x12a4   : > { %v9440_v54 = vshrl.u32 %v12179_v33, 16  ;;  %9016 = vmatmul.mubr.bf16.gmra.mrb[176].mxu1 %v8735_v58  ;;  %v9443_v63 = vshll.u32 %v12179_v33, 16  ;;  %v12815_v36 = vld [vmem:[%s16295_s2 + $0x1c0] ss:$24 sps:$4 sm:$0xff]   ;;  %v12821_v33 = vld [vmem:[%s16295_s2 + $0x1f4] ss:$24 sps:$4 sm:$0xff]  }
0x12a5   : > { %11986 = vmatprep.mubr.msk.bf16.mxu1 %vm505_vm0, %v15783_v17  ;;  %v12819_v58 = vld [vmem:[%s16295_s2 + $0x1f0] ss:$24 sps:$4 sm:$0xff]  }
0x12a6   : > { %v9442_v20 = vrot.slane %v9440_v54, 7 }
0x12a8   : > { %v9445_v42 = vor.u32 %v9443_v63, %v9442_v20  ;;  %v9447_v39 = vrot.slane %v9442_v20, 4  ;;  %v12826_v20 = vld [vmem:[%s16295_s2 + $0x224] ss:$24 sps:$4 sm:$0xff]   ;;  %v12824_v63 = vld [vmem:[%s16295_s2 + $0x220] ss:$24 sps:$4 sm:$0xff]  }
0x12aa   : > { %v15839_v10 = vld [vmem:[#allocation2 + $0x84] sm:$0xff]   ;;  %v9446_v24 = vsel %vm13192_vm8, %v13213_v14, %v9445_v42  ;;  %v9455_v49 = vsel %vm13192_vm8, %v9447_v39, %v13197_v55  ;;  %v9532_v42 = vld [vmem:[#allocation2 + $0xa0] sm:$0xf] }
0x12ab   : > { %9593 = vrot.lane.b32.xlu1 %v15839_v10, %s12844_s5  ;;  %9506 = vst.msk [vmem:[#allocation2 + $0x8c] sm:$0xf] %vm172_vm1, %v9446_v24  ;;  %9507 = vst.msk [vmem:[#allocation2 + $0x90] sm:$0xf] %vm172_vm1, %v9455_v49  ;;  %v11903_v39 = vcombine.low %v15853_v56, %v9532_v42  ;;  %v12822_v24 = vld [vmem:[#allocation2 + $0xa4] ss:$0 sps:$4 sm:$0xff]  }
0x12b2   : > { %v15855_v38 = vld [vmem:[#allocation2 + $0x8c] sm:$0xff]  }
0x12b3   : > { %v9103_v40 = vpop.permute.xlu1 %9102  ;;  %9595 = vrot.lane.b32.xlu0 %v15855_v38, %s12844_s5 }
0x12b4   : > { %v9136_v0 = vadd.f32 %v9103_v40, %v15595_v31 }
0x12b6   : > { %v9218_v44 = vadd.f32 %v15602_v5, %v9136_v0 }
0x12b7   : > { %9599 = vrot.lane.b32.xlu0 %v11902_v26, %s12844_s5 }
0x12b8   : > { %vm9234_vm14 = vcmp.ge.f32.partialorder %v9218_v44, 0.0  ;;  %v9250_v21 = vmul.f32 0.2, %v9218_v44 }
0x12ba   : > { %v9266_v31 = vsel %vm9234_vm14, %v9218_v44, %v9250_v21 }
0x12bb   : > { %v12181_v51 = vpack.c.bf16 %v9266_v31, %v9266_v31 }
0x12bd   : > { %v9458_v48 = vshrl.u32 %v12181_v51, 16  ;;  %v9461_v27 = vshll.u32 %v12181_v51, 16 }
0x12bf   : > { %v9460_v52 = vrot.slane %v9458_v48, 7 }
0x12c1   : > { %v9463_v7 = vor.u32 %v9461_v27, %v9460_v52  ;;  %v9465_v41 = vrot.slane %v9460_v52, 4 }
0x12c3   : > { %v9464_v5 = vsel %vm13192_vm8, %v13213_v14, %v9463_v7  ;;  %v9473_v50 = vsel %vm13192_vm8, %v9465_v41, %v13197_v55  ;;  %v12787_v14 = vld [vmem:[#allocation2 + $0x54] sm:$0xff]  }
0x12c4   : > { %9508 = vst.msk [vmem:[#allocation2 + $0x94] sm:$0xf] %vm172_vm1, %v9464_v5  ;;  %9509 = vst.msk [vmem:[#allocation2 + $0x98] sm:$0xf] %vm172_vm1, %v9473_v50 }
0x12cb   : > { %v15870_v35 = vld [vmem:[#allocation2 + $0x94] sm:$0xf]  ;;  %v9530_v47 = vld [vmem:[#allocation2 + $0x98] sm:$0xf] }
0x12cc   : > { %v15873_v19 = vcombine.low %v15870_v35, %v9530_v47  ;;  %v11900_v31 = vcombine.low %v15870_v35, %v15870_v35 }
0x12ce   : > { %9597 = vrot.lane.b32.xlu1 %v15873_v19, %s12844_s5 }
0x12f4   : > { %v9584_v55 = vpop.permute.xlu1 %9583 }
0x12f5   : > { %v15884_v28 = vsel %vm505_vm0, %v12787_v14, %v9584_v55 }
0x12f6   : > { %10129 = vmatmul.mubr.bf16.vlgmr.msra.gmra.mrb[180].mxu0 %v15884_v28  ;;  %10248 = vmatmul.mubr.bf16.vlgmr.msra.gmra.mrb[180].mxu1 %v15884_v28 }
0x12f7   : > { %10337 = vmatpush1.bf16.msra.mxu0 %v12788_v59  ;;  %11978 = vmatprep.mubr.msk.bf16.mxu0 %vm505_vm0, %v15797_v34 }
0x12f8   : > { %11987 = vmatprep.mubr.msk.bf16.mxu1 %vm505_vm0, %v15797_v34  ;;  %10338 = vmatprep.subr.bf16.mxu0 %v12793_v13 }
0x12f9   : > { %12211 = vmatpush1.bf16.msra.mxu1 %v12788_v59 }
0x12fa   : > { %12200 = vmatprep.subr.bf16.mxu1 %v12793_v13 }
0x12fb   : > { %10339 = vmatpush1.bf16.msra.mxu0 %v12791_v32 }
0x12fc   : > { %v9586_v25 = vpop.permute.xlu1 %9585  ;;  %10340 = vmatprep.subr.bf16.mxu0 %v12796_v6 }
0x12fd   : > { %v15903_v2 = vsel %vm505_vm0, %v15769_v23, %v9586_v25  ;;  %12212 = vmatpush1.bf16.msra.mxu1 %v12791_v32  ;;  %v12797_v23 = vld [vmem:[%s16295_s2 + $0xa0] ss:$24 sps:$4 sm:$0xff]  }
0x12fe   : > { %10139 = vmatmul.mubr.bf16.gmra.mrb[184].mxu0 %v15903_v2  ;;  %10258 = vmatmul.mubr.bf16.gmra.mrb[184].mxu1 %v15903_v2 }
0x12ff   : > { %11979 = vmatprep.mubr.msk.bf16.mxu0 %vm505_vm0, %v15811_v11  ;;  %11988 = vmatprep.mubr.msk.bf16.mxu1 %vm505_vm0, %v15811_v11 }
0x1300   : > { %10341 = vmatpush1.bf16.msra.mxu0 %v12794_v12  ;;  %12201 = vmatprep.subr.bf16.mxu1 %v12796_v6 }
0x1301   : > { %10342 = vmatprep.subr.bf16.mxu0 %v12799_v15  ;;  %12213 = vmatpush1.bf16.msra.mxu1 %v12794_v12 }
0x1302   : > { %12202 = vmatprep.subr.bf16.mxu1 %v12799_v15 }
0x1304   : > { %v9588_v37 = vpop.permute.xlu0 %9587  ;;  %10343 = vmatpush1.bf16.msra.mxu0 %v12797_v23 }
0x1305   : > { %v15925_v60 = vsel %vm505_vm0, %v15783_v17, %v9588_v37  ;;  %10344 = vmatprep.subr.bf16.mxu0 %v12802_v4  ;;  %12214 = vmatpush1.bf16.msra.mxu1 %v12797_v23 }
0x1306   : > { %10149 = vmatmul.mubr.bf16.gmra.mrb[188].mxu0 %v15925_v60  ;;  %10268 = vmatmul.mubr.bf16.gmra.mrb[188].mxu1 %v15925_v60 }
0x1307   : > { %11980 = vmatprep.mubr.msk.bf16.mxu0 %vm505_vm0, %v15825_v9  ;;  %11989 = vmatprep.mubr.msk.bf16.mxu1 %vm505_vm0, %v15825_v9 }
0x1308   : > { %10345 = vmatpush1.bf16.msra.mxu0 %v12800_v22  ;;  %12203 = vmatprep.subr.bf16.mxu1 %v12802_v4 }
0x1309   : > { %10346 = vmatprep.subr.bf16.mxu0 %v12805_v3  ;;  %12215 = vmatpush1.bf16.msra.mxu1 %v12800_v22 }
0x130a   : > { %12204 = vmatprep.subr.bf16.mxu1 %v12805_v3 }
0x130c   : > { %v9590_v30 = vpop.permute.xlu1 %9589  ;;  %10347 = vmatpush1.bf16.msra.mxu0 %v12803_v16 }
0x130d   : > { %v15947_v29 = vsel %vm505_vm0, %v15797_v34, %v9590_v30  ;;  %10348 = vmatprep.subr.bf16.mxu0 %v12808_v45  ;;  %12216 = vmatpush1.bf16.msra.mxu1 %v12803_v16 }
0x130e   : > { %10159 = vmatmul.mubr.bf16.gmra.mrb[192].mxu0 %v15947_v29  ;;  %10278 = vmatmul.mubr.bf16.gmra.mrb[192].mxu1 %v15947_v29 }
0x130f   : > { %11981 = vmatprep.mubr.msk.bf16.mxu0 %vm505_vm0, %v15839_v10  ;;  %11990 = vmatprep.mubr.msk.bf16.mxu1 %vm505_vm0, %v15839_v10 }
0x1310   : > { %10349 = vmatpush1.bf16.msra.mxu0 %v12806_v57  ;;  %12205 = vmatprep.subr.bf16.mxu1 %v12808_v45 }
0x1311   : > { %10350 = vmatprep.subr.bf16.mxu0 %v12811_v61  ;;  %12217 = vmatpush1.bf16.msra.mxu1 %v12806_v57 }
0x1312   : > { %12206 = vmatprep.subr.bf16.mxu1 %v12811_v61 }
0x1314   : > { %v9592_v18 = vpop.permute.xlu0 %9591  ;;  %10351 = vmatpush1.bf16.msra.mxu0 %v12809_v43 }
0x1315   : > { %v15969_v8 = vsel %vm505_vm0, %v15811_v11, %v9592_v18  ;;  %10352 = vmatprep.subr.bf16.mxu0 %v12814_v53  ;;  %12218 = vmatpush1.bf16.msra.mxu1 %v12809_v43 }
0x1316   : > { %10169 = vmatmul.mubr.bf16.gmra.mrb[196].mxu0 %v15969_v8  ;;  %10288 = vmatmul.mubr.bf16.gmra.mrb[196].mxu1 %v15969_v8 }
0x1317   : > { %11982 = vmatprep.mubr.msk.bf16.mxu0 %vm505_vm0, %v15855_v38  ;;  %11991 = vmatprep.mubr.msk.bf16.mxu1 %vm505_vm0, %v15855_v38 }
0x1318   : > { %10353 = vmatpush1.bf16.msra.mxu0 %v12812_v46  ;;  %12207 = vmatprep.subr.bf16.mxu1 %v12814_v53 }
0x1319   : > { %10354 = vmatprep.subr.bf16.mxu0 %v12817_v1  ;;  %12219 = vmatpush1.bf16.msra.mxu1 %v12812_v46 }
0x131a   : > { %12208 = vmatprep.subr.bf16.mxu1 %v12817_v1 }
0x131c   : > { %10355 = vmatpush1.bf16.msra.mxu0 %v12815_v36 }
0x131d   : > { %v9594_v62 = vpop.permute.xlu1 %9593  ;;  %10356 = vmatprep.subr.bf16.mxu0 %v12821_v33  ;;  %12220 = vmatpush1.bf16.msra.mxu1 %v12815_v36 }
0x131e   : > { %v9629_v54 = vsel %vm505_vm0, %v15825_v9, %v9594_v62  ;;  %12209 = vmatprep.subr.bf16.mxu1 %v12821_v33 }
0x131f   : > { %10179 = vmatmul.mubr.bf16.gmra.mrb[200].mxu0 %v9629_v54  ;;  %10298 = vmatmul.mubr.bf16.gmra.mrb[200].mxu1 %v9629_v54 }
0x1320   : > { %11983 = vmatprep.mubr.msk.bf16.mxu0 %vm505_vm0, %v15873_v19  ;;  %11992 = vmatprep.mubr.msk.bf16.mxu1 %vm505_vm0, %v15873_v19 }
0x1321   : > { %10357 = vmatpush1.bf16.msra.mxu0 %v12819_v58  ;;  %12221 = vmatpush1.bf16.msra.mxu1 %v12819_v58 }
0x1322   : > { %10358 = vmatprep.subr.bf16.mxu0 %v12826_v20  ;;  %12210 = vmatprep.subr.bf16.mxu1 %v12826_v20 }
0x1325   : > { %10359 = vmatpush1.bf16.msra.mxu0 %v12824_v63  ;;  %12222 = vmatpush1.bf16.msra.mxu1 %v12824_v63  ;;  %v9596_v40 = vpop.permute.xlu0 %9595 }
0x1326   : > { %v9633_v0 = vsel %vm505_vm0, %v15839_v10, %v9596_v40 }
0x1327   : > { %10189 = vmatmul.mubr.bf16.gmra.mrb[204].mxu0 %v9633_v0  ;;  %10308 = vmatmul.mubr.bf16.gmra.mrb[204].mxu1 %v9633_v0 }
0x1328   : > { %11984 = vmatprep.mubr.msk.bf16.mxu0 %vm505_vm0, %v11903_v39  ;;  %11993 = vmatprep.mubr.msk.bf16.mxu1 %vm505_vm0, %v11903_v39 }
0x1329   : > { %v9600_v21 = vpop.permute.xlu0 %9599 }
0x132a   : > { %v9641_v51 = vsel %vm505_vm0, %v11900_v31, %v9600_v21 }
0x1340   : > { %v9598_v49 = vpop.permute.xlu1 %9597 }
0x1341   : > { %v9637_v44 = vsel %vm505_vm0, %v15855_v38, %v9598_v49 }
0x1342   : > { %10199 = vmatmul.mubr.bf16.gmra.mrb[208].mxu0 %v9637_v44  ;;  %10318 = vmatmul.mubr.bf16.gmra.mrb[208].mxu1 %v9637_v44 }
0x1343   : > { %11985 = vmatprep.mubr.msk.bf16.mxu0 %vm505_vm0, %v12822_v24  ;;  %11994 = vmatprep.mubr.msk.bf16.mxu1 %vm505_vm0, %v12822_v24 }
0x134a   : > { %10209 = vmatmul.mubr.bf16.gmra.mrb[212].mxu0 %v9641_v51  ;;  %10328 = vmatmul.mubr.bf16.gmra.mrb[212].mxu1 %v9641_v51 }
0x134b   : > { %11995 = vmatprep.mubr.msk.bf16.mxu0 %vm505_vm0, %v15783_v17  ;;  %12000 = vmatprep.mubr.msk.bf16.mxu1 %vm505_vm0, %v15855_v38 }
0x1352   : > { %10369 = vmatmul.mubr.bf16.vlgmr.msra.gmra.mrb[216].mxu0 %v15884_v28  ;;  %10419 = vmatmul.mubr.bf16.vlgmr.msra.gmra.mrb[216].mxu1 %v9629_v54 }
0x1353   : > { %11996 = vmatprep.mubr.msk.bf16.mxu0 %vm505_vm0, %v15797_v34  ;;  %12001 = vmatprep.mubr.msk.bf16.mxu1 %vm505_vm0, %v15873_v19 }
0x135a   : > { %10379 = vmatmul.mubr.bf16.gmra.mrb[220].mxu0 %v15903_v2  ;;  %10429 = vmatmul.mubr.bf16.gmra.mrb[220].mxu1 %v9633_v0 }
0x135b   : > { %11997 = vmatprep.mubr.msk.bf16.mxu0 %vm505_vm0, %v15811_v11  ;;  %12002 = vmatprep.mubr.msk.bf16.mxu1 %vm505_vm0, %v11903_v39 }
0x1362   : > { %10389 = vmatmul.mubr.bf16.gmra.mrb[224].mxu0 %v15925_v60  ;;  %10439 = vmatmul.mubr.bf16.gmra.mrb[224].mxu1 %v9637_v44 }
0x1363   : > { %11998 = vmatprep.mubr.msk.bf16.mxu0 %vm505_vm0, %v15825_v9  ;;  %12003 = vmatprep.mubr.msk.bf16.mxu1 %vm505_vm0, %v12822_v24 }
0x136a   : > { %10399 = vmatmul.mubr.bf16.gmra.mrb[228].mxu0 %v15947_v29  ;;  %10449 = vmatmul.mubr.bf16.gmra.mrb[228].mxu1 %v9641_v51 }
0x136b   : > { %11999 = vmatprep.mubr.msk.bf16.mxu0 %vm505_vm0, %v15839_v10 }
0x1372   : > { %10409 = vmatmul.mubr.bf16.gmra.mrb[232].mxu0 %v15969_v8 }
0x1373   : > { %v8111_v17 = vpop.f32.mrb[176].mxu0 }
0x1374   : > { %v8113_v34 = vpop.f32.mrb[177].mxu0 }
0x1375   : > { %v8115_v11 = vpop.f32.mrb[178].mxu0 }
0x1376   : > { %v8116_v56 = vpop.f32.mrb[179].mxu0 }
0x1377   : > { %v9017_v48 = vpop.f32.mrb[176].mxu1 }
0x1378   : > { %v9019_v38 = vpop.f32.mrb[177].mxu1 }
0x1379   : > { %v9021_v52 = vpop.f32.mrb[178].mxu1 }
0x137a   : > { %v9022_v27 = vpop.f32.mrb[179].mxu1 }
0x13c9   : > { %v10130_v26 = vpop.f32.mrb[180].mxu0  ;;  %v10249_v9 = vpop.f32.mrb[180].mxu1 }
0x13ca   : > { %v10132_v7 = vpop.f32.mrb[181].mxu0  ;;  %v10251_v41 = vpop.f32.mrb[181].mxu1  ;;  %v10491_v35 = vrot.slane %v10249_v9, 1 }
0x13cb   : > { %v10134_v5 = vpop.f32.mrb[182].mxu0  ;;  %v10253_v50 = vpop.f32.mrb[182].mxu1  ;;  %v10494_v14 = vrot.slane %v10251_v41, 1 }
0x13cc   : > { %v10492_v47 = vrot.slane %v10253_v50, 1  ;;  %v10136_v19 = vpop.f32.mrb[183].mxu0  ;;  %v10255_v10 = vpop.f32.mrb[183].mxu1 }
0x13cd   : > { %v10495_v59 = vrot.slane %v10255_v10, 1 }
0x13ce   : > { %v10493_v55 = vsel %vm845_vm2, %v10491_v35, %v10492_v47 }
0x13cf   : > { %v16035_v13 = vadd.f32 %v10493_v55, %v10130_v26  ;;  %v10496_v28 = vsel %vm845_vm2, %v10494_v14, %v10495_v59 }
0x13d0   : > { %v16038_v32 = vadd.f32 %v10496_v28, %v10132_v7 }
0x13d1   : > { %v10140_v6 = vpop.f32.mrb[184].mxu0  ;;  %v10259_v25 = vpop.f32.mrb[184].mxu1 }
0x13d2   : > { %v10497_v12 = vrot.slane %v10259_v25, 1  ;;  %v10142_v2 = vpop.f32.mrb[185].mxu0  ;;  %v10261_v15 = vpop.f32.mrb[185].mxu1 }
0x13d3   : > { %v10499_v23 = vrot.slane %v10261_v15, 1  ;;  %v10144_v4 = vpop.f32.mrb[186].mxu0  ;;  %v10263_v37 = vpop.f32.mrb[186].mxu1 }
0x13d4   : > { %v10498_v22 = vsel %vm845_vm2, %v10492_v47, %v10497_v12  ;;  %v10501_v60 = vrot.slane %v10263_v37, 1  ;;  %v10146_v3 = vpop.f32.mrb[187].mxu0  ;;  %v10265_v16 = vpop.f32.mrb[187].mxu1 }
0x13d5   : > { %v16041_v45 = vadd.f32 %v10498_v22, %v10134_v5  ;;  %v10500_v30 = vsel %vm845_vm2, %v10495_v59, %v10499_v23  ;;  %v10503_v57 = vrot.slane %v10265_v16, 1 }
0x13d6   : > { %v16044_v29 = vadd.f32 %v10500_v30, %v10136_v19  ;;  %v10502_v61 = vsel %vm845_vm2, %v10497_v12, %v10501_v60 }
0x13d7   : > { %v16047_v43 = vadd.f32 %v10502_v61, %v10140_v6  ;;  %v10504_v53 = vsel %vm845_vm2, %v10499_v23, %v10503_v57 }
0x13d8   : > { %v16050_v18 = vadd.f32 %v10504_v53, %v10142_v2 }
0x13d9   : > { %v10150_v46 = vpop.f32.mrb[188].mxu0  ;;  %v10269_v8 = vpop.f32.mrb[188].mxu1 }
0x13da   : > { %v10505_v1 = vrot.slane %v10269_v8, 1  ;;  %v10152_v36 = vpop.f32.mrb[189].mxu0  ;;  %v10271_v33 = vpop.f32.mrb[189].mxu1 }
0x13db   : > { %v10507_v62 = vrot.slane %v10271_v33, 1  ;;  %v10154_v58 = vpop.f32.mrb[190].mxu0  ;;  %v10273_v54 = vpop.f32.mrb[190].mxu1 }
0x13dc   : > { %v10506_v20 = vsel %vm845_vm2, %v10501_v60, %v10505_v1  ;;  %v10509_v63 = vrot.slane %v10273_v54, 1  ;;  %v10156_v42 = vpop.f32.mrb[191].mxu0  ;;  %v10275_v39 = vpop.f32.mrb[191].mxu1 }
0x13dd   : > { %v16053_v40 = vadd.f32 %v10506_v20, %v10144_v4  ;;  %v10508_v0 = vsel %vm845_vm2, %v10503_v57, %v10507_v62  ;;  %v10511_v24 = vrot.slane %v10275_v39, 1 }
0x13de   : > { %v16056_v49 = vadd.f32 %v10508_v0, %v10146_v3  ;;  %v10510_v44 = vsel %vm845_vm2, %v10505_v1, %v10509_v63 }
0x13df   : > { %v16059_v21 = vadd.f32 %v10510_v44, %v10150_v46  ;;  %v10512_v31 = vsel %vm845_vm2, %v10507_v62, %v10511_v24 }
0x13e0   : > { %v16062_v51 = vadd.f32 %v10512_v31, %v10152_v36 }
0x13e1   : > { %v10160_v17 = vpop.f32.mrb[192].mxu0  ;;  %v10279_v34 = vpop.f32.mrb[192].mxu1 }
0x13e2   : > { %v10513_v11 = vrot.slane %v10279_v34, 1  ;;  %v10162_v56 = vpop.f32.mrb[193].mxu0  ;;  %v10281_v48 = vpop.f32.mrb[193].mxu1 }
0x13e3   : > { %v10515_v38 = vrot.slane %v10281_v48, 1  ;;  %v10164_v52 = vpop.f32.mrb[194].mxu0  ;;  %v10283_v27 = vpop.f32.mrb[194].mxu1 }
0x13e4   : > { %v10514_v26 = vsel %vm845_vm2, %v10509_v63, %v10513_v11  ;;  %v10517_v9 = vrot.slane %v10283_v27, 1  ;;  %v10166_v7 = vpop.f32.mrb[195].mxu0  ;;  %v10285_v41 = vpop.f32.mrb[195].mxu1 }
0x13e5   : > { %v16065_v5 = vadd.f32 %v10514_v26, %v10154_v58  ;;  %v10516_v50 = vsel %vm845_vm2, %v10511_v24, %v10515_v38  ;;  %v10519_v35 = vrot.slane %v10285_v41, 1 }
0x13e6   : > { %v16068_v47 = vadd.f32 %v10516_v50, %v10156_v42  ;;  %v10518_v19 = vsel %vm845_vm2, %v10513_v11, %v10517_v9 }
0x13e7   : > { %v16071_v10 = vadd.f32 %v10518_v19, %v10160_v17  ;;  %v10520_v14 = vsel %vm845_vm2, %v10515_v38, %v10519_v35 }
0x13e8   : > { %v16074_v59 = vadd.f32 %v10520_v14, %v10162_v56 }
0x13e9   : > { %v10170_v55 = vpop.f32.mrb[196].mxu0  ;;  %v10289_v28 = vpop.f32.mrb[196].mxu1 }
0x13ea   : > { %v10521_v6 = vrot.slane %v10289_v28, 1  ;;  %v10172_v25 = vpop.f32.mrb[197].mxu0  ;;  %v10291_v12 = vpop.f32.mrb[197].mxu1 }
0x13eb   : > { %v10523_v2 = vrot.slane %v10291_v12, 1  ;;  %v10174_v15 = vpop.f32.mrb[198].mxu0  ;;  %v10293_v23 = vpop.f32.mrb[198].mxu1 }
0x13ec   : > { %v10522_v4 = vsel %vm845_vm2, %v10517_v9, %v10521_v6  ;;  %v10525_v37 = vrot.slane %v10293_v23, 1  ;;  %v10176_v22 = vpop.f32.mrb[199].mxu0  ;;  %v10295_v60 = vpop.f32.mrb[199].mxu1 }
0x13ed   : > { %v16077_v3 = vadd.f32 %v10522_v4, %v10164_v52  ;;  %v10524_v16 = vsel %vm845_vm2, %v10519_v35, %v10523_v2  ;;  %v10527_v30 = vrot.slane %v10295_v60, 1 }
0x13ee   : > { %v16080_v57 = vadd.f32 %v10524_v16, %v10166_v7  ;;  %v10526_v61 = vsel %vm845_vm2, %v10521_v6, %v10525_v37 }
0x13ef   : > { %v16083_v53 = vadd.f32 %v10526_v61, %v10170_v55  ;;  %v10528_v46 = vsel %vm845_vm2, %v10523_v2, %v10527_v30 }
0x13f0   : > { %v16086_v8 = vadd.f32 %v10528_v46, %v10172_v25 }
0x13f2   : > { %v10180_v1 = vpop.f32.mrb[200].mxu0  ;;  %v10299_v36 = vpop.f32.mrb[200].mxu1 }
0x13f3   : > { %v10529_v33 = vrot.slane %v10299_v36, 1  ;;  %v10182_v62 = vpop.f32.mrb[201].mxu0  ;;  %v10301_v58 = vpop.f32.mrb[201].mxu1 }
0x13f4   : > { %v10531_v54 = vrot.slane %v10301_v58, 1  ;;  %v10184_v20 = vpop.f32.mrb[202].mxu0  ;;  %v10303_v63 = vpop.f32.mrb[202].mxu1 }
0x13f5   : > { %v10530_v42 = vsel %vm845_vm2, %v10525_v37, %v10529_v33  ;;  %v10533_v39 = vrot.slane %v10303_v63, 1  ;;  %v10186_v0 = vpop.f32.mrb[203].mxu0  ;;  %v10305_v24 = vpop.f32.mrb[203].mxu1 }
0x13f6   : > { %v16089_v44 = vadd.f32 %v10530_v42, %v10174_v15  ;;  %v10532_v31 = vsel %vm845_vm2, %v10527_v30, %v10531_v54  ;;  %v10535_v17 = vrot.slane %v10305_v24, 1 }
0x13f7   : > { %v16092_v34 = vadd.f32 %v10532_v31, %v10176_v22  ;;  %v10534_v11 = vsel %vm845_vm2, %v10529_v33, %v10533_v39 }
0x13f8   : > { %v16095_v56 = vadd.f32 %v10534_v11, %v10180_v1  ;;  %v10536_v48 = vsel %vm845_vm2, %v10531_v54, %v10535_v17 }
0x13f9   : > { %v16098_v38 = vadd.f32 %v10536_v48, %v10182_v62 }
0x13fa   : > { %v10190_v52 = vpop.f32.mrb[204].mxu0  ;;  %v10309_v27 = vpop.f32.mrb[204].mxu1 }
0x13fb   : > { %v10537_v26 = vrot.slane %v10309_v27, 1  ;;  %v10192_v9 = vpop.f32.mrb[205].mxu0  ;;  %v10311_v7 = vpop.f32.mrb[205].mxu1 }
0x13fc   : > { %v10539_v41 = vrot.slane %v10311_v7, 1  ;;  %v10194_v50 = vpop.f32.mrb[206].mxu0  ;;  %v10313_v35 = vpop.f32.mrb[206].mxu1 }
0x13fd   : > { %v10538_v19 = vsel %vm845_vm2, %v10533_v39, %v10537_v26  ;;  %v10541_v14 = vrot.slane %v10313_v35, 1  ;;  %v10196_v55 = vpop.f32.mrb[207].mxu0  ;;  %v10315_v28 = vpop.f32.mrb[207].mxu1 }
0x13fe   : > { %v16101_v6 = vadd.f32 %v10538_v19, %v10184_v20  ;;  %v10540_v25 = vsel %vm845_vm2, %v10535_v17, %v10539_v41  ;;  %v10543_v12 = vrot.slane %v10315_v28, 1 }
0x13ff   : > { %v16104_v2 = vadd.f32 %v10540_v25, %v10186_v0  ;;  %v10542_v15 = vsel %vm845_vm2, %v10537_v26, %v10541_v14 }
0x1400   : > { %v16107_v23 = vadd.f32 %v10542_v15, %v10190_v52  ;;  %v10544_v4 = vsel %vm845_vm2, %v10539_v41, %v10543_v12 }
0x1401   : > { %v16110_v37 = vadd.f32 %v10544_v4, %v10192_v9 }
0x1415   : > { %v10200_v22 = vpop.f32.mrb[208].mxu0  ;;  %v10319_v60 = vpop.f32.mrb[208].mxu1 }
0x1416   : > { %v10545_v16 = vrot.slane %v10319_v60, 1  ;;  %v10202_v30 = vpop.f32.mrb[209].mxu0  ;;  %v10321_v61 = vpop.f32.mrb[209].mxu1 }
0x1417   : > { %v10547_v46 = vrot.slane %v10321_v61, 1  ;;  %v10204_v1 = vpop.f32.mrb[210].mxu0  ;;  %v10323_v36 = vpop.f32.mrb[210].mxu1 }
0x1418   : > { %v10546_v33 = vsel %vm845_vm2, %v10541_v14, %v10545_v16  ;;  %v10549_v62 = vrot.slane %v10323_v36, 1  ;;  %v10206_v58 = vpop.f32.mrb[211].mxu0  ;;  %v10325_v54 = vpop.f32.mrb[211].mxu1 }
0x1419   : > { %v16113_v20 = vadd.f32 %v10546_v33, %v10194_v50  ;;  %v10548_v63 = vsel %vm845_vm2, %v10543_v12, %v10547_v46  ;;  %v10551_v42 = vrot.slane %v10325_v54, 1 }
0x141a   : > { %v16116_v39 = vadd.f32 %v10548_v63, %v10196_v55  ;;  %v10550_v0 = vsel %vm845_vm2, %v10545_v16, %v10549_v62 }
0x141b   : > { %v16119_v24 = vadd.f32 %v10550_v0, %v10200_v22  ;;  %v10552_v31 = vsel %vm845_vm2, %v10547_v46, %v10551_v42 }
0x141c   : > { %v16122_v17 = vadd.f32 %v10552_v31, %v10202_v30 }
0x141d   : > { %v10210_v11 = vpop.f32.mrb[212].mxu0  ;;  %v10329_v48 = vpop.f32.mrb[212].mxu1 }
0x141e   : > { %v10553_v52 = vrot.slane %v10329_v48, 1  ;;  %v10211_v27 = vpop.f32.mrb[213].mxu0  ;;  %v10331_v26 = vpop.f32.mrb[213].mxu1 }
0x141f   : > { %v10555_v9 = vrot.slane %v10331_v26, 1  ;;  %v10212_v7 = vpop.f32.mrb[214].mxu0  ;;  %v10333_v41 = vpop.f32.mrb[214].mxu1 }
0x1420   : > { %v10554_v50 = vsel %vm845_vm2, %v10549_v62, %v10553_v52  ;;  %v10213_v35 = vpop.f32.mrb[215].mxu0  ;;  %v10334_v19 = vpop.f32.mrb[215].mxu1 }
0x1421   : > { %v16125_v14 = vadd.f32 %v10554_v50, %v10204_v1  ;;  %v10556_v55 = vsel %vm845_vm2, %v10551_v42, %v10555_v9 }
0x1422   : > { %v16128_v28 = vadd.f32 %v10556_v55, %v10206_v58 }
0x1425   : > { %v10370_v25 = vpop.f32.mrb[216].mxu0  ;;  %v16130_v12 = vpop.f32.mrb[216].mxu1 }
0x1426   : > { %v10372_v15 = vpop.f32.mrb[217].mxu0  ;;  %v16132_v4 = vpop.f32.mrb[217].mxu1  ;;  %v10655_v16 = vrot.slane %v10370_v25, 2  ;;  %v10693_v30 = vrot.slane %v16130_v12, 2 }
0x1427   : > { %v10374_v22 = vpop.f32.mrb[218].mxu0  ;;  %v10424_v60 = vpop.f32.mrb[218].mxu1  ;;  %v10658_v33 = vrot.slane %v10372_v15, 2  ;;  %v10695_v62 = vrot.slane %v16132_v4, 2 }
0x1428   : > { %v10656_v61 = vrot.slane %v10374_v22, 2  ;;  %v10697_v46 = vrot.slane %v10424_v60, 2  ;;  %v10376_v1 = vpop.f32.mrb[219].mxu0  ;;  %v10426_v36 = vpop.f32.mrb[219].mxu1 }
0x1429   : > { %v10659_v58 = vrot.slane %v10376_v1, 2  ;;  %v10699_v54 = vrot.slane %v10426_v36, 2 }
0x142a   : > { %v10657_v63 = vsel %vm960_vm3, %v10655_v16, %v10656_v61  ;;  %v10698_v42 = vsel %vm960_vm3, %v10693_v30, %v10697_v46 }
0x142b   : > { %v10753_v0 = vadd.f32 %v10657_v63, %v16035_v13  ;;  %v10773_v31 = vadd.f32 %v10698_v42, %v16095_v56  ;;  %v10660_v11 = vsel %vm960_vm3, %v10658_v33, %v10659_v58  ;;  %v10700_v48 = vsel %vm960_vm3, %v10695_v62, %v10699_v54 }
0x142c   : > { %v10754_v52 = vadd.f32 %v10660_v11, %v16038_v32  ;;  %v10774_v27 = vadd.f32 %v10700_v48, %v16098_v38 }
0x142d   : > { %vm10785_vm0 = vcmp.ge.f32.partialorder %v10753_v0, 0.0  ;;  %v10817_v26 = vmul.f32 0.2, %v10753_v0  ;;  %vm10805_vm1 = vcmp.ge.f32.partialorder %v10773_v31, 0.0  ;;  %v10837_v9 = vmul.f32 0.2, %v10773_v31 }
0x142e   : > { %vm10786_vm2 = vcmp.ge.f32.partialorder %v10754_v52, 0.0  ;;  %v10818_v7 = vmul.f32 0.2, %v10754_v52  ;;  %vm10806_vm8 = vcmp.ge.f32.partialorder %v10774_v27, 0.0  ;;  %v10838_v13 = vmul.f32 0.2, %v10774_v27 }
0x142f   : > { %v10849_v56 = vsel %vm10785_vm0, %v10753_v0, %v10817_v26  ;;  %v10869_v41 = vsel %vm10805_vm1, %v10773_v31, %v10837_v9  ;;  %v10380_v50 = vpop.f32.mrb[220].mxu0  ;;  %v10430_v35 = vpop.f32.mrb[220].mxu1 }
0x1430   : > { %v10850_v32 = vsel %vm10786_vm2, %v10754_v52, %v10818_v7  ;;  %v10870_v19 = vsel %vm10806_vm8, %v10774_v27, %v10838_v13  ;;  %v10661_v38 = vrot.slane %v10380_v50, 2  ;;  %v10701_v55 = vrot.slane %v10430_v35, 2  ;;  %v10382_v25 = vpop.f32.mrb[221].mxu0  ;;  %v10432_v15 = vpop.f32.mrb[221].mxu1 }
0x1431   : > { %v12183_v22 = vpack.c.bf16 %v10850_v32, %v10849_v56  ;;  %v12193_v60 = vpack.c.bf16 %v10870_v19, %v10869_v41  ;;  %v10663_v16 = vrot.slane %v10382_v25, 2  ;;  %v10703_v1 = vrot.slane %v10432_v15, 2  ;;  %v16154_v36 = vpop.f32.mrb[222].mxu0  ;;  %v16156_v33 = vpop.f32.mrb[222].mxu1 }
0x1432   : > { %v10662_v63 = vsel %vm960_vm3, %v10656_v61, %v10661_v38  ;;  %v10702_v42 = vsel %vm960_vm3, %v10697_v46, %v10701_v55  ;;  %v10665_v0 = vrot.slane %v16154_v36, 2  ;;  %v10705_v31 = vrot.slane %v16156_v33, 2  ;;  %v10386_v11 = vpop.f32.mrb[223].mxu0  ;;  %v10436_v48 = vpop.f32.mrb[223].mxu1 }
0x1433   : > { %10977 = vst [vmem:[%s16152_s13] sm:$0xff] %v12183_v22  ;;  %10987 = vst [vmem:[%s16152_s13 + $0x50] sm:$0xff] %v12193_v60  ;;  %v10755_v52 = vadd.f32 %v10662_v63, %v16041_v45  ;;  %v10775_v27 = vadd.f32 %v10702_v42, %v16101_v6  ;;  %v10664_v26 = vsel %vm960_vm3, %v10659_v58, %v10663_v16 }
0x1434   : > { %v10704_v9 = vsel %vm960_vm3, %v10699_v54, %v10703_v1  ;;  %v10756_v61 = vadd.f32 %v10664_v26, %v16044_v29  ;;  %v10666_v7 = vsel %vm960_vm3, %v10661_v38, %v10665_v0  ;;  %v10706_v13 = vsel %vm960_vm3, %v10701_v55, %v10705_v31 }
0x1435   : > { %v10776_v46 = vadd.f32 %v10704_v9, %v16104_v2  ;;  %vm10787_vm15 = vcmp.ge.f32.partialorder %v10755_v52, 0.0  ;;  %v10819_v56 = vmul.f32 0.2, %v10755_v52  ;;  %vm10807_vm4 = vcmp.ge.f32.partialorder %v10775_v27, 0.0  ;;  %v16174_v35 = vpop.f32.mrb[224].mxu0  ;;  %v16176_v2 = vpop.f32.mrb[224].mxu1 }
0x1436   : > { %v10839_v41 = vmul.f32 0.2, %v10775_v27  ;;  %vm10788_vm7 = vcmp.ge.f32.partialorder %v10756_v61, 0.0  ;;  %v10820_v45 = vmul.f32 0.2, %v10756_v61  ;;  %v10757_v54 = vadd.f32 %v10666_v7, %v16047_v43  ;;  %v16178_v25 = vpop.f32.mrb[225].mxu0 }
0x1437   : > { %vm10808_vm5 = vcmp.ge.f32.partialorder %v10776_v46, 0.0  ;;  %v10840_v6 = vmul.f32 0.2, %v10776_v46  ;;  %v10851_v50 = vsel %vm10787_vm15, %v10755_v52, %v10819_v56  ;;  %v10777_v29 = vadd.f32 %v10706_v13, %v16107_v23  ;;  %v16180_v15 = vpop.f32.mrb[225].mxu1  ;;  %v16182_v36 = vpop.f32.mrb[226].mxu0 }
0x1438   : > { %v10871_v58 = vsel %vm10807_vm4, %v10775_v27, %v10839_v41  ;;  %v10852_v32 = vsel %vm10788_vm7, %v10756_v61, %v10820_v45  ;;  %v10667_v38 = vrot.slane %v10386_v11, 2  ;;  %v10707_v55 = vrot.slane %v10436_v48, 2  ;;  %v16184_v23 = vpop.f32.mrb[226].mxu1  ;;  %v16188_v11 = vpop.f32.mrb[227].mxu0 }
0x1439   : > { %v10872_v19 = vsel %vm10808_vm5, %v10776_v46, %v10840_v6  ;;  %v12184_v22 = vpack.c.bf16 %v10852_v32, %v10851_v50  ;;  %vm10789_vm10 = vcmp.ge.f32.partialorder %v10757_v54, 0.0  ;;  %v10821_v43 = vmul.f32 0.2, %v10757_v54  ;;  %v16190_v48 = vpop.f32.mrb[227].mxu1 }
0x143a   : > { %v12194_v60 = vpack.c.bf16 %v10872_v19, %v10871_v58  ;;  %vm10809_vm6 = vcmp.ge.f32.partialorder %v10777_v29, 0.0  ;;  %v10841_v33 = vmul.f32 0.2, %v10777_v29  ;;  %v10668_v63 = vsel %vm960_vm3, %v10663_v16, %v10667_v38 }
0x143b   : > { %v10708_v42 = vsel %vm960_vm3, %v10703_v1, %v10707_v55  ;;  %10978 = vst [vmem:[%s16152_s13 + $0x8] sm:$0xff] %v12184_v22  ;;  %v10853_v52 = vsel %vm10789_vm10, %v10757_v54, %v10821_v43  ;;  %v10758_v27 = vadd.f32 %v10668_v63, %v16050_v18  ;;  %v10669_v9 = vrot.slane %v16174_v35, 2 }
0x143c   : > { %10988 = vst [vmem:[%s16152_s13 + $0x58] sm:$0xff] %v12194_v60  ;;  %v10778_v26 = vadd.f32 %v10708_v42, %v16110_v37  ;;  %v10873_v61 = vsel %vm10809_vm6, %v10777_v29, %v10841_v33  ;;  %v10709_v46 = vrot.slane %v16176_v2, 2  ;;  %v10671_v16 = vrot.slane %v16178_v25, 2 }
0x143d   : > { %v10711_v1 = vrot.slane %v16180_v15, 2  ;;  %vm10790_vm9 = vcmp.ge.f32.partialorder %v10758_v27, 0.0  ;;  %v10822_v7 = vmul.f32 0.2, %v10758_v27  ;;  %v10670_v56 = vsel %vm960_vm3, %v10665_v0, %v10669_v9  ;;  %v16204_v45 = vpop.f32.mrb[228].mxu0  ;;  %v16206_v6 = vpop.f32.mrb[228].mxu1 }
0x143e   : > { %vm10810_vm11 = vcmp.ge.f32.partialorder %v10778_v26, 0.0  ;;  %v10842_v13 = vmul.f32 0.2, %v10778_v26  ;;  %v10710_v41 = vsel %vm960_vm3, %v10705_v31, %v10709_v46  ;;  %v10672_v18 = vsel %vm960_vm3, %v10667_v38, %v10671_v16  ;;  %v16210_v35 = vpop.f32.mrb[229].mxu0  ;;  %v16212_v0 = vpop.f32.mrb[229].mxu1 }
0x143f   : > { %v10712_v37 = vsel %vm960_vm3, %v10707_v55, %v10711_v1  ;;  %v10854_v50 = vsel %vm10790_vm9, %v10758_v27, %v10822_v7  ;;  %v10759_v54 = vadd.f32 %v10670_v56, %v16053_v40  ;;  %v10779_v29 = vadd.f32 %v10710_v41, %v16113_v20  ;;  %v16216_v38 = vpop.f32.mrb[230].mxu0  ;;  %v10454_v55 = vpop.f32.mrb[230].mxu1 }
0x1440   : > { %v10874_v58 = vsel %vm10810_vm11, %v10778_v26, %v10842_v13  ;;  %v12185_v31 = vpack.c.bf16 %v10854_v50, %v10853_v52  ;;  %v10760_v32 = vadd.f32 %v10672_v18, %v16056_v49  ;;  %v10780_v19 = vadd.f32 %v10712_v37, %v16116_v39  ;;  %v16222_v39 = vpop.f32.mrb[231].mxu0  ;;  %v10455_v33 = vpop.f32.mrb[231].mxu1 }
0x1441   : > { %v12195_v2 = vpack.c.bf16 %v10874_v58, %v10873_v61  ;;  %vm10791_vm12 = vcmp.ge.f32.partialorder %v10759_v54, 0.0  ;;  %v10823_v25 = vmul.f32 0.2, %v10759_v54  ;;  %vm10811_vm13 = vcmp.ge.f32.partialorder %v10779_v29, 0.0 }
0x1442   : > { %v10843_v15 = vmul.f32 0.2, %v10779_v29  ;;  %10979 = vst [vmem:[%s16152_s13 + $0x10] sm:$0xff] %v12185_v31  ;;  %vm10792_vm14 = vcmp.ge.f32.partialorder %v10760_v32, 0.0  ;;  %v10824_v40 = vmul.f32 0.2, %v10760_v32 }
0x1443   : > { %10989 = vst [vmem:[%s16152_s13 + $0x60] sm:$0xff] %v12195_v2  ;;  %vm10812_vm0 = vcmp.ge.f32.partialorder %v10780_v19, 0.0  ;;  %v10844_v20 = vmul.f32 0.2, %v10780_v19  ;;  %v10855_v22 = vsel %vm10791_vm12, %v10759_v54, %v10823_v25  ;;  %v10673_v43 = vrot.slane %v16182_v36, 2 }
0x1444   : > { %v10875_v60 = vsel %vm10811_vm13, %v10779_v29, %v10843_v15  ;;  %v10713_v49 = vrot.slane %v16184_v23, 2  ;;  %v10856_v63 = vsel %vm10792_vm14, %v10760_v32, %v10824_v40  ;;  %v10675_v52 = vrot.slane %v16188_v11, 2 }
0x1445   : > { %v10876_v42 = vsel %vm10812_vm0, %v10780_v19, %v10844_v20  ;;  %v10715_v27 = vrot.slane %v16190_v48, 2  ;;  %v12186_v26 = vpack.c.bf16 %v10856_v63, %v10855_v22  ;;  %v10674_v7 = vsel %vm960_vm3, %v10669_v9, %v10673_v43  ;;  %v16228_v36 = vpop.f32.mrb[232].mxu0 }
0x1446   : > { %v12196_v61 = vpack.c.bf16 %v10876_v42, %v10875_v60  ;;  %v10714_v13 = vsel %vm960_vm3, %v10709_v46, %v10713_v49  ;;  %v10761_v23 = vadd.f32 %v10674_v7, %v16059_v21  ;;  %v10676_v41 = vsel %vm960_vm3, %v10671_v16, %v10675_v52  ;;  %v16234_v37 = vpop.f32.mrb[233].mxu0 }
0x1447   : > { %v10781_v56 = vadd.f32 %v10714_v13, %v16119_v24  ;;  %v10716_v18 = vsel %vm960_vm3, %v10711_v1, %v10715_v27  ;;  %10980 = vst [vmem:[%s16152_s13 + $0x18] sm:$0xff] %v12186_v26  ;;  %v10762_v11 = vadd.f32 %v10676_v41, %v16062_v51  ;;  %v10677_v9 = vrot.slane %v16204_v45, 2  ;;  %v16242_v50 = vpop.f32.mrb[234].mxu0 }
0x1448   : > { %10990 = vst [vmem:[%s16152_s13 + $0x68] sm:$0xff] %v12196_v61  ;;  %v10782_v48 = vadd.f32 %v10716_v18, %v16122_v17  ;;  %v10717_v46 = vrot.slane %v16206_v6, 2  ;;  %vm10793_vm1 = vcmp.ge.f32.partialorder %v10761_v23, 0.0  ;;  %v10825_v21 = vmul.f32 0.2, %v10761_v23  ;;  %v16246_v45 = vpop.f32.mrb[235].mxu0 }
0x1449   : > { %vm10813_vm2 = vcmp.ge.f32.partialorder %v10781_v56, 0.0  ;;  %v10845_v24 = vmul.f32 0.2, %v10781_v56  ;;  %vm10794_vm8 = vcmp.ge.f32.partialorder %v10762_v11, 0.0  ;;  %v10826_v16 = vmul.f32 0.2, %v10762_v11 }
0x144a   : > { %vm10814_vm15 = vcmp.ge.f32.partialorder %v10782_v48, 0.0  ;;  %v10846_v1 = vmul.f32 0.2, %v10782_v48  ;;  %v10857_v58 = vsel %vm10793_vm1, %v10761_v23, %v10825_v21  ;;  %v10678_v51 = vsel %vm960_vm3, %v10673_v43, %v10677_v9 }
0x144b   : > { %v10877_v54 = vsel %vm10813_vm2, %v10781_v56, %v10845_v24  ;;  %v10718_v17 = vsel %vm960_vm3, %v10713_v49, %v10717_v46  ;;  %v10858_v6 = vsel %vm10794_vm8, %v10762_v11, %v10826_v16  ;;  %v10763_v31 = vadd.f32 %v10678_v51, %v16065_v5 }
0x144c   : > { %v10878_v29 = vsel %vm10814_vm15, %v10782_v48, %v10846_v1  ;;  %v10783_v2 = vadd.f32 %v10718_v17, %v16125_v14  ;;  %v12187_v32 = vpack.c.bf16 %v10858_v6, %v10857_v58  ;;  %v10679_v55 = vrot.slane %v16210_v35, 2 }
0x144d   : > { %v12197_v19 = vpack.c.bf16 %v10878_v29, %v10877_v54  ;;  %v10719_v25 = vrot.slane %v16212_v0, 2  ;;  %vm10795_vm4 = vcmp.ge.f32.partialorder %v10763_v31, 0.0  ;;  %v10827_v15 = vmul.f32 0.2, %v10763_v31 }
0x144e   : > { %vm10815_vm7 = vcmp.ge.f32.partialorder %v10783_v2, 0.0  ;;  %v10847_v40 = vmul.f32 0.2, %v10783_v2  ;;  %10981 = vst [vmem:[%s16152_s13 + $0x20] sm:$0xff] %v12187_v32  ;;  %v10680_v20 = vsel %vm960_vm3, %v10675_v52, %v10679_v55  ;;  %v10681_v5 = vrot.slane %v16216_v38, 2 }
0x144f   : > { %10991 = vst [vmem:[%s16152_s13 + $0x70] sm:$0xff] %v12197_v19  ;;  %v10720_v22 = vsel %vm960_vm3, %v10715_v27, %v10719_v25  ;;  %v10683_v14 = vrot.slane %v16222_v39, 2  ;;  %v10859_v60 = vsel %vm10795_vm4, %v10763_v31, %v10827_v15  ;;  %v10764_v35 = vadd.f32 %v10680_v20, %v16068_v47 }
0x1450   : > { %v10879_v43 = vsel %vm10815_vm7, %v10783_v2, %v10847_v40  ;;  %v10784_v0 = vadd.f32 %v10720_v22, %v16128_v28  ;;  %v10682_v49 = vsel %vm960_vm3, %v10677_v9, %v10681_v5  ;;  %v10685_v63 = vrot.slane %v16228_v36, 2 }
0x1451   : > { %v10684_v33 = vsel %vm960_vm3, %v10679_v55, %v10683_v14  ;;  %v10687_v42 = vrot.slane %v16234_v37, 2  ;;  %vm10796_vm5 = vcmp.ge.f32.partialorder %v10764_v35, 0.0  ;;  %v10828_v52 = vmul.f32 0.2, %v10764_v35 }
0x1452   : > { %vm10816_vm10 = vcmp.ge.f32.partialorder %v10784_v0, 0.0  ;;  %v10848_v38 = vmul.f32 0.2, %v10784_v0  ;;  %v10765_v39 = vadd.f32 %v10682_v49, %v16071_v10  ;;  %v10766_v27 = vadd.f32 %v10684_v33, %v16074_v59 }
0x1453   : > { %v10686_v47 = vsel %vm960_vm3, %v10681_v5, %v10685_v63  ;;  %v10688_v28 = vsel %vm960_vm3, %v10683_v14, %v10687_v42  ;;  %v10860_v26 = vsel %vm10796_vm5, %v10764_v35, %v10828_v52  ;;  %v10689_v37 = vrot.slane %v16242_v50, 2 }
0x1454   : > { %v10880_v61 = vsel %vm10816_vm10, %v10784_v0, %v10848_v38  ;;  %v10767_v7 = vadd.f32 %v10686_v47, %v16077_v3  ;;  %v10768_v13 = vadd.f32 %v10688_v28, %v16080_v57  ;;  %v12188_v36 = vpack.c.bf16 %v10860_v26, %v10859_v60 }
0x1455   : > { %v12198_v23 = vpack.c.bf16 %v10880_v61, %v10879_v43  ;;  %vm10797_vm6 = vcmp.ge.f32.partialorder %v10765_v39, 0.0  ;;  %v10829_v56 = vmul.f32 0.2, %v10765_v39  ;;  %vm10798_vm9 = vcmp.ge.f32.partialorder %v10766_v27, 0.0 }
0x1456   : > { %v10830_v10 = vmul.f32 0.2, %v10766_v27  ;;  %vm10799_vm11 = vcmp.ge.f32.partialorder %v10767_v7, 0.0  ;;  %v10831_v41 = vmul.f32 0.2, %v10767_v7  ;;  %10982 = vst [vmem:[%s16152_s13 + $0x28] sm:$0xff] %v12188_v36  ;;  %v10690_v46 = vsel %vm960_vm3, %v10685_v63, %v10689_v37 }
0x1457   : > { %10992 = vst [vmem:[%s16152_s13 + $0x78] sm:$0xff] %v12198_v23  ;;  %v10861_v59 = vsel %vm10797_vm6, %v10765_v39, %v10829_v56  ;;  %vm10800_vm12 = vcmp.ge.f32.partialorder %v10768_v13, 0.0  ;;  %v10832_v18 = vmul.f32 0.2, %v10768_v13  ;;  %v10691_v57 = vrot.slane %v16246_v45, 2 }
0x1458   : > { %v10862_v3 = vsel %vm10798_vm9, %v10766_v27, %v10830_v10  ;;  %v10863_v11 = vsel %vm10799_vm11, %v10767_v7, %v10831_v41  ;;  %v10694_v21 = vsel %vm960_vm3, %v10689_v37, %v10693_v30  ;;  %v10769_v16 = vadd.f32 %v10690_v46, %v16083_v53 }
0x1459   : > { %v12189_v48 = vpack.c.bf16 %v10862_v3, %v10861_v59  ;;  %v10864_v9 = vsel %vm10800_vm12, %v10768_v13, %v10832_v18  ;;  %v10771_v1 = vadd.f32 %v10694_v21, %v16089_v44  ;;  %v10692_v58 = vsel %vm960_vm3, %v10687_v42, %v10691_v57 }
0x145a   : > { %v12190_v24 = vpack.c.bf16 %v10864_v9, %v10863_v11  ;;  %v10696_v50 = vsel %vm960_vm3, %v10691_v57, %v10695_v62  ;;  %v10770_v54 = vadd.f32 %v10692_v58, %v16086_v8  ;;  %vm10801_vm13 = vcmp.ge.f32.partialorder %v10769_v16, 0.0 }
0x145b   : > { %10983 = vst [vmem:[%s16152_s13 + $0x30] sm:$0xff] %v12189_v48  ;;  %vm10803_vm14 = vcmp.ge.f32.partialorder %v10771_v1, 0.0  ;;  %v10833_v12 = vmul.f32 0.2, %v10769_v16  ;;  %v10835_v30 = vmul.f32 0.2, %v10771_v1  ;;  %v10772_v53 = vadd.f32 %v10696_v50, %v16092_v34 }
0x145c   : > { %10984 = vst [vmem:[%s16152_s13 + $0x38] sm:$0xff] %v12190_v24  ;;  %vm10802_vm0 = vcmp.ge.f32.partialorder %v10770_v54, 0.0  ;;  %v10834_v44 = vmul.f32 0.2, %v10770_v54 }
0x145d   : > { %v10865_v51 = vsel %vm10801_vm13, %v10769_v16, %v10833_v12  ;;  %v10867_v17 = vsel %vm10803_vm14, %v10771_v1, %v10835_v30  ;;  %vm10804_vm1 = vcmp.ge.f32.partialorder %v10772_v53, 0.0  ;;  %v10836_v45 = vmul.f32 0.2, %v10772_v53 }
0x145e   : > { %v10866_v4 = vsel %vm10802_vm0, %v10770_v54, %v10834_v44 }
0x145f   : > { %v12191_v6 = vpack.c.bf16 %v10866_v4, %v10865_v51  ;;  %v10868_v62 = vsel %vm10804_vm1, %v10772_v53, %v10836_v45 }
0x1460   : > { %v12192_v29 = vpack.c.bf16 %v10868_v62, %v10867_v17 }
0x1461   : > { %10985 = vst [vmem:[%s16152_s13 + $0x40] sm:$0xff] %v12191_v6 }
0x1462   : > { %10986 = vst [vmem:[%s16152_s13 + $0x48] sm:$0xff] %v12192_v29 }
0x1463 PF: > { %s13_s12 = sadd.s32 1, %s12842_s12  }
0x1464   : > { %p10_p4 = scmp.ge.s32.totalorder %s13_s12, 4  }
0x1466   :  { %12 = sbr.rel (!%p10_p4) target bundleno = 1 (0x1), region = 72 }

</bundles_post_ra>
